<compile_context>
chip_gen: v7x
topology: tpu7x:2x2x1
jax: 0.10.0
libtpu: 0.0.40
codegen_flags: <defaults>
</compile_context>

<pallas_src>
import functools

import jax
import jax.numpy as jnp
from jax.experimental import pallas as pl
from jax.experimental.pallas import tpu as pltpu


_XPAD = 128  # x channels occupy lanes [0, 128); h occupies lanes [128, 128+hd)


def _round_up(x, m):
    return ((x + m - 1) // m) * m


# ----------------------------------------------------------------------------
# Pallas kernel: one ConvLSTM layer over the full sequence.  grid = (T,).
#   x_ref   : (Np_ext, Cin)        bf16, padded/flattened frame at time t
#   w_ref   : (9*(128+hd), 4*hd)   bf16, fused per-tap GEMM weights (resident)
#   b_ref   : (1, 4*hd)            f32  (resident)
#   mask_ref: (Np, 1)              f32, 1 at real pixels, 0 on the padding ring
#   h_seq_ref: (Np_ext, hd)        bf16 output, h_t in the padded layout
#   c_out_ref: (Np, hd)            f32 output, final cell state
#   comb_ref : (Np_ext, 128+hd)    bf16 scratch, [x | pad | h], persists over t
#   c_ref    : (Np, hd)            f32 scratch, cell state, persists over t
# ----------------------------------------------------------------------------
def _convlstm_layer_kernel(x_ref, w_ref, b_ref, mask_ref,      # inputs
                           h_seq_ref, c_out_ref,               # outputs
                           comb_ref, c_ref,                    # scratch
                           *, n_rows, g_off, wp, hd, cin):
    t = pl.program_id(0)
    kpad = _XPAD + hd

    @pl.when(t == 0)
    def _():
        comb_ref[...] = jnp.zeros_like(comb_ref)   # h_{-1} = 0 (+ zero borders)
        c_ref[...] = jnp.zeros_like(c_ref)         # c_{-1} = 0

    # Stage the current frame into the combined [x | pad | h] buffer; the h
    # part still holds h_{t-1} from the previous grid step.
    comb_ref[:, 0:cin] = x_ref[...]

    # 3x3 "same" conv as 9 shifted GEMMs (fused K = 128 + hd), accumulated in
    # f32; the bias is folded into the accumulator init (single broadcast).
    gates = jnp.broadcast_to(b_ref[...], (n_rows, 4 * hd)).astype(jnp.float32)
    for ky in range(3):
        for kx in range(3):
            start = g_off + (ky - 1) * wp + (kx - 1)
            patch = comb_ref[start:start + n_rows, :]          # (Np, 128+hd) bf16
            k = ky * 3 + kx
            w_k = w_ref[k * kpad:(k + 1) * kpad, :]            # (128+hd, 4*hd) bf16
            gates = gates + jnp.dot(patch, w_k,
                                    preferred_element_type=jnp.float32)

    # One wide sigmoid over (i, f, o), one tanh over g.
    ifo = jax.nn.sigmoid(gates[:, :3 * hd])
    g_gate = jnp.tanh(gates[:, 3 * hd:])
    i_gate = ifo[:, 0 * hd:1 * hd]
    f_gate = ifo[:, 1 * hd:2 * hd]
    o_gate = ifo[:, 2 * hd:3 * hd]

    m = mask_ref[...]                                          # (Np, 1)
    c_next = (f_gate * c_ref[...] + i_gate * g_gate) * m       # zero on pad ring
    h_next = o_gate * jnp.tanh(c_next)                         # => zero on pad ring

    c_ref[...] = c_next
    comb_ref[g_off:g_off + n_rows, _XPAD:_XPAD + hd] = h_next.astype(comb_ref.dtype)

    # Emit h_t in the padded/flattened layout (zero borders preserved) so the
    # next layer / wrapper can consume it directly.
    h_seq_ref[...] = comb_ref[:, _XPAD:_XPAD + hd]

    @pl.when(t == pl.num_programs(0) - 1)
    def _():
        c_out_ref[...] = c_next


def _convlstm_layer(x_ext, w_fused, b, mask, *, B, H, W, G):
    """Run one ConvLSTM layer over the whole sequence with a single pallas_call."""
    T, n_ext, cin = x_ext.shape
    hp, wp = H + 2, W + 2
    n_rows = B * hp * wp
    hd = b.shape[1] // 4
    kpad = _XPAD + hd
    assert n_ext == n_rows + 2 * G
    assert w_fused.shape == (9 * kpad, 4 * hd)

    kernel = functools.partial(_convlstm_layer_kernel, n_rows=n_rows,
                               g_off=G, wp=wp, hd=hd, cin=cin)

    h_seq, c_last = pl.pallas_call(
        kernel,
        grid=(T,),
        in_specs=[
            pl.BlockSpec((None, n_ext, cin), lambda t: (t, 0, 0)),   # x_t (streamed)
            pl.BlockSpec((9 * kpad, 4 * hd), lambda t: (0, 0)),      # weights (resident)
            pl.BlockSpec((1, 4 * hd), lambda t: (0, 0)),             # bias (resident)
            pl.BlockSpec((n_rows, 1), lambda t: (0, 0)),             # mask (resident)
        ],
        out_specs=(
            pl.BlockSpec((None, n_ext, hd), lambda t: (t, 0, 0)),    # h sequence
            pl.BlockSpec((n_rows, hd), lambda t: (0, 0)),            # final c
        ),
        out_shape=(
            jax.ShapeDtypeStruct((T, n_ext, hd), jnp.bfloat16),
            jax.ShapeDtypeStruct((n_rows, hd), jnp.float32),
        ),
        scratch_shapes=[
            pltpu.VMEM((n_ext, kpad), jnp.bfloat16),   # combined [x | h] buffer
            pltpu.VMEM((n_rows, hd), jnp.float32),     # cell state c
        ],
        compiler_params=pltpu.CompilerParams(
            dimension_semantics=("arbitrary",)),       # sequential recurrence over T
    )(x_ext, w_fused, b, mask)
    return h_seq, c_last


# ----------------------------------------------------------------------------
# Parameters: deterministic synthetic init mirroring
# nn.Conv2d(cin + hd, 4*hd, kernel=3, padding=1, bias=True) per layer,
# converted to the fused GEMM layout used by the kernel.
# ----------------------------------------------------------------------------
def _fuse_conv_weight(w_pt, cin, hd):
    """(4*hd, cin+hd, 3, 3) PyTorch conv weight -> (9*(128+hd), 4*hd) bf16,
    matching the kernel's [x | zero-pad | h] lane layout per tap."""
    assert cin <= _XPAD
    four_hd = w_pt.shape[0]
    w_x = jnp.transpose(w_pt[:, :cin], (2, 3, 1, 0))          # (3,3,cin,4hd)
    w_h = jnp.transpose(w_pt[:, cin:], (2, 3, 1, 0))          # (3,3,hd,4hd)
    zpad = jnp.zeros((3, 3, _XPAD - cin, four_hd), w_pt.dtype)
    w_f = jnp.concatenate([w_x, zpad, w_h], axis=2)           # (3,3,128+hd,4hd)
    return w_f.reshape(9 * (_XPAD + hd), four_hd).astype(jnp.bfloat16)


def init_params(key, input_dim, hidden_dims, kernel_size=(3, 3)):
    assert tuple(kernel_size) == (3, 3)
    params = []
    cur_in = input_dim
    for hd in hidden_dims:
        key, kw, kb = jax.random.split(key, 3)
        w = 0.05 * jax.random.normal(kw, (4 * hd, cur_in + hd, 3, 3),
                                     dtype=jnp.float32)
        b = 0.05 * jax.random.normal(kb, (4 * hd,), dtype=jnp.float32)
        params.append({
            "w": _fuse_conv_weight(w, cur_in, hd),   # bf16 MXU operand
            "b": b.reshape(1, 4 * hd),               # f32
        })
        cur_in = hd
    return params


# ----------------------------------------------------------------------------
# Full ConvLSTM forward (batch_first=True, return_all_layers=False):
#   input : x (B, T, C, H, W)  [PyTorch NCHW per frame]
#   output: (layer_output, last_state_list)
#     layer_output    : (B, T, hidden_dims[-1], H, W)
#     last_state_list : [[h, c]] each of shape (B, hidden_dims[-1], H, W)
# ----------------------------------------------------------------------------
@jax.jit
def conv_lstm_forward(x_btchw, params):
    B, T, C0, H, W = x_btchw.shape
    hp, wp = H + 2, W + 2
    n_rows = B * hp * wp
    G = _round_up(wp + 1, 16)   # row extension so all 9 tap slices stay in-bounds

    # Interior mask: 1 at real pixels, 0 on the conv zero-padding ring.
    m2 = jnp.zeros((hp, wp), jnp.float32).at[1:H + 1, 1:W + 1].set(1.0)
    mask = jnp.broadcast_to(m2.reshape(1, hp * wp), (B, hp * wp)).reshape(n_rows, 1)

    # Layer-0 input: NCHW -> NHWC -> spatial zero-pad -> flatten -> extend -> bf16.
    x_nhwc = jnp.transpose(x_btchw, (1, 0, 3, 4, 2))                   # (T,B,H,W,C)
    x_pad = jnp.pad(x_nhwc, ((0, 0), (0, 0), (1, 1), (1, 1), (0, 0)))  # (T,B,H+2,W+2,C)
    x_flat = x_pad.reshape(T, n_rows, C0)
    cur = jnp.pad(x_flat, ((0, 0), (G, G), (0, 0))).astype(jnp.bfloat16)

    h_seq = c_last = None
    hd = None
    for layer in params:
        hd = layer["b"].shape[1] // 4
        h_seq, c_last = _convlstm_layer(cur, layer["w"], layer["b"], mask,
                                        B=B, H=H, W=W, G=G)
        cur = h_seq   # already in the padded/flattened bf16 layout

    # return_all_layers=False: keep only the last layer; convert back to NCHW.
    h_all = h_seq[:, G:G + n_rows, :].astype(jnp.float32)
    h_all = h_all.reshape(T, B, hp, wp, hd)[:, :, 1:H + 1, 1:W + 1, :]  # (T,B,H,W,hd)
    layer_output = jnp.transpose(h_all, (1, 0, 4, 2, 3))                # (B,T,hd,H,W)
    h_last = layer_output[:, -1]                                        # (B,hd,H,W)
    c_img = c_last.reshape(B, hp, wp, hd)[:, 1:H + 1, 1:W + 1, :]
    c_last_out = jnp.transpose(c_img, (0, 3, 1, 2))                     # (B,hd,H,W)
    return layer_output, [[h_last, c_last_out]]


if __name__ == "__main__":
    key = jax.random.PRNGKey(0)

    # Small shapes consistent with the module's forward (batch_first=True):
    # x: (B, T, C, H, W)
    B, T, C, H, W = 2, 4, 4, 8, 8
    hidden_dims = [32, 32]          # num_layers = 2, kernel_size = (3, 3)

    key, kx, kp = jax.random.split(key, 3)
    x = jax.random.normal(kx, (B, T, C, H, W), dtype=jnp.float32)
    params = init_params(kp, input_dim=C, hidden_dims=hidden_dims)

    layer_output, last_states = conv_lstm_forward(x, params)
    jax.block_until_ready(layer_output)
    jax.block_until_ready(last_states[0][0])
    jax.block_until_ready(last_states[0][1])

    # Shape + sanity checks (match PyTorch output conventions).
    assert layer_output.shape == (B, T, hidden_dims[-1], H, W)
    assert last_states[0][0].shape == (B, hidden_dims[-1], H, W)
    assert last_states[0][1].shape == (B, hidden_dims[-1], H, W)
    assert bool(jnp.isfinite(layer_output).all())
    assert bool(jnp.isfinite(last_states[0][1]).all())

    print("KERNEL_OK")
</pallas_src>

<mosaic_0001>
module attributes {stable_mosaic.version = 11 : i64} {
  func.func @_convlstm_layer_kernel(%arg0: i32, %arg1: memref<1x232x4xbf16, #tpu.memory_space<vmem>>, %arg2: memref<1440x128xbf16, #tpu.memory_space<vmem>>, %arg3: memref<1x128xf32, #tpu.memory_space<vmem>>, %arg4: memref<200x1xf32, #tpu.memory_space<vmem>>, %arg5: memref<1x232x32xbf16, #tpu.memory_space<vmem>>, %arg6: memref<200x32xf32, #tpu.memory_space<vmem>>, %arg7: memref<232x160xbf16, #tpu.memory_space<vmem>>, %arg8: memref<200x32xf32, #tpu.memory_space<vmem>>) attributes {dimension_semantics = [#tpu.dimension_semantics<arbitrary>], iteration_bounds = array<i64: 4>, scalar_prefetch = 0 : i64, scratch_operands = 2 : i64, tpu.core_type = #tpu.core_type<tc>, window_params = [{transform_indices = @transform_0, window_bounds = array<i64: 1, 232, 4>}, {pipeline_mode = #tpu.pipeline_mode<synchronous>, transform_indices = @transform_1, window_bounds = array<i64: 1440, 128>}, {pipeline_mode = #tpu.pipeline_mode<synchronous>, transform_indices = @transform_2, window_bounds = array<i64: 1, 128>}, {pipeline_mode = #tpu.pipeline_mode<synchronous>, transform_indices = @transform_3, window_bounds = array<i64: 200, 1>}, {transform_indices = @transform_4, window_bounds = array<i64: 1, 232, 32>}, {pipeline_mode = #tpu.pipeline_mode<synchronous>, transform_indices = @transform_5, window_bounds = array<i64: 200, 32>}]} {
    %c0_i32 = arith.constant 0 : i32
    %0 = arith.cmpi eq, %arg0, %c0_i32 : i32
    %1 = arith.extui %0 : i1 to i32
    %c0_i32_0 = arith.constant 0 : i32
    %2 = arith.cmpi ne, %1, %c0_i32_0 : i32
    scf.if %2 {
      %cst_48 = arith.constant 0.000000e+00 : bf16
      %75 = vector.broadcast %cst_48 : bf16 to vector<232x160xbf16>
      %c0_49 = arith.constant 0 : index
      %c0_50 = arith.constant 0 : index
      %76 = vector.load %arg7[%c0_49, %c0_50] : memref<232x160xbf16, #tpu.memory_space<vmem>>, vector<232x160xbf16>
      tpu.vector_store %arg7[%c0_49, %c0_50], %75 {strides = array<i32>} : memref<232x160xbf16, #tpu.memory_space<vmem>>, vector<232x160xbf16>,
      %cst_51 = arith.constant 0.000000e+00 : f32
      %77 = vector.broadcast %cst_51 : f32 to vector<200x32xf32>
      %c0_52 = arith.constant 0 : index
      %c0_53 = arith.constant 0 : index
      %78 = vector.load %arg8[%c0_52, %c0_53] : memref<200x32xf32, #tpu.memory_space<vmem>>, vector<200x32xf32>
      tpu.vector_store %arg8[%c0_52, %c0_53], %77 {strides = array<i32>} : memref<200x32xf32, #tpu.memory_space<vmem>>, vector<200x32xf32>,
    } else {
    }
    %c0 = arith.constant 0 : index
    %c0_1 = arith.constant 0 : index
    %c0_2 = arith.constant 0 : index
    %3 = vector.load %arg1[%c0, %c0_1, %c0_2] : memref<1x232x4xbf16, #tpu.memory_space<vmem>>, vector<1x232x4xbf16>
    %4 = vector.shape_cast %3 : vector<1x232x4xbf16> to vector<232x4xbf16>
    %c0_3 = arith.constant 0 : index
    %c0_4 = arith.constant 0 : index
    %5 = vector.load %arg7[%c0_3, %c0_4] : memref<232x160xbf16, #tpu.memory_space<vmem>>, vector<232x4xbf16>
    tpu.vector_store %arg7[%c0_3, %c0_4], %4 {strides = array<i32>} : memref<232x160xbf16, #tpu.memory_space<vmem>>, vector<232x4xbf16>,
    %c0_5 = arith.constant 0 : index
    %c0_6 = arith.constant 0 : index
    %6 = vector.load %arg3[%c0_5, %c0_6] : memref<1x128xf32, #tpu.memory_space<vmem>>, vector<1x128xf32>
    %7 = vector.shape_cast %6 : vector<1x128xf32> to vector<1x128xf32>
    %8 = vector.broadcast %7 : vector<1x128xf32> to vector<200x128xf32>
    %c5 = arith.constant 5 : index
    %c0_7 = arith.constant 0 : index
    %9 = vector.load %arg7[%c5, %c0_7] : memref<232x160xbf16, #tpu.memory_space<vmem>>, vector<200x160xbf16>
    %c0_8 = arith.constant 0 : index
    %c0_9 = arith.constant 0 : index
    %10 = vector.load %arg2[%c0_8, %c0_9] : memref<1440x128xbf16, #tpu.memory_space<vmem>>, vector<160x128xbf16>
    %cst = arith.constant dense<0.000000e+00> : vector<200x128xf32>
    %11 = tpu.matmul %9, %10, %cst {dimension_numbers = #tpu.dot_dimension_numbers<[1], [0], [0], [1], [0, 0, 1, 1], [], []>} : vector<200x160xbf16>, vector<160x128xbf16>, vector<200x128xf32> -> vector<200x128xf32>
    %12 = arith.addf %8, %11 : vector<200x128xf32>
    %c6 = arith.constant 6 : index
    %c0_10 = arith.constant 0 : index
    %13 = vector.load %arg7[%c6, %c0_10] : memref<232x160xbf16, #tpu.memory_space<vmem>>, vector<200x160xbf16>
    %c160 = arith.constant 160 : index
    %c0_11 = arith.constant 0 : index
    %14 = vector.load %arg2[%c160, %c0_11] : memref<1440x128xbf16, #tpu.memory_space<vmem>>, vector<160x128xbf16>
    %cst_12 = arith.constant dense<0.000000e+00> : vector<200x128xf32>
    %15 = tpu.matmul %13, %14, %cst_12 {dimension_numbers = #tpu.dot_dimension_numbers<[1], [0], [0], [1], [0, 0, 1, 1], [], []>} : vector<200x160xbf16>, vector<160x128xbf16>, vector<200x128xf32> -> vector<200x128xf32>
    %16 = arith.addf %12, %15 : vector<200x128xf32>
    %c7 = arith.constant 7 : index
    %c0_13 = arith.constant 0 : index
    %17 = vector.load %arg7[%c7, %c0_13] : memref<232x160xbf16, #tpu.memory_space<vmem>>, vector<200x160xbf16>
    %c320 = arith.constant 320 : index
    %c0_14 = arith.constant 0 : index
    %18 = vector.load %arg2[%c320, %c0_14] : memref<1440x128xbf16, #tpu.memory_space<vmem>>, vector<160x128xbf16>
    %cst_15 = arith.constant dense<0.000000e+00> : vector<200x128xf32>
    %19 = tpu.matmul %17, %18, %cst_15 {dimension_numbers = #tpu.dot_dimension_numbers<[1], [0], [0], [1], [0, 0, 1, 1], [], []>} : vector<200x160xbf16>, vector<160x128xbf16>, vector<200x128xf32> -> vector<200x128xf32>
    %20 = arith.addf %16, %19 : vector<200x128xf32>
    %c15 = arith.constant 15 : index
    %c0_16 = arith.constant 0 : index
    %21 = vector.load %arg7[%c15, %c0_16] : memref<232x160xbf16, #tpu.memory_space<vmem>>, vector<200x160xbf16>
    %c480 = arith.constant 480 : index
    %c0_17 = arith.constant 0 : index
    %22 = vector.load %arg2[%c480, %c0_17] : memref<1440x128xbf16, #tpu.memory_space<vmem>>, vector<160x128xbf16>
    %cst_18 = arith.constant dense<0.000000e+00> : vector<200x128xf32>
    %23 = tpu.matmul %21, %22, %cst_18 {dimension_numbers = #tpu.dot_dimension_numbers<[1], [0], [0], [1], [0, 0, 1, 1], [], []>} : vector<200x160xbf16>, vector<160x128xbf16>, vector<200x128xf32> -> vector<200x128xf32>
    %24 = arith.addf %20, %23 : vector<200x128xf32>
    %c16 = arith.constant 16 : index
    %c0_19 = arith.constant 0 : index
    %25 = vector.load %arg7[%c16, %c0_19] : memref<232x160xbf16, #tpu.memory_space<vmem>>, vector<200x160xbf16>
    %c640 = arith.constant 640 : index
    %c0_20 = arith.constant 0 : index
    %26 = vector.load %arg2[%c640, %c0_20] : memref<1440x128xbf16, #tpu.memory_space<vmem>>, vector<160x128xbf16>
    %cst_21 = arith.constant dense<0.000000e+00> : vector<200x128xf32>
    %27 = tpu.matmul %25, %26, %cst_21 {dimension_numbers = #tpu.dot_dimension_numbers<[1], [0], [0], [1], [0, 0, 1, 1], [], []>} : vector<200x160xbf16>, vector<160x128xbf16>, vector<200x128xf32> -> vector<200x128xf32>
    %28 = arith.addf %24, %27 : vector<200x128xf32>
    %c17 = arith.constant 17 : index
    %c0_22 = arith.constant 0 : index
    %29 = vector.load %arg7[%c17, %c0_22] : memref<232x160xbf16, #tpu.memory_space<vmem>>, vector<200x160xbf16>
    %c800 = arith.constant 800 : index
    %c0_23 = arith.constant 0 : index
    %30 = vector.load %arg2[%c800, %c0_23] : memref<1440x128xbf16, #tpu.memory_space<vmem>>, vector<160x128xbf16>
    %cst_24 = arith.constant dense<0.000000e+00> : vector<200x128xf32>
    %31 = tpu.matmul %29, %30, %cst_24 {dimension_numbers = #tpu.dot_dimension_numbers<[1], [0], [0], [1], [0, 0, 1, 1], [], []>} : vector<200x160xbf16>, vector<160x128xbf16>, vector<200x128xf32> -> vector<200x128xf32>
    %32 = arith.addf %28, %31 : vector<200x128xf32>
    %c25 = arith.constant 25 : index
    %c0_25 = arith.constant 0 : index
    %33 = vector.load %arg7[%c25, %c0_25] : memref<232x160xbf16, #tpu.memory_space<vmem>>, vector<200x160xbf16>
    %c960 = arith.constant 960 : index
    %c0_26 = arith.constant 0 : index
    %34 = vector.load %arg2[%c960, %c0_26] : memref<1440x128xbf16, #tpu.memory_space<vmem>>, vector<160x128xbf16>
    %cst_27 = arith.constant dense<0.000000e+00> : vector<200x128xf32>
    %35 = tpu.matmul %33, %34, %cst_27 {dimension_numbers = #tpu.dot_dimension_numbers<[1], [0], [0], [1], [0, 0, 1, 1], [], []>} : vector<200x160xbf16>, vector<160x128xbf16>, vector<200x128xf32> -> vector<200x128xf32>
    %36 = arith.addf %32, %35 : vector<200x128xf32>
    %c26 = arith.constant 26 : index
    %c0_28 = arith.constant 0 : index
    %37 = vector.load %arg7[%c26, %c0_28] : memref<232x160xbf16, #tpu.memory_space<vmem>>, vector<200x160xbf16>
    %c1120 = arith.constant 1120 : index
    %c0_29 = arith.constant 0 : index
    %38 = vector.load %arg2[%c1120, %c0_29] : memref<1440x128xbf16, #tpu.memory_space<vmem>>, vector<160x128xbf16>
    %cst_30 = arith.constant dense<0.000000e+00> : vector<200x128xf32>
    %39 = tpu.matmul %37, %38, %cst_30 {dimension_numbers = #tpu.dot_dimension_numbers<[1], [0], [0], [1], [0, 0, 1, 1], [], []>} : vector<200x160xbf16>, vector<160x128xbf16>, vector<200x128xf32> -> vector<200x128xf32>
    %40 = arith.addf %36, %39 : vector<200x128xf32>
    %c27 = arith.constant 27 : index
    %c0_31 = arith.constant 0 : index
    %41 = vector.load %arg7[%c27, %c0_31] : memref<232x160xbf16, #tpu.memory_space<vmem>>, vector<200x160xbf16>
    %c1280 = arith.constant 1280 : index
    %c0_32 = arith.constant 0 : index
    %42 = vector.load %arg2[%c1280, %c0_32] : memref<1440x128xbf16, #tpu.memory_space<vmem>>, vector<160x128xbf16>
    %cst_33 = arith.constant dense<0.000000e+00> : vector<200x128xf32>
    %43 = tpu.matmul %41, %42, %cst_33 {dimension_numbers = #tpu.dot_dimension_numbers<[1], [0], [0], [1], [0, 0, 1, 1], [], []>} : vector<200x160xbf16>, vector<160x128xbf16>, vector<200x128xf32> -> vector<200x128xf32>
    %44 = arith.addf %40, %43 : vector<200x128xf32>
    %45 = vector.extract_strided_slice %44 {offsets = [0, 0], sizes = [200, 96], strides = [1, 1]} : vector<200x128xf32> to vector<200x96xf32>
    %46 = arith.negf %45 : vector<200x96xf32>
    %47 = math.exp %46 : vector<200x96xf32>
    %cst_34 = arith.constant 1.000000e+00 : f32
    %48 = vector.broadcast %cst_34 : f32 to vector<200x96xf32>
    %49 = arith.addf %48, %47 : vector<200x96xf32>
    %50 = arith.divf %48, %49 : vector<200x96xf32>
    %51 = vector.extract_strided_slice %44 {offsets = [0, 96], sizes = [200, 32], strides = [1, 1]} : vector<200x128xf32> to vector<200x32xf32>
    %52 = math.tanh %51 : vector<200x32xf32>
    %53 = vector.extract_strided_slice %50 {offsets = [0, 0], sizes = [200, 32], strides = [1, 1]} : vector<200x96xf32> to vector<200x32xf32>
    %54 = vector.extract_strided_slice %50 {offsets = [0, 32], sizes = [200, 32], strides = [1, 1]} : vector<200x96xf32> to vector<200x32xf32>
    %55 = vector.extract_strided_slice %50 {offsets = [0, 64], sizes = [200, 32], strides = [1, 1]} : vector<200x96xf32> to vector<200x32xf32>
    %c0_35 = arith.constant 0 : index
    %c0_36 = arith.constant 0 : index
    %56 = vector.load %arg4[%c0_35, %c0_36] : memref<200x1xf32, #tpu.memory_space<vmem>>, vector<200x1xf32>
    %c0_37 = arith.constant 0 : index
    %c0_38 = arith.constant 0 : index
    %57 = vector.load %arg8[%c0_37, %c0_38] : memref<200x32xf32, #tpu.memory_space<vmem>>, vector<200x32xf32>
    %58 = arith.mulf %54, %57 : vector<200x32xf32>
    %59 = arith.mulf %53, %52 : vector<200x32xf32>
    %60 = arith.addf %58, %59 : vector<200x32xf32>
    %61 = vector.broadcast %56 : vector<200x1xf32> to vector<200x32xf32>
    %62 = arith.mulf %60, %61 : vector<200x32xf32>
    %63 = math.tanh %62 : vector<200x32xf32>
    %64 = arith.mulf %55, %63 : vector<200x32xf32>
    %c0_39 = arith.constant 0 : index
    %c0_40 = arith.constant 0 : index
    %65 = vector.load %arg8[%c0_39, %c0_40] : memref<200x32xf32, #tpu.memory_space<vmem>>, vector<200x32xf32>
    tpu.vector_store %arg8[%c0_39, %c0_40], %62 {strides = array<i32>} : memref<200x32xf32, #tpu.memory_space<vmem>>, vector<200x32xf32>,
    %66 = arith.truncf %64 : vector<200x32xf32> to vector<200x32xbf16>
    %c16_41 = arith.constant 16 : index
    %c128 = arith.constant 128 : index
    %67 = vector.load %arg7[%c16_41, %c128] : memref<232x160xbf16, #tpu.memory_space<vmem>>, vector<200x32xbf16>
    tpu.vector_store %arg7[%c16_41, %c128], %66 {strides = array<i32>} : memref<232x160xbf16, #tpu.memory_space<vmem>>, vector<200x32xbf16>,
    %c0_42 = arith.constant 0 : index
    %c128_43 = arith.constant 128 : index
    %68 = vector.load %arg7[%c0_42, %c128_43] : memref<232x160xbf16, #tpu.memory_space<vmem>>, vector<232x32xbf16>
    %c0_44 = arith.constant 0 : index
    %c0_45 = arith.constant 0 : index
    %c0_46 = arith.constant 0 : index
    %69 = vector.load %arg5[%c0_44, %c0_45, %c0_46] : memref<1x232x32xbf16, #tpu.memory_space<vmem>>, vector<1x232x32xbf16>
    %70 = vector.shape_cast %69 : vector<1x232x32xbf16> to vector<232x32xbf16>
    %71 = vector.shape_cast %68 : vector<232x32xbf16> to vector<1x232x32xbf16>
    tpu.vector_store %arg5[%c0_44, %c0_45, %c0_46], %71 {strides = array<i32>} : memref<1x232x32xbf16, #tpu.memory_space<vmem>>, vector<1x232x32xbf16>,
    %c3_i32 = arith.constant 3 : i32
    %72 = arith.cmpi eq, %arg0, %c3_i32 : i32
    %73 = arith.extui %72 : i1 to i32
    %c0_i32_47 = arith.constant 0 : i32
    %74 = arith.cmpi ne, %73, %c0_i32_47 : i32
    scf.if %74 {
      %c0_48 = arith.constant 0 : index
      %c0_49 = arith.constant 0 : index
      %75 = vector.load %arg6[%c0_48, %c0_49] : memref<200x32xf32, #tpu.memory_space<vmem>>, vector<200x32xf32>
      tpu.vector_store %arg6[%c0_48, %c0_49], %62 {strides = array<i32>} : memref<200x32xf32, #tpu.memory_space<vmem>>, vector<200x32xf32>,
    } else {
    }
    return
  }
  func.func @transform_0(%arg0: i32) -> (i32, i32, i32) {
    %c0_i32 = arith.constant 0 : i32
    %c0_i32_0 = arith.constant 0 : i32
    %c0_i32_1 = arith.constant 0 : i32
    return %arg0, %c0_i32, %c0_i32_0 : i32, i32, i32
  }
  func.func @transform_1(%arg0: i32) -> (i32, i32) {
    %c0_i32 = arith.constant 0 : i32
    %c0_i32_0 = arith.constant 0 : i32
    %c0_i32_1 = arith.constant 0 : i32
    return %c0_i32, %c0_i32_0 : i32, i32
  }
  func.func @transform_2(%arg0: i32) -> (i32, i32) {
    %c0_i32 = arith.constant 0 : i32
    %c0_i32_0 = arith.constant 0 : i32
    %c0_i32_1 = arith.constant 0 : i32
    return %c0_i32, %c0_i32_0 : i32, i32
  }
  func.func @transform_3(%arg0: i32) -> (i32, i32) {
    %c0_i32 = arith.constant 0 : i32
    %c0_i32_0 = arith.constant 0 : i32
    %c0_i32_1 = arith.constant 0 : i32
    return %c0_i32, %c0_i32_0 : i32, i32
  }
  func.func @transform_4(%arg0: i32) -> (i32, i32, i32) {
    %c0_i32 = arith.constant 0 : i32
    %c0_i32_0 = arith.constant 0 : i32
    %c0_i32_1 = arith.constant 0 : i32
    return %arg0, %c0_i32, %c0_i32_0 : i32, i32, i32
  }
  func.func @transform_5(%arg0: i32) -> (i32, i32) {
    %c0_i32 = arith.constant 0 : i32
    %c0_i32_0 = arith.constant 0 : i32
    %c0_i32_1 = arith.constant 0 : i32
    return %c0_i32, %c0_i32_0 : i32, i32
  }
}

module attributes {stable_mosaic.version = 11 : i64} {
  func.func @_convlstm_layer_kernel(%arg0: i32, %arg1: memref<1x232x32xbf16, #tpu.memory_space<vmem>>, %arg2: memref<1440x128xbf16, #tpu.memory_space<vmem>>, %arg3: memref<1x128xf32, #tpu.memory_space<vmem>>, %arg4: memref<200x1xf32, #tpu.memory_space<vmem>>, %arg5: memref<1x232x32xbf16, #tpu.memory_space<vmem>>, %arg6: memref<200x32xf32, #tpu.memory_space<vmem>>, %arg7: memref<232x160xbf16, #tpu.memory_space<vmem>>, %arg8: memref<200x32xf32, #tpu.memory_space<vmem>>) attributes {dimension_semantics = [#tpu.dimension_semantics<arbitrary>], iteration_bounds = array<i64: 4>, scalar_prefetch = 0 : i64, scratch_operands = 2 : i64, tpu.core_type = #tpu.core_type<tc>, window_params = [{transform_indices = @transform_0, window_bounds = array<i64: 1, 232, 32>}, {pipeline_mode = #tpu.pipeline_mode<synchronous>, transform_indices = @transform_1, window_bounds = array<i64: 1440, 128>}, {pipeline_mode = #tpu.pipeline_mode<synchronous>, transform_indices = @transform_2, window_bounds = array<i64: 1, 128>}, {pipeline_mode = #tpu.pipeline_mode<synchronous>, transform_indices = @transform_3, window_bounds = array<i64: 200, 1>}, {transform_indices = @transform_4, window_bounds = array<i64: 1, 232, 32>}, {pipeline_mode = #tpu.pipeline_mode<synchronous>, transform_indices = @transform_5, window_bounds = array<i64: 200, 32>}]} {
    %c0_i32 = arith.constant 0 : i32
    %0 = arith.cmpi eq, %arg0, %c0_i32 : i32
    %1 = arith.extui %0 : i1 to i32
    %c0_i32_0 = arith.constant 0 : i32
    %2 = arith.cmpi ne, %1, %c0_i32_0 : i32
    scf.if %2 {
      %cst_48 = arith.constant 0.000000e+00 : bf16
      %75 = vector.broadcast %cst_48 : bf16 to vector<232x160xbf16>
      %c0_49 = arith.constant 0 : index
      %c0_50 = arith.constant 0 : index
      %76 = vector.load %arg7[%c0_49, %c0_50] : memref<232x160xbf16, #tpu.memory_space<vmem>>, vector<232x160xbf16>
      tpu.vector_store %arg7[%c0_49, %c0_50], %75 {strides = array<i32>} : memref<232x160xbf16, #tpu.memory_space<vmem>>, vector<232x160xbf16>,
      %cst_51 = arith.constant 0.000000e+00 : f32
      %77 = vector.broadcast %cst_51 : f32 to vector<200x32xf32>
      %c0_52 = arith.constant 0 : index
      %c0_53 = arith.constant 0 : index
      %78 = vector.load %arg8[%c0_52, %c0_53] : memref<200x32xf32, #tpu.memory_space<vmem>>, vector<200x32xf32>
      tpu.vector_store %arg8[%c0_52, %c0_53], %77 {strides = array<i32>} : memref<200x32xf32, #tpu.memory_space<vmem>>, vector<200x32xf32>,
    } else {
    }
    %c0 = arith.constant 0 : index
    %c0_1 = arith.constant 0 : index
    %c0_2 = arith.constant 0 : index
    %3 = vector.load %arg1[%c0, %c0_1, %c0_2] : memref<1x232x32xbf16, #tpu.memory_space<vmem>>, vector<1x232x32xbf16>
    %4 = vector.shape_cast %3 : vector<1x232x32xbf16> to vector<232x32xbf16>
    %c0_3 = arith.constant 0 : index
    %c0_4 = arith.constant 0 : index
    %5 = vector.load %arg7[%c0_3, %c0_4] : memref<232x160xbf16, #tpu.memory_space<vmem>>, vector<232x32xbf16>
    tpu.vector_store %arg7[%c0_3, %c0_4], %4 {strides = array<i32>} : memref<232x160xbf16, #tpu.memory_space<vmem>>, vector<232x32xbf16>,
    %c0_5 = arith.constant 0 : index
    %c0_6 = arith.constant 0 : index
    %6 = vector.load %arg3[%c0_5, %c0_6] : memref<1x128xf32, #tpu.memory_space<vmem>>, vector<1x128xf32>
    %7 = vector.shape_cast %6 : vector<1x128xf32> to vector<1x128xf32>
    %8 = vector.broadcast %7 : vector<1x128xf32> to vector<200x128xf32>
    %c5 = arith.constant 5 : index
    %c0_7 = arith.constant 0 : index
    %9 = vector.load %arg7[%c5, %c0_7] : memref<232x160xbf16, #tpu.memory_space<vmem>>, vector<200x160xbf16>
    %c0_8 = arith.constant 0 : index
    %c0_9 = arith.constant 0 : index
    %10 = vector.load %arg2[%c0_8, %c0_9] : memref<1440x128xbf16, #tpu.memory_space<vmem>>, vector<160x128xbf16>
    %cst = arith.constant dense<0.000000e+00> : vector<200x128xf32>
    %11 = tpu.matmul %9, %10, %cst {dimension_numbers = #tpu.dot_dimension_numbers<[1], [0], [0], [1], [0, 0, 1, 1], [], []>} : vector<200x160xbf16>, vector<160x128xbf16>, vector<200x128xf32> -> vector<200x128xf32>
    %12 = arith.addf %8, %11 : vector<200x128xf32>
    %c6 = arith.constant 6 : index
    %c0_10 = arith.constant 0 : index
    %13 = vector.load %arg7[%c6, %c0_10] : memref<232x160xbf16, #tpu.memory_space<vmem>>, vector<200x160xbf16>
    %c160 = arith.constant 160 : index
    %c0_11 = arith.constant 0 : index
    %14 = vector.load %arg2[%c160, %c0_11] : memref<1440x128xbf16, #tpu.memory_space<vmem>>, vector<160x128xbf16>
    %cst_12 = arith.constant dense<0.000000e+00> : vector<200x128xf32>
    %15 = tpu.matmul %13, %14, %cst_12 {dimension_numbers = #tpu.dot_dimension_numbers<[1], [0], [0], [1], [0, 0, 1, 1], [], []>} : vector<200x160xbf16>, vector<160x128xbf16>, vector<200x128xf32> -> vector<200x128xf32>
    %16 = arith.addf %12, %15 : vector<200x128xf32>
    %c7 = arith.constant 7 : index
    %c0_13 = arith.constant 0 : index
    %17 = vector.load %arg7[%c7, %c0_13] : memref<232x160xbf16, #tpu.memory_space<vmem>>, vector<200x160xbf16>
    %c320 = arith.constant 320 : index
    %c0_14 = arith.constant 0 : index
    %18 = vector.load %arg2[%c320, %c0_14] : memref<1440x128xbf16, #tpu.memory_space<vmem>>, vector<160x128xbf16>
    %cst_15 = arith.constant dense<0.000000e+00> : vector<200x128xf32>
    %19 = tpu.matmul %17, %18, %cst_15 {dimension_numbers = #tpu.dot_dimension_numbers<[1], [0], [0], [1], [0, 0, 1, 1], [], []>} : vector<200x160xbf16>, vector<160x128xbf16>, vector<200x128xf32> -> vector<200x128xf32>
    %20 = arith.addf %16, %19 : vector<200x128xf32>
    %c15 = arith.constant 15 : index
    %c0_16 = arith.constant 0 : index
    %21 = vector.load %arg7[%c15, %c0_16] : memref<232x160xbf16, #tpu.memory_space<vmem>>, vector<200x160xbf16>
    %c480 = arith.constant 480 : index
    %c0_17 = arith.constant 0 : index
    %22 = vector.load %arg2[%c480, %c0_17] : memref<1440x128xbf16, #tpu.memory_space<vmem>>, vector<160x128xbf16>
    %cst_18 = arith.constant dense<0.000000e+00> : vector<200x128xf32>
    %23 = tpu.matmul %21, %22, %cst_18 {dimension_numbers = #tpu.dot_dimension_numbers<[1], [0], [0], [1], [0, 0, 1, 1], [], []>} : vector<200x160xbf16>, vector<160x128xbf16>, vector<200x128xf32> -> vector<200x128xf32>
    %24 = arith.addf %20, %23 : vector<200x128xf32>
    %c16 = arith.constant 16 : index
    %c0_19 = arith.constant 0 : index
    %25 = vector.load %arg7[%c16, %c0_19] : memref<232x160xbf16, #tpu.memory_space<vmem>>, vector<200x160xbf16>
    %c640 = arith.constant 640 : index
    %c0_20 = arith.constant 0 : index
    %26 = vector.load %arg2[%c640, %c0_20] : memref<1440x128xbf16, #tpu.memory_space<vmem>>, vector<160x128xbf16>
    %cst_21 = arith.constant dense<0.000000e+00> : vector<200x128xf32>
    %27 = tpu.matmul %25, %26, %cst_21 {dimension_numbers = #tpu.dot_dimension_numbers<[1], [0], [0], [1], [0, 0, 1, 1], [], []>} : vector<200x160xbf16>, vector<160x128xbf16>, vector<200x128xf32> -> vector<200x128xf32>
    %28 = arith.addf %24, %27 : vector<200x128xf32>
    %c17 = arith.constant 17 : index
    %c0_22 = arith.constant 0 : index
    %29 = vector.load %arg7[%c17, %c0_22] : memref<232x160xbf16, #tpu.memory_space<vmem>>, vector<200x160xbf16>
    %c800 = arith.constant 800 : index
    %c0_23 = arith.constant 0 : index
    %30 = vector.load %arg2[%c800, %c0_23] : memref<1440x128xbf16, #tpu.memory_space<vmem>>, vector<160x128xbf16>
    %cst_24 = arith.constant dense<0.000000e+00> : vector<200x128xf32>
    %31 = tpu.matmul %29, %30, %cst_24 {dimension_numbers = #tpu.dot_dimension_numbers<[1], [0], [0], [1], [0, 0, 1, 1], [], []>} : vector<200x160xbf16>, vector<160x128xbf16>, vector<200x128xf32> -> vector<200x128xf32>
    %32 = arith.addf %28, %31 : vector<200x128xf32>
    %c25 = arith.constant 25 : index
    %c0_25 = arith.constant 0 : index
    %33 = vector.load %arg7[%c25, %c0_25] : memref<232x160xbf16, #tpu.memory_space<vmem>>, vector<200x160xbf16>
    %c960 = arith.constant 960 : index
    %c0_26 = arith.constant 0 : index
    %34 = vector.load %arg2[%c960, %c0_26] : memref<1440x128xbf16, #tpu.memory_space<vmem>>, vector<160x128xbf16>
    %cst_27 = arith.constant dense<0.000000e+00> : vector<200x128xf32>
    %35 = tpu.matmul %33, %34, %cst_27 {dimension_numbers = #tpu.dot_dimension_numbers<[1], [0], [0], [1], [0, 0, 1, 1], [], []>} : vector<200x160xbf16>, vector<160x128xbf16>, vector<200x128xf32> -> vector<200x128xf32>
    %36 = arith.addf %32, %35 : vector<200x128xf32>
    %c26 = arith.constant 26 : index
    %c0_28 = arith.constant 0 : index
    %37 = vector.load %arg7[%c26, %c0_28] : memref<232x160xbf16, #tpu.memory_space<vmem>>, vector<200x160xbf16>
    %c1120 = arith.constant 1120 : index
    %c0_29 = arith.constant 0 : index
    %38 = vector.load %arg2[%c1120, %c0_29] : memref<1440x128xbf16, #tpu.memory_space<vmem>>, vector<160x128xbf16>
    %cst_30 = arith.constant dense<0.000000e+00> : vector<200x128xf32>
    %39 = tpu.matmul %37, %38, %cst_30 {dimension_numbers = #tpu.dot_dimension_numbers<[1], [0], [0], [1], [0, 0, 1, 1], [], []>} : vector<200x160xbf16>, vector<160x128xbf16>, vector<200x128xf32> -> vector<200x128xf32>
    %40 = arith.addf %36, %39 : vector<200x128xf32>
    %c27 = arith.constant 27 : index
    %c0_31 = arith.constant 0 : index
    %41 = vector.load %arg7[%c27, %c0_31] : memref<232x160xbf16, #tpu.memory_space<vmem>>, vector<200x160xbf16>
    %c1280 = arith.constant 1280 : index
    %c0_32 = arith.constant 0 : index
    %42 = vector.load %arg2[%c1280, %c0_32] : memref<1440x128xbf16, #tpu.memory_space<vmem>>, vector<160x128xbf16>
    %cst_33 = arith.constant dense<0.000000e+00> : vector<200x128xf32>
    %43 = tpu.matmul %41, %42, %cst_33 {dimension_numbers = #tpu.dot_dimension_numbers<[1], [0], [0], [1], [0, 0, 1, 1], [], []>} : vector<200x160xbf16>, vector<160x128xbf16>, vector<200x128xf32> -> vector<200x128xf32>
    %44 = arith.addf %40, %43 : vector<200x128xf32>
    %45 = vector.extract_strided_slice %44 {offsets = [0, 0], sizes = [200, 96], strides = [1, 1]} : vector<200x128xf32> to vector<200x96xf32>
    %46 = arith.negf %45 : vector<200x96xf32>
    %47 = math.exp %46 : vector<200x96xf32>
    %cst_34 = arith.constant 1.000000e+00 : f32
    %48 = vector.broadcast %cst_34 : f32 to vector<200x96xf32>
    %49 = arith.addf %48, %47 : vector<200x96xf32>
    %50 = arith.divf %48, %49 : vector<200x96xf32>
    %51 = vector.extract_strided_slice %44 {offsets = [0, 96], sizes = [200, 32], strides = [1, 1]} : vector<200x128xf32> to vector<200x32xf32>
    %52 = math.tanh %51 : vector<200x32xf32>
    %53 = vector.extract_strided_slice %50 {offsets = [0, 0], sizes = [200, 32], strides = [1, 1]} : vector<200x96xf32> to vector<200x32xf32>
    %54 = vector.extract_strided_slice %50 {offsets = [0, 32], sizes = [200, 32], strides = [1, 1]} : vector<200x96xf32> to vector<200x32xf32>
    %55 = vector.extract_strided_slice %50 {offsets = [0, 64], sizes = [200, 32], strides = [1, 1]} : vector<200x96xf32> to vector<200x32xf32>
    %c0_35 = arith.constant 0 : index
    %c0_36 = arith.constant 0 : index
    %56 = vector.load %arg4[%c0_35, %c0_36] : memref<200x1xf32, #tpu.memory_space<vmem>>, vector<200x1xf32>
    %c0_37 = arith.constant 0 : index
    %c0_38 = arith.constant 0 : index
    %57 = vector.load %arg8[%c0_37, %c0_38] : memref<200x32xf32, #tpu.memory_space<vmem>>, vector<200x32xf32>
    %58 = arith.mulf %54, %57 : vector<200x32xf32>
    %59 = arith.mulf %53, %52 : vector<200x32xf32>
    %60 = arith.addf %58, %59 : vector<200x32xf32>
    %61 = vector.broadcast %56 : vector<200x1xf32> to vector<200x32xf32>
    %62 = arith.mulf %60, %61 : vector<200x32xf32>
    %63 = math.tanh %62 : vector<200x32xf32>
    %64 = arith.mulf %55, %63 : vector<200x32xf32>
    %c0_39 = arith.constant 0 : index
    %c0_40 = arith.constant 0 : index
    %65 = vector.load %arg8[%c0_39, %c0_40] : memref<200x32xf32, #tpu.memory_space<vmem>>, vector<200x32xf32>
    tpu.vector_store %arg8[%c0_39, %c0_40], %62 {strides = array<i32>} : memref<200x32xf32, #tpu.memory_space<vmem>>, vector<200x32xf32>,
    %66 = arith.truncf %64 : vector<200x32xf32> to vector<200x32xbf16>
    %c16_41 = arith.constant 16 : index
    %c128 = arith.constant 128 : index
    %67 = vector.load %arg7[%c16_41, %c128] : memref<232x160xbf16, #tpu.memory_space<vmem>>, vector<200x32xbf16>
    tpu.vector_store %arg7[%c16_41, %c128], %66 {strides = array<i32>} : memref<232x160xbf16, #tpu.memory_space<vmem>>, vector<200x32xbf16>,
    %c0_42 = arith.constant 0 : index
    %c128_43 = arith.constant 128 : index
    %68 = vector.load %arg7[%c0_42, %c128_43] : memref<232x160xbf16, #tpu.memory_space<vmem>>, vector<232x32xbf16>
    %c0_44 = arith.constant 0 : index
    %c0_45 = arith.constant 0 : index
    %c0_46 = arith.constant 0 : index
    %69 = vector.load %arg5[%c0_44, %c0_45, %c0_46] : memref<1x232x32xbf16, #tpu.memory_space<vmem>>, vector<1x232x32xbf16>
    %70 = vector.shape_cast %69 : vector<1x232x32xbf16> to vector<232x32xbf16>
    %71 = vector.shape_cast %68 : vector<232x32xbf16> to vector<1x232x32xbf16>
    tpu.vector_store %arg5[%c0_44, %c0_45, %c0_46], %71 {strides = array<i32>} : memref<1x232x32xbf16, #tpu.memory_space<vmem>>, vector<1x232x32xbf16>,
    %c3_i32 = arith.constant 3 : i32
    %72 = arith.cmpi eq, %arg0, %c3_i32 : i32
    %73 = arith.extui %72 : i1 to i32
    %c0_i32_47 = arith.constant 0 : i32
    %74 = arith.cmpi ne, %73, %c0_i32_47 : i32
    scf.if %74 {
      %c0_48 = arith.constant 0 : index
      %c0_49 = arith.constant 0 : index
      %75 = vector.load %arg6[%c0_48, %c0_49] : memref<200x32xf32, #tpu.memory_space<vmem>>, vector<200x32xf32>
      tpu.vector_store %arg6[%c0_48, %c0_49], %62 {strides = array<i32>} : memref<200x32xf32, #tpu.memory_space<vmem>>, vector<200x32xf32>,
    } else {
    }
    return
  }
  func.func @transform_0(%arg0: i32) -> (i32, i32, i32) {
    %c0_i32 = arith.constant 0 : i32
    %c0_i32_0 = arith.constant 0 : i32
    %c0_i32_1 = arith.constant 0 : i32
    return %arg0, %c0_i32, %c0_i32_0 : i32, i32, i32
  }
  func.func @transform_1(%arg0: i32) -> (i32, i32) {
    %c0_i32 = arith.constant 0 : i32
    %c0_i32_0 = arith.constant 0 : i32
    %c0_i32_1 = arith.constant 0 : i32
    return %c0_i32, %c0_i32_0 : i32, i32
  }
  func.func @transform_2(%arg0: i32) -> (i32, i32) {
    %c0_i32 = arith.constant 0 : i32
    %c0_i32_0 = arith.constant 0 : i32
    %c0_i32_1 = arith.constant 0 : i32
    return %c0_i32, %c0_i32_0 : i32, i32
  }
  func.func @transform_3(%arg0: i32) -> (i32, i32) {
    %c0_i32 = arith.constant 0 : i32
    %c0_i32_0 = arith.constant 0 : i32
    %c0_i32_1 = arith.constant 0 : i32
    return %c0_i32, %c0_i32_0 : i32, i32
  }
  func.func @transform_4(%arg0: i32) -> (i32, i32, i32) {
    %c0_i32 = arith.constant 0 : i32
    %c0_i32_0 = arith.constant 0 : i32
    %c0_i32_1 = arith.constant 0 : i32
    return %arg0, %c0_i32, %c0_i32_0 : i32, i32, i32
  }
  func.func @transform_5(%arg0: i32) -> (i32, i32) {
    %c0_i32 = arith.constant 0 : i32
    %c0_i32_0 = arith.constant 0 : i32
    %c0_i32_1 = arith.constant 0 : i32
    return %c0_i32, %c0_i32_0 : i32, i32
  }
}

</mosaic_0001>

<bundles_post_ra>
// kernel: conv_lstm_forward.3
= control target key start
LH: loop header
LB: loop body
LE: loop exit
PB: predicated region body
PF: predicated region fallthrough
CT: control target
= control target key end

     0   :  { %s7471_s18 = smov 0   ;;  %s10196_s0 = inlined_call_operand.vmem [shape: bf16[4,232,32], index: 0, kind: input, shape index: {}]   ;;  %s10197_s1 = inlined_call_operand.vmem [shape: bf16[1440,128], index: 1, kind: input, shape index: {}]   ;;  %s10198_s2 = inlined_call_operand.vmem [shape: f32[1,128], index: 2, kind: input, shape index: {}]   ;;  %s10199_s3 = inlined_call_operand.vmem [shape: f32[200,1], index: 3, kind: input, shape index: {}]   ;;  %s10200_s4 = inlined_call_operand.vmem [shape: bf16[4,232,32], index: 4, kind: output, shape index: {0}]   ;;  %s10201_s5 = inlined_call_operand.vmem [shape: f32[200,32], index: 5, kind: output, shape index: {1}]  }
   0x1 LB: > { %s7477_s19 = sadd.s32 4294967295, %s7433_s18   ;;  %p6139_p0 = scmp.ge.s32.totalorder %s7433_s18, 1  ;;  %s7433_s18 = sphi %s7471_s18, %s16_s18  }
   0x2   : > { %p185_p1 = scmp.lt.s32.totalorder %s7433_s18, 5 }
   0x4   : > { %p186_p2 = pnand %p6139_p0, %p185_p1 }
   0x6   : > { %189 = sbr.rel (%p186_p2) target bundleno = 1267 (0x4f3), region = 36 }
   0xd   : > { %p213_p3 = scmp.lt.s32.totalorder %s7477_s19, 3  ;;  %p6142_p4 = scmp.ne.s32.totalorder %s7477_s19, 0 }
   0xe   : > { %vm228_vm0 = vcmask (!%p6142_p4), 1043456   ;;  %vm229_vm1 = vcmask (!%p6142_p4), 261124   ;;  %vm260_vm2 = vcmask (!%p6142_p4), 261120   ;;  %v7435_v1 = vmov (!%p6142_p4), 0  }
   0xf   : > { %s214_s20 = scalar_select %p213_p3, %s7477_s19, 3 }
  0x10   : > { %227 = sbr.rel (%p6142_p4) target bundleno = 45 (0x2d), region = 40  ;;  %vm7494_vm3 = vmor (!%p6142_p4), %vm229_vm1, %vm228_vm0  ;;  %v7436_v2 = vmov (!%p6142_p4), 0.0  }
  0x11   : > { %s7001_s21 = smul.u32 116, %s214_s20  ;;  %231 = vst.msk [vmem:[#allocation2] sm:$0xff] (!%p6142_p4), %vm7494_vm3, %v7435_v1  ;;  %232 = vst.msk [vmem:[#allocation2 + $0x8] sm:$0xff] (!%p6142_p4), %vm7494_vm3, %v7435_v1 }
  0x12   : > { %233 = vst.msk [vmem:[#allocation2 + $0x10] sm:$0xff] (!%p6142_p4), %vm7494_vm3, %v7435_v1  ;;  %234 = vst.msk [vmem:[#allocation2 + $0x18] sm:$0xff] (!%p6142_p4), %vm7494_vm3, %v7435_v1 }
  0x13   : > { %s7486_s24 = scalar_lea.vmem %s10196_s0, %s7001_s21  ;;  %s7491_s27 = scalar_lea.vmem %s10200_s4, %s7001_s21  ;;  %235 = vst.msk [vmem:[#allocation2 + $0x20] sm:$0xff] (!%p6142_p4), %vm7494_vm3, %v7435_v1  ;;  %236 = vst.msk [vmem:[#allocation2 + $0x28] sm:$0xff] (!%p6142_p4), %vm7494_vm3, %v7435_v1 }
  0x14   : > { %237 = vst.msk [vmem:[#allocation2 + $0x30] sm:$0xff] (!%p6142_p4), %vm7494_vm3, %v7435_v1  ;;  %238 = vst.msk [vmem:[#allocation2 + $0x38] sm:$0xff] (!%p6142_p4), %vm7494_vm3, %v7435_v1 }
  0x15   : > { %239 = vst.msk [vmem:[#allocation2 + $0x40] sm:$0xff] (!%p6142_p4), %vm7494_vm3, %v7435_v1  ;;  %240 = vst.msk [vmem:[#allocation2 + $0x48] sm:$0xff] (!%p6142_p4), %vm7494_vm3, %v7435_v1 }
  0x16   : > { %241 = vst.msk [vmem:[#allocation2 + $0x50] sm:$0xff] (!%p6142_p4), %vm7494_vm3, %v7435_v1  ;;  %242 = vst.msk [vmem:[#allocation2 + $0x58] sm:$0xff] (!%p6142_p4), %vm7494_vm3, %v7435_v1 }
  0x17   : > { %243 = vst.msk [vmem:[#allocation2 + $0x60] sm:$0xff] %vm7494_vm3, %v7435_v1  ;;  %244 = vst.msk [vmem:[#allocation2 + $0x68] sm:$0xff] %vm7494_vm3, %v7435_v1 }
  0x18   : > { %245 = vst.msk [vmem:[#allocation2 + $0x70] sm:$0xff] %vm7494_vm3, %v7435_v1  ;;  %246 = vst.msk [vmem:[#allocation2 + $0x78] sm:$0xff] %vm7494_vm3, %v7435_v1 }
  0x19   : > { %247 = vst.msk [vmem:[#allocation2 + $0x80] sm:$0xff] %vm7494_vm3, %v7435_v1  ;;  %248 = vst.msk [vmem:[#allocation2 + $0x88] sm:$0xff] %vm7494_vm3, %v7435_v1 }
  0x1a   : > { %249 = vst.msk [vmem:[#allocation2 + $0x90] sm:$0xff] %vm7494_vm3, %v7435_v1  ;;  %250 = vst.msk [vmem:[#allocation2 + $0x98] sm:$0xff] %vm7494_vm3, %v7435_v1 }
  0x1b   : > { %251 = vst.msk [vmem:[#allocation2 + $0xa0] sm:$0xff] %vm7494_vm3, %v7435_v1  ;;  %252 = vst.msk [vmem:[#allocation2 + $0xa8] sm:$0xff] %vm7494_vm3, %v7435_v1 }
  0x1c   : > { %253 = vst.msk [vmem:[#allocation2 + $0xb0] sm:$0xff] %vm7494_vm3, %v7435_v1  ;;  %254 = vst.msk [vmem:[#allocation2 + $0xb8] sm:$0xff] %vm7494_vm3, %v7435_v1 }
  0x1d   : > { %255 = vst.msk [vmem:[#allocation2 + $0xc0] sm:$0xff] %vm7494_vm3, %v7435_v1  ;;  %256 = vst.msk [vmem:[#allocation2 + $0xc8] sm:$0xff] %vm7494_vm3, %v7435_v1 }
  0x1e   : > { %257 = vst.msk [vmem:[#allocation2 + $0xd0] sm:$0xff] %vm7494_vm3, %v7435_v1  ;;  %258 = vst.msk [vmem:[#allocation2 + $0xd8] sm:$0xff] %vm7494_vm3, %v7435_v1 }
  0x1f   : > { %259 = vst.msk [vmem:[#allocation2 + $0xe0] sm:$0xff] %vm7494_vm3, %v7435_v1 }
  0x20   : > { %261 = vst.msk [vmem:[#allocation3] sm:$0xff] %vm260_vm2, %v7436_v2  ;;  %262 = vst.msk [vmem:[#allocation3 + $0x8] sm:$0xff] %vm260_vm2, %v7436_v2 }
  0x21   : > { %263 = vst.msk [vmem:[#allocation3 + $0x10] sm:$0xff] %vm260_vm2, %v7436_v2  ;;  %264 = vst.msk [vmem:[#allocation3 + $0x18] sm:$0xff] %vm260_vm2, %v7436_v2 }
  0x22   : > { %265 = vst.msk [vmem:[#allocation3 + $0x20] sm:$0xff] %vm260_vm2, %v7436_v2  ;;  %266 = vst.msk [vmem:[#allocation3 + $0x28] sm:$0xff] %vm260_vm2, %v7436_v2 }
  0x23   : > { %267 = vst.msk [vmem:[#allocation3 + $0x30] sm:$0xff] %vm260_vm2, %v7436_v2  ;;  %268 = vst.msk [vmem:[#allocation3 + $0x38] sm:$0xff] %vm260_vm2, %v7436_v2 }
  0x24   : > { %269 = vst.msk [vmem:[#allocation3 + $0x40] sm:$0xff] %vm260_vm2, %v7436_v2  ;;  %270 = vst.msk [vmem:[#allocation3 + $0x48] sm:$0xff] %vm260_vm2, %v7436_v2 }
  0x25   : > { %271 = vst.msk [vmem:[#allocation3 + $0x50] sm:$0xff] %vm260_vm2, %v7436_v2  ;;  %272 = vst.msk [vmem:[#allocation3 + $0x58] sm:$0xff] %vm260_vm2, %v7436_v2 }
  0x26   : > { %273 = vst.msk [vmem:[#allocation3 + $0x60] sm:$0xff] %vm260_vm2, %v7436_v2  ;;  %274 = vst.msk [vmem:[#allocation3 + $0x68] sm:$0xff] %vm260_vm2, %v7436_v2 }
  0x27   : > { %275 = vst.msk [vmem:[#allocation3 + $0x70] sm:$0xff] %vm260_vm2, %v7436_v2  ;;  %276 = vst.msk [vmem:[#allocation3 + $0x78] sm:$0xff] %vm260_vm2, %v7436_v2 }
  0x28   : > { %277 = vst.msk [vmem:[#allocation3 + $0x80] sm:$0xff] %vm260_vm2, %v7436_v2  ;;  %278 = vst.msk [vmem:[#allocation3 + $0x88] sm:$0xff] %vm260_vm2, %v7436_v2 }
  0x29   : > { %279 = vst.msk [vmem:[#allocation3 + $0x90] sm:$0xff] %vm260_vm2, %v7436_v2  ;;  %280 = vst.msk [vmem:[#allocation3 + $0x98] sm:$0xff] %vm260_vm2, %v7436_v2 }
  0x2a   : > { %281 = vst.msk [vmem:[#allocation3 + $0xa0] sm:$0xff] %vm260_vm2, %v7436_v2  ;;  %282 = vst.msk [vmem:[#allocation3 + $0xa8] sm:$0xff] %vm260_vm2, %v7436_v2 }
  0x2b   : > { %283 = vst.msk [vmem:[#allocation3 + $0xb0] sm:$0xff] %vm260_vm2, %v7436_v2  ;;  %284 = vst.msk [vmem:[#allocation3 + $0xb8] sm:$0xff] %vm260_vm2, %v7436_v2 }
  0x2c   : > { %285 = vst.msk [vmem:[#allocation3 + $0xc0] sm:$0xff] %vm260_vm2, %v7436_v2 }
  0x2d PF: > { %v7018_v3 = vld [vmem:[%s10197_s1] sm:$0xff]   ;;  %v10206_v4 = vmov 0   ;;  %v7020_v6 = vld [vmem:[%s10197_s1 + $0x8] sm:$0xff]   ;;  %v7022_v8 = vld [vmem:[%s10197_s1 + $0x10] sm:$0xff]   ;;  %vm315_vm4 = vcmask 257024   ;;  %vm808_vm5 = vcmask 261120  }
  0x2e   : > { %848 = vmatprep.subr.bf16.mxu1 %v10206_v4  ;;  %2594 = vmatprep.subr.bf16.mxu0 %v10206_v4  ;;  %v7019_v5 = vld [vmem:[%s10197_s1 + $0x140] sm:$0xff]   ;;  %v7021_v7 = vld [vmem:[%s10197_s1 + $0x148] sm:$0xff]   ;;  %v7023_v9 = vld [vmem:[%s10197_s1 + $0x150] sm:$0xff]   ;;  %vm502_vm6 = vsmask.f32 5376  ;;  %vm1035_vm8 = vcmask 1044480  }
  0x2f   : > { %849 = vmatpush1.bf16.msra.mxu1 %v7018_v3  ;;  %7016 = vset.pattern.permute.xlu1 %v10206_v4  ;;  %v7024_v10 = vld [vmem:[%s10197_s1 + $0x18] sm:$0xff]   ;;  %v7026_v12 = vld [vmem:[%s10197_s1 + $0x20] sm:$0xff]   ;;  %v7028_v14 = vld [vmem:[%s10197_s1 + $0x28] sm:$0xff]   ;;  %vm2905_vm7 = vsmask.f32 7424  ;;  %vm4040_vm10 = vcmask 1046528  }
  0x30   : > { %2595 = vmatpush1.bf16.msra.mxu0 %v7019_v5  ;;  %850 = vmatprep.subr.bf16.mxu1 %v10206_v4  ;;  %v7025_v11 = vld [vmem:[%s10197_s1 + $0x158] sm:$0xff]   ;;  %v7027_v13 = vld [vmem:[%s10197_s1 + $0x160] sm:$0xff]   ;;  %v7029_v15 = vld [vmem:[%s10197_s1 + $0x168] sm:$0xff]   ;;  %vm1385_vm9 = vsmask.f32 4352  ;;  %s7438_s28 = smov 32  }
  0x31   : > { %2596 = vmatprep.subr.bf16.mxu0 %v10206_v4  ;;  %7017 = vset.pattern.permute.xlu0 %v10206_v4  ;;  %v286_v16 = vld [vmem:[%s7486_s24] sm:$0xf]  ;;  %v287_v17 = vld [vmem:[%s7486_s24 + $0x4] sm:$0xf]  ;;  %v288_v18 = vld [vmem:[%s7486_s24 + $0x8] sm:$0xf] }
  0x32   : > { %v7030_v19 = vld [vmem:[%s10197_s1 + $0x30] sm:$0xff]   ;;  %v289_v20 = vld [vmem:[%s7486_s24 + $0xc] sm:$0xf]  ;;  %316 = vst.msk [vmem:[#allocation2] sm:$0xf] %vm315_vm4, %v286_v16  ;;  %v7032_v24 = vld [vmem:[%s10197_s1 + $0x38] sm:$0xff]  }
  0x33   : > { %851 = vmatpush1.bf16.msra.mxu1 %v7020_v6  ;;  %317 = vst.msk [vmem:[#allocation2 + $0x8] sm:$0xf] %vm315_vm4, %v287_v17  ;;  %318 = vst.msk [vmem:[#allocation2 + $0x10] sm:$0xf] %vm315_vm4, %v288_v18  ;;  %v7031_v21 = vld [vmem:[%s10197_s1 + $0x170] sm:$0xff]   ;;  %v7033_v27 = vld [vmem:[%s10197_s1 + $0x178] sm:$0xff]  }
  0x34   : > { %2597 = vmatpush1.bf16.msra.mxu0 %v7021_v7  ;;  %852 = vmatprep.subr.bf16.mxu1 %v10206_v4  ;;  %319 = vst.msk [vmem:[#allocation2 + $0x18] sm:$0xf] %vm315_vm4, %v289_v20  ;;  %v290_v22 = vld [vmem:[%s7486_s24 + $0x10] sm:$0xf]  ;;  %v291_v23 = vld [vmem:[%s7486_s24 + $0x14] sm:$0xf] }
  0x35   : > { %2598 = vmatprep.subr.bf16.mxu0 %v10206_v4  ;;  %320 = vst.msk [vmem:[#allocation2 + $0x20] sm:$0xf] %vm315_vm4, %v290_v22  ;;  %321 = vst.msk [vmem:[#allocation2 + $0x28] sm:$0xf] %vm315_vm4, %v291_v23  ;;  %v292_v25 = vld [vmem:[%s7486_s24 + $0x18] sm:$0xf] }
  0x36   : > { %v293_v26 = vld [vmem:[%s7486_s24 + $0x1c] sm:$0xf]  ;;  %322 = vst.msk [vmem:[#allocation2 + $0x30] sm:$0xf] %vm315_vm4, %v292_v25  ;;  %v7034_v34 = vld [vmem:[%s10197_s1 + $0x40] sm:$0xff]   ;;  %v7036_v45 = vld [vmem:[%s10197_s1 + $0x48] sm:$0xff]  }
  0x37   : > { %853 = vmatpush1.bf16.msra.mxu1 %v7022_v8  ;;  %323 = vst.msk [vmem:[#allocation2 + $0x38] sm:$0xf] %vm315_vm4, %v293_v26  ;;  %v7035_v35 = vld [vmem:[%s10197_s1 + $0x180] sm:$0xff]   ;;  %v7037_v51 = vld [vmem:[%s10197_s1 + $0x188] sm:$0xff]   ;;  %v7042_v6 = vld [vmem:[%s10197_s1 + $0x190] sm:$0xff]   ;;  %s7439_s22 = smov 96  }
  0x38   : > { %2599 = vmatpush1.bf16.msra.mxu0 %v7023_v9  ;;  %854 = vmatprep.subr.bf16.mxu1 %v10206_v4  ;;  %v294_v38 = vld [vmem:[%s7486_s24 + $0x20] sm:$0xf]  ;;  %v295_v50 = vld [vmem:[%s7486_s24 + $0x24] sm:$0xf]  ;;  %v297_v17 = vld [vmem:[%s7486_s24 + $0x2c] sm:$0xf] }
  0x39   : > { %2600 = vmatprep.subr.bf16.mxu0 %v10206_v4  ;;  %v352_v28 = vld [vmem:[#allocation2] sm:$0xcc]  ;;  %324 = vst.msk [vmem:[#allocation2 + $0x40] sm:$0xf] %vm315_vm4, %v294_v38  ;;  %325 = vst.msk [vmem:[#allocation2 + $0x48] sm:$0xf] %vm315_vm4, %v295_v50 }
  0x3a   : > { %v7663_v29 = vld [vmem:[#allocation2 + $0x8] sm:$0xff]  ;;  %v354_v30 = vld [vmem:[#allocation2 + $0x10] sm:$0xff]  ;;  %327 = vst.msk [vmem:[#allocation2 + $0x58] sm:$0xf] %vm315_vm4, %v297_v17  ;;  %vm4390_vm11 = vsmask.f32 6400 }
  0x3b   : > { %855 = vmatpush1.bf16.msra.mxu1 %v7024_v10  ;;  %v355_v31 = vld [vmem:[#allocation2 + $0x18] sm:$0xff]  ;;  %v6145_v32 = vcombine.high %v352_v28, %v7663_v29  ;;  %v6144_v33 = vcombine.low %v352_v28, %v7663_v29  ;;  %v296_v10 = vld [vmem:[%s7486_s24 + $0x28] sm:$0xf]  ;;  %v299_v38 = vld [vmem:[%s7486_s24 + $0x34] sm:$0xf]  ;;  %p6539_p5 = scmp.ne.s32.totalorder %s7477_s19, 3 }
  0x3c   : > { %2601 = vmatpush1.bf16.msra.mxu0 %v7025_v11  ;;  %856 = vmatprep.subr.bf16.mxu1 %v10206_v4  ;;  %v7673_v36 = vcombine.high %v354_v30, %v355_v31  ;;  %v7675_v37 = vcombine.low %v354_v30, %v355_v31  ;;  %v356_v43 = vld [vmem:[#allocation2 + $0x20] sm:$0xff]  ;;  %v357_v44 = vld [vmem:[#allocation2 + $0x28] sm:$0xff]  ;;  %326 = vst.msk [vmem:[#allocation2 + $0x50] sm:$0xf] %vm315_vm4, %v296_v10  ;;  %v7045_v28 = vld [vmem:[%s10197_s1 + $0x198] sm:$0xff]  }
  0x3d   : > { %2602 = vmatprep.subr.bf16.mxu0 %v10206_v4  ;;  %v521_v39 = vshrl.u32 %v6145_v32, 16  ;;  %v524_v40 = vshll.u32 %v6145_v32, 16  ;;  %v504_v41 = vshrl.u32 %v6144_v33, 16  ;;  %v507_v42 = vshll.u32 %v6144_v33, 16  ;;  %v358_v60 = vld [vmem:[#allocation2 + $0x30] sm:$0xff] }
  0x3e   : > { %v7685_v46 = vshrl.u32 %v7673_v36, 16  ;;  %v7688_v47 = vshll.u32 %v7673_v36, 16  ;;  %6328 = vmatprep.mubr.msk.bf16.mxu0 %vm808_vm5, %v7673_v36  ;;  %v7693_v48 = vshrl.u32 %v7675_v37, 16  ;;  %v7696_v49 = vshll.u32 %v7675_v37, 16  ;;  %v359_v61 = vld [vmem:[#allocation2 + $0x38] sm:$0xff] }
  0x3f   : > { %857 = vmatpush1.bf16.msra.mxu1 %v7026_v12  ;;  %v523_v52 = vrot.slane %v521_v39, 2  ;;  %v526_v53 = vrot.slane %v524_v40, 3  ;;  %v506_v54 = vrot.slane %v504_v41, 2  ;;  %v509_v55 = vrot.slane %v507_v42, 3  ;;  %v298_v33 = vld [vmem:[%s7486_s24 + $0x30] sm:$0xf] }
  0x40   : > { %2603 = vmatpush1.bf16.msra.mxu0 %v7027_v13  ;;  %858 = vmatprep.subr.bf16.mxu1 %v10206_v4  ;;  %10299 = vst [vmem:[#allocation4_spill] sm:$0xff] %v7685_v46  ;;  %10300 = vst [vmem:[#allocation5_spill] sm:$0xff] %v7688_v47  ;;  %v531_v56 = vrot.slane %v7685_v46, 2  ;;  %v534_v57 = vrot.slane %v7688_v47, 3  ;;  %v514_v58 = vrot.slane %v7693_v48, 2  ;;  %v517_v59 = vrot.slane %v7696_v49, 3 }
  0x41   : > { %2604 = vmatprep.subr.bf16.mxu0 %v10206_v4  ;;  %10301 = vst [vmem:[#allocation6_spill] sm:$0xff] %v7693_v48  ;;  %10302 = vst [vmem:[#allocation7_spill] sm:$0xff] %v7696_v49  ;;  %v527_v62 = vor.u32 %v526_v53, %v523_v52  ;;  %v510_v63 = vor.u32 %v509_v55, %v506_v54  ;;  %v7708_v0 = vcombine.high %v356_v43, %v357_v44  ;;  %v7044_v13 = vld [vmem:[%s10197_s1 + $0x50] sm:$0xff]   ;;  %v360_v16 = vld [vmem:[#allocation2 + $0x40] sm:$0xff] }
  0x42   : > { %v535_v1 = vor.u32 %v534_v57, %v531_v56  ;;  %v518_v2 = vor.u32 %v517_v59, %v514_v58  ;;  %v7711_v3 = vcombine.low %v356_v43, %v357_v44  ;;  %v7713_v5 = vcombine.high %v358_v60, %v359_v61  ;;  %v361_v26 = vld [vmem:[#allocation2 + $0x48] sm:$0xff]  ;;  %328 = vst.msk [vmem:[#allocation2 + $0x60] sm:$0xf] %vm315_vm4, %v298_v33  ;;  %v363_v55 = vld [vmem:[#allocation2 + $0x58] sm:$0xff] }
  0x43   : > { %859 = vmatpush1.bf16.msra.mxu1 %v7028_v14  ;;  %v7719_v7 = vshrl.u32 %v7708_v0, 16  ;;  %v7722_v8 = vshll.u32 %v7708_v0, 16  ;;  %v7724_v9 = vcombine.low %v358_v60, %v359_v61  ;;  %v7765_v32 = vcombine.high %v360_v16, %v361_v26  ;;  %329 = vst.msk [vmem:[#allocation2 + $0x68] sm:$0xf] %vm315_vm4, %v299_v38  ;;  %v300_v56 = vld [vmem:[%s7486_s24 + $0x38] sm:$0xf] }
  0x44   : > { %2605 = vmatpush1.bf16.msra.mxu0 %v7029_v15  ;;  %860 = vmatprep.subr.bf16.mxu1 %v10206_v4  ;;  %v536_v11 = vsel %vm502_vm6, %v527_v62, %v535_v1  ;;  %v519_v12 = vsel %vm502_vm6, %v510_v63, %v518_v2  ;;  %v7733_v14 = vshrl.u32 %v7711_v3, 16  ;;  %v7736_v15 = vshll.u32 %v7711_v3, 16  ;;  %v301_v59 = vld [vmem:[%s7486_s24 + $0x3c] sm:$0xf]  ;;  %330 = vst.msk [vmem:[#allocation2 + $0x70] sm:$0xf] %vm315_vm4, %v300_v56 }
  0x45   : > { %2606 = vmatprep.subr.bf16.mxu0 %v10206_v4  ;;  %10303 = vst [vmem:[#allocation8_spill] sm:$0xff] %v7719_v7  ;;  %10304 = vst [vmem:[#allocation9_spill] sm:$0xff] %v7722_v8  ;;  %6180 = vmatprep.mubr.msk.bf16.mxu1 %vm808_vm5, %v536_v11  ;;  %v549_v18 = vrot.slane %v7719_v7, 2  ;;  %v7744_v20 = vshrl.u32 %v7713_v5, 16  ;;  %v7758_v25 = vshll.u32 %v7724_v9, 16  ;;  %v7778_v41 = vshrl.u32 %v7765_v32, 16 }
  0x46   : > { %10305 = vst [vmem:[#allocation10_spill] sm:$0xff] %v7733_v14  ;;  %10306 = vst [vmem:[#allocation11_spill] sm:$0xff] %v7736_v15  ;;  %v540_v22 = vrot.slane %v7733_v14, 2  ;;  %v543_v23 = vrot.slane %v7736_v15, 3  ;;  %v7781_v42 = vshll.u32 %v7765_v32, 16  ;;  %v7795_v54 = vcombine.low %v360_v16, %v361_v26  ;;  %v7055_v60 = vld [vmem:[%s10197_s1 + $0x60] sm:$0xff]  }
  0x47   : > { %861 = vmatpush1.bf16.msra.mxu1 %v7030_v19  ;;  %v552_v19 = vrot.slane %v7722_v8, 3  ;;  %10307 = vst [vmem:[#allocation12_spill] sm:$0xff] %v7744_v20  ;;  %10309 = vst [vmem:[#allocation14_spill] sm:$0xff] %v7758_v25  ;;  %v567_v30 = vrot.slane %v7744_v20, 2  ;;  %v561_v44 = vrot.slane %v7758_v25, 3  ;;  %v585_v52 = vrot.slane %v7778_v41, 2 }
  0x48   : > { %2607 = vmatpush1.bf16.msra.mxu0 %v7031_v21  ;;  %862 = vmatprep.subr.bf16.mxu1 %v10206_v4  ;;  %v7747_v21 = vshll.u32 %v7713_v5, 16  ;;  %10310 = vst [vmem:[#allocation15_spill] sm:$0xff] %v7781_v42  ;;  %v588_v53 = vrot.slane %v7781_v42, 3  ;;  %331 = vst.msk [vmem:[#allocation2 + $0x78] sm:$0xf] %vm315_vm4, %v301_v59  ;;  %v7051_v63 = vld [vmem:[%s10197_s1 + $0x1a8] sm:$0xff]  }
  0x49   : > { %2608 = vmatprep.subr.bf16.mxu0 %v10206_v4  ;;  %v302_v61 = vld [vmem:[%s7486_s24 + $0x40] sm:$0xf]  ;;  %v7061_v16 = vld [vmem:[%s10197_s1 + $0x68] sm:$0xff]   ;;  %v307_v56 = vld [vmem:[%s7486_s24 + $0x54] sm:$0xf] }
  0x4a   : > { %10308 = vst [vmem:[#allocation13_spill] sm:$0xff] %v7747_v21  ;;  %v570_v31 = vrot.slane %v7747_v21, 3  ;;  %332 = vst.msk [vmem:[#allocation2 + $0x80] sm:$0xf] %vm315_vm4, %v302_v61  ;;  %v589_v10 = vor.u32 %v588_v53, %v585_v52  ;;  %v365_v17 = vld [vmem:[#allocation2 + $0x68] sm:$0xff] }
  0x4b   : > { %863 = vmatpush1.bf16.msra.mxu1 %v7032_v24  ;;  %v7755_v24 = vshrl.u32 %v7724_v9, 16  ;;  %v304_v26 = vld [vmem:[%s7486_s24 + $0x48] sm:$0xf]  ;;  %v306_v52 = vld [vmem:[%s7486_s24 + $0x50] sm:$0xf] }
  0x4c   : > { %2609 = vmatpush1.bf16.msra.mxu0 %v7033_v27  ;;  %864 = vmatprep.subr.bf16.mxu1 %v10206_v4  ;;  %v553_v27 = vor.u32 %v552_v19, %v549_v18  ;;  %v571_v40 = vor.u32 %v570_v31, %v567_v30  ;;  %334 = vst.msk [vmem:[#allocation2 + $0x90] sm:$0xf] %vm315_vm4, %v304_v26  ;;  %v366_v53 = vld [vmem:[#allocation2 + $0x70] sm:$0xff]  ;;  %336 = vst.msk [vmem:[#allocation2 + $0xa0] sm:$0xf] %vm315_vm4, %v306_v52 }
  0x4d   : > { %2610 = vmatprep.subr.bf16.mxu0 %v10206_v4  ;;  %v558_v43 = vrot.slane %v7755_v24, 2  ;;  %337 = vst.msk [vmem:[#allocation2 + $0xa8] sm:$0xf] %vm315_vm4, %v307_v56  ;;  %v7064_v56 = vld [vmem:[%s10197_s1 + $0x1d0] sm:$0xff]  }
  0x4e   : > { %v554_v39 = vsel %vm502_vm6, %v535_v1, %v553_v27  ;;  %v572_v57 = vsel %vm502_vm6, %v553_v27, %v571_v40  ;;  %v7816_v1 = vshrl.u32 %v7795_v54, 16  ;;  %v590_v27 = vsel %vm502_vm6, %v571_v40, %v589_v10 }
  0x4f   : > { %865 = vmatpush1.bf16.msra.mxu1 %v7034_v34  ;;  %v544_v34 = vor.u32 %v543_v23, %v540_v22  ;;  %v562_v62 = vor.u32 %v561_v44, %v558_v43  ;;  %v7056_v43 = vld [vmem:[%s10197_s1 + $0x1b8] sm:$0xff]  }
  0x50   : > { %2611 = vmatpush1.bf16.msra.mxu0 %v7035_v35  ;;  %866 = vmatprep.subr.bf16.mxu1 %v10206_v4  ;;  %v7050_v35 = vld [vmem:[%s10197_s1 + $0x58] sm:$0xff]   ;;  %v576_v19 = vrot.slane %v7816_v1, 2 }
  0x51   : > { %2612 = vmatprep.subr.bf16.mxu0 %v10206_v4  ;;  %v545_v50 = vsel %vm502_vm6, %v518_v2, %v544_v34  ;;  %v7819_v2 = vshll.u32 %v7795_v54, 16  ;;  %v563_v18 = vsel %vm502_vm6, %v544_v34, %v562_v62  ;;  %v305_v34 = vld [vmem:[%s7486_s24 + $0x4c] sm:$0xf] }
  0x52   : > { %335 = vst.msk [vmem:[#allocation2 + $0x98] sm:$0xf] %vm315_vm4, %v305_v34 }
  0x53   : > { %867 = vmatpush1.bf16.msra.mxu1 %v7036_v45  ;;  %v362_v45 = vld [vmem:[#allocation2 + $0x50] sm:$0xff]  ;;  %10311 = vst [vmem:[#allocation16_spill] sm:$0xff] %v7819_v2  ;;  %v579_v22 = vrot.slane %v7819_v2, 3 }
  0x54   : > { %2613 = vmatpush1.bf16.msra.mxu0 %v7037_v51  ;;  %1198 = vmatprep.subr.bf16.mxu1 %v10206_v4  ;;  %v7047_v51 = vld [vmem:[%s10197_s1 + $0x1a0] sm:$0xff]   ;;  %v7800_v58 = vcombine.high %v362_v45, %v363_v55  ;;  %v7840_v23 = vcombine.low %v362_v45, %v363_v55  ;;  %v367_v55 = vld [vmem:[#allocation2 + $0x78] sm:$0xff] }
  0x55   : > { %3224 = vmatprep.subr.bf16.mxu0 %v10206_v4  ;;  %v580_v38 = vor.u32 %v579_v22, %v576_v19  ;;  %v309_v22 = vld [vmem:[%s7486_s24 + $0x5c] sm:$0xf] }
  0x56   : > { %881 = vmatmul.mubr.bf16.vlgmr.msra.gmra.mrb[0].mxu1 %v519_v12  ;;  %v7826_v11 = vshrl.u32 %v7800_v58, 16  ;;  %v7829_v12 = vshll.u32 %v7800_v58, 16  ;;  %v7865_v40 = vshll.u32 %v7840_v23, 16  ;;  %339 = vst.msk [vmem:[#allocation2 + $0xb8] sm:$0xf] %vm315_vm4, %v309_v22 }
  0x57   : > { %2627 = vmatmul.mubr.bf16.vlgmr.msra.gmra.mrb[0].mxu0 %v7675_v37  ;;  %1199 = vmatpush1.bf16.msra.mxu1 %v7044_v13  ;;  %v364_v13 = vld [vmem:[#allocation2 + $0x60] sm:$0xff]  ;;  %v581_v59 = vsel %vm502_vm6, %v562_v62, %v580_v38 }
  0x58   : > { %3225 = vmatpush1.bf16.msra.mxu0 %v7042_v6  ;;  %6329 = vmatprep.mubr.msk.bf16.mxu0 %vm808_vm5, %v7708_v0  ;;  %v303_v6 = vld [vmem:[%s7486_s24 + $0x44] sm:$0xf]  ;;  %10312 = vst [vmem:[#allocation17_spill] sm:$0xff] %v7829_v12  ;;  %v603_v30 = vrot.slane %v7826_v11, 2  ;;  %v606_v31 = vrot.slane %v7829_v12, 3  ;;  %v7849_v33 = vcombine.high %v364_v13, %v365_v17  ;;  %v597_v61 = vrot.slane %v7865_v40, 3 }
  0x59   : > { %3226 = vmatprep.subr.bf16.mxu0 %v10206_v4  ;;  %6181 = vmatprep.mubr.msk.bf16.mxu1 %vm808_vm5, %v554_v39  ;;  %333 = vst.msk [vmem:[#allocation2 + $0x88] sm:$0xf] %vm315_vm4, %v303_v6  ;;  %v7862_v39 = vshrl.u32 %v7840_v23, 16  ;;  %v7059_v6 = vld [vmem:[%s10197_s1 + $0x1c0] sm:$0xff]  }
  0x5a   : > { %1200 = vmatprep.subr.bf16.mxu1 %v10206_v4  ;;  %v607_v44 = vor.u32 %v606_v31, %v603_v30  ;;  %v7873_v45 = vshrl.u32 %v7849_v33, 16  ;;  %v7078_v62 = vld [vmem:[%s10197_s1 + $0x80] sm:$0xff]   ;;  %v7063_v30 = vld [vmem:[%s10197_s1 + $0x1c8] sm:$0xff]  }
  0x5b   : > { %1201 = vmatpush1.bf16.msra.mxu1 %v7050_v35  ;;  %v7067_v35 = vld [vmem:[%s10197_s1 + $0x70] sm:$0xff]  }
  0x5c   : > { %3227 = vmatpush1.bf16.msra.mxu0 %v7045_v28  ;;  %1202 = vmatprep.subr.bf16.mxu1 %v10206_v4  ;;  %v7054_v28 = vld [vmem:[%s10197_s1 + $0x1b0] sm:$0xff]  }
  0x5d   : > { %3228 = vmatprep.subr.bf16.mxu0 %v10206_v4 }
  0x5e   : > { %889 = vmatmul.mubr.bf16.gmra.mrb[4].mxu1 %v545_v50  ;;  %v7876_v50 = vshll.u32 %v7849_v33, 16 }
  0x5f   : > { %2635 = vmatmul.mubr.bf16.gmra.mrb[4].mxu0 %v7711_v3  ;;  %6182 = vmatprep.mubr.msk.bf16.mxu1 %vm808_vm5, %v572_v57  ;;  %v7885_v57 = vcombine.low %v364_v13, %v365_v17  ;;  %v621_v13 = vrot.slane %v7873_v45, 2  ;;  %v7898_v17 = vcombine.high %v366_v53, %v367_v55 }
  0x60   : > { %3229 = vmatpush1.bf16.msra.mxu0 %v7047_v51  ;;  %6330 = vmatprep.mubr.msk.bf16.mxu0 %vm808_vm5, %v7713_v5  ;;  %v7073_v51 = vld [vmem:[%s10197_s1 + $0x78] sm:$0xff]  }
  0x61   : > { %3230 = vmatprep.subr.bf16.mxu0 %v10206_v4  ;;  %1203 = vmatpush1.bf16.msra.mxu1 %v7055_v60  ;;  %v594_v60 = vrot.slane %v7862_v39, 2  ;;  %10313 = vst [vmem:[#allocation18_spill] sm:$0xff] %v7898_v17  ;;  %v7909_v19 = vshll.u32 %v7885_v57, 16  ;;  %v7924_v31 = vshrl.u32 %v7898_v17, 16  ;;  %v7927_v34 = vshll.u32 %v7898_v17, 16 }
  0x62   : > { %1204 = vmatprep.subr.bf16.mxu1 %v10206_v4 }
  0x63   : > { %v598_v26 = vor.u32 %v597_v61, %v594_v60  ;;  %v615_v52 = vrot.slane %v7909_v19, 3  ;;  %v7945_v61 = vld [vmem:[#allocation2 + $0x84] ss:$8 sps:$4 sm:$0xff]  }
  0x64   : > { %3231 = vmatpush1.bf16.msra.mxu0 %v7051_v63  ;;  %v608_v63 = vsel %vm502_vm6, %v589_v10, %v607_v44  ;;  %v7906_v10 = vshrl.u32 %v7885_v57, 16  ;;  %10314 = vst [vmem:[#allocation19_spill] sm:$0xff] %v7945_v61  ;;  %v7971_v22 = vshrl.u32 %v7945_v61, 16 }
  0x65   : > { %3232 = vmatprep.subr.bf16.mxu0 %v10206_v4  ;;  %1205 = vmatpush1.bf16.msra.mxu1 %v7061_v16  ;;  %v624_v16 = vrot.slane %v7876_v50, 3  ;;  %v599_v60 = vsel %vm502_vm6, %v580_v38, %v598_v26 }
  0x66   : > { %897 = vmatmul.mubr.bf16.gmra.mrb[8].mxu1 %v563_v18  ;;  %1206 = vmatprep.subr.bf16.mxu1 %v10206_v4  ;;  %v308_v18 = vld [vmem:[%s7486_s24 + $0x58] sm:$0xf]  ;;  %10316 = vst [vmem:[#allocation21_spill] sm:$0xff] %v7971_v22 }
  0x67   : > { %2643 = vmatmul.mubr.bf16.gmra.mrb[8].mxu0 %v7724_v9  ;;  %6183 = vmatprep.mubr.msk.bf16.mxu1 %vm808_vm5, %v590_v27  ;;  %338 = vst.msk [vmem:[#allocation2 + $0xb0] sm:$0xf] %vm315_vm4, %v308_v18  ;;  %v310_v27 = vld [vmem:[%s7486_s24 + $0x60] sm:$0xf]  ;;  %v7068_v18 = vld [vmem:[%s10197_s1 + $0x1d8] sm:$0xff]  }
  0x68   : > { %6331 = vmatprep.mubr.msk.bf16.mxu0 %vm808_vm5, %v7765_v32  ;;  %3233 = vmatpush1.bf16.msra.mxu0 %v7054_v28  ;;  %v625_v28 = vor.u32 %v624_v16, %v621_v13  ;;  %340 = vst.msk [vmem:[#allocation2 + $0xc0] sm:$0xf] %vm315_vm4, %v310_v27  ;;  %v642_v13 = vrot.slane %v7927_v34, 3  ;;  %v7974_v27 = vshll.u32 %v7945_v61, 16  ;;  %v1009_v61 = vld [vmem:[#allocation2] sm:$0x88] }
  0x69   : > { %3234 = vmatprep.subr.bf16.mxu0 %v10206_v4  ;;  %1207 = vmatpush1.bf16.msra.mxu1 %v7067_v35  ;;  %v311_v35 = vld [vmem:[%s7486_s24 + $0x64] sm:$0xf] }
  0x6a   : > { %1208 = vmatprep.subr.bf16.mxu1 %v10206_v4  ;;  %341 = vst.msk [vmem:[#allocation2 + $0xc8] sm:$0xf] %vm315_vm4, %v311_v35 }
  0x6c   : > { %3235 = vmatpush1.bf16.msra.mxu0 %v7056_v43  ;;  %v7086_v43 = vld [vmem:[%s10197_s1 + $0x88] sm:$0xff]  }
  0x6d   : > { %3236 = vmatprep.subr.bf16.mxu0 %v10206_v4  ;;  %1209 = vmatpush1.bf16.msra.mxu1 %v7073_v51  ;;  %v612_v51 = vrot.slane %v7906_v10, 2 }
  0x6e   : > { %905 = vmatmul.mubr.bf16.gmra.mrb[12].mxu1 %v581_v59  ;;  %1210 = vmatprep.subr.bf16.mxu1 %v10206_v4  ;;  %v7941_v59 = vcombine.low %v366_v53, %v367_v55  ;;  %v7090_v53 = vld [vmem:[%s10197_s1 + $0x90] sm:$0xff]  }
  0x6f   : > { %2651 = vmatmul.mubr.bf16.gmra.mrb[12].mxu0 %v7795_v54  ;;  %6184 = vmatprep.mubr.msk.bf16.mxu1 %vm808_vm5, %v608_v63  ;;  %v626_v63 = vsel %vm502_vm6, %v607_v44, %v625_v28  ;;  %v7960_v44 = vld [vmem:[#allocation2 + $0x80] ss:$8 sps:$4 sm:$0xff]   ;;  %v616_v16 = vor.u32 %v615_v52, %v612_v51 }
  0x70   : > { %6332 = vmatprep.mubr.msk.bf16.mxu0 %vm808_vm5, %v7800_v58  ;;  %3237 = vmatpush1.bf16.msra.mxu0 %v7059_v6  ;;  %v639_v6 = vrot.slane %v7924_v31, 2  ;;  %v7955_v55 = vshrl.u32 %v7941_v59, 16  ;;  %v7958_v38 = vshll.u32 %v7941_v59, 16  ;;  %v7983_v51 = vshrl.u32 %v7960_v44, 16 }
  0x71   : > { %3238 = vmatprep.subr.bf16.mxu0 %v10206_v4  ;;  %1211 = vmatpush1.bf16.msra.mxu1 %v7078_v62  ;;  %v617_v52 = vsel %vm502_vm6, %v598_v26, %v616_v16 }
  0x72   : > { %1212 = vmatprep.subr.bf16.mxu1 %v10206_v4  ;;  %10315 = vst [vmem:[#allocation20_spill] sm:$0xff] %v7955_v55  ;;  %v643_v62 = vor.u32 %v642_v13, %v639_v6  ;;  %v630_v35 = vrot.slane %v7955_v55, 2  ;;  %10317 = vst [vmem:[#allocation22_spill] sm:$0xff] %v7983_v51  ;;  %v657_v6 = vrot.slane %v7971_v22, 2  ;;  %v660_v13 = vrot.slane %v7974_v27, 3 }
  0x73   : > { %v648_v55 = vrot.slane %v7983_v51, 2  ;;  %v8031_v22 = vld [vmem:[#allocation2 + $0xa4] ss:$8 sps:$4 sm:$0xff]  }
  0x74   : > { %3239 = vmatpush1.bf16.msra.mxu0 %v7063_v30  ;;  %v7092_v30 = vld [vmem:[%s10197_s1 + $0x98] sm:$0xff]   ;;  %10323 = vst [vmem:[#allocation28_spill] sm:$0xff] %v8031_v22 }
  0x75   : > { %3240 = vmatprep.subr.bf16.mxu0 %v10206_v4  ;;  %1213 = vmatpush1.bf16.msra.mxu1 %v7086_v43  ;;  %v633_v43 = vrot.slane %v7958_v38, 3 }
  0x76   : > { %913 = vmatmul.mubr.bf16.gmra.mrb[16].mxu1 %v599_v60  ;;  %1214 = vmatprep.subr.bf16.mxu1 %v10206_v4  ;;  %v7988_v60 = vld [vmem:[#allocation2 + $0x94] ss:$8 sps:$4 sm:$0xff]  }
  0x77   : > { %2659 = vmatmul.mubr.bf16.gmra.mrb[16].mxu0 %v7840_v23  ;;  %6185 = vmatprep.mubr.msk.bf16.mxu1 %vm808_vm5, %v626_v63  ;;  %10318 = vst [vmem:[#allocation23_spill] sm:$0xff] %v7988_v60  ;;  %v644_v63 = vsel %vm502_vm6, %v625_v28, %v643_v62  ;;  %v634_v26 = vor.u32 %v633_v43, %v630_v35  ;;  %v2911_v28 = vrot.slane %v7696_v49, 1 }
  0x78   : > { %6333 = vmatprep.mubr.msk.bf16.mxu0 %vm808_vm5, %v7849_v33  ;;  %3241 = vmatpush1.bf16.msra.mxu0 %v7064_v56  ;;  %v2923_v56 = vrot.slane %v7688_v47, 1  ;;  %v2928_v47 = vrot.slane %v7722_v8, 1  ;;  %v661_v35 = vor.u32 %v660_v13, %v657_v6  ;;  %v1040_v8 = vrot.slane %v7673_v36, 3 }
  0x79   : > { %3242 = vmatprep.subr.bf16.mxu0 %v10206_v4  ;;  %1215 = vmatpush1.bf16.msra.mxu1 %v7090_v53  ;;  %v7994_v53 = vshll.u32 %v7960_v44, 16  ;;  %v635_v49 = vsel %vm502_vm6, %v616_v16, %v634_v26 }
  0x7a   : > { %1216 = vmatprep.subr.bf16.mxu1 %v10206_v4  ;;  %v2924_v43 = vor.u32 %v2923_v56, %v7685_v46  ;;  %v662_v51 = vsel %vm502_vm6, %v643_v62, %v661_v35 }
  0x7b   : > { %10319 = vst [vmem:[#allocation24_spill] sm:$0xff] %v7994_v53 }
  0x7c   : > { %3243 = vmatpush1.bf16.msra.mxu0 %v7068_v18  ;;  %v8004_v18 = vshrl.u32 %v7988_v60, 16  ;;  %v2929_v36 = vsel %vm2905_vm7, %v2924_v43, %v2928_v47  ;;  %v2912_v43 = vor.u32 %v2911_v28, %v7693_v48  ;;  %v2944_v28 = vrot.slane %v7747_v21, 1 }
  0x7d   : > { %3853 = vmatprep.subr.bf16.mxu0 %v10206_v4  ;;  %1217 = vmatpush1.bf16.msra.mxu1 %v7092_v30  ;;  %v8007_v30 = vshll.u32 %v7988_v60, 16  ;;  %v8021_v60 = vld [vmem:[#allocation2 + $0x90] ss:$8 sps:$4 sm:$0xff]  }
  0x7e   : > { %921 = vmatmul.mubr.bf16.gmra.mrb[20].mxu1 %v617_v52  ;;  %1620 = vmatprep.subr.bf16.mxu1 %v10206_v4  ;;  %10320 = vst [vmem:[#allocation25_spill] sm:$0xff] %v8004_v18  ;;  %v8013_v52 = vcombine.low %v1009_v61, %v7663_v29  ;;  %v8016_v4 = vcombine.high %v1009_v61, %v7663_v29  ;;  %v675_v13 = vrot.slane %v8004_v18, 2  ;;  %v1037_v29 = vrot.slane %v7675_v37, 3 }
  0x7f   : > { %2667 = vmatmul.mubr.bf16.gmra.mrb[20].mxu0 %v7885_v57  ;;  %6186 = vmatprep.mubr.msk.bf16.mxu1 %vm808_vm5, %v644_v63  ;;  %v651_v63 = vrot.slane %v7994_v53, 3  ;;  %v678_v46 = vrot.slane %v8007_v30, 3  ;;  %v1044_v61 = vrot.slane %v7708_v0, 3  ;;  %v313_v53 = vld [vmem:[%s7486_s24 + $0x6c] sm:$0xf]  ;;  %v1042_v0 = vrot.slane %v7711_v3, 3 }
  0x80   : > { %6334 = vmatprep.mubr.msk.bf16.mxu0 %vm808_vm5, %v7898_v17  ;;  %10321 = vst [vmem:[#allocation26_spill] sm:$0xff] %v8013_v52  ;;  %10322 = vst [vmem:[#allocation27_spill] sm:$0xff] %v8016_v4  ;;  %v1039_v6 = vrot.slane %v8016_v4, 3  ;;  %v1036_v56 = vrot.slane %v8013_v52, 3  ;;  %v312_v4 = vld [vmem:[%s7486_s24 + $0x68] sm:$0xf] }
  0x81   : > { %v2916_v52 = vrot.slane %v7736_v15, 1  ;;  %v8043_v37 = vsel %vm1035_vm8, %v1040_v8, %v1044_v61  ;;  %342 = vst.msk [vmem:[#allocation2 + $0xd0] sm:$0xf] %vm315_vm4, %v312_v4  ;;  %343 = vst.msk [vmem:[#allocation2 + $0xd8] sm:$0xf] %vm315_vm4, %v313_v53  ;;  %v8048_v62 = vor.u32 %v651_v63, %v648_v55  ;;  %v8060_v4 = vshll.u32 %v8021_v60, 16 }
  0x82   : > { %v8034_v16 = vsel %vm1035_vm8, %v1039_v6, %v1040_v8  ;;  %v8040_v18 = vsel %vm1035_vm8, %v1036_v56, %v1037_v29  ;;  %v8052_v6 = vshrl.u32 %v8021_v60, 16  ;;  %v1048_v56 = vrot.slane %v7713_v5, 3  ;;  %v8073_v53 = vld [vmem:[#allocation2 + $0xa0] ss:$8 sps:$4 sm:$0xff]  }
  0x83   : > { %v8057_v8 = vor.u32 %v678_v46, %v675_v13  ;;  %v1046_v3 = vrot.slane %v7724_v9, 3  ;;  %v8068_v55 = vshrl.u32 %v8031_v22, 16  ;;  %v8071_v5 = vshll.u32 %v8031_v22, 16 }
  0x84   : > { %v8076_v46 = vsel %vm1035_vm8, %v1044_v61, %v1048_v56  ;;  %v1052_v9 = vrot.slane %v7765_v32, 3  ;;  %v653_v13 = vsel %vm502_vm6, %v634_v26, %v8048_v62  ;;  %v1050_v15 = vrot.slane %v7795_v54, 3  ;;  %v7072_v32 = vld [vmem:[%s10197_s1 + $0x1e0] sm:$0xff]  }
  0x85   : > { %v8081_v63 = vsel %vm1035_vm8, %v1042_v0, %v1046_v3  ;;  %v680_v61 = vsel %vm502_vm6, %v661_v35, %v8057_v8  ;;  %v693_v26 = vrot.slane %v8068_v55, 2  ;;  %v1054_v35 = vrot.slane %v7840_v23, 3 }
  0x86   : > { %929 = vmatmul.mubr.bf16.gmra.mrb[24].mxu1 %v635_v49  ;;  %v8063_v49 = vsel %vm1035_vm8, %v1037_v29, %v1042_v0  ;;  %v2917_v29 = vsel %vm2905_vm7, %v2912_v43, %v2916_v52  ;;  %v8093_v21 = vsel %vm1035_vm8, %v1048_v56, %v1052_v9  ;;  %v1056_v0 = vrot.slane %v7800_v58, 3 }
  0x87   : > { %2675 = vmatmul.mubr.bf16.gmra.mrb[24].mxu0 %v7941_v59  ;;  %6187 = vmatprep.mubr.msk.bf16.mxu1 %vm808_vm5, %v662_v51  ;;  %v2940_v51 = vor.u32 %v2928_v47, %v7719_v7  ;;  %v669_v47 = vrot.slane %v8060_v4, 3  ;;  %10324 = vst [vmem:[#allocation29_spill] sm:$0xff] %v8093_v21  ;;  %v696_v43 = vrot.slane %v8071_v5, 3  ;;  %v8101_v7 = vld [vmem:[#allocation2 + $0xb4] ss:$8 sps:$4 sm:$0xff]   ;;  %v8104_v54 = vsel %vm1035_vm8, %v1046_v3, %v1050_v15 }
  0x88   : > { %6377 = vmatprep.mubr.msk.bf16.mxu0 %vm808_vm5, %v2929_v36  ;;  %v666_v36 = vrot.slane %v8052_v6, 2  ;;  %10325 = vst [vmem:[#allocation30_spill] sm:$0xff] %v8104_v54  ;;  %v8109_v48 = vshrl.u32 %v8073_v53, 16  ;;  %v8112_v58 = vsel %vm1035_vm8, %v1052_v9, %v1056_v0  ;;  %v8115_v22 = vshll.u32 %v8073_v53, 16  ;;  %v7077_v9 = vld [vmem:[%s10197_s1 + $0x1e8] sm:$0xff]  }
  0x89   : > { %v2945_v56 = vsel %vm2905_vm7, %v2940_v51, %v2944_v28  ;;  %10326 = vst [vmem:[#allocation31_spill] sm:$0xff] %v8112_v58  ;;  %v8118_v21 = vsel %vm1035_vm8, %v1050_v15, %v1054_v35  ;;  %v1060_v3 = vrot.slane %v7849_v33, 3  ;;  %v2932_v51 = vor.u32 %v2916_v52, %v7733_v14  ;;  %v377_v52 = vld [vmem:[#allocation2 + $0xc8] sm:$0x77] }
  0x8a   : > { %10327 = vst [vmem:[#allocation32_spill] sm:$0xff] %v8118_v21  ;;  %v670_v23 = vor.u32 %v669_v47, %v666_v36  ;;  %v2936_v54 = vrot.slane %v7758_v25, 1  ;;  %v1058_v58 = vrot.slane %v7885_v57, 3  ;;  %v697_v15 = vor.u32 %v696_v43, %v693_v26 }
  0x8b   : > { %v8132_v33 = vshrl.u32 %v8101_v7, 16  ;;  %v8138_v36 = vsel %vm1035_vm8, %v1056_v0, %v1060_v3  ;;  %v2956_v47 = vor.u32 %v2944_v28, %v7744_v20  ;;  %v2960_v57 = vrot.slane %v7781_v42, 1  ;;  %v8155_v20 = vld [vmem:[#allocation2 + $0xb0] ss:$8 sps:$4 sm:$0xff]  }
  0x8c   : > { %10330 = vst [vmem:[#allocation35_spill] sm:$0xff] %v8138_v36  ;;  %v684_v26 = vrot.slane %v8109_v48, 2  ;;  %v687_v43 = vrot.slane %v8115_v22, 3  ;;  %v671_v25 = vsel %vm502_vm6, %v8048_v62, %v670_v23  ;;  %v2937_v28 = vsel %vm2905_vm7, %v2932_v51, %v2936_v54 }
  0x8d   : > { %10328 = vst [vmem:[#allocation33_spill] sm:$0xff] %v8132_v33  ;;  %v1062_v42 = vrot.slane %v7941_v59, 3  ;;  %v698_v14 = vsel %vm502_vm6, %v8057_v8, %v697_v15  ;;  %v10333_v36 = vrot.slane %v7898_v17, 3  ;;  %v2961_v51 = vsel %vm2905_vm7, %v2956_v47, %v2960_v57 }
  0x8e   : > { %937 = vmatmul.mubr.bf16.gmra.mrb[28].mxu1 %v653_v13  ;;  %v8127_v13 = vld [vmem:[#allocation2 + $0xc0] sm:$0xff]  ;;  %v688_v59 = vor.u32 %v687_v43, %v684_v26  ;;  %v1066_v8 = vrot.slane %v7960_v44, 3  ;;  %v8179_v17 = vshrl.u32 %v8155_v20, 16  ;;  %v2972_v47 = vor.u32 %v2960_v57, %v7778_v41 }
  0x8f   : > { %3257 = vmatmul.mubr.bf16.vlgmr.msra.gmra.mrb[0].mxu0 %v2917_v29  ;;  %6188 = vmatprep.mubr.msk.bf16.mxu1 %vm808_vm5, %v680_v61  ;;  %v8135_v29 = vshll.u32 %v8101_v7, 16  ;;  %v10331_v61 = vmov 0   ;;  %v8168_v62 = vsel %vm1035_vm8, %v1060_v3, %v10333_v36  ;;  %v8173_v21 = vsel %vm1035_vm8, %v1058_v58, %v1062_v42 }
  0x90   : > { %3854 = vmatpush1.bf16.msra.mxu0 %v7072_v32  ;;  %6378 = vmatprep.mubr.msk.bf16.mxu0 %vm808_vm5, %v2945_v56  ;;  %v8144_v32 = vsel %vm1035_vm8, %v1054_v35, %v1058_v58  ;;  %v7082_v56 = vld [vmem:[%s10197_s1 + $0x1f0] sm:$0xff]   ;;  %v8158_v35 = vcombine.high %v8127_v13, %v377_v52  ;;  %10334 = vst [vmem:[#allocation37_spill] sm:$0xff] %v8179_v17  ;;  %v8182_v3 = vshll.u32 %v8155_v20, 16  ;;  %v2976_v26 = vrot.slane %v7829_v12, 1 }
  0x91   : > { %10329 = vst [vmem:[#allocation34_spill] sm:$0xff] %v8135_v29  ;;  %3855 = vmatprep.subr.bf16.mxu0 %v10331_v61  ;;  %10332 = vst [vmem:[#allocation36_spill] sm:$0xff] %v8144_v32  ;;  %v711_v32 = vrot.slane %v8132_v33, 2  ;;  %v714_v0 = vrot.slane %v8135_v29, 3  ;;  %v689_v43 = vsel %vm502_vm6, %v670_v23, %v688_v59 }
  0x92   : > { %10335 = vst [vmem:[#allocation38_spill] sm:$0xff] %v8182_v3  ;;  %v727_v36 = vshrl.u32 %v8158_v35, 16  ;;  %v730_v44 = vshll.u32 %v8158_v35, 16  ;;  %v2977_v23 = vsel %vm2905_vm7, %v2972_v47, %v2976_v26  ;;  %v2988_v47 = vor.u32 %v2976_v26, %v7826_v11  ;;  %v7095_v26 = vld [vmem:[%s10197_s1 + $0x210] sm:$0xff]  }
  0x93   : > { %v715_v58 = vor.u32 %v714_v0, %v711_v32  ;;  %v702_v32 = vrot.slane %v8179_v17, 2  ;;  %v705_v0 = vrot.slane %v8182_v3, 3 }
  0x94   : > { %3856 = vmatpush1.bf16.msra.mxu0 %v7077_v9  ;;  %v2948_v9 = vor.u32 %v2936_v54, %v7755_v24  ;;  %v8192_v54 = vsel %vm1035_vm8, %v1062_v42, %v1066_v8  ;;  %v7091_v42 = vld [vmem:[%s10197_s1 + $0x200] sm:$0xff]  }
  0x95   : > { %3857 = vmatprep.subr.bf16.mxu0 %v10331_v61  ;;  %v716_v12 = vsel %vm502_vm6, %v697_v15, %v715_v58 }
  0x96   : > { %945 = vmatmul.mubr.bf16.gmra.mrb[32].mxu1 %v671_v25  ;;  %v2952_v25 = vrot.slane %v7819_v2, 1  ;;  %v732_v2 = vrot.slane %v730_v44, 3 }
  0x97   : > { %3265 = vmatmul.mubr.bf16.gmra.mrb[4].mxu0 %v2937_v28  ;;  %6189 = vmatprep.mubr.msk.bf16.mxu1 %vm808_vm5, %v698_v14  ;;  %v7089_v14 = vld [vmem:[%s10197_s1 + $0x1f8] sm:$0xff]   ;;  %v729_v28 = vrot.slane %v727_v36, 2  ;;  %v2968_v36 = vrot.slane %v7865_v40, 1 }
  0x98   : > { %6379 = vmatprep.mubr.msk.bf16.mxu0 %vm808_vm5, %v2961_v51  ;;  %3858 = vmatpush1.bf16.msra.mxu0 %v7082_v56  ;;  %v1070_v56 = vrot.slane %v8021_v60, 3  ;;  %v8202_v51 = vcombine.low %v8127_v13, %v377_v52  ;;  %v2953_v57 = vsel %vm2905_vm7, %v2948_v9, %v2952_v25  ;;  %v2964_v52 = vor.u32 %v2952_v25, %v7816_v1  ;;  %v7093_v25 = vld [vmem:[%s10197_s1 + $0x208] sm:$0xff]  }
  0x99   : > { %3859 = vmatprep.subr.bf16.mxu0 %v10331_v61  ;;  %v706_v9 = vor.u32 %v705_v0, %v702_v32  ;;  %v1078_v32 = vrot.slane %v8155_v20, 3  ;;  %v10237_v20 = vrot.slane %v8158_v35, 3 }
  0x9a   : > { %v8210_v60 = vsel %vm1035_vm8, %v1066_v8, %v1070_v56  ;;  %v718_v15 = vshrl.u32 %v8202_v51, 16  ;;  %v721_v44 = vshll.u32 %v8202_v51, 16  ;;  %v1074_v8 = vrot.slane %v8073_v53, 3 }
  0x9b   : > { %v707_v53 = vsel %vm502_vm6, %v688_v59, %v706_v9 }
  0x9c   : > { %3860 = vmatpush1.bf16.msra.mxu0 %v7089_v14  ;;  %v733_v14 = vor.u32 %v732_v2, %v729_v28  ;;  %v2969_v2 = vsel %vm2905_vm7, %v2964_v52, %v2968_v36  ;;  %v720_v0 = vrot.slane %v718_v15, 2  ;;  %v723_v28 = vrot.slane %v721_v44, 3 }
  0x9d   : > { %3861 = vmatprep.subr.bf16.mxu0 %v10331_v61  ;;  %v2980_v44 = vor.u32 %v2968_v36, %v7862_v39  ;;  %v7101_v36 = vld [vmem:[%s10197_s1 + $0x220] sm:$0xff]  }
  0x9e   : > { %953 = vmatmul.mubr.bf16.gmra.mrb[36].mxu1 %v689_v43  ;;  %v2992_v43 = vrot.slane %v7876_v50, 1  ;;  %v724_v52 = vor.u32 %v723_v28, %v720_v0  ;;  %v7105_v28 = vld [vmem:[%s10197_s1 + $0x228] sm:$0xff]  }
  0x9f   : > { %3273 = vmatmul.mubr.bf16.gmra.mrb[8].mxu0 %v2953_v57  ;;  %6190 = vmatprep.mubr.msk.bf16.mxu1 %vm808_vm5, %v716_v12  ;;  %v8228_v12 = vsel %vm1035_vm8, %v1070_v56, %v1074_v8  ;;  %v10238_v57 = vrot.slane %v8101_v7, 3  ;;  %v8239_v56 = vsel %vm1035_vm8, %v1074_v8, %v1078_v32  ;;  %v2984_v8 = vrot.slane %v7909_v19, 1 }
  0xa0   : > { %6380 = vmatprep.mubr.msk.bf16.mxu0 %vm808_vm5, %v2977_v23  ;;  %3862 = vmatpush1.bf16.msra.mxu0 %v7091_v42  ;;  %v734_v42 = vsel %vm502_vm6, %v715_v58, %v733_v14  ;;  %v2993_v59 = vsel %vm2905_vm7, %v2988_v47, %v2992_v43  ;;  %v10236_v23 = vrot.slane %v8202_v51, 3  ;;  %v3004_v47 = vor.u32 %v2992_v43, %v7873_v45 }
  0xa1   : > { %3863 = vmatprep.subr.bf16.mxu0 %v10331_v61  ;;  %v8250_v58 = vsel %vm1035_vm8, %v10238_v57, %v10237_v20  ;;  %v2996_v43 = vor.u32 %v2984_v8, %v7906_v10 }
  0xa2   : > { %v8256_v15 = vsel %vm1035_vm8, %v1078_v32, %v10236_v23  ;;  %v725_v32 = vsel %vm502_vm6, %v706_v9, %v724_v52  ;;  %v3000_v9 = vrot.slane %v7958_v38, 1 }
  0xa4   : > { %3864 = vmatpush1.bf16.msra.mxu0 %v7093_v25  ;;  %v7097_v25 = vld [vmem:[%s10197_s1 + $0x218] sm:$0xff]  }
  0xa5   : > { %3865 = vmatprep.subr.bf16.mxu0 %v10331_v61 }
  0xa6   : > { %961 = vmatmul.mubr.bf16.gmra.mrb[40].mxu1 %v707_v53  ;;  %v3008_v53 = vrot.slane %v7927_v34, 1 }
  0xa7   : > { %3281 = vmatmul.mubr.bf16.gmra.mrb[12].mxu0 %v2969_v2  ;;  %6191 = vmatprep.mubr.msk.bf16.mxu1 %vm808_vm5, %v734_v42  ;;  %v2985_v2 = vsel %vm2905_vm7, %v2980_v44, %v2984_v8  ;;  %v10336_v44 = vld [vmem:[#allocation20_spill] sm:$0xff] }
  0xa8   : > { %6381 = vmatprep.mubr.msk.bf16.mxu0 %vm808_vm5, %v2993_v59  ;;  %3866 = vmatpush1.bf16.msra.mxu0 %v7095_v26  ;;  %v3009_v0 = vsel %vm2905_vm7, %v3004_v47, %v3008_v53  ;;  %v3020_v42 = vor.u32 %v3008_v53, %v7924_v31  ;;  %v3024_v26 = vrot.slane %v7974_v27, 1  ;;  %v3001_v59 = vsel %vm2905_vm7, %v2996_v43, %v3000_v9  ;;  %v10338_v53 = vld [vmem:[#allocation21_spill] sm:$0xff]  ;;  %v10339_v43 = vld [vmem:[#allocation22_spill] sm:$0xff] }
  0xa9   : > { %3867 = vmatprep.subr.bf16.mxu0 %v10331_v61  ;;  %v3012_v8 = vor.u32 %v3000_v9, %v10336_v44 }
  0xac   : > { %3868 = vmatpush1.bf16.msra.mxu0 %v7097_v25  ;;  %v10337_v25 = vld [vmem:[#allocation24_spill] sm:$0xff] }
  0xad   : > { %3869 = vmatprep.subr.bf16.mxu0 %v10331_v61  ;;  %v3016_v47 = vrot.slane %v10337_v25, 1 }
  0xae   : > { %969 = vmatmul.mubr.bf16.gmra.mrb[44].mxu1 %v725_v32  ;;  %v3036_v32 = vor.u32 %v3024_v26, %v10338_v53 }
  0xaf   : > { %3289 = vmatmul.mubr.bf16.gmra.mrb[16].mxu0 %v2985_v2  ;;  %6192 = vmatprep.mubr.msk.bf16.mxu1 %vm808_vm5, %v733_v14  ;;  %v3025_v14 = vsel %vm2905_vm7, %v3020_v42, %v3024_v26  ;;  %v3040_v2 = vrot.slane %v8007_v30, 1  ;;  %v3028_v9 = vor.u32 %v3016_v47, %v10339_v43  ;;  %v7096_v42 = vld [vmem:[%s10197_s1 + $0xa8] sm:$0xff]   ;;  %v10340_v26 = vld [vmem:[#allocation25_spill] sm:$0xff] }
  0xb0   : > { %6382 = vmatprep.mubr.msk.bf16.mxu0 %vm808_vm5, %v3009_v0  ;;  %3870 = vmatpush1.bf16.msra.mxu0 %v7101_v36  ;;  %v3017_v36 = vsel %vm2905_vm7, %v3012_v8, %v3016_v47  ;;  %v8320_v47 = vld [vmem:[#allocation2 + $0xc8] sm:$0xff] }
  0xb1   : > { %3871 = vmatprep.subr.bf16.mxu0 %v10331_v61  ;;  %v3041_v0 = vsel %vm2905_vm7, %v3036_v32, %v3040_v2 }
  0xb4   : > { %3872 = vmatpush1.bf16.msra.mxu0 %v7105_v28  ;;  %v3032_v28 = vrot.slane %v8060_v4, 1 }
  0xb5   : > { %4203 = vmatprep.subr.bf16.mxu0 %v10331_v61 }
  0xb6   : > { %977 = vmatmul.mubr.bf16.gmra.mrb[48].mxu1 %v724_v52  ;;  %v7094_v52 = vld [vmem:[%s10197_s1 + $0xa0] sm:$0xff]   ;;  %v3044_v32 = vor.u32 %v3032_v28, %v8052_v6 }
  0xb7   : > { %3297 = vmatmul.mubr.bf16.gmra.mrb[20].mxu0 %v3001_v59  ;;  %6205 = vmatprep.mubr.msk.bf16.mxu1 %vm808_vm5, %v8034_v16  ;;  %v314_v16 = vld [vmem:[%s7486_s24 + $0x70] sm:$0xf]  ;;  %v3056_v59 = vrot.slane %v8071_v5, 1 }
  0xb8   : > { %6383 = vmatprep.mubr.msk.bf16.mxu0 %vm808_vm5, %v3025_v14  ;;  %344 = vst.msk [vmem:[#allocation2 + $0xe0] sm:$0xf] %vm315_vm4, %v314_v16  ;;  %v7098_v14 = vld [vmem:[%s10197_s1 + $0xb0] sm:$0xff]   ;;  %v7106_v16 = vld [vmem:[%s10197_s1 + $0xc0] sm:$0xff]  }
  0xbe   : > { %1231 = vmatmul.mubr.bf16.vlgmr.msra.gmra.mrb[0].mxu1 %v8040_v18  ;;  %v3052_v18 = vor.u32 %v3040_v2, %v10340_v26  ;;  %v3048_v2 = vrot.slane %v8115_v22, 1 }
  0xbf   : > { %3305 = vmatmul.mubr.bf16.gmra.mrb[24].mxu0 %v3017_v36  ;;  %6206 = vmatprep.mubr.msk.bf16.mxu1 %vm808_vm5, %v8043_v37  ;;  %v3033_v37 = vsel %vm2905_vm7, %v3028_v9, %v3032_v28  ;;  %v7102_v36 = vld [vmem:[%s10197_s1 + $0xb8] sm:$0xff]  }
  0xc0   : > { %1621 = vmatpush1.bf16.msra.mxu1 %v7094_v52  ;;  %6384 = vmatprep.mubr.msk.bf16.mxu0 %vm808_vm5, %v3041_v0  ;;  %v3057_v8 = vsel %vm2905_vm7, %v3052_v18, %v3056_v59  ;;  %v3068_v52 = vor.u32 %v3056_v59, %v8068_v55  ;;  %v6364_v0 = vcombine.high %v8127_v13, %v8320_v47  ;;  %v2780_v18 = vld [vmem:[#allocation2 + $0xd8] sm:$0x11] }
  0xc1   : > { %1622 = vmatprep.subr.bf16.mxu1 %v10331_v61  ;;  %v10341_v59 = vld [vmem:[#allocation29_spill] sm:$0xff] }
  0xc2   : > { %v3086_v28 = vshll.u32 %v6364_v0, 16 }
  0xc4   : > { %1623 = vmatpush1.bf16.msra.mxu1 %v7096_v42  ;;  %v8342_v42 = vld [vmem:[#allocation2 + $0xd0] sm:$0xff] }
  0xc5   : > { %1624 = vmatprep.subr.bf16.mxu1 %v10331_v61  ;;  %v6365_v23 = vcombine.low %v8342_v42, %v2780_v18 }
  0xc6   : > { %1239 = vmatmul.mubr.bf16.gmra.mrb[4].mxu1 %v8063_v49  ;;  %v3072_v49 = vrot.slane %v8135_v29, 1 }
  0xc7   : > { %3313 = vmatmul.mubr.bf16.gmra.mrb[28].mxu0 %v3033_v37  ;;  %6207 = vmatprep.mubr.msk.bf16.mxu1 %vm808_vm5, %v8076_v46  ;;  %v3049_v46 = vsel %vm2905_vm7, %v3044_v32, %v3048_v2  ;;  %v3060_v37 = vor.u32 %v3048_v2, %v8109_v48  ;;  %v3094_v57 = vshll.u32 %v6365_v23, 16 }
  0xc8   : > { %6385 = vmatprep.mubr.msk.bf16.mxu0 %vm808_vm5, %v3057_v8  ;;  %1625 = vmatpush1.bf16.msra.mxu1 %v7098_v14  ;;  %v3073_v9 = vsel %vm2905_vm7, %v3068_v52, %v3072_v49  ;;  %v3064_v14 = vrot.slane %v8182_v3, 1  ;;  %v6363_v8 = vcombine.low %v8127_v13, %v8320_v47  ;;  %v3084_v32 = vor.u32 %v3072_v49, %v8132_v33  ;;  %v7118_v13 = vld [vmem:[%s10197_s1 + $0xd0] sm:$0xff]   ;;  %v10342_v49 = vld [vmem:[#allocation30_spill] sm:$0xff] }
  0xc9   : > { %1626 = vmatprep.subr.bf16.mxu1 %v10331_v61  ;;  %v6366_v52 = vcombine.high %v8342_v42, %v2780_v18  ;;  %v7131_v18 = vld [vmem:[%s10197_s1 + $0xe0] sm:$0xff]  }
  0xca   : > { %v3078_v2 = vshll.u32 %v6363_v8, 16 }
  0xcc   : > { %1627 = vmatpush1.bf16.msra.mxu1 %v7102_v36  ;;  %v3088_v36 = vrot.slane %v3086_v28, 1  ;;  %v10343_v28 = vld [vmem:[#allocation31_spill] sm:$0xff] }
  0xcd   : > { %1628 = vmatprep.subr.bf16.mxu1 %v10331_v61 }
  0xce   : > { %1247 = vmatmul.mubr.bf16.gmra.mrb[8].mxu1 %v8081_v63  ;;  %v7113_v63 = vld [vmem:[%s10197_s1 + $0xc8] sm:$0xff]  }
  0xcf   : > { %3321 = vmatmul.mubr.bf16.gmra.mrb[32].mxu0 %v3049_v46  ;;  %6208 = vmatprep.mubr.msk.bf16.mxu1 %vm808_vm5, %v10341_v59  ;;  %v3065_v46 = vsel %vm2905_vm7, %v3060_v37, %v3064_v14  ;;  %v3102_v59 = vshll.u32 %v6366_v52, 16  ;;  %v3076_v37 = vor.u32 %v3064_v14, %v8179_v17 }
  0xd0   : > { %6386 = vmatprep.mubr.msk.bf16.mxu0 %vm808_vm5, %v3073_v9  ;;  %1629 = vmatpush1.bf16.msra.mxu1 %v7106_v16  ;;  %v3089_v16 = vsel %vm2905_vm7, %v3084_v32, %v3088_v36  ;;  %v3098_v9 = vshrl.u32 %v6364_v0, 16  ;;  %v7125_v0 = vld [vmem:[%s10197_s1 + $0xd8] sm:$0xff]  }
  0xd1   : > { %1630 = vmatprep.subr.bf16.mxu1 %v10331_v61  ;;  %v3104_v20 = vrot.slane %v3102_v59, 1  ;;  %v3109_v59 = vshrl.u32 %v6366_v52, 16  ;;  %v10346_v52 = vld [vmem:[#allocation36_spill] sm:$0xff] }
  0xd2   : > { %v3100_v32 = vor.u32 %v3098_v9, %v3088_v36  ;;  %v10344_v36 = vld [vmem:[#allocation32_spill] sm:$0xff]  ;;  %v3096_v9 = vrot.slane %v3094_v57, 1 }
  0xd4   : > { %1631 = vmatpush1.bf16.msra.mxu1 %v7113_v63  ;;  %v3080_v63 = vrot.slane %v3078_v2, 1  ;;  %v3105_v14 = vsel %vm2905_vm7, %v3100_v32, %v3104_v20 }
  0xd5   : > { %1632 = vmatprep.subr.bf16.mxu1 %v10331_v61 }
  0xd6   : > { %1255 = vmatmul.mubr.bf16.gmra.mrb[12].mxu1 %v10342_v49  ;;  %v8373_v49 = vld [vmem:[#allocation2 + $0x20] sm:$0xff] }
  0xd7   : > { %3329 = vmatmul.mubr.bf16.gmra.mrb[36].mxu0 %v3065_v46  ;;  %6209 = vmatprep.mubr.msk.bf16.mxu1 %vm808_vm5, %v10343_v28  ;;  %v3385_v46 = vld [vmem:[#allocation2 + $0x18] sm:$0xff]  ;;  %v3081_v28 = vsel %vm2905_vm7, %v3076_v37, %v3080_v63  ;;  %v7136_v37 = vld [vmem:[%s10197_s1 + $0xe8] sm:$0xff]  }
  0xd8   : > { %6387 = vmatprep.mubr.msk.bf16.mxu0 %vm808_vm5, %v3089_v16  ;;  %1633 = vmatpush1.bf16.msra.mxu1 %v7118_v13  ;;  %v3090_v16 = vshrl.u32 %v6363_v8, 16  ;;  %v6391_v2 = vcombine.high %v3385_v46, %v8373_v49  ;;  %v10345_v13 = vld [vmem:[#allocation35_spill] sm:$0xff] }
  0xd9   : > { %1634 = vmatprep.subr.bf16.mxu1 %v10331_v61 }
  0xda   : > { %v3092_v8 = vor.u32 %v3090_v16, %v3080_v63  ;;  %v3550_v32 = vshll.u32 %v6391_v2, 16  ;;  %v3106_v16 = vshrl.u32 %v6365_v23, 16 }
  0xdc   : > { %1635 = vmatpush1.bf16.msra.mxu1 %v7125_v0  ;;  %v8389_v0 = vld [vmem:[#allocation2 + $0x2c] ss:$8 sps:$4 sm:$0xff]   ;;  %v3552_v63 = vrot.slane %v3550_v32, 1  ;;  %v3108_v32 = vor.u32 %v3106_v16, %v3096_v9 }
  0xdd   : > { %1636 = vmatprep.subr.bf16.mxu1 %v10331_v61  ;;  %v10243_v57 = vshll.u32 %v8389_v0, 16  ;;  %v10258_v17 = vshrl.u32 %v8389_v0, 16 }
  0xde   : > { %1263 = vmatmul.mubr.bf16.gmra.mrb[16].mxu1 %v10344_v36  ;;  %v3111_v36 = vor.u32 %v3109_v59, %v3104_v20 }
  0xdf   : > { %3337 = vmatmul.mubr.bf16.gmra.mrb[40].mxu0 %v3081_v28  ;;  %6210 = vmatprep.mubr.msk.bf16.mxu1 %vm808_vm5, %v10345_v13  ;;  %v3097_v28 = vsel %vm2905_vm7, %v3092_v8, %v3096_v9  ;;  %v6390_v13 = vcombine.low %v3385_v46, %v8373_v49  ;;  %v8401_v8 = vld [vmem:[#allocation2 + $0x28] ss:$8 sps:$4 sm:$0xff]   ;;  %v3557_v59 = vrot.slane %v10243_v57, 1 }
  0xe0   : > { %6388 = vmatprep.mubr.msk.bf16.mxu0 %vm808_vm5, %v3105_v14  ;;  %1637 = vmatpush1.bf16.msra.mxu1 %v7131_v18  ;;  %v3548_v14 = vshrl.u32 %v6391_v2, 16  ;;  %v10347_v18 = vld [vmem:[#allocation19_spill] sm:$0xff] }
  0xe1   : > { %1638 = vmatprep.subr.bf16.mxu1 %v10331_v61  ;;  %v1068_v20 = vrot.slane %v10347_v18, 3  ;;  %v3538_v46 = vshll.u32 %v6390_v13, 16  ;;  %v8449_v57 = vld [vmem:[#allocation2 + $0x48] ss:$8 sps:$4 sm:$0xff]  }
  0xe2   : > { %v3553_v2 = vor.u32 %v3552_v63, %v3548_v14  ;;  %v10350_v63 = vld [vmem:[#allocation23_spill] sm:$0xff]  ;;  %10352 = vst [vmem:[#allocation20_spill] sm:$0xff] %v8449_v57 }
  0xe3   : > { %v3540_v23 = vrot.slane %v3538_v46, 1  ;;  %v1072_v16 = vrot.slane %v10350_v63, 3  ;;  %v8420_v46 = vld [vmem:[#allocation2 + $0x38] ss:$8 sps:$4 sm:$0xff]  }
  0xe4   : > { %1639 = vmatpush1.bf16.msra.mxu1 %v7136_v37  ;;  %v8405_v37 = vld [vmem:[#allocation2 + $0x3c] ss:$8 sps:$4 sm:$0xff]   ;;  %v3558_v18 = vsel %vm2905_vm7, %v3553_v2, %v3557_v59  ;;  %v3569_v2 = vor.u32 %v10258_v17, %v3557_v59 }
  0xe5   : > { %2275 = vmatprep.subr.bf16.mxu1 %v10331_v61  ;;  %v10241_v14 = vshll.u32 %v8405_v37, 16  ;;  %v10246_v59 = vshrl.u32 %v8405_v37, 16 }
  0xe6   : > { %1271 = vmatmul.mubr.bf16.gmra.mrb[20].mxu1 %v10346_v52  ;;  %v10348_v52 = vld [vmem:[#allocation18_spill] sm:$0xff] }
  0xe7   : > { %3345 = vmatmul.mubr.bf16.gmra.mrb[44].mxu0 %v3097_v28  ;;  %6211 = vmatprep.mubr.msk.bf16.mxu1 %vm808_vm5, %v8168_v62  ;;  %v10349_v28 = vrot.slane %v10348_v52, 3  ;;  %v3536_v62 = vshrl.u32 %v6390_v13, 16  ;;  %v3573_v52 = vrot.slane %v10241_v14, 1  ;;  %v10351_v14 = vld [vmem:[#allocation28_spill] sm:$0xff] }
  0xe8   : > { %6389 = vmatprep.mubr.msk.bf16.mxu0 %vm808_vm5, %v3111_v36  ;;  %v10242_v36 = vshll.u32 %v8401_v8, 16 }
  0xe9   : > { %v1069_v3 = vsel %vm1035_vm8, %v10349_v28, %v1068_v20  ;;  %v3541_v9 = vor.u32 %v3540_v23, %v3536_v62  ;;  %v1073_v28 = vsel %vm1035_vm8, %v1068_v20, %v1072_v16  ;;  %v10251_v62 = vshrl.u32 %v8401_v8, 16 }
  0xea   : > { %v3545_v13 = vrot.slane %v10242_v36, 1  ;;  %v10244_v23 = vshll.u32 %v8420_v46, 16  ;;  %v1076_v36 = vrot.slane %v10351_v14, 3  ;;  %v10247_v14 = vshll.u32 %v8449_v57, 16 }
  0xec   : > { %v3561_v20 = vor.u32 %v10251_v62, %v3545_v13 }
  0xee   : > { %1279 = vmatmul.mubr.bf16.gmra.mrb[24].mxu1 %v8173_v21  ;;  %v8426_v21 = vld [vmem:[#allocation2 + $0x4c] ss:$8 sps:$4 sm:$0xff]  }
  0xef   : > { %3353 = vmatmul.mubr.bf16.gmra.mrb[48].mxu0 %v3108_v32  ;;  %6212 = vmatprep.mubr.msk.bf16.mxu1 %vm808_vm5, %v1069_v3  ;;  %v3546_v3 = vsel %vm2905_vm7, %v3541_v9, %v3545_v13  ;;  %v7112_v32 = vld [vmem:[%s10197_s1 + $0x230] sm:$0xff]   ;;  %v10245_v63 = vshll.u32 %v8426_v21, 16  ;;  %v3565_v9 = vrot.slane %v10244_v23, 1  ;;  %v8456_v13 = vld [vmem:[#allocation2 + $0x5c] ss:$8 sps:$4 sm:$0xff]  }
  0xf0   : > { %6426 = vmatprep.mubr.msk.bf16.mxu0 %vm808_vm5, %v3558_v18  ;;  %v3574_v18 = vsel %vm2905_vm7, %v3569_v2, %v3573_v52  ;;  %v7117_v2 = vld [vmem:[%s10197_s1 + $0x238] sm:$0xff]   ;;  %10353 = vst [vmem:[#allocation24_spill] sm:$0xff] %v8456_v13  ;;  %v7122_v23 = vld [vmem:[%s10197_s1 + $0x240] sm:$0xff]  }
  0xf6   : > { %1287 = vmatmul.mubr.bf16.gmra.mrb[28].mxu1 %v8192_v54  ;;  %v3585_v54 = vor.u32 %v10246_v59, %v3573_v52  ;;  %v10249_v59 = vshll.u32 %v8456_v13, 16 }
  0xf7   : > { %3886 = vmatmul.mubr.bf16.vlgmr.msra.gmra.mrb[0].mxu0 %v3546_v3  ;;  %6213 = vmatprep.mubr.msk.bf16.mxu1 %vm808_vm5, %v1073_v28  ;;  %v3589_v3 = vrot.slane %v10245_v63, 1  ;;  %v1077_v28 = vsel %vm1035_vm8, %v1072_v16, %v1076_v36  ;;  %v10250_v63 = vshrl.u32 %v8426_v21, 16 }
  0xf8   : > { %4204 = vmatpush1.bf16.msra.mxu0 %v7112_v32  ;;  %6427 = vmatprep.mubr.msk.bf16.mxu0 %vm808_vm5, %v3574_v18  ;;  %v3566_v32 = vsel %vm2905_vm7, %v3561_v20, %v3565_v9  ;;  %v10248_v18 = vshrl.u32 %v8420_v46, 16  ;;  %v3581_v20 = vrot.slane %v10247_v14, 1  ;;  %v10255_v14 = vshrl.u32 %v8449_v57, 16  ;;  %v10370_v57 = vld [vmem:[#allocation9_spill] sm:$0xff] }
  0xf9   : > { %4205 = vmatprep.subr.bf16.mxu0 %v10331_v61  ;;  %v3590_v52 = vsel %vm2905_vm7, %v3585_v54, %v3589_v3  ;;  %v7130_v54 = vld [vmem:[%s10197_s1 + $0x248] sm:$0xff]   ;;  %v1415_v29 = vrot.slane %v10370_v57, 4 }
  0xfa   : > { %v3577_v16 = vor.u32 %v10248_v18, %v3565_v9 }
  0xfc   : > { %4206 = vmatpush1.bf16.msra.mxu0 %v7117_v2  ;;  %v8476_v2 = vld [vmem:[#allocation2 + $0x58] ss:$8 sps:$4 sm:$0xff]   ;;  %v3582_v9 = vsel %vm2905_vm7, %v3577_v16, %v3581_v20  ;;  %v8508_v16 = vld [vmem:[#allocation2 + $0x68] ss:$8 sps:$4 sm:$0xff]  }
  0xfd   : > { %4207 = vmatprep.subr.bf16.mxu0 %v10331_v61  ;;  %10354 = vst [vmem:[#allocation21_spill] sm:$0xff] %v8476_v2  ;;  %v10253_v18 = vshll.u32 %v8476_v2, 16  ;;  %10357 = vst [vmem:[#allocation25_spill] sm:$0xff] %v8508_v16 }
  0xfe   : > { %1295 = vmatmul.mubr.bf16.gmra.mrb[32].mxu1 %v8210_v60  ;;  %v3601_v60 = vor.u32 %v10250_v63, %v3589_v3  ;;  %v7135_v3 = vld [vmem:[%s10197_s1 + $0x250] sm:$0xff]   ;;  %v10254_v63 = vshrl.u32 %v8456_v13, 16 }
  0xff   : > { %3894 = vmatmul.mubr.bf16.gmra.mrb[4].mxu0 %v3566_v32  ;;  %6214 = vmatprep.mubr.msk.bf16.mxu1 %vm808_vm5, %v1077_v28  ;;  %v3605_v32 = vrot.slane %v10249_v59, 1  ;;  %v8485_v28 = vld [vmem:[#allocation2 + $0x6c] ss:$8 sps:$4 sm:$0xff]  }
 0x100   : > { %6428 = vmatprep.mubr.msk.bf16.mxu0 %vm808_vm5, %v3590_v52  ;;  %4208 = vmatpush1.bf16.msra.mxu0 %v7122_v23  ;;  %10355 = vst [vmem:[#allocation22_spill] sm:$0xff] %v8485_v28  ;;  %v10356_v23 = vrot.slane %v8101_v7, 3  ;;  %v10252_v62 = vshll.u32 %v8485_v28, 16  ;;  %v3593_v7 = vor.u32 %v10255_v14, %v3581_v20 }
 0x101   : > { %4209 = vmatprep.subr.bf16.mxu0 %v10331_v61  ;;  %v3606_v59 = vsel %vm2905_vm7, %v3601_v60, %v3605_v32 }
 0x102   : > { %v1081_v52 = vsel %vm1035_vm8, %v1076_v36, %v10356_v23  ;;  %v3597_v36 = vrot.slane %v10253_v18, 1  ;;  %v3621_v60 = vrot.slane %v10252_v62, 1  ;;  %v10256_v23 = vshll.u32 %v8508_v16, 16 }
 0x104   : > { %4210 = vmatpush1.bf16.msra.mxu0 %v7130_v54  ;;  %v7140_v54 = vld [vmem:[%s10197_s1 + $0x258] sm:$0xff]   ;;  %v3598_v20 = vsel %vm2905_vm7, %v3593_v7, %v3597_v36  ;;  %v3613_v14 = vrot.slane %v10256_v23, 1 }
 0x105   : > { %4211 = vmatprep.subr.bf16.mxu0 %v10331_v61  ;;  %v8531_v7 = vld [vmem:[#allocation2 + $0x78] ss:$8 sps:$4 sm:$0xff]  }
 0x106   : > { %1303 = vmatmul.mubr.bf16.gmra.mrb[36].mxu1 %v8228_v12  ;;  %v3617_v12 = vor.u32 %v10254_v63, %v3605_v32 }
 0x107   : > { %3902 = vmatmul.mubr.bf16.gmra.mrb[8].mxu0 %v3582_v9  ;;  %6215 = vmatprep.mubr.msk.bf16.mxu1 %vm808_vm5, %v1081_v52  ;;  %v10257_v9 = vshrl.u32 %v8476_v2, 16  ;;  %v7148_v52 = vld [vmem:[%s10197_s1 + $0x260] sm:$0xff]   ;;  %v10361_v2 = vld [vmem:[#allocation5_spill] sm:$0xff] }
 0x108   : > { %6429 = vmatprep.mubr.msk.bf16.mxu0 %vm808_vm5, %v3606_v59  ;;  %4212 = vmatpush1.bf16.msra.mxu0 %v7135_v3  ;;  %v8517_v59 = vld [vmem:[#allocation2 + $0x7c] ss:$8 sps:$4 sm:$0xff]   ;;  %v3622_v32 = vsel %vm2905_vm7, %v3617_v12, %v3621_v60  ;;  %v10266_v3 = vshrl.u32 %v8485_v28, 16  ;;  %v1407_v13 = vrot.slane %v10361_v2, 4 }
 0x109   : > { %10358 = vst [vmem:[#allocation29_spill] sm:$0xff] %v8517_v59  ;;  %4213 = vmatprep.subr.bf16.mxu0 %v10331_v61  ;;  %v10265_v62 = vshll.u32 %v8517_v59, 16  ;;  %v3609_v12 = vor.u32 %v10257_v9, %v3597_v36  ;;  %v10360_v9 = vld [vmem:[#allocation4_spill] sm:$0xff] }
 0x10a   : > { %v1406_v17 = vrot.slane %v10360_v9, 3  ;;  %v10363_v9 = vrot.slane %v8158_v35, 3  ;;  %v10365_v35 = vshrl.u32 %v8517_v59, 16  ;;  %v10279_v59 = vshrl.u32 %v8531_v7, 16 }
 0x10b   : > { %v3614_v28 = vsel %vm2905_vm7, %v3609_v12, %v3613_v14 }
 0x10c   : > { %4214 = vmatpush1.bf16.msra.mxu0 %v7140_v54  ;;  %v10359_v54 = vld [vmem:[#allocation27_spill] sm:$0xff] }
 0x10d   : > { %4215 = vmatprep.subr.bf16.mxu0 %v10331_v61  ;;  %v1399_v18 = vshrl.u32 %v10359_v54, 16  ;;  %v1402_v63 = vshll.u32 %v10359_v54, 16  ;;  %v8549_v54 = vld [vmem:[#allocation2 + $0x8c] ss:$8 sps:$4 sm:$0xff]  }
 0x10e   : > { %1311 = vmatmul.mubr.bf16.gmra.mrb[40].mxu1 %v8239_v56  ;;  %v7153_v56 = vld [vmem:[%s10197_s1 + $0x268] sm:$0xff]  }
 0x10f   : > { %3910 = vmatmul.mubr.bf16.gmra.mrb[12].mxu0 %v3598_v20  ;;  %6216 = vmatprep.mubr.msk.bf16.mxu1 %vm808_vm5, %v8250_v58  ;;  %v3633_v58 = vor.u32 %v10266_v3, %v3621_v60  ;;  %v3637_v20 = vrot.slane %v10265_v62, 1  ;;  %v1401_v23 = vrot.slane %v1399_v18, 3  ;;  %v7155_v60 = vld [vmem:[%s10197_s1 + $0x270] sm:$0xff]  }
 0x110   : > { %6430 = vmatprep.mubr.msk.bf16.mxu0 %vm808_vm5, %v3622_v32  ;;  %4216 = vmatpush1.bf16.msra.mxu0 %v7148_v52  ;;  %v10267_v32 = vshll.u32 %v8531_v7, 16  ;;  %v1404_v52 = vrot.slane %v1402_v63, 4  ;;  %v10362_v63 = vshrl.u32 %v8508_v16, 16 }
 0x111   : > { %4217 = vmatprep.subr.bf16.mxu0 %v10331_v61  ;;  %v3638_v62 = vsel %vm2905_vm7, %v3633_v58, %v3637_v20  ;;  %v10364_v58 = vld [vmem:[#allocation26_spill] sm:$0xff] }
 0x112   : > { %v3625_v18 = vor.u32 %v10362_v63, %v3613_v14  ;;  %v3629_v2 = vrot.slane %v10267_v32, 1  ;;  %v1405_v12 = vor.u32 %v1404_v52, %v1401_v23  ;;  %v1387_v3 = vshrl.u32 %v10364_v58, 16  ;;  %v7159_v14 = vld [vmem:[%s10197_s1 + $0x278] sm:$0xff]   ;;  %v10367_v52 = vld [vmem:[#allocation6_spill] sm:$0xff]  ;;  %v10368_v32 = vld [vmem:[#allocation7_spill] sm:$0xff] }
 0x113   : > { %v1390_v36 = vshll.u32 %v10364_v58, 16  ;;  %v10366_v23 = vshll.u32 %v8549_v54, 16  ;;  %v1394_v63 = vrot.slane %v10367_v52, 3  ;;  %v1395_v16 = vrot.slane %v10368_v32, 4 }
 0x114   : > { %4218 = vmatpush1.bf16.msra.mxu0 %v7153_v56  ;;  %v1408_v56 = vor.u32 %v1407_v13, %v1406_v17  ;;  %v8584_v13 = vld [vmem:[#allocation2 + $0x9c] ss:$8 sps:$4 sm:$0xff]   ;;  %v3641_v57 = vor.u32 %v10279_v59, %v3629_v2 }
 0x115   : > { %4219 = vmatprep.subr.bf16.mxu0 %v10331_v61  ;;  %v3653_v17 = vrot.slane %v10366_v23, 1  ;;  %v1392_v58 = vrot.slane %v1390_v36, 4  ;;  %v10276_v52 = vshll.u32 %v8584_v13, 16  ;;  %v1396_v32 = vor.u32 %v1395_v16, %v1394_v63  ;;  %v10372_v16 = vld [vmem:[#allocation10_spill] sm:$0xff] }
 0x116   : > { %1319 = vmatmul.mubr.bf16.gmra.mrb[44].mxu1 %v8256_v15  ;;  %v8575_v15 = vld [vmem:[#allocation2 + $0x88] ss:$8 sps:$4 sm:$0xff]   ;;  %v1410_v63 = vrot.slane %v10372_v16, 3 }
 0x117   : > { %3918 = vmatmul.mubr.bf16.gmra.mrb[16].mxu0 %v3614_v28  ;;  %6217 = vmatprep.mubr.msk.bf16.mxu1 %vm808_vm5, %v10363_v9  ;;  %v3649_v28 = vor.u32 %v10365_v35, %v3637_v20  ;;  %v1389_v9 = vrot.slane %v1387_v3, 3  ;;  %v10277_v20 = vshll.u32 %v8575_v15, 16  ;;  %v10369_v35 = vld [vmem:[#allocation8_spill] sm:$0xff]  ;;  %v10371_v3 = vrot.slane %v8202_v51, 3 }
 0x118   : > { %6431 = vmatprep.mubr.msk.bf16.mxu0 %vm808_vm5, %v3638_v62  ;;  %4220 = vmatpush1.bf16.msra.mxu0 %v7155_v60  ;;  %v3630_v62 = vsel %vm2905_vm7, %v3625_v18, %v3629_v2  ;;  %v1409_v60 = vsel %vm1385_vm9, %v1405_v12, %v1408_v56  ;;  %v1414_v23 = vrot.slane %v10369_v35, 3  ;;  %v10278_v18 = vshrl.u32 %v8549_v54, 16  ;;  %v8602_v12 = vld [vmem:[#allocation2 + $0x98] ss:$8 sps:$4 sm:$0xff]  }
 0x119   : > { %4221 = vmatprep.subr.bf16.mxu0 %v10331_v61  ;;  %v3654_v33 = vsel %vm2905_vm7, %v3649_v28, %v3653_v17  ;;  %v1393_v36 = vor.u32 %v1392_v58, %v1389_v9  ;;  %v10287_v2 = vshrl.u32 %v8575_v15, 16  ;;  %v10281_v35 = vshll.u32 %v8602_v12, 16 }
 0x11a   : > { %v1416_v28 = vor.u32 %v1415_v29, %v1414_v23  ;;  %v3665_v51 = vor.u32 %v10278_v18, %v3653_v17  ;;  %v7141_v17 = vld [vmem:[%s10197_s1 + $0xf0] sm:$0xff]  }
 0x11b   : > { %v1397_v9 = vsel %vm1385_vm9, %v1393_v36, %v1396_v32  ;;  %v3661_v59 = vrot.slane %v10281_v35, 1  ;;  %v10377_v35 = vld [vmem:[#allocation15_spill] sm:$0xff] }
 0x11c   : > { %4222 = vmatpush1.bf16.msra.mxu0 %v7159_v14  ;;  %v3645_v14 = vrot.slane %v10277_v20, 1  ;;  %v1417_v23 = vsel %vm1385_vm9, %v1408_v56, %v1416_v28  ;;  %v10375_v20 = vld [vmem:[#allocation13_spill] sm:$0xff] }
 0x11d   : > { %4625 = vmatprep.subr.bf16.mxu0 %v10331_v61  ;;  %v1423_v16 = vrot.slane %v10375_v20, 4 }
 0x11e   : > { %1327 = vmatmul.mubr.bf16.gmra.mrb[48].mxu1 %v10371_v3  ;;  %v3646_v29 = vsel %vm2905_vm7, %v3641_v57, %v3645_v14  ;;  %v10374_v3 = vld [vmem:[#allocation12_spill] sm:$0xff]  ;;  %v3657_v56 = vor.u32 %v10287_v2, %v3645_v14  ;;  %v8646_v14 = vld [vmem:[#allocation2 + $0xbc] ss:$8 sps:$4 sm:$0xff]   ;;  %v8708_v2 = vcombine.low %v8320_v47, %v8342_v42 }
 0x11f   : > { %3926 = vmatmul.mubr.bf16.gmra.mrb[20].mxu0 %v3630_v62  ;;  %6230 = vmatprep.mubr.msk.bf16.mxu1 %vm808_vm5, %v1409_v60  ;;  %v3669_v62 = vrot.slane %v10276_v52, 1  ;;  %v8613_v60 = vld [vmem:[#allocation2 + $0xac] ss:$8 sps:$4 sm:$0xff]   ;;  %v1422_v52 = vrot.slane %v10374_v3, 3 }
 0x120   : > { %6432 = vmatprep.mubr.msk.bf16.mxu0 %vm808_vm5, %v3654_v33  ;;  %v10373_v33 = vld [vmem:[#allocation11_spill] sm:$0xff]  ;;  %v10280_v18 = vshll.u32 %v8613_v60, 16  ;;  %v3662_v3 = vsel %vm2905_vm7, %v3657_v56, %v3661_v59  ;;  %v10284_v56 = vshll.u32 %v8646_v14, 16 }
 0x121   : > { %v1411_v58 = vrot.slane %v10373_v33, 4  ;;  %v3670_v36 = vsel %vm2905_vm7, %v3665_v51, %v3669_v62  ;;  %v10282_v33 = vshrl.u32 %v8584_v13, 16  ;;  %v1424_v20 = vor.u32 %v1423_v16, %v1422_v52  ;;  %v8636_v51 = vld [vmem:[#allocation2 + $0xa8] ss:$8 sps:$4 sm:$0xff]  }
 0x122   : > { %v10286_v16 = vshrl.u32 %v8602_v12, 16 }
 0x123   : > { %v1412_v57 = vor.u32 %v1411_v58, %v1410_v63  ;;  %v3685_v63 = vrot.slane %v10280_v18, 1  ;;  %v1418_v58 = vrot.slane %v7755_v24, 3  ;;  %v1430_v18 = vrot.slane %v7778_v41, 3  ;;  %v7154_v24 = vld [vmem:[%s10197_s1 + $0x100] sm:$0xff]  }
 0x124   : > { %v8665_v41 = vld [vmem:[#allocation2 + $0xb8] ss:$8 sps:$4 sm:$0xff]  }
 0x126   : > { %1653 = vmatmul.mubr.bf16.vlgmr.msra.gmra.mrb[0].mxu1 %v1397_v9  ;;  %v7149_v9 = vld [vmem:[%s10197_s1 + $0xf8] sm:$0xff]  }
 0x127   : > { %3934 = vmatmul.mubr.bf16.gmra.mrb[24].mxu0 %v3646_v29  ;;  %6231 = vmatprep.mubr.msk.bf16.mxu1 %vm808_vm5, %v1417_v23  ;;  %v3681_v29 = vor.u32 %v10282_v33, %v3669_v62  ;;  %v10376_v23 = vld [vmem:[#allocation14_spill] sm:$0xff]  ;;  %v10283_v62 = vshll.u32 %v8636_v51, 16  ;;  %v1431_v33 = vrot.slane %v10377_v35, 4  ;;  %v3673_v35 = vor.u32 %v10286_v16, %v3661_v59 }
 0x128   : > { %2276 = vmatpush1.bf16.msra.mxu1 %v7141_v17  ;;  %6433 = vmatprep.mubr.msk.bf16.mxu0 %vm808_vm5, %v3670_v36  ;;  %v1419_v52 = vrot.slane %v10376_v23, 4  ;;  %v1413_v17 = vsel %vm1385_vm9, %v1396_v32, %v1412_v57  ;;  %v1425_v36 = vsel %vm1385_vm9, %v1416_v28, %v1424_v20  ;;  %v10285_v32 = vshrl.u32 %v8613_v60, 16 }
 0x129   : > { %2277 = vmatprep.subr.bf16.mxu1 %v10331_v61  ;;  %v3686_v23 = vsel %vm2905_vm7, %v3681_v29, %v3685_v63  ;;  %v1432_v29 = vor.u32 %v1431_v33, %v1430_v18  ;;  %v1426_v18 = vrot.slane %v7816_v1, 3  ;;  %v10378_v33 = vld [vmem:[#allocation16_spill] sm:$0xff] }
 0x12a   : > { %v1420_v28 = vor.u32 %v1419_v52, %v1418_v58  ;;  %v3697_v58 = vor.u32 %v10285_v32, %v3685_v63  ;;  %v3701_v52 = vrot.slane %v10284_v56, 1  ;;  %v1438_v63 = vrot.slane %v7826_v11, 3  ;;  %v3409_v11 = vld [vmem:[#allocation2 + $0xd8] sm:$0xff] }
 0x12b   : > { %v1433_v16 = vsel %vm1385_vm9, %v1424_v20, %v1432_v29 }
 0x12c   : > { %2278 = vmatpush1.bf16.msra.mxu1 %v7149_v9  ;;  %v3677_v9 = vrot.slane %v10283_v62, 1  ;;  %v1421_v59 = vsel %vm1385_vm9, %v1412_v57, %v1420_v28  ;;  %v10379_v62 = vld [vmem:[#allocation17_spill] sm:$0xff]  ;;  %v7160_v57 = vld [vmem:[%s10197_s1 + $0x110] sm:$0xff]   ;;  %v3702_v1 = vsel %vm2905_vm7, %v3697_v58, %v3701_v52 }
 0x12d   : > { %2279 = vmatprep.subr.bf16.mxu1 %v10331_v61  ;;  %v1439_v56 = vrot.slane %v10379_v62, 4  ;;  %v3410_v62 = vld [vmem:[#allocation2 + $0xe0] sm:$0x11] }
 0x12e   : > { %1661 = vmatmul.mubr.bf16.gmra.mrb[4].mxu1 %v1413_v17  ;;  %v7156_v17 = vld [vmem:[%s10197_s1 + $0x108] sm:$0xff]   ;;  %v3678_v32 = vsel %vm2905_vm7, %v3673_v35, %v3677_v9 }
 0x12f   : > { %3942 = vmatmul.mubr.bf16.gmra.mrb[28].mxu0 %v3662_v3  ;;  %6232 = vmatprep.mubr.msk.bf16.mxu1 %vm808_vm5, %v1425_v36  ;;  %v8681_v3 = vcombine.high %v8320_v47, %v8342_v42  ;;  %v1427_v36 = vrot.slane %v10378_v33, 4  ;;  %v3711_v33 = vshrl.u32 %v8646_v14, 16  ;;  %v1440_v58 = vor.u32 %v1439_v56, %v1438_v63 }
 0x130   : > { %6434 = vmatprep.mubr.msk.bf16.mxu0 %vm808_vm5, %v3686_v23  ;;  %2280 = vmatpush1.bf16.msra.mxu1 %v7154_v24  ;;  %v3687_v24 = vshrl.u32 %v8636_v51, 16  ;;  %v3691_v23 = vshll.u32 %v8665_v41, 16  ;;  %v1434_v56 = vrot.slane %v7862_v39, 3  ;;  %v1435_v47 = vrot.slane %v7865_v40, 4  ;;  %v7164_v39 = vld [vmem:[%s10197_s1 + $0x120] sm:$0xff]  }
 0x131   : > { %2281 = vmatprep.subr.bf16.mxu1 %v10331_v61  ;;  %v1428_v20 = vor.u32 %v1427_v36, %v1426_v18  ;;  %v8717_v18 = vcombine.high %v3409_v11, %v3410_v62  ;;  %v1441_v63 = vsel %vm1385_vm9, %v1432_v29, %v1440_v58 }
 0x132   : > { %v3689_v35 = vor.u32 %v3687_v24, %v3677_v9  ;;  %v10380_v9 = vshll.u32 %v8681_v3, 16  ;;  %v1436_v29 = vor.u32 %v1435_v47, %v1434_v56 }
 0x133   : > { %v1429_v42 = vsel %vm1385_vm9, %v1420_v28, %v1428_v20  ;;  %v10290_v28 = vshrl.u32 %v8681_v3, 16 }
 0x134   : > { %2282 = vmatpush1.bf16.msra.mxu1 %v7156_v17  ;;  %v3693_v17 = vrot.slane %v3691_v23, 1 }
 0x135   : > { %2283 = vmatprep.subr.bf16.mxu1 %v10331_v61 }
 0x136   : > { %1669 = vmatmul.mubr.bf16.gmra.mrb[8].mxu1 %v1421_v59  ;;  %v3717_v59 = vrot.slane %v10380_v9, 1  ;;  %v3694_v36 = vsel %vm2905_vm7, %v3689_v35, %v3693_v17  ;;  %v1447_v9 = vrot.slane %v7876_v50, 4  ;;  %v3731_v35 = vshll.u32 %v8717_v18, 16 }
 0x137   : > { %3950 = vmatmul.mubr.bf16.gmra.mrb[32].mxu0 %v3678_v32  ;;  %6233 = vmatprep.mubr.msk.bf16.mxu1 %vm808_vm5, %v1433_v16  ;;  %v7162_v32 = vld [vmem:[%s10197_s1 + $0x118] sm:$0xff]   ;;  %v3713_v16 = vor.u32 %v3711_v33, %v3701_v52  ;;  %v10288_v52 = vshll.u32 %v8708_v2, 16 }
 0x138   : > { %6435 = vmatprep.mubr.msk.bf16.mxu0 %vm808_vm5, %v3702_v1  ;;  %2284 = vmatpush1.bf16.msra.mxu1 %v7160_v57  ;;  %v3703_v57 = vshrl.u32 %v8665_v41, 16  ;;  %v1446_v1 = vrot.slane %v7873_v45, 3  ;;  %v8737_v45 = vcombine.low %v3409_v11, %v3410_v62  ;;  %v3729_v56 = vor.u32 %v10290_v28, %v3717_v59 }
 0x139   : > { %2285 = vmatprep.subr.bf16.mxu1 %v10331_v61  ;;  %v3718_v40 = vsel %vm2905_vm7, %v3713_v16, %v3717_v59  ;;  %v3733_v47 = vrot.slane %v3731_v35, 1  ;;  %v1437_v11 = vsel %vm1385_vm9, %v1428_v20, %v1436_v29  ;;  %v1442_v62 = vrot.slane %v7906_v10, 3  ;;  %v7168_v20 = vld [vmem:[%s10197_s1 + $0x130] sm:$0xff]   ;;  %v7170_v35 = vld [vmem:[%s10197_s1 + $0x138] sm:$0xff]  }
 0x13a   : > { %v3705_v50 = vor.u32 %v3703_v57, %v3693_v17  ;;  %v1448_v16 = vor.u32 %v1447_v9, %v1446_v1  ;;  %v1443_v17 = vrot.slane %v7909_v19, 4  ;;  %v1455_v59 = vrot.slane %v7927_v34, 4 }
 0x13b   : > { %v3734_v10 = vsel %vm2905_vm7, %v3729_v56, %v3733_v47 }
 0x13c   : > { %2286 = vmatpush1.bf16.msra.mxu1 %v7162_v32  ;;  %v3709_v32 = vrot.slane %v10288_v52, 1  ;;  %v1449_v9 = vsel %vm1385_vm9, %v1440_v58, %v1448_v16  ;;  %v1444_v19 = vor.u32 %v1443_v17, %v1442_v62 }
 0x13d   : > { %2287 = vmatprep.subr.bf16.mxu1 %v10331_v61 }
 0x13e   : > { %1677 = vmatmul.mubr.bf16.gmra.mrb[12].mxu1 %v1429_v42  ;;  %v7166_v42 = vld [vmem:[%s10197_s1 + $0x128] sm:$0xff]   ;;  %v3710_v1 = vsel %vm2905_vm7, %v3705_v50, %v3709_v32  ;;  %v4014_v50 = vld [vmem:[#allocation2 + $0x18] sm:$0xee] }
 0x13f   : > { %3958 = vmatmul.mubr.bf16.gmra.mrb[36].mxu0 %v3694_v36  ;;  %6234 = vmatprep.mubr.msk.bf16.mxu1 %vm808_vm5, %v1441_v63  ;;  %v10289_v36 = vshrl.u32 %v8708_v2, 16  ;;  %v3723_v63 = vshll.u32 %v8737_v45, 16 }
 0x140   : > { %6436 = vmatprep.mubr.msk.bf16.mxu0 %vm808_vm5, %v3718_v40  ;;  %2288 = vmatpush1.bf16.msra.mxu1 %v7164_v39  ;;  %v1454_v39 = vrot.slane %v7924_v31, 3  ;;  %v3738_v40 = vshrl.u32 %v8717_v18, 16 }
 0x141   : > { %2289 = vmatprep.subr.bf16.mxu1 %v10331_v61  ;;  %v3721_v58 = vor.u32 %v10289_v36, %v3709_v32  ;;  %v3725_v31 = vrot.slane %v3723_v63, 1  ;;  %v1450_v32 = vrot.slane %v10336_v44, 3  ;;  %v1462_v63 = vrot.slane %v10338_v53, 3  ;;  %v4995_v36 = vld [vmem:[#allocation3 + $0x48] sm:$0xff] }
 0x142   : > { %v1456_v34 = vor.u32 %v1455_v59, %v1454_v39  ;;  %v3740_v17 = vor.u32 %v3738_v40, %v3733_v47  ;;  %v1458_v39 = vrot.slane %v10339_v43, 3  ;;  %v1459_v59 = vrot.slane %v10337_v25, 4 }
 0x143   : > { %v3726_v56 = vsel %vm2905_vm7, %v3721_v58, %v3725_v31  ;;  %v1470_v58 = vrot.slane %v10340_v26, 3  ;;  %v1471_v40 = vrot.slane %v8007_v30, 4  ;;  %v4042_v43 = vrot.slane %v8401_v8, 1 }
 0x144   : > { %2290 = vmatpush1.bf16.msra.mxu1 %v7166_v42  ;;  %v1445_v42 = vsel %vm1385_vm9, %v1436_v29, %v1444_v19  ;;  %v1457_v62 = vsel %vm1385_vm9, %v1448_v16, %v1456_v34  ;;  %v1466_v30 = vrot.slane %v8052_v6, 3 }
 0x145   : > { %2291 = vmatprep.subr.bf16.mxu1 %v10331_v61 }
 0x146   : > { %1685 = vmatmul.mubr.bf16.gmra.mrb[16].mxu1 %v1437_v11  ;;  %v1451_v11 = vrot.slane %v7958_v38, 4  ;;  %v3735_v38 = vshrl.u32 %v8737_v45, 16 }
 0x147   : > { %3966 = vmatmul.mubr.bf16.gmra.mrb[40].mxu0 %v3710_v1  ;;  %6235 = vmatprep.mubr.msk.bf16.mxu1 %vm808_vm5, %v1449_v9  ;;  %v1463_v1 = vrot.slane %v7974_v27, 4  ;;  %v8781_v9 = vcombine.high %v4014_v50, %v8373_v49  ;;  %v4045_v27 = vrot.slane %v8389_v0, 1 }
 0x148   : > { %6437 = vmatprep.mubr.msk.bf16.mxu0 %vm808_vm5, %v3734_v10  ;;  %2292 = vmatpush1.bf16.msra.mxu1 %v7168_v20  ;;  %v1452_v44 = vor.u32 %v1451_v11, %v1450_v32  ;;  %v3737_v47 = vor.u32 %v3735_v38, %v3725_v31  ;;  %v8794_v10 = vcombine.low %v4014_v50, %v8373_v49  ;;  %v4049_v49 = vrot.slane %v8405_v37, 1 }
 0x149   : > { %2293 = vmatprep.subr.bf16.mxu1 %v10331_v61  ;;  %v1464_v29 = vor.u32 %v1463_v1, %v1462_v63  ;;  %v4044_v53 = vrot.slane %v8781_v9, 1  ;;  %v1472_v31 = vor.u32 %v1471_v40, %v1470_v58  ;;  %v1478_v32 = vrot.slane %v8068_v55, 3 }
 0x14a   : > { %v1453_v16 = vsel %vm1385_vm9, %v1444_v19, %v1452_v44  ;;  %v1460_v19 = vor.u32 %v1459_v59, %v1458_v39  ;;  %v4041_v25 = vrot.slane %v8794_v10, 1  ;;  %v1479_v11 = vrot.slane %v8071_v5, 4  ;;  %v8823_v5 = vld [vmem:[#allocation2 + $0xc8] sm:$0xff]  ;;  %v10382_v39 = vld [vmem:[#allocation34_spill] sm:$0xff] }
 0x14b   : > { %v1465_v20 = vsel %vm1385_vm9, %v1456_v34, %v1464_v29  ;;  %v1467_v34 = vrot.slane %v8060_v4, 4  ;;  %v4047_v4 = vrot.slane %v8420_v46, 1  ;;  %v4053_v55 = vrot.slane %v8426_v21, 1 }
 0x14c   : > { %2294 = vmatpush1.bf16.msra.mxu1 %v7170_v35  ;;  %v4046_v35 = vsel %vm4040_vm10, %v4044_v53, %v4045_v27  ;;  %v1461_v26 = vsel %vm1385_vm9, %v1452_v44, %v1460_v19  ;;  %v4043_v50 = vsel %vm4040_vm10, %v4041_v25, %v4042_v43  ;;  %v1480_v63 = vor.u32 %v1479_v11, %v1478_v32 }
 0x14d   : > { %6567 = vmatprep.subr.bf16.mxu1 %v10331_v61  ;;  %v1468_v6 = vor.u32 %v1467_v34, %v1466_v30  ;;  %v4048_v44 = vsel %vm4040_vm10, %v4042_v43, %v4047_v4  ;;  %v1474_v38 = vrot.slane %v8109_v48, 3  ;;  %v1487_v59 = vrot.slane %v10382_v39, 4  ;;  %v10385_v34 = vld [vmem:[#allocation37_spill] sm:$0xff] }
 0x14e   : > { %1693 = vmatmul.mubr.bf16.gmra.mrb[20].mxu1 %v1445_v42  ;;  %v7161_v42 = vld [vmem:[%s10197_s1 + $0x280] sm:$0xff]   ;;  %v1481_v53 = vsel %vm1385_vm9, %v1472_v31, %v1480_v63  ;;  %v4054_v40 = vsel %vm4040_vm10, %v4049_v49, %v4053_v55 }
 0x14f   : > { %3974 = vmatmul.mubr.bf16.gmra.mrb[44].mxu0 %v3726_v56  ;;  %6236 = vmatprep.mubr.msk.bf16.mxu1 %vm808_vm5, %v1457_v62  ;;  %v1473_v56 = vsel %vm1385_vm9, %v1464_v29, %v1472_v31  ;;  %v4050_v62 = vsel %vm4040_vm10, %v4045_v27, %v4049_v49  ;;  %v1469_v1 = vsel %vm1385_vm9, %v1460_v19, %v1468_v6  ;;  %v1475_v29 = vrot.slane %v8115_v22, 4  ;;  %v7165_v27 = vld [vmem:[%s10197_s1 + $0x290] sm:$0xff]   ;;  %v7167_v31 = vld [vmem:[%s10197_s1 + $0x298] sm:$0xff]  }
 0x150   : > { %6438 = vmatprep.mubr.msk.bf16.mxu0 %vm808_vm5, %v3740_v17  ;;  %v7163_v17 = vld [vmem:[%s10197_s1 + $0x288] sm:$0xff]   ;;  %v10383_v22 = vld [vmem:[#allocation20_spill] sm:$0xff] }
 0x151   : > { %v1476_v48 = vor.u32 %v1475_v29, %v1474_v38  ;;  %v10384_v49 = vld [vmem:[#allocation24_spill] sm:$0xff] }
 0x153   : > { %v1477_v30 = vsel %vm1385_vm9, %v1468_v6, %v1476_v48 }
 0x156   : > { %1701 = vmatmul.mubr.bf16.gmra.mrb[24].mxu1 %v1453_v16  ;;  %v10381_v16 = vld [vmem:[#allocation33_spill] sm:$0xff] }
 0x157   : > { %3982 = vmatmul.mubr.bf16.gmra.mrb[48].mxu0 %v3737_v47  ;;  %6237 = vmatprep.mubr.msk.bf16.mxu1 %vm808_vm5, %v1465_v20  ;;  %v1486_v47 = vrot.slane %v10381_v16, 3  ;;  %v7400_v20 = vld [vmem:[#allocation2 + $0xc0] sm:$0xff]  ;;  %v1781_v16 = vld [vmem:[#allocation2 + $0x8] sm:$0x88] }
 0x158   : > { %6451 = vmatprep.mubr.msk.bf16.mxu0 %vm808_vm5, %v4046_v35  ;;  %v6219_v58 = vcombine.high %v7400_v20, %v8823_v5  ;;  %v4051_v35 = vrot.slane %v10383_v22, 1  ;;  %v6218_v32 = vcombine.low %v7400_v20, %v8823_v5 }
 0x159   : > { %v1488_v19 = vor.u32 %v1487_v59, %v1486_v47  ;;  %v10388_v47 = vld [vmem:[#allocation22_spill] sm:$0xff] }
 0x15a   : > { %v1500_v25 = vshrl.u32 %v6219_v58, 16  ;;  %v1503_v43 = vshll.u32 %v6219_v58, 16  ;;  %v4052_v11 = vsel %vm4040_vm10, %v4047_v4, %v4051_v35  ;;  %v1491_v29 = vshrl.u32 %v6218_v32, 16 }
 0x15b   : > { %v1494_v4 = vshll.u32 %v6218_v32, 16  ;;  %v4061_v39 = vrot.slane %v10388_v47, 1 }
 0x15c   : > { %v1493_v20 = vrot.slane %v1491_v29, 3 }
 0x15d   : > { %v1496_v58 = vrot.slane %v1494_v4, 4 }
 0x15e   : > { %1709 = vmatmul.mubr.bf16.gmra.mrb[28].mxu1 %v1461_v26  ;;  %v4057_v26 = vrot.slane %v10384_v49, 1 }
 0x15f   : > { %4236 = vmatmul.mubr.bf16.vlgmr.msra.gmra.mrb[0].mxu0 %v4043_v50  ;;  %6238 = vmatprep.mubr.msk.bf16.mxu1 %vm808_vm5, %v1473_v56  ;;  %v1482_v50 = vrot.slane %v10385_v34, 3  ;;  %v7403_v34 = vld [vmem:[#allocation2 + $0x20] sm:$0xff] }
 0x160   : > { %4626 = vmatpush1.bf16.msra.mxu0 %v7161_v42  ;;  %6452 = vmatprep.mubr.msk.bf16.mxu0 %vm808_vm5, %v4050_v62  ;;  %v10386_v42 = vld [vmem:[#allocation38_spill] sm:$0xff]  ;;  %v1489_v62 = vsel %vm1385_vm9, %v1480_v63, %v1488_v19  ;;  %v4058_v38 = vsel %vm4040_vm10, %v4053_v55, %v4057_v26  ;;  %v10387_v63 = vld [vmem:[#allocation21_spill] sm:$0xff]  ;;  %v7171_v55 = vld [vmem:[%s10197_s1 + $0x2a8] sm:$0xff]  }
 0x161   : > { %4627 = vmatprep.subr.bf16.mxu0 %v10331_v61  ;;  %v1483_v56 = vrot.slane %v10386_v42, 4  ;;  %v7172_v42 = vld [vmem:[%s10197_s1 + $0x2b0] sm:$0xff]  }
 0x163   : > { %v1484_v6 = vor.u32 %v1483_v56, %v1482_v50  ;;  %v4062_v56 = vsel %vm4040_vm10, %v4057_v26, %v4061_v39  ;;  %v7173_v26 = vld [vmem:[%s10197_s1 + $0x2b8] sm:$0xff]  }
 0x164   : > { %4628 = vmatpush1.bf16.msra.mxu0 %v7163_v17  ;;  %v1502_v17 = vrot.slane %v1500_v25, 3 }
 0x165   : > { %4629 = vmatprep.subr.bf16.mxu0 %v10331_v61  ;;  %v1485_v59 = vsel %vm1385_vm9, %v1476_v48, %v1484_v6  ;;  %v1497_v48 = vor.u32 %v1496_v58, %v1493_v20 }
 0x166   : > { %1717 = vmatmul.mubr.bf16.gmra.mrb[32].mxu1 %v1469_v1  ;;  %v1505_v1 = vrot.slane %v1503_v43, 4 }
 0x167   : > { %4244 = vmatmul.mubr.bf16.gmra.mrb[4].mxu0 %v4048_v44  ;;  %6239 = vmatprep.mubr.msk.bf16.mxu1 %vm808_vm5, %v1481_v53  ;;  %v7169_v44 = vld [vmem:[%s10197_s1 + $0x2a0] sm:$0xff]   ;;  %v4055_v53 = vrot.slane %v10387_v63, 1  ;;  %v1498_v29 = vsel %vm1385_vm9, %v1484_v6, %v1497_v48 }
 0x168   : > { %6453 = vmatprep.mubr.msk.bf16.mxu0 %vm808_vm5, %v4054_v40  ;;  %4630 = vmatpush1.bf16.msra.mxu0 %v7165_v27  ;;  %v1506_v27 = vor.u32 %v1505_v1, %v1502_v17  ;;  %v7401_v40 = vld [vmem:[#allocation2 + $0x10] sm:$0xff]  ;;  %v10390_v1 = vld [vmem:[#allocation29_spill] sm:$0xff] }
 0x169   : > { %4631 = vmatprep.subr.bf16.mxu0 %v10331_v61  ;;  %v6244_v25 = vcombine.high %v1781_v16, %v7401_v40  ;;  %v4056_v43 = vsel %vm4040_vm10, %v4051_v35, %v4055_v53  ;;  %v10389_v35 = vld [vmem:[#allocation25_spill] sm:$0xff] }
 0x16a   : > { %v4059_v32 = vrot.slane %v10389_v35, 1 }
 0x16c   : > { %4632 = vmatpush1.bf16.msra.mxu0 %v7167_v31  ;;  %v1507_v31 = vsel %vm1385_vm9, %v1488_v19, %v1506_v27  ;;  %v1949_v19 = vshrl.u32 %v6244_v25, 16  ;;  %v4060_v4 = vsel %vm4040_vm10, %v4055_v53, %v4059_v32 }
 0x16d   : > { %4633 = vmatprep.subr.bf16.mxu0 %v10331_v61 }
 0x16e   : > { %1725 = vmatmul.mubr.bf16.gmra.mrb[36].mxu1 %v1477_v30  ;;  %v7402_v30 = vld [vmem:[#allocation2 + $0x18] sm:$0xff] }
 0x16f   : > { %4252 = vmatmul.mubr.bf16.gmra.mrb[8].mxu0 %v4052_v11  ;;  %6240 = vmatprep.mubr.msk.bf16.mxu1 %vm808_vm5, %v1489_v62  ;;  %v6246_v50 = vcombine.high %v7402_v30, %v7403_v34  ;;  %v1952_v11 = vshll.u32 %v6244_v25, 16 }
 0x170   : > { %6454 = vmatprep.mubr.msk.bf16.mxu0 %vm808_vm5, %v4058_v38  ;;  %4634 = vmatpush1.bf16.msra.mxu0 %v7169_v44  ;;  %v4065_v44 = vrot.slane %v10390_v1, 1  ;;  %v6243_v38 = vcombine.low %v1781_v16, %v7401_v40  ;;  %v4063_v16 = vrot.slane %v8531_v7, 1 }
 0x171   : > { %4635 = vmatprep.subr.bf16.mxu0 %v10331_v61  ;;  %v1957_v62 = vshrl.u32 %v6246_v50, 16  ;;  %v1960_v17 = vshll.u32 %v6246_v50, 16  ;;  %v1954_v20 = vrot.slane %v1952_v11, 4 }
 0x172   : > { %v1932_v6 = vshrl.u32 %v6243_v38, 16  ;;  %v1935_v53 = vshll.u32 %v6243_v38, 16  ;;  %v4064_v38 = vsel %vm4040_vm10, %v4059_v32, %v4063_v16  ;;  %v4067_v32 = vrot.slane %v8575_v15, 1 }
 0x173   : > { %v1959_v58 = vrot.slane %v1957_v62, 3  ;;  %v1962_v25 = vrot.slane %v1960_v17, 4  ;;  %v4069_v17 = vrot.slane %v8549_v54, 1 }
 0x174   : > { %4636 = vmatpush1.bf16.msra.mxu0 %v7171_v55  ;;  %v1951_v55 = vrot.slane %v1949_v19, 3 }
 0x175   : > { %4637 = vmatprep.subr.bf16.mxu0 %v10331_v61  ;;  %v1963_v19 = vor.u32 %v1962_v25, %v1959_v58  ;;  %v7406_v25 = vld [vmem:[#allocation2 + $0x38] sm:$0xff] }
 0x176   : > { %1733 = vmatmul.mubr.bf16.gmra.mrb[40].mxu1 %v1485_v59  ;;  %v6245_v59 = vcombine.low %v7402_v30, %v7403_v34  ;;  %v1955_v34 = vor.u32 %v1954_v20, %v1951_v55 }
 0x177   : > { %4260 = vmatmul.mubr.bf16.gmra.mrb[12].mxu0 %v4056_v43  ;;  %6241 = vmatprep.mubr.msk.bf16.mxu1 %vm808_vm5, %v1507_v31  ;;  %v7404_v43 = vld [vmem:[#allocation2 + $0x28] sm:$0xff]  ;;  %v7405_v31 = vld [vmem:[#allocation2 + $0x30] sm:$0xff] }
 0x178   : > { %6455 = vmatprep.mubr.msk.bf16.mxu0 %vm808_vm5, %v4062_v56  ;;  %4638 = vmatpush1.bf16.msra.mxu0 %v7172_v42  ;;  %v6248_v50 = vcombine.high %v7404_v43, %v7405_v31  ;;  %v7174_v42 = vld [vmem:[%s10197_s1 + $0x2c0] sm:$0xff]   ;;  %v4066_v56 = vsel %vm4040_vm10, %v4061_v39, %v4065_v44  ;;  %v1940_v40 = vshrl.u32 %v6245_v59, 16  ;;  %v1943_v30 = vshll.u32 %v6245_v59, 16  ;;  %v7175_v39 = vld [vmem:[%s10197_s1 + $0x2c8] sm:$0xff]  }
 0x179   : > { %4639 = vmatprep.subr.bf16.mxu0 %v10331_v61  ;;  %v6247_v59 = vcombine.low %v7404_v43, %v7405_v31  ;;  %v1964_v55 = vsel %vm1385_vm9, %v1955_v34, %v1963_v19  ;;  %v4073_v34 = vrot.slane %v8584_v13, 1 }
 0x17a   : > { %v1975_v11 = vshrl.u32 %v6248_v50, 16  ;;  %v1978_v62 = vshll.u32 %v6248_v50, 16  ;;  %v7407_v50 = vld [vmem:[#allocation2 + $0x40] sm:$0xff] }
 0x17b   : > { %v1969_v43 = vshll.u32 %v6247_v59, 16 }
 0x17c   : > { %4640 = vmatpush1.bf16.msra.mxu0 %v7173_v26  ;;  %v1937_v26 = vrot.slane %v1935_v53, 4  ;;  %v1977_v20 = vrot.slane %v1975_v11, 3  ;;  %v1980_v58 = vrot.slane %v1978_v62, 4  ;;  %v1966_v53 = vshrl.u32 %v6247_v59, 16 }
 0x17d   : > { %4641 = vmatprep.subr.bf16.mxu0 %v10331_v61  ;;  %v6249_v11 = vcombine.low %v7406_v25, %v7407_v50 }
 0x17e   : > { %1741 = vmatmul.mubr.bf16.gmra.mrb[44].mxu1 %v1498_v29  ;;  %v1942_v29 = vrot.slane %v1940_v40, 3  ;;  %v1981_v31 = vor.u32 %v1980_v58, %v1977_v20  ;;  %v1968_v62 = vrot.slane %v1966_v53, 3 }
 0x17f   : > { %4268 = vmatmul.mubr.bf16.gmra.mrb[16].mxu0 %v4060_v4  ;;  %6242 = vmatprep.mubr.msk.bf16.mxu1 %vm808_vm5, %v1506_v27  ;;  %v1934_v27 = vrot.slane %v1932_v6, 3  ;;  %v1945_v4 = vrot.slane %v1943_v30, 4  ;;  %v1984_v20 = vshrl.u32 %v6249_v11, 16  ;;  %v1987_v58 = vshll.u32 %v6249_v11, 16 }
 0x180   : > { %6456 = vmatprep.mubr.msk.bf16.mxu0 %vm808_vm5, %v4066_v56  ;;  %4642 = vmatpush1.bf16.msra.mxu0 %v7174_v42  ;;  %v6250_v42 = vcombine.high %v7406_v25, %v7407_v50  ;;  %v4070_v56 = vsel %vm4040_vm10, %v4065_v44, %v4069_v17 }
 0x181   : > { %4643 = vmatprep.subr.bf16.mxu0 %v10331_v61  ;;  %v1938_v52 = vor.u32 %v1937_v26, %v1934_v27  ;;  %v1946_v6 = vor.u32 %v1945_v4, %v1942_v29  ;;  %v1982_v27 = vsel %vm1385_vm9, %v1963_v19, %v1981_v31  ;;  %v7408_v29 = vld [vmem:[#allocation2 + $0x48] sm:$0xff]  ;;  %v7409_v4 = vld [vmem:[#allocation2 + $0x50] sm:$0xff]  ;;  %v7410_v19 = vld [vmem:[%s10197_s1 + $0x140] sm:$0xff]   ;;  %v1989_v53 = vrot.slane %v1987_v58, 4 }
 0x182   : > { %v1993_v40 = vshrl.u32 %v6250_v42, 16  ;;  %v1996_v30 = vshll.u32 %v6250_v42, 16  ;;  %v6252_v59 = vcombine.high %v7408_v29, %v7409_v4 }
 0x183   : > { %v1947_v44 = vsel %vm1385_vm9, %v1938_v52, %v1946_v6 }
 0x184   : > { %4644 = vmatpush1.bf16.msra.mxu0 %v7175_v39  ;;  %v1971_v39 = vrot.slane %v1969_v43, 4  ;;  %v1995_v26 = vrot.slane %v1993_v40, 3  ;;  %v2011_v50 = vshrl.u32 %v6252_v59, 16  ;;  %v2014_v42 = vshll.u32 %v6252_v59, 16  ;;  %v7414_v59 = vld [vmem:[%s10197_s1 + $0x150] sm:$0xff]  }
 0x186   : > { %1749 = vmatmul.mubr.bf16.gmra.mrb[48].mxu1 %v1497_v48  ;;  %v4068_v48 = vsel %vm4040_vm10, %v4063_v16, %v4067_v32  ;;  %v1972_v52 = vor.u32 %v1971_v39, %v1968_v62  ;;  %v4071_v16 = vrot.slane %v8602_v12, 1  ;;  %v2016_v62 = vrot.slane %v2014_v42, 4  ;;  %v7412_v39 = vld [vmem:[#allocation2 + $0x58] sm:$0xff] }
 0x187   : > { %4276 = vmatmul.mubr.bf16.gmra.mrb[20].mxu0 %v4064_v38  ;;  %6279 = vmatprep.mubr.msk.bf16.mxu1 %vm808_vm5, %v1964_v55  ;;  %v1998_v38 = vrot.slane %v1996_v30, 4  ;;  %v4074_v55 = vsel %vm4040_vm10, %v4069_v17, %v4073_v34  ;;  %v4077_v17 = vrot.slane %v8613_v60, 1  ;;  %v6251_v30 = vcombine.low %v7408_v29, %v7409_v4 }
 0x188   : > { %6457 = vmatprep.mubr.msk.bf16.mxu0 %vm808_vm5, %v4070_v56  ;;  %v1986_v56 = vrot.slane %v1984_v20, 3  ;;  %v1973_v43 = vsel %vm1385_vm9, %v1946_v6, %v1972_v52  ;;  %v4072_v40 = vsel %vm4040_vm10, %v4067_v32, %v4071_v16  ;;  %v4075_v32 = vrot.slane %v8636_v51, 1 }
 0x189   : > { %v1999_v25 = vor.u32 %v1998_v38, %v1995_v26  ;;  %v4078_v38 = vsel %vm4040_vm10, %v4073_v34, %v4077_v17  ;;  %v2005_v29 = vshll.u32 %v6251_v30, 16  ;;  %v4081_v20 = vrot.slane %v8646_v14, 1 }
 0x18a   : > { %v1990_v6 = vor.u32 %v1989_v53, %v1986_v56 }
 0x18b   : > { %v2000_v11 = vsel %vm1385_vm9, %v1981_v31, %v1999_v25  ;;  %v2002_v31 = vshrl.u32 %v6251_v30, 16  ;;  %v2007_v42 = vrot.slane %v2005_v29, 4  ;;  %v7415_v30 = vld [vmem:[#allocation2 + $0x68] sm:$0xff]  ;;  %v4085_v29 = vrot.slane %v8681_v3, 1 }
 0x18c   : > { %v1991_v58 = vsel %vm1385_vm9, %v1972_v52, %v1990_v6 }
 0x18e   : > { %2308 = vmatmul.mubr.bf16.vlgmr.msra.gmra.mrb[0].mxu1 %v1947_v44  ;;  %v7411_v44 = vld [vmem:[%s10197_s1 + $0x148] sm:$0xff]  }
 0x18f   : > { %4284 = vmatmul.mubr.bf16.gmra.mrb[24].mxu0 %v4068_v48  ;;  %6280 = vmatprep.mubr.msk.bf16.mxu1 %vm808_vm5, %v1982_v27  ;;  %v2013_v48 = vrot.slane %v2011_v50, 3  ;;  %v7413_v27 = vld [vmem:[#allocation2 + $0x60] sm:$0xff]  ;;  %v2004_v50 = vrot.slane %v2002_v31, 3 }
 0x190   : > { %6577 = vmatpush1.bf16.msra.mxu1 %v7410_v19  ;;  %6458 = vmatprep.mubr.msk.bf16.mxu0 %vm808_vm5, %v4074_v55  ;;  %v6254_v26 = vcombine.high %v7412_v39, %v7413_v27  ;;  %v4076_v19 = vsel %vm4040_vm10, %v4071_v16, %v4075_v32  ;;  %v6253_v56 = vcombine.low %v7412_v39, %v7413_v27  ;;  %v4079_v39 = vrot.slane %v8665_v41, 1  ;;  %v8942_v31 = vld [vmem:[#allocation2 + $0x80] sm:$0xff]  ;;  %v4982_v41 = vld [vmem:[%s10199_s3 + $0xa8] sm:$0xff] }
 0x191   : > { %6568 = vmatprep.subr.bf16.mxu1 %v10331_v61  ;;  %v2017_v4 = vor.u32 %v2016_v62, %v2013_v48  ;;  %v7417_v48 = vld [vmem:[%s10197_s1 + $0x158] sm:$0xff]   ;;  %v4082_v62 = vsel %vm4040_vm10, %v4077_v17, %v4081_v20  ;;  %v2008_v52 = vor.u32 %v2007_v42, %v2004_v50  ;;  %v7418_v17 = vld [vmem:[%s10197_s1 + $0x160] sm:$0xff]  }
 0x192   : > { %v2029_v34 = vshrl.u32 %v6254_v26, 16  ;;  %v2032_v55 = vshll.u32 %v6254_v26, 16  ;;  %v2020_v16 = vshrl.u32 %v6253_v56, 16  ;;  %v4080_v42 = vsel %vm4040_vm10, %v4075_v32, %v4079_v39 }
 0x193   : > { %v2018_v53 = vsel %vm1385_vm9, %v1999_v25, %v2017_v4  ;;  %v2023_v25 = vshll.u32 %v6253_v56, 16 }
 0x194   : > { %6578 = vmatpush1.bf16.msra.mxu1 %v7411_v44 }
 0x195   : > { %6569 = vmatprep.subr.bf16.mxu1 %v10331_v61 }
 0x196   : > { %2316 = vmatmul.mubr.bf16.gmra.mrb[4].mxu1 %v1973_v43  ;;  %v2031_v43 = vrot.slane %v2029_v34, 3  ;;  %v2009_v34 = vsel %vm1385_vm9, %v1990_v6, %v2008_v52 }
 0x197   : > { %4292 = vmatmul.mubr.bf16.gmra.mrb[28].mxu0 %v4072_v40  ;;  %6281 = vmatprep.mubr.msk.bf16.mxu1 %vm808_vm5, %v2000_v11  ;;  %v2034_v40 = vrot.slane %v2032_v55, 4  ;;  %v7416_v11 = vld [vmem:[#allocation2 + $0x70] sm:$0xff]  ;;  %v2022_v55 = vrot.slane %v2020_v16, 3  ;;  %v4083_v16 = vrot.slane %v8708_v2, 1 }
 0x198   : > { %6459 = vmatprep.mubr.msk.bf16.mxu0 %vm808_vm5, %v4078_v38  ;;  %6579 = vmatpush1.bf16.msra.mxu1 %v7414_v59  ;;  %v6256_v44 = vcombine.high %v7415_v30, %v7416_v11  ;;  %v6255_v59 = vcombine.low %v7415_v30, %v7416_v11  ;;  %v4086_v30 = vsel %vm4040_vm10, %v4081_v20, %v4085_v29  ;;  %v7421_v20 = vld [vmem:[%s10197_s1 + $0x170] sm:$0xff]  }
 0x199   : > { %6570 = vmatprep.subr.bf16.mxu1 %v10331_v61  ;;  %v2035_v27 = vor.u32 %v2034_v40, %v2031_v43  ;;  %v7420_v40 = vld [vmem:[%s10197_s1 + $0x168] sm:$0xff]  }
 0x19a   : > { %v2047_v26 = vshrl.u32 %v6256_v44, 16  ;;  %v2050_v38 = vshll.u32 %v6256_v44, 16  ;;  %v2038_v6 = vshrl.u32 %v6255_v59, 16  ;;  %v2041_v11 = vshll.u32 %v6255_v59, 16 }
 0x19b   : > { %v2036_v56 = vsel %vm1385_vm9, %v2017_v4, %v2035_v27 }
 0x19c   : > { %6580 = vmatpush1.bf16.msra.mxu1 %v7417_v48  ;;  %v2052_v43 = vrot.slane %v2050_v38, 4  ;;  %v4988_v48 = vld [vmem:[#allocation3 + $0x10] sm:$0xff]  ;;  %v8965_v38 = vld [vmem:[#allocation2 + $0x88] sm:$0xff]  ;;  %v2040_v59 = vrot.slane %v2038_v6, 3 }
 0x19d   : > { %6571 = vmatprep.subr.bf16.mxu1 %v10331_v61  ;;  %5040 = vrot.lane.b32.xlu1 %v4988_v48, %s7438_s28  ;;  %v7422_v6 = vld [vmem:[%s10197_s1 + $0x178] sm:$0xff]  }
 0x19e   : > { %2324 = vmatmul.mubr.bf16.gmra.mrb[8].mxu1 %v1991_v58  ;;  %v2025_v58 = vrot.slane %v2023_v25, 4 }
 0x19f   : > { %4300 = vmatmul.mubr.bf16.gmra.mrb[32].mxu0 %v4076_v19  ;;  %6282 = vmatprep.mubr.msk.bf16.mxu1 %vm808_vm5, %v2018_v53  ;;  %v7419_v19 = vld [vmem:[#allocation2 + $0x78] sm:$0xff]  ;;  %v2049_v53 = vrot.slane %v2047_v26, 3  ;;  %v4089_v26 = vrot.slane %v8717_v18, 1  ;;  %v10394_v18 = vshll.u32 %v8401_v8, 16 }
 0x1a0   : > { %6460 = vmatprep.mubr.msk.bf16.mxu0 %vm808_vm5, %v4082_v62  ;;  %6581 = vmatpush1.bf16.msra.mxu1 %v7418_v17  ;;  %v6258_v50 = vcombine.high %v7419_v19, %v8942_v31  ;;  %v2026_v32 = vor.u32 %v2025_v58, %v2022_v55  ;;  %v4986_v62 = vld [vmem:[#allocation3] sm:$0xff]  ;;  %v8967_v17 = vld [vmem:[#allocation2 + $0x90] sm:$0xff]  ;;  %v4989_v55 = vld [vmem:[#allocation3 + $0x18] sm:$0xff] }
 0x1a1   : > { %6572 = vmatprep.subr.bf16.mxu1 %v10331_v61  ;;  %v2053_v25 = vor.u32 %v2052_v43, %v2049_v53  ;;  %5036 = vrot.lane.b32.xlu0 %v4986_v62, %s7438_s28  ;;  %v4987_v53 = vld [vmem:[#allocation3 + $0x8] sm:$0xff]  ;;  %v4084_v43 = vsel %vm4040_vm10, %v4079_v39, %v4083_v16 }
 0x1a2   : > { %v2065_v44 = vshrl.u32 %v6258_v50, 16  ;;  %v2068_v4 = vshll.u32 %v6258_v50, 16  ;;  %v2027_v58 = vsel %vm1385_vm9, %v2008_v52, %v2026_v32  ;;  %v4090_v52 = vsel %vm4040_vm10, %v4085_v29, %v4089_v26  ;;  %5042 = vrot.lane.b32.xlu1 %v4989_v55, %s7438_s28  ;;  %v4990_v29 = vld [vmem:[#allocation3 + $0x20] sm:$0xff] }
 0x1a3   : > { %v6259_v55 = vcombine.low %v8965_v38, %v8967_v17 }
 0x1a4   : > { %6582 = vmatpush1.bf16.msra.mxu1 %v7420_v40  ;;  %v2067_v50 = vrot.slane %v2065_v44, 3  ;;  %v2054_v40 = vsel %vm1385_vm9, %v2035_v27, %v2053_v25  ;;  %v4991_v27 = vld [vmem:[#allocation3 + $0x28] sm:$0xff] }
 0x1a5   : > { %6573 = vmatprep.subr.bf16.mxu1 %v10331_v61  ;;  %5038 = vrot.lane.b32.xlu0 %v4987_v53, %s7438_s28 }
 0x1a6   : > { %2332 = vmatmul.mubr.bf16.gmra.mrb[12].mxu1 %v2009_v34  ;;  %v2043_v34 = vrot.slane %v2041_v11, 4  ;;  %5046 = vrot.lane.b32.xlu1 %v4991_v27, %s7438_s28 }
 0x1a7   : > { %4308 = vmatmul.mubr.bf16.gmra.mrb[36].mxu0 %v4080_v42  ;;  %6283 = vmatprep.mubr.msk.bf16.mxu1 %vm808_vm5, %v2036_v56  ;;  %v2070_v42 = vrot.slane %v2068_v4, 4  ;;  %v6257_v56 = vcombine.low %v7419_v19, %v8942_v31  ;;  %v4087_v19 = vrot.slane %v8737_v45, 1 }
 0x1a8   : > { %6461 = vmatprep.mubr.msk.bf16.mxu0 %vm808_vm5, %v4086_v30  ;;  %6583 = vmatpush1.bf16.msra.mxu1 %v7421_v20  ;;  %v6260_v30 = vcombine.high %v8965_v38, %v8967_v17  ;;  %v8986_v39 = vor.u32 %v2043_v34, %v2040_v59  ;;  %v7423_v20 = vld [vmem:[%s10197_s1 + $0x180] sm:$0xff]   ;;  %v4404_v59 = vshrl.u32 %v8781_v9, 16  ;;  %v4407_v34 = vshll.u32 %v8781_v9, 16 }
 0x1a9   : > { %6574 = vmatprep.subr.bf16.mxu1 %v10331_v61  ;;  %v8991_v11 = vor.u32 %v2070_v42, %v2067_v50  ;;  %v2056_v44 = vshrl.u32 %v6257_v56, 16  ;;  %v2059_v4 = vshll.u32 %v6257_v56, 16  ;;  %v9003_v50 = vld [vmem:[#allocation2 + $0xa0] sm:$0xff]  ;;  %5044 = vrot.lane.b32.xlu0 %v4990_v29, %s7438_s28  ;;  %v4088_v9 = vsel %vm4040_vm10, %v4083_v16, %v4087_v19  ;;  %v7424_v29 = vld [vmem:[%s10197_s1 + $0x188] sm:$0xff]  }
 0x1aa   : > { %v2083_v48 = vshrl.u32 %v6260_v30, 16  ;;  %v2086_v62 = vshll.u32 %v6260_v30, 16  ;;  %v2045_v42 = vsel %vm1385_vm9, %v2026_v32, %v8986_v39  ;;  %v4993_v56 = vld [vmem:[#allocation3 + $0x38] sm:$0xff]  ;;  %v4992_v30 = vld [vmem:[#allocation3 + $0x30] sm:$0xff]  ;;  %v4406_v16 = vrot.slane %v4404_v59, 1 }
 0x1ab   : > { %v2072_v53 = vsel %vm1385_vm9, %v2053_v25, %v8991_v11  ;;  %v10392_v25 = vshll.u32 %v8389_v0, 16  ;;  %5050 = vrot.lane.b32.xlu1 %v4993_v56, %s7438_s28 }
 0x1ac   : > { %6584 = vmatpush1.bf16.msra.mxu1 %v7422_v6  ;;  %v2085_v6 = vrot.slane %v2083_v48, 3  ;;  %v2077_v48 = vshll.u32 %v6259_v55, 16 }
 0x1ad   : > { %6575 = vmatprep.subr.bf16.mxu1 %v10331_v61  ;;  %5048 = vrot.lane.b32.xlu0 %v4992_v30, %s7438_s28  ;;  %v9034_v30 = vld [vmem:[#allocation2 + $0xa8] sm:$0xff] }
 0x1ae   : > { %2340 = vmatmul.mubr.bf16.gmra.mrb[16].mxu1 %v2027_v58  ;;  %v9001_v58 = vld [vmem:[#allocation2 + $0x98] sm:$0xff] }
 0x1af   : > { %4316 = vmatmul.mubr.bf16.gmra.mrb[40].mxu0 %v4084_v43  ;;  %6284 = vmatprep.mubr.msk.bf16.mxu1 %vm808_vm5, %v2054_v40  ;;  %v2058_v43 = vrot.slane %v2056_v44, 3  ;;  %v2061_v40 = vrot.slane %v2059_v4, 4  ;;  %v6262_v32 = vcombine.high %v9001_v58, %v9003_v50  ;;  %v4412_v44 = vrot.slane %v10392_v25, 2 }
 0x1b0   : > { %6462 = vmatprep.mubr.msk.bf16.mxu0 %vm808_vm5, %v4090_v52  ;;  %6585 = vmatpush1.bf16.msra.mxu1 %v7423_v20  ;;  %v10391_v52 = vshrl.u32 %v8389_v0, 16  ;;  %v4409_v20 = vrot.slane %v4407_v34, 2  ;;  %v2074_v4 = vshrl.u32 %v6259_v55, 16  ;;  %v4994_v34 = vld [vmem:[#allocation3 + $0x40] sm:$0xff]  ;;  %v10393_v0 = vshrl.u32 %v8401_v8, 16 }
 0x1b1   : > { %6576 = vmatprep.subr.bf16.mxu1 %v10331_v61  ;;  %v2088_v61 = vrot.slane %v2086_v62, 4  ;;  %v4392_v62 = vshrl.u32 %v8794_v10, 16  ;;  %v2062_v59 = vor.u32 %v2061_v40, %v2058_v43  ;;  %v2104_v56 = vshll.u32 %v6262_v32, 16  ;;  %5054 = vrot.lane.b32.xlu1 %v4995_v36, %s7438_s28 }
 0x1b2   : > { %v4411_v27 = vrot.slane %v10391_v52, 1  ;;  %v4395_v52 = vshll.u32 %v8794_v10, 16  ;;  %v4410_v10 = vor.u32 %v4409_v20, %v4406_v16  ;;  %v2076_v28 = vrot.slane %v2074_v4, 3  ;;  %5052 = vrot.lane.b32.xlu0 %v4994_v34, %s7438_s28 }
 0x1b3   : > { %v2089_v55 = vor.u32 %v2088_v61, %v2085_v6  ;;  %v4394_v43 = vrot.slane %v4392_v62, 1  ;;  %v2063_v6 = vsel %vm1385_vm9, %v8986_v39, %v2062_v59  ;;  %v6261_v61 = vcombine.low %v9001_v58, %v9003_v50 }
 0x1b4   : > { %6586 = vmatpush1.bf16.msra.mxu1 %v7424_v29  ;;  %v4399_v29 = vrot.slane %v10393_v0, 1  ;;  %v4413_v25 = vor.u32 %v4412_v44, %v4411_v27  ;;  %v4397_v40 = vrot.slane %v4395_v52, 2  ;;  %v4400_v0 = vrot.slane %v10394_v18, 2  ;;  %v4996_v27 = vld [vmem:[#allocation3 + $0x50] sm:$0xff] }
 0x1b5   : > { %v2106_v16 = vrot.slane %v2104_v56, 4  ;;  %v10395_v44 = vshrl.u32 %v8405_v37, 16  ;;  %v2095_v56 = vshll.u32 %v6261_v61, 16 }
 0x1b6   : > { %2348 = vmatmul.mubr.bf16.gmra.mrb[20].mxu1 %v2045_v42  ;;  %v2101_v42 = vshrl.u32 %v6262_v32, 16  ;;  %v2090_v32 = vsel %vm1385_vm9, %v8991_v11, %v2089_v55  ;;  %v4414_v8 = vsel %vm4390_vm11, %v4410_v10, %v4413_v25  ;;  %v4398_v52 = vor.u32 %v4397_v40, %v4394_v43  ;;  %v4999_v11 = vld [vmem:[#allocation3 + $0x68] sm:$0xff]  ;;  %5056 = vrot.lane.b32.xlu0 %v4996_v27, %s7438_s28  ;;  %v4998_v10 = vld [vmem:[#allocation3 + $0x60] sm:$0xff]  ;;  %v5001_v43 = vld [vmem:[#allocation3 + $0x78] sm:$0xff] }
 0x1b7   : > { %4324 = vmatmul.mubr.bf16.gmra.mrb[44].mxu0 %v4088_v9  ;;  %6285 = vmatprep.mubr.msk.bf16.mxu1 %vm808_vm5, %v2072_v53  ;;  %v9036_v9 = vld [vmem:[#allocation2 + $0xb0] sm:$0xff]  ;;  %v2079_v53 = vrot.slane %v2077_v48, 4  ;;  %v4419_v4 = vrot.slane %v10395_v44, 1  ;;  %v10396_v48 = vshll.u32 %v8405_v37, 16  ;;  %v4401_v34 = vor.u32 %v4400_v0, %v4399_v29  ;;  %v9063_v29 = vld [vmem:[#allocation2 + $0xc0] sm:$0xff] }
 0x1b8   : > { %6463 = vmatprep.mubr.msk.bf16.mxu0 %vm808_vm5, %v4089_v26  ;;  %v4997_v26 = vld [vmem:[#allocation3 + $0x58] sm:$0xff]  ;;  %v2103_v36 = vrot.slane %v2101_v42, 3  ;;  %v6264_v20 = vcombine.high %v9034_v30, %v9036_v9  ;;  %v2092_v42 = vshrl.u32 %v6261_v61, 16  ;;  %v2097_v0 = vrot.slane %v2095_v56, 4  ;;  %v5003_v56 = vld [vmem:[#allocation3 + $0x88] sm:$0xff] }
 0x1b9   : > { %v4420_v39 = vrot.slane %v10396_v48, 2  ;;  %5058 = vrot.lane.b32.xlu1 %v4997_v26, %s7438_s28  ;;  %v2080_v62 = vor.u32 %v2079_v53, %v2076_v28  ;;  %v9061_v28 = vld [vmem:[#allocation2 + $0xb8] sm:$0xff]  ;;  %v6263_v53 = vcombine.low %v9034_v30, %v9036_v9  ;;  %v10397_v61 = vshrl.u32 %v8420_v46, 16 }
 0x1ba   : > { %v2107_v37 = vor.u32 %v2106_v16, %v2103_v36  ;;  %v2119_v18 = vshrl.u32 %v6264_v20, 16  ;;  %v2122_v26 = vshll.u32 %v6264_v20, 16  ;;  %5060 = vrot.lane.b32.xlu0 %v4998_v10, %s7438_s28  ;;  %v2094_v40 = vrot.slane %v2092_v42, 3  ;;  %v5000_v16 = vld [vmem:[#allocation3 + $0x70] sm:$0xff] }
 0x1bb   : > { %v2081_v45 = vsel %vm1385_vm9, %v2062_v59, %v2080_v62  ;;  %v4415_v27 = vrot.slane %v10397_v61, 1  ;;  %v6266_v44 = vcombine.high %v9061_v28, %v9063_v29  ;;  %v10399_v48 = vshrl.u32 %v8426_v21, 16 }
 0x1bc   : > { %v2108_v20 = vsel %vm1385_vm9, %v2089_v55, %v2107_v37  ;;  %v2121_v59 = vrot.slane %v2119_v18, 3  ;;  %v2113_v42 = vshll.u32 %v6263_v53, 16  ;;  %v2098_v55 = vor.u32 %v2097_v0, %v2094_v40  ;;  %v5005_v0 = vld [vmem:[#allocation3 + $0x98] sm:$0xff] }
 0x1bd   : > { %5062 = vrot.lane.b32.xlu1 %v4999_v11, %s7438_s28 }
 0x1be   : > { %2356 = vmatmul.mubr.bf16.gmra.mrb[24].mxu1 %v2063_v6  ;;  %v4421_v6 = vor.u32 %v4420_v39, %v4419_v4  ;;  %v4427_v39 = vrot.slane %v10399_v48, 1  ;;  %5064 = vrot.lane.b32.xlu0 %v5000_v16, %s7438_s28  ;;  %v10402_v16 = vshll.u32 %v10383_v22, 16 }
 0x1bf   : > { %4332 = vmatmul.mubr.bf16.gmra.mrb[48].mxu0 %v4087_v19  ;;  %6286 = vmatprep.mubr.msk.bf16.mxu1 %vm808_vm5, %v2090_v32  ;;  %v4402_v19 = vsel %vm4390_vm11, %v4398_v52, %v4401_v34  ;;  %v10398_v32 = vshll.u32 %v8420_v46, 16  ;;  %v10400_v52 = vshll.u32 %v8426_v21, 16  ;;  %v2110_v46 = vshrl.u32 %v6263_v53, 16 }
 0x1c0   : > { %6476 = vmatprep.mubr.msk.bf16.mxu0 %vm808_vm5, %v4414_v8  ;;  %v2124_v8 = vrot.slane %v2122_v26, 4  ;;  %v4422_v4 = vsel %vm4390_vm11, %v4413_v25, %v4421_v6  ;;  %v5002_v25 = vld [vmem:[#allocation3 + $0x80] sm:$0xff]  ;;  %v2137_v26 = vshrl.u32 %v6266_v44, 16  ;;  %v2140_v21 = vshll.u32 %v6266_v44, 16 }
 0x1c1   : > { %v4416_v36 = vrot.slane %v10398_v32, 2  ;;  %v4428_v11 = vrot.slane %v10400_v52, 2  ;;  %5066 = vrot.lane.b32.xlu1 %v5001_v43, %s7438_s28  ;;  %v9087_v32 = vld [vmem:[#allocation2 + $0xd0] sm:$0xff]  ;;  %v2115_v53 = vrot.slane %v2113_v42, 4  ;;  %v10401_v43 = vshrl.u32 %v10383_v22, 16 }
 0x1c2   : > { %v2125_v18 = vor.u32 %v2124_v8, %v2121_v59  ;;  %v4424_v40 = vrot.slane %v10402_v16, 2  ;;  %5068 = vrot.lane.b32.xlu0 %v5002_v25, %s7438_s28  ;;  %v5004_v59 = vld [vmem:[#allocation3 + $0x90] sm:$0xff]  ;;  %v2139_v44 = vrot.slane %v2137_v26, 3  ;;  %v6268_v48 = vcombine.high %v8823_v5, %v9087_v32  ;;  %v5007_v42 = vld [vmem:[#allocation3 + $0xa8] sm:$0xff] }
 0x1c3   : > { %v4417_v10 = vor.u32 %v4416_v36, %v4415_v27  ;;  %v4429_v61 = vor.u32 %v4428_v11, %v4427_v39  ;;  %v2099_v27 = vsel %vm1385_vm9, %v2080_v62, %v2098_v55  ;;  %v10403_v39 = vshrl.u32 %v10384_v49, 16 }
 0x1c4   : > { %v2126_v8 = vsel %vm1385_vm9, %v2107_v37, %v2125_v18  ;;  %v10404_v62 = vshll.u32 %v10384_v49, 16  ;;  %v2155_v26 = vshrl.u32 %v6268_v48, 16  ;;  %v2158_v49 = vshll.u32 %v6268_v48, 16 }
 0x1c5   : > { %5070 = vrot.lane.b32.xlu1 %v5003_v56, %s7438_s28  ;;  %v4418_v36 = vsel %vm4390_vm11, %v4401_v34, %v4417_v10  ;;  %v4430_v22 = vsel %vm4390_vm11, %v4421_v6, %v4429_v61  ;;  %v4435_v52 = vrot.slane %v10403_v39, 1  ;;  %v5006_v6 = vld [vmem:[#allocation3 + $0xa0] sm:$0xff] }
 0x1c6   : > { %2364 = vmatmul.mubr.bf16.gmra.mrb[28].mxu1 %v2081_v45  ;;  %v2112_v45 = vrot.slane %v2110_v46, 3  ;;  %v4436_v11 = vrot.slane %v10404_v62, 2  ;;  %5072 = vrot.lane.b32.xlu0 %v5004_v59, %s7438_s28  ;;  %v10406_v59 = vshll.u32 %v10387_v63, 16 }
 0x1c7   : > { %4658 = vmatmul.mubr.bf16.vlgmr.msra.gmra.mrb[0].mxu0 %v4402_v19  ;;  %6287 = vmatprep.mubr.msk.bf16.mxu1 %vm808_vm5, %v2108_v20  ;;  %v4423_v19 = vrot.slane %v10401_v43, 1  ;;  %v6265_v20 = vcombine.low %v9061_v28, %v9063_v29  ;;  %v5009_v43 = vld [vmem:[#allocation3 + $0xb8] sm:$0xff] }
 0x1c8   : > { %6477 = vmatprep.mubr.msk.bf16.mxu0 %vm808_vm5, %v4422_v4  ;;  %v2142_v4 = vrot.slane %v2140_v21, 4  ;;  %v2116_v34 = vor.u32 %v2115_v53, %v2112_v45  ;;  %v4437_v21 = vor.u32 %v4436_v11, %v4435_v52  ;;  %v4963_v11 = vld [vmem:[%s10199_s3 + $0x10] sm:$0xff] }
 0x1c9   : > { %5074 = vrot.lane.b32.xlu1 %v5005_v0, %s7438_s28  ;;  %v4425_v46 = vor.u32 %v4424_v40, %v4423_v19  ;;  %v2128_v37 = vshrl.u32 %v6265_v20, 16  ;;  %v2131_v56 = vshll.u32 %v6265_v20, 16  ;;  %v10405_v40 = vshrl.u32 %v10387_v63, 16 }
 0x1ca   : > { %v2143_v25 = vor.u32 %v2142_v4, %v2139_v44  ;;  %v2117_v45 = vsel %vm1385_vm9, %v2098_v55, %v2116_v34  ;;  %5076 = vrot.lane.b32.xlu0 %v5006_v6, %s7438_s28  ;;  %v2157_v55 = vrot.slane %v2155_v26, 3  ;;  %v2160_v44 = vrot.slane %v2158_v49, 4 }
 0x1cb   : > { %v4426_v53 = vsel %vm4390_vm11, %v4417_v10, %v4425_v46  ;;  %v2130_v19 = vrot.slane %v2128_v37, 3  ;;  %v2133_v16 = vrot.slane %v2131_v56, 4  ;;  %v4431_v0 = vrot.slane %v10405_v40, 1 }
 0x1cc   : > { %v2144_v20 = vsel %vm1385_vm9, %v2125_v18, %v2143_v25  ;;  %v4438_v10 = vsel %vm4390_vm11, %v4429_v61, %v4437_v21  ;;  %v10407_v4 = vshrl.u32 %v10388_v47, 16  ;;  %v10409_v49 = vshrl.u32 %v10389_v35, 16 }
 0x1cd   : > { %5078 = vrot.lane.b32.xlu1 %v5007_v42, %s7438_s28  ;;  %v2134_v63 = vor.u32 %v2133_v16, %v2130_v19  ;;  %v10411_v16 = vshrl.u32 %v10390_v1, 16 }
 0x1ce   : > { %2372 = vmatmul.mubr.bf16.gmra.mrb[32].mxu1 %v2099_v27  ;;  %v6267_v27 = vcombine.low %v8823_v5, %v9087_v32  ;;  %v4443_v48 = vrot.slane %v10407_v4, 1  ;;  %v4961_v5 = vld [vmem:[%s10199_s3] sm:$0xff]  ;;  %v10415_v4 = vshrl.u32 %v8549_v54, 16 }
 0x1cf   : > { %4666 = vmatmul.mubr.bf16.gmra.mrb[4].mxu0 %v4418_v36  ;;  %6288 = vmatprep.mubr.msk.bf16.mxu1 %vm808_vm5, %v2126_v8  ;;  %v5008_v36 = vld [vmem:[#allocation3 + $0xb0] sm:$0xff]  ;;  %v4432_v8 = vrot.slane %v10406_v59, 2  ;;  %v2135_v42 = vsel %vm1385_vm9, %v2116_v34, %v2134_v63  ;;  %v4451_v40 = vrot.slane %v10411_v16, 1 }
 0x1d0   : > { %6478 = vmatprep.mubr.msk.bf16.mxu0 %vm808_vm5, %v4430_v22  ;;  %v10408_v22 = vshll.u32 %v10388_v47, 16  ;;  %5080 = vrot.lane.b32.xlu0 %v5008_v36, %s7438_s28  ;;  %v2146_v18 = vshrl.u32 %v6267_v27, 16  ;;  %v2149_v61 = vshll.u32 %v6267_v27, 16  ;;  %v2161_v47 = vor.u32 %v2160_v44, %v2157_v55  ;;  %v4962_v44 = vld [vmem:[%s10199_s3 + $0x8] sm:$0xff]  ;;  %v4972_v16 = vld [vmem:[%s10199_s3 + $0x58] sm:$0xff] }
 0x1d1   : > { %5082 = vrot.lane.b32.xlu1 %v5009_v43, %s7438_s28  ;;  %v4433_v52 = vor.u32 %v4432_v8, %v4431_v0  ;;  %v10412_v0 = vshll.u32 %v10390_v1, 16  ;;  %v10414_v8 = vshll.u32 %v8531_v7, 16 }
 0x1d2   : > { %v4444_v39 = vrot.slane %v10408_v22, 2  ;;  %v2148_v37 = vrot.slane %v2146_v18, 3  ;;  %v2151_v56 = vrot.slane %v2149_v61, 4  ;;  %v2162_v26 = vsel %vm1385_vm9, %v2143_v25, %v2161_v47  ;;  %v4965_v18 = vld [vmem:[%s10199_s3 + $0x20] sm:$0xff] }
 0x1d3   : > { %v4434_v6 = vsel %vm4390_vm11, %v4425_v46, %v4433_v52  ;;  %v4452_v34 = vrot.slane %v10412_v0, 2  ;;  %v4448_v55 = vrot.slane %v10414_v8, 2  ;;  %v10416_v22 = vshll.u32 %v8549_v54, 16  ;;  %v4968_v54 = vld [vmem:[%s10199_s3 + $0x38] sm:$0xff]  ;;  %v4973_v8 = vld [vmem:[%s10199_s3 + $0x60] sm:$0xff] }
 0x1d4   : > { %v4445_v62 = vor.u32 %v4444_v39, %v4443_v48  ;;  %v2152_v46 = vor.u32 %v2151_v56, %v2148_v37  ;;  %v4459_v48 = vrot.slane %v10415_v4, 1  ;;  %v6307_v61 = vcombine.high %v8942_v31, %v8965_v38  ;;  %v4967_v37 = vld [vmem:[%s10199_s3 + $0x30] sm:$0xff] }
 0x1d5   : > { %5388 = vperm.xlu1 %7016, %v4961_v5   ;;  %v4453_v27 = vor.u32 %v4452_v34, %v4451_v40  ;;  %v4460_v39 = vrot.slane %v10416_v22, 2  ;;  %v4966_v5 = vld [vmem:[%s10199_s3 + $0x28] sm:$0xff]  ;;  %v6309_v40 = vcombine.high %v8967_v17, %v9001_v58  ;;  %v10421_v34 = vshrl.u32 %v8602_v12, 16 }
 0x1d6   : > { %2380 = vmatmul.mubr.bf16.gmra.mrb[36].mxu1 %v2117_v45  ;;  %v4439_v45 = vrot.slane %v10409_v49, 1  ;;  %v4446_v19 = vsel %vm4390_vm11, %v4437_v21, %v4445_v62  ;;  %v4964_v21 = vld [vmem:[%s10199_s3 + $0x18] sm:$0xff]  ;;  %v2153_v1 = vsel %vm1385_vm9, %v2134_v63, %v2152_v46  ;;  %v10420_v49 = vshll.u32 %v8584_v13, 16 }
 0x1d7   : > { %4674 = vmatmul.mubr.bf16.gmra.mrb[8].mxu0 %v4426_v53  ;;  %6289 = vmatprep.mubr.msk.bf16.mxu1 %vm808_vm5, %v2144_v20  ;;  %v10410_v53 = vshll.u32 %v10389_v35, 16  ;;  %v5010_v35 = vld [vmem:[#allocation3 + $0xc0] sm:$0xff]  ;;  %v10413_v20 = vshrl.u32 %v8531_v7, 16  ;;  %v4461_v63 = vor.u32 %v4460_v39, %v4459_v48  ;;  %v4471_v4 = vrot.slane %v3687_v24, 1 }
 0x1d8   : > { %6479 = vmatprep.mubr.msk.bf16.mxu0 %vm808_vm5, %v4438_v10  ;;  %5084 = vrot.lane.b32.xlu0 %v5010_v35, %s7438_s28  ;;  %v4454_v10 = vsel %vm4390_vm11, %v4445_v62, %v4453_v27  ;;  %v10423_v35 = vshrl.u32 %v8613_v60, 16  ;;  %v10425_v48 = vshll.u32 %v8636_v51, 16  ;;  %v4483_v39 = vrot.slane %v3711_v33, 1  ;;  %v4978_v24 = vld [vmem:[%s10199_s3 + $0x88] sm:$0xff]  ;;  %v4977_v33 = vld [vmem:[%s10199_s3 + $0x80] sm:$0xff] }
 0x1d9   : > { %v4440_v43 = vrot.slane %v10410_v53, 2  ;;  %5398 = vperm.xlu1 %7016, %v4963_v11   ;;  %v4447_v59 = vrot.slane %v10413_v20, 1  ;;  %v10418_v11 = vshll.u32 %v8575_v15, 16  ;;  %v4462_v56 = vsel %vm4390_vm11, %v4453_v27, %v4461_v63  ;;  %v4970_v53 = vld [vmem:[%s10199_s3 + $0x48] sm:$0xff] }
 0x1da   : > { %v4974_v20 = vld [vmem:[%s10199_s3 + $0x68] sm:$0xff]  ;;  %v4472_v22 = vrot.slane %v10425_v48, 2 }
 0x1db   : > { %v4441_v25 = vor.u32 %v4440_v43, %v4439_v45  ;;  %v4449_v7 = vor.u32 %v4448_v55, %v4447_v59  ;;  %v4468_v45 = vrot.slane %v10420_v49, 2  ;;  %v4976_v55 = vld [vmem:[%s10199_s3 + $0x78] sm:$0xff] }
 0x1dc   : > { %5393 = vperm.xlu0 %7017, %v4962_v44   ;;  %v6311_v44 = vcombine.high %v9003_v50, %v9034_v30  ;;  %v4473_v51 = vor.u32 %v4472_v22, %v4471_v4 }
 0x1dd   : > { %5403 = vperm.xlu1 %7016, %v4964_v21   ;;  %v4442_v36 = vsel %vm4390_vm11, %v4433_v52, %v4441_v25  ;;  %v4450_v52 = vsel %vm4390_vm11, %v4441_v25, %v4449_v7  ;;  %v10422_v25 = vshll.u32 %v8602_v12, 16  ;;  %v4475_v21 = vrot.slane %v10423_v35, 1 }
 0x1de   : > { %2388 = vmatmul.mubr.bf16.gmra.mrb[40].mxu1 %v2135_v42  ;;  %v4456_v42 = vrot.slane %v10418_v11, 2  ;;  %v10427_v11 = vshrl.u32 %v8681_v3, 16 }
 0x1df   : > { %4682 = vmatmul.mubr.bf16.gmra.mrb[12].mxu0 %v4434_v6  ;;  %6290 = vmatprep.mubr.msk.bf16.mxu1 %vm808_vm5, %v2162_v26  ;;  %v10419_v6 = vshrl.u32 %v8584_v13, 16  ;;  %v6306_v13 = vcombine.low %v8942_v31, %v8965_v38  ;;  %v4464_v27 = vrot.slane %v10422_v25, 2  ;;  %v4971_v31 = vld [vmem:[%s10199_s3 + $0x50] sm:$0xff] }
 0x1e0   : > { %6480 = vmatprep.mubr.msk.bf16.mxu0 %vm808_vm5, %v4446_v19  ;;  %5408 = vperm.xlu0 %7017, %v4965_v18   ;;  %v4969_v19 = vld [vmem:[%s10199_s3 + $0x40] sm:$0xff] }
 0x1e1   : > { %5413 = vperm.xlu1 %7016, %v4966_v5   ;;  %v4467_v26 = vrot.slane %v10419_v6, 1  ;;  %v10426_v5 = vshll.u32 %v8646_v14, 16  ;;  %v6310_v14 = vcombine.low %v9003_v50, %v9034_v30  ;;  %v4364_v18 = vld [vmem:[#allocation2 + $0xe0] sm:$0x33]  ;;  %v4979_v50 = vld [vmem:[%s10199_s3 + $0x90] sm:$0xff]  ;;  %v7425_v6 = vld [vmem:[#allocation2 + $0xd8] sm:$0xff] }
 0x1e3   : > { %v4469_v43 = vor.u32 %v4468_v45, %v4467_v26  ;;  %v6465_v26 = vcombine.high %v7425_v6, %v4364_v18 }
 0x1e4   : > { %5418 = vperm.xlu0 %7017, %v4967_v37   ;;  %v10428_v37 = vshll.u32 %v8681_v3, 16  ;;  %v4981_v3 = vld [vmem:[%s10199_s3 + $0xa0] sm:$0xff] }
 0x1e5   : > { %5423 = vperm.xlu1 %7016, %v4968_v54   ;;  %v4470_v38 = vsel %vm4390_vm11, %v4461_v63, %v4469_v43  ;;  %v4980_v54 = vld [vmem:[%s10199_s3 + $0x98] sm:$0xff]  ;;  %v4505_v49 = vshrl.u32 %v6465_v26, 16  ;;  %v4508_v45 = vshll.u32 %v6465_v26, 16 }
 0x1e6   : > { %2396 = vmatmul.mubr.bf16.gmra.mrb[44].mxu1 %v2153_v1  ;;  %v10424_v1 = vshll.u32 %v8613_v60, 16  ;;  %v6308_v60 = vcombine.low %v8967_v17, %v9001_v58  ;;  %v4975_v17 = vld [vmem:[%s10199_s3 + $0x70] sm:$0xff] }
 0x1e7   : > { %4690 = vmatmul.mubr.bf16.gmra.mrb[16].mxu0 %v4442_v36  ;;  %6291 = vmatprep.mubr.msk.bf16.mxu1 %vm808_vm5, %v2161_v47  ;;  %v10417_v47 = vshrl.u32 %v8575_v15, 16 }
 0x1e8   : > { %6481 = vmatprep.mubr.msk.bf16.mxu0 %vm808_vm5, %v4454_v10  ;;  %5428 = vperm.xlu0 %7017, %v4969_v19   ;;  %v4476_v36 = vrot.slane %v10424_v1, 2 }
 0x1e9   : > { %v4455_v62 = vrot.slane %v10417_v47, 1  ;;  %5433 = vperm.xlu1 %7016, %v4970_v53   ;;  %v4479_v47 = vrot.slane %v3703_v57, 1  ;;  %v6312_v53 = vcombine.low %v9036_v9, %v9061_v28 }
 0x1ea   : > { %v4477_v59 = vor.u32 %v4476_v36, %v4475_v21  ;;  %v6317_v21 = vcombine.high %v9087_v32, %v9087_v32 }
 0x1eb   : > { %v4457_v15 = vor.u32 %v4456_v42, %v4455_v62  ;;  %v4480_v62 = vrot.slane %v3691_v23, 2  ;;  %v4491_v42 = vrot.slane %v10427_v11, 1 }
 0x1ec   : > { %5438 = vperm.xlu0 %7017, %v4971_v31   ;;  %v4478_v58 = vsel %vm4390_vm11, %v4469_v43, %v4477_v59 }
 0x1ed   : > { %v4458_v0 = vsel %vm4390_vm11, %v4449_v7, %v4457_v15  ;;  %5443 = vperm.xlu1 %7016, %v4972_v16   ;;  %v4484_v7 = vrot.slane %v10426_v5, 2  ;;  %v4481_v23 = vor.u32 %v4480_v62, %v4479_v47 }
 0x1ee   : > { %2404 = vmatmul.mubr.bf16.gmra.mrb[48].mxu1 %v2152_v46  ;;  %v4463_v46 = vrot.slane %v10421_v34, 1  ;;  %v6464_v34 = vcombine.low %v7425_v6, %v4364_v18 }
 0x1ef   : > { %4698 = vmatmul.mubr.bf16.gmra.mrb[20].mxu0 %v4450_v52  ;;  %6335 = vmatprep.mubr.msk.bf16.mxu1 %vm808_vm5, %v6307_v61  ;;  %v4485_v63 = vor.u32 %v4484_v7, %v4483_v39  ;;  %v6313_v61 = vcombine.high %v9036_v9, %v9061_v28  ;;  %v4482_v19 = vsel %vm4390_vm11, %v4473_v51, %v4481_v23  ;;  %v4507_v9 = vrot.slane %v4505_v49, 1  ;;  %v9345_v49 = vld [vmem:[%s10198_s2] ss:$0 sm:$0xff] }
 0x1f0   : > { %6482 = vmatprep.mubr.msk.bf16.mxu0 %vm808_vm5, %v4462_v56  ;;  %v4465_v12 = vor.u32 %v4464_v27, %v4463_v46  ;;  %5448 = vperm.xlu0 %7017, %v4973_v8   ;;  %v4492_v56 = vrot.slane %v10428_v37, 2  ;;  %v4983_v46 = vld [vmem:[%s10199_s3 + $0xb0] sm:$0xff]  ;;  %v4510_v28 = vrot.slane %v4508_v45, 2  ;;  %v4496_v31 = vshrl.u32 %v6464_v34, 16 }
 0x1f1   : > { %5453 = vperm.xlu1 %7016, %v4974_v20   ;;  %v4486_v30 = vsel %vm4390_vm11, %v4477_v59, %v4485_v63  ;;  %v6316_v8 = vcombine.low %v9087_v32, %v9087_v32 }
 0x1f2   : > { %v4466_v10 = vsel %vm4390_vm11, %v4457_v15, %v4465_v12  ;;  %v4474_v52 = vsel %vm4390_vm11, %v4465_v12, %v4473_v51  ;;  %v4493_v57 = vor.u32 %v4492_v56, %v4491_v42  ;;  %v7426_v15 = vld [vmem:[#allocation2 + $0xc8] sm:$0xff]  ;;  %v4498_v36 = vrot.slane %v4496_v31, 1 }
 0x1f3   : > { %v6315_v43 = vcombine.high %v9063_v29, %v7426_v15  ;;  %v6314_v35 = vcombine.low %v9063_v29, %v7426_v15 }
 0x1f4   : > { %5458 = vperm.xlu0 %7017, %v4975_v17   ;;  %v4494_v25 = vsel %vm4390_vm11, %v4485_v63, %v4493_v57 }
 0x1f5   : > { %5463 = vperm.xlu1 %7016, %v4976_v55  }
 0x1f6   : > { %2683 = vmatmul.mubr.bf16.vlgmr.msra.gmra.mrb[28].mxu1 %v6306_v13  ;;  %v10429_v13 = vshrl.u32 %v8708_v2, 16 }
 0x1f7   : > { %4706 = vmatmul.mubr.bf16.gmra.mrb[24].mxu0 %v4458_v0  ;;  %6336 = vmatprep.mubr.msk.bf16.mxu1 %vm808_vm5, %v6309_v40  ;;  %v10430_v40 = vshll.u32 %v8708_v2, 16  ;;  %v4499_v2 = vshll.u32 %v6464_v34, 16 }
 0x1f8   : > { %6483 = vmatprep.mubr.msk.bf16.mxu0 %vm808_vm5, %v4470_v38  ;;  %5468 = vperm.xlu0 %7017, %v4977_v33   ;;  %v4487_v16 = vrot.slane %v10429_v13, 1  ;;  %v4511_v38 = vor.u32 %v4510_v28, %v4507_v9 }
 0x1f9   : > { %5473 = vperm.xlu1 %7016, %v4978_v24   ;;  %v4488_v0 = vrot.slane %v10430_v40, 2  ;;  %v4501_v20 = vrot.slane %v4499_v2, 2 }
 0x1fa   : > { %v4512_v12 = vsel %vm4390_vm11, %v4493_v57, %v4511_v38 }
 0x1fb   : > { %v4489_v27 = vor.u32 %v4488_v0, %v4487_v16  ;;  %v4502_v59 = vor.u32 %v4501_v20, %v4498_v36 }
 0x1fc   : > { %5478 = vperm.xlu0 %7017, %v4979_v50  }
 0x1fd   : > { %5483 = vperm.xlu1 %7016, %v4980_v54   ;;  %v4490_v1 = vsel %vm4390_vm11, %v4481_v23, %v4489_v27  ;;  %v4503_v29 = vsel %vm4390_vm11, %v4489_v27, %v4502_v59 }
 0x1fe   : > { %2691 = vmatmul.mubr.bf16.gmra.mrb[32].mxu1 %v6308_v60 }
 0x1ff   : > { %4714 = vmatmul.mubr.bf16.gmra.mrb[28].mxu0 %v4466_v10  ;;  %6337 = vmatprep.mubr.msk.bf16.mxu1 %vm808_vm5, %v6311_v44 }
 0x200   : > { %6484 = vmatprep.mubr.msk.bf16.mxu0 %vm808_vm5, %v4478_v58  ;;  %5488 = vperm.xlu0 %7017, %v4981_v3  }
 0x201   : > { %5493 = vperm.xlu1 %7016, %v4982_v41  }
 0x204   : > { %5498 = vperm.xlu0 %7017, %v4983_v46  }
 0x206   : > { %2699 = vmatmul.mubr.bf16.gmra.mrb[36].mxu1 %v6310_v14 }
 0x207   : > { %4722 = vmatmul.mubr.bf16.gmra.mrb[32].mxu0 %v4474_v52  ;;  %6338 = vmatprep.mubr.msk.bf16.mxu1 %vm808_vm5, %v6313_v61 }
 0x208   : > { %6485 = vmatprep.mubr.msk.bf16.mxu0 %vm808_vm5, %v4486_v30 }
 0x20e   : > { %2707 = vmatmul.mubr.bf16.gmra.mrb[40].mxu1 %v6312_v53 }
 0x20f   : > { %4730 = vmatmul.mubr.bf16.gmra.mrb[36].mxu0 %v4482_v19  ;;  %6339 = vmatprep.mubr.msk.bf16.mxu1 %vm808_vm5, %v6315_v43  ;;  %v9316_v33 = vpop.permute.xlu1 %5040 }
 0x210   : > { %6486 = vmatprep.mubr.msk.bf16.mxu0 %vm808_vm5, %v4494_v25 }
 0x213   : > { %v9324_v47 = vpop.permute.xlu0 %5036 }
 0x214   : > { %v9322_v52 = vpop.permute.xlu1 %5042 }
 0x216   : > { %2715 = vmatmul.mubr.bf16.gmra.mrb[44].mxu1 %v6314_v35 }
 0x217   : > { %4738 = vmatmul.mubr.bf16.gmra.mrb[40].mxu0 %v4490_v1  ;;  %6340 = vmatprep.mubr.msk.bf16.mxu1 %vm808_vm5, %v6317_v21  ;;  %v9332_v37 = vpop.permute.xlu0 %5038 }
 0x218   : > { %6487 = vmatprep.mubr.msk.bf16.mxu0 %vm808_vm5, %v4512_v12  ;;  %v9330_v42 = vpop.permute.xlu1 %5046 }
 0x21b   : > { %v9340_v23 = vpop.permute.xlu0 %5044 }
 0x21d   : > { %v9336_v26 = vpop.permute.xlu1 %5050 }
 0x21e   : > { %2723 = vmatmul.mubr.bf16.gmra.mrb[48].mxu1 %v6316_v8 }
 0x21f   : > { %4746 = vmatmul.mubr.bf16.gmra.mrb[44].mxu0 %v4503_v29  ;;  %v9350_v53 = vpop.permute.xlu0 %5048 }
 0x220   : > { %6488 = vmatprep.mubr.msk.bf16.mxu0 %vm808_vm5, %v4511_v38 }
 0x223   : > { %v9347_v45 = vpop.permute.xlu1 %5054 }
 0x224   : > { %v9360_v46 = vpop.permute.xlu0 %5052 }
 0x227   : > { %4754 = vmatmul.mubr.bf16.gmra.mrb[48].mxu0 %v4502_v59 }
 0x228   : > { %v9372_v1 = vpop.permute.xlu0 %5056 }
 0x22b   : > { %v9358_v34 = vpop.permute.xlu1 %5058 }
 0x22f   : > { %v9367_v38 = vpop.permute.xlu1 %5062 }
 0x233   : > { %v9377_v8 = vpop.permute.xlu1 %5066 }
 0x234   : > { %10431 = vst [vmem:[#allocation30_spill] sm:$0xff] %v9377_v8 }
 0x261   : > { %v2309_v60 = vpop.f32.mrb[0].mxu1 }
 0x262   : > { %v2311_v55 = vpop.f32.mrb[1].mxu1  ;;  %v6587_v3 = vadd.f32 %v9345_v49, %v2309_v60 }
 0x263   : > { %v2312_v44 = vpop.f32.mrb[2].mxu1 }
 0x264   : > { %v2314_v10 = vpop.f32.mrb[3].mxu1  ;;  %v6589_v43 = vadd.f32 %v9345_v49, %v2312_v44  ;;  %v9383_v44 = vpop.permute.xlu0 %5060 }
 0x269   : > { %v2317_v4 = vpop.f32.mrb[4].mxu1 }
 0x26a   : > { %v2319_v48 = vpop.f32.mrb[5].mxu1  ;;  %v6591_v25 = vadd.f32 %v9345_v49, %v2317_v4 }
 0x26b   : > { %v2320_v22 = vpop.f32.mrb[6].mxu1 }
 0x26c   : > { %v2322_v17 = vpop.f32.mrb[7].mxu1  ;;  %v6593_v28 = vadd.f32 %v9345_v49, %v2320_v22 }
 0x26d   : > { %v9390_v17 = vpop.permute.xlu1 %5070 }
 0x26e   : > { %10432 = vst [vmem:[#allocation31_spill] sm:$0xff] %v9390_v17 }
 0x271   : > { %v2325_v58 = vpop.f32.mrb[8].mxu1 }
 0x272   : > { %v2327_v39 = vpop.f32.mrb[9].mxu1  ;;  %v6595_v20 = vadd.f32 %v9345_v49, %v2325_v58 }
 0x273   : > { %v2328_v5 = vpop.f32.mrb[10].mxu1  ;;  %v9394_v39 = vpop.permute.xlu0 %5064 }
 0x274   : > { %v2330_v7 = vpop.f32.mrb[11].mxu1  ;;  %v6597_v29 = vadd.f32 %v9345_v49, %v2328_v5  ;;  %10433 = vst [vmem:[#allocation32_spill] sm:$0xff] %v9394_v39 }
 0x279   : > { %v9312_v32 = vpop.f32.mrb[12].mxu1 }
 0x27a   : > { %v2335_v24 = vpop.f32.mrb[13].mxu1  ;;  %v6599_v58 = vadd.f32 %v9345_v49, %v9312_v32 }
 0x27b   : > { %v9314_v51 = vpop.f32.mrb[14].mxu1 }
 0x27c   : > { %v2338_v63 = vpop.f32.mrb[15].mxu1  ;;  %v6601_v24 = vadd.f32 %v9345_v49, %v9314_v51 }
 0x281   : > { %v9318_v14 = vpop.f32.mrb[16].mxu1 }
 0x282   : > { %v2343_v18 = vpop.f32.mrb[17].mxu1  ;;  %v6603_v51 = vadd.f32 %v9345_v49, %v9318_v14 }
 0x283   : > { %v9320_v54 = vpop.f32.mrb[18].mxu1 }
 0x284   : > { %v2346_v61 = vpop.f32.mrb[19].mxu1 }
 0x289   : > { %v9326_v62 = vpop.f32.mrb[20].mxu1 }
 0x28a   : > { %v2351_v50 = vpop.f32.mrb[21].mxu1 }
 0x28b   : > { %v9328_v30 = vpop.f32.mrb[22].mxu1 }
 0x28c   : > { %v2354_v11 = vpop.f32.mrb[23].mxu1 }
 0x291   : > { %v9334_v56 = vpop.f32.mrb[24].mxu1 }
 0x292   : > { %v2359_v6 = vpop.f32.mrb[25].mxu1 }
 0x293   : > { %v9338_v41 = vpop.f32.mrb[26].mxu1  ;;  %v9404_v6 = vpop.permute.xlu1 %5074 }
 0x294   : > { %v2362_v57 = vpop.f32.mrb[27].mxu1  ;;  %10434 = vst [vmem:[#allocation35_spill] sm:$0xff] %v9404_v6 }
 0x295   : > { %v9406_v57 = vpop.permute.xlu0 %5068 }
 0x296   : > { %10435 = vst [vmem:[#allocation36_spill] sm:$0xff] %v9406_v57 }
 0x29a   : > { %v4659_v15 = vpop.f32.mrb[0].mxu0 }
 0x29b   : > { %v9353_v19 = vadd.f32 %v6587_v3, %v4659_v15  ;;  %v4661_v13 = vpop.f32.mrb[1].mxu0 }
 0x29c   : > { %v4662_v16 = vpop.f32.mrb[2].mxu0 }
 0x29d   : > { %7200 = vtanh.f32 %v9353_v19  ;;  %v9356_v40 = vadd.f32 %v6589_v43, %v4662_v16  ;;  %v4664_v0 = vpop.f32.mrb[3].mxu0  ;;  %v6605_v43 = vadd.f32 %v9345_v49, %v9320_v54  ;;  %v6607_v54 = vadd.f32 %v9345_v49, %v9326_v62 }
 0x29f   : > { %7202 = vtanh.f32 %v9356_v40 }
 0x2a2   : > { %v4667_v9 = vpop.f32.mrb[4].mxu0 }
 0x2a3   : > { %v9365_v27 = vadd.f32 %v6591_v25, %v4667_v9  ;;  %v4669_v31 = vpop.f32.mrb[5].mxu0  ;;  %v9417_v25 = vpop.permute.xlu1 %5078 }
 0x2a4   : > { %v4670_v2 = vpop.f32.mrb[6].mxu0  ;;  %10436 = vst [vmem:[#allocation19_spill] sm:$0xff] %v9417_v25  ;;  %v9422_v31 = vpop.permute.xlu0 %5072 }
 0x2a5   : > { %7204 = vtanh.f32 %v9365_v27  ;;  %v9370_v35 = vadd.f32 %v6593_v28, %v4670_v2  ;;  %v4672_v21 = vpop.f32.mrb[7].mxu0  ;;  %10437 = vst [vmem:[#allocation18_spill] sm:$0xff] %v9422_v31 }
 0x2a7   : > { %v7201_v36 = vpop.eup %7200  ;;  %7206 = vtanh.f32 %v9370_v35 }
 0x2a8   : > { %5161 = vrot.lane.b32.xlu1 %v7201_v36, %s7438_s28  ;;  %v9428_v36 = vpop.permute.xlu1 %5082 }
 0x2a9   : > { %v7203_v12 = vpop.eup %7202  ;;  %10438 = vst [vmem:[#allocation23_spill] sm:$0xff] %v9428_v36 }
 0x2aa   : > { %v4675_v59 = vpop.f32.mrb[8].mxu0  ;;  %5163 = vrot.lane.b32.xlu0 %v7203_v12, %s7438_s28 }
 0x2ab   : > { %v9380_v60 = vadd.f32 %v6595_v20, %v4675_v59  ;;  %v4677_v55 = vpop.f32.mrb[9].mxu0  ;;  %v6609_v20 = vadd.f32 %v9345_v49, %v9328_v30  ;;  %v6611_v30 = vadd.f32 %v9345_v49, %v9334_v56 }
 0x2ac   : > { %v4678_v10 = vpop.f32.mrb[10].mxu0 }
 0x2ad   : > { %7208 = vtanh.f32 %v9380_v60  ;;  %v9386_v4 = vadd.f32 %v6597_v29, %v4678_v10  ;;  %v4680_v48 = vpop.f32.mrb[11].mxu0  ;;  %v9435_v29 = vpop.permute.xlu0 %5076 }
 0x2ae   : > { %10439 = vst [vmem:[#allocation28_spill] sm:$0xff] %v9435_v29 }
 0x2af   : > { %v7205_v22 = vpop.eup %7204  ;;  %7210 = vtanh.f32 %v9386_v4 }
 0x2b0   : > { %5165 = vrot.lane.b32.xlu1 %v7205_v22, %s7438_s28  ;;  %v9442_v22 = vpop.permute.xlu1 %5388 }
 0x2b1   : > { %v7207_v5 = vpop.eup %7206 }
 0x2b2   : > { %v4683_v7 = vpop.f32.mrb[12].mxu0  ;;  %5167 = vrot.lane.b32.xlu0 %v7207_v5, %s7438_s28  ;;  %v9446_v5 = vpop.permute.xlu0 %5080 }
 0x2b3   : > { %v9398_v63 = vadd.f32 %v6599_v58, %v4683_v7  ;;  %v4685_v18 = vpop.f32.mrb[13].mxu0  ;;  %10440 = vst [vmem:[#allocation27_spill] sm:$0xff] %v9446_v5 }
 0x2b4   : > { %v4686_v61 = vpop.f32.mrb[14].mxu0 }
 0x2b5   : > { %7212 = vtanh.f32 %v9398_v63  ;;  %v9402_v50 = vadd.f32 %v6601_v24, %v4686_v61  ;;  %v4688_v11 = vpop.f32.mrb[15].mxu0  ;;  %v6613_v61 = vadd.f32 %v9345_v49, %v9338_v41 }
 0x2b7   : > { %v7209_v32 = vpop.eup %7208  ;;  %7214 = vtanh.f32 %v9402_v50 }
 0x2b8   : > { %5169 = vrot.lane.b32.xlu1 %v7209_v32, %s7438_s28 }
 0x2b9   : > { %v7211_v3 = vpop.eup %7210 }
 0x2ba   : > { %v4691_v15 = vpop.f32.mrb[16].mxu0  ;;  %5171 = vrot.lane.b32.xlu0 %v7211_v3, %s7438_s28 }
 0x2bb   : > { %v9414_v13 = vadd.f32 %v6603_v51, %v4691_v15  ;;  %v4693_v16 = vpop.f32.mrb[17].mxu0 }
 0x2bc   : > { %v4694_v0 = vpop.f32.mrb[18].mxu0 }
 0x2bd   : > { %7216 = vtanh.f32 %v9414_v13  ;;  %v9420_v9 = vadd.f32 %v6605_v43, %v4694_v0  ;;  %v4696_v28 = vpop.f32.mrb[19].mxu0  ;;  %v9458_v0 = vpop.permute.xlu1 %5398 }
 0x2bf   : > { %v7213_v14 = vpop.eup %7212  ;;  %7218 = vtanh.f32 %v9420_v9 }
 0x2c0   : > { %5173 = vrot.lane.b32.xlu1 %v7213_v14, %s7438_s28  ;;  %v9461_v14 = vpop.permute.xlu0 %5084 }
 0x2c1   : > { %v7215_v2 = vpop.eup %7214  ;;  %10441 = vst [vmem:[#allocation4_spill] sm:$0xff] %v9461_v14 }
 0x2c2   : > { %v4699_v21 = vpop.f32.mrb[20].mxu0  ;;  %5175 = vrot.lane.b32.xlu0 %v7215_v2, %s7438_s28 }
 0x2c3   : > { %v9432_v12 = vadd.f32 %v6607_v54, %v4699_v21  ;;  %v4701_v59 = vpop.f32.mrb[21].mxu0 }
 0x2c4   : > { %v4702_v55 = vpop.f32.mrb[22].mxu0 }
 0x2c5   : > { %7220 = vtanh.f32 %v9432_v12  ;;  %v9438_v10 = vadd.f32 %v6609_v20, %v4702_v55  ;;  %v4704_v62 = vpop.f32.mrb[23].mxu0 }
 0x2c7   : > { %v7217_v48 = vpop.eup %7216  ;;  %7222 = vtanh.f32 %v9438_v10 }
 0x2c8   : > { %5177 = vrot.lane.b32.xlu1 %v7217_v48, %s7438_s28 }
 0x2c9   : > { %v2684_v58 = vpop.f32.mrb[28].mxu1  ;;  %v7219_v7 = vpop.eup %7218 }
 0x2ca   : > { %v4707_v24 = vpop.f32.mrb[24].mxu0  ;;  %v2686_v18 = vpop.f32.mrb[29].mxu1  ;;  %5179 = vrot.lane.b32.xlu0 %v7219_v7, %s7438_s28  ;;  %v6615_v41 = vadd.f32 %v9345_v49, %v2684_v58 }
 0x2cb   : > { %v9450_v11 = vadd.f32 %v6611_v30, %v4707_v24  ;;  %v4709_v32 = vpop.f32.mrb[25].mxu0  ;;  %v2687_v51 = vpop.f32.mrb[30].mxu1 }
 0x2cc   : > { %v4710_v3 = vpop.f32.mrb[26].mxu0  ;;  %v2689_v15 = vpop.f32.mrb[31].mxu1  ;;  %v6617_v20 = vadd.f32 %v9345_v49, %v2687_v51 }
 0x2cd   : > { %7224 = vtanh.f32 %v9450_v11  ;;  %v9454_v56 = vadd.f32 %v6613_v61, %v4710_v3  ;;  %v4712_v43 = vpop.f32.mrb[27].mxu0  ;;  %v9472_v18 = vpop.permute.xlu1 %5403 }
 0x2ce   : > { %v9475_v51 = vpop.permute.xlu0 %5393 }
 0x2cf   : > { %v7221_v16 = vpop.eup %7220  ;;  %7226 = vtanh.f32 %v9454_v56 }
 0x2d0   : > { %5181 = vrot.lane.b32.xlu1 %v7221_v16, %s7438_s28 }
 0x2d1   : > { %v2692_v28 = vpop.f32.mrb[32].mxu1  ;;  %v7223_v54 = vpop.eup %7222 }
 0x2d2   : > { %v4715_v2 = vpop.f32.mrb[28].mxu0  ;;  %v2694_v21 = vpop.f32.mrb[33].mxu1  ;;  %5183 = vrot.lane.b32.xlu0 %v7223_v54, %s7438_s28  ;;  %v6619_v61 = vadd.f32 %v9345_v49, %v2692_v28 }
 0x2d3   : > { %v9464_v59 = vadd.f32 %v6615_v41, %v4715_v2  ;;  %v4717_v55 = vpop.f32.mrb[29].mxu0  ;;  %v2695_v62 = vpop.f32.mrb[34].mxu1 }
 0x2d4   : > { %v4718_v48 = vpop.f32.mrb[30].mxu0  ;;  %v2697_v30 = vpop.f32.mrb[35].mxu1  ;;  %v6621_v16 = vadd.f32 %v9345_v49, %v2695_v62 }
 0x2d5   : > { %7228 = vtanh.f32 %v9464_v59  ;;  %v9468_v7 = vadd.f32 %v6617_v20, %v4718_v48  ;;  %v4720_v58 = vpop.f32.mrb[31].mxu0  ;;  %v9486_v30 = vpop.permute.xlu1 %5413 }
 0x2d7   : > { %v7225_v24 = vpop.eup %7224  ;;  %7230 = vtanh.f32 %v9468_v7 }
 0x2d8   : > { %5185 = vrot.lane.b32.xlu1 %v7225_v24, %s7438_s28  ;;  %v9489_v24 = vpop.permute.xlu0 %5408 }
 0x2d9   : > { %v2700_v32 = vpop.f32.mrb[36].mxu1  ;;  %v7227_v3 = vpop.eup %7226 }
 0x2da   : > { %v4723_v15 = vpop.f32.mrb[32].mxu0  ;;  %v2702_v43 = vpop.f32.mrb[37].mxu1  ;;  %5187 = vrot.lane.b32.xlu0 %v7227_v3, %s7438_s28  ;;  %v6623_v62 = vadd.f32 %v9345_v49, %v2700_v32 }
 0x2db   : > { %v9478_v41 = vadd.f32 %v6619_v61, %v4723_v15  ;;  %v4725_v54 = vpop.f32.mrb[33].mxu0  ;;  %v2703_v2 = vpop.f32.mrb[38].mxu1 }
 0x2dc   : > { %v4726_v21 = vpop.f32.mrb[34].mxu0  ;;  %v2705_v20 = vpop.f32.mrb[39].mxu1  ;;  %v6625_v43 = vadd.f32 %v9345_v49, %v2703_v2 }
 0x2dd   : > { %7232 = vtanh.f32 %v9478_v41  ;;  %v9482_v55 = vadd.f32 %v6621_v16, %v4726_v21  ;;  %v4728_v28 = vpop.f32.mrb[35].mxu0 }
 0x2df   : > { %v7229_v48 = vpop.eup %7228  ;;  %7234 = vtanh.f32 %v9482_v55 }
 0x2e0   : > { %5189 = vrot.lane.b32.xlu1 %v7229_v48, %s7438_s28 }
 0x2e1   : > { %v2708_v58 = vpop.f32.mrb[40].mxu1  ;;  %v7231_v61 = vpop.eup %7230 }
 0x2e2   : > { %v4731_v3 = vpop.f32.mrb[36].mxu0  ;;  %v2710_v15 = vpop.f32.mrb[41].mxu1  ;;  %5191 = vrot.lane.b32.xlu0 %v7231_v61, %s7438_s28  ;;  %v6627_v2 = vadd.f32 %v9345_v49, %v2708_v58 }
 0x2e3   : > { %v9492_v16 = vadd.f32 %v6623_v62, %v4731_v3  ;;  %v4733_v54 = vpop.f32.mrb[37].mxu0  ;;  %v2711_v21 = vpop.f32.mrb[42].mxu1 }
 0x2e4   : > { %v4734_v20 = vpop.f32.mrb[38].mxu0  ;;  %v2713_v28 = vpop.f32.mrb[43].mxu1  ;;  %v6629_v36 = vadd.f32 %v9345_v49, %v2711_v21 }
 0x2e5   : > { %7236 = vtanh.f32 %v9492_v16  ;;  %v9496_v48 = vadd.f32 %v6625_v43, %v4734_v20  ;;  %v4736_v32 = vpop.f32.mrb[39].mxu0  ;;  %v9500_v15 = vpop.permute.xlu1 %5423 }
 0x2e6   : > { %v9503_v61 = vpop.permute.xlu0 %5418 }
 0x2e7   : > { %v7233_v14 = vpop.eup %7232  ;;  %7238 = vtanh.f32 %v9496_v48 }
 0x2e8   : > { %5193 = vrot.lane.b32.xlu1 %v7233_v14, %s7438_s28 }
 0x2e9   : > { %v2716_v62 = vpop.f32.mrb[44].mxu1  ;;  %v7235_v3 = vpop.eup %7234 }
 0x2ea   : > { %v4739_v54 = vpop.f32.mrb[40].mxu0  ;;  %v2718_v28 = vpop.f32.mrb[45].mxu1  ;;  %5195 = vrot.lane.b32.xlu0 %v7235_v3, %s7438_s28  ;;  %v6631_v21 = vadd.f32 %v9345_v49, %v2716_v62 }
 0x2eb   : > { %v9506_v43 = vadd.f32 %v6627_v2, %v4739_v54  ;;  %v4741_v20 = vpop.f32.mrb[41].mxu0  ;;  %v2719_v32 = vpop.f32.mrb[46].mxu1 }
 0x2ec   : > { %v4742_v5 = vpop.f32.mrb[42].mxu0  ;;  %v2721_v14 = vpop.f32.mrb[47].mxu1 }
 0x2ed   : > { %7240 = vtanh.f32 %v9506_v43  ;;  %v9510_v25 = vadd.f32 %v6629_v36, %v4742_v5  ;;  %v4744_v58 = vpop.f32.mrb[43].mxu0  ;;  %v9512_v6 = vpop.permute.xlu0 %5428  ;;  %v6633_v14 = vadd.f32 %v9345_v49, %v2719_v32 }
 0x2ee   : > { %v9517_v2 = vpop.permute.xlu1 %5433 }
 0x2ef   : > { %v7237_v29 = vpop.eup %7236  ;;  %7242 = vtanh.f32 %v9510_v25 }
 0x2f0   : > { %5197 = vrot.lane.b32.xlu1 %v7237_v29, %s7438_s28 }
 0x2f1   : > { %v2724_v3 = vpop.f32.mrb[48].mxu1  ;;  %v7239_v54 = vpop.eup %7238 }
 0x2f2   : > { %v4747_v28 = vpop.f32.mrb[44].mxu0  ;;  %v2726_v20 = vpop.f32.mrb[49].mxu1  ;;  %5199 = vrot.lane.b32.xlu0 %v7239_v54, %s7438_s28  ;;  %v6635_v32 = vadd.f32 %v9345_v49, %v2724_v3 }
 0x2f3   : > { %v9520_v36 = vadd.f32 %v6631_v21, %v4747_v28  ;;  %v4749_v5 = vpop.f32.mrb[45].mxu0  ;;  %v2727_v58 = vpop.f32.mrb[50].mxu1 }
 0x2f4   : > { %v4750_v31 = vpop.f32.mrb[46].mxu0  ;;  %v2728_v17 = vpop.f32.mrb[51].mxu1  ;;  %v6490_v58 = vmul.f32 -1.442695, %v9356_v40  ;;  %v4985_v40 = vld [vmem:[%s10199_s3 + $0xc0] sm:$0xff] }
 0x2f5   : > { %7244 = vtanh.f32 %v9520_v36  ;;  %v9524_v29 = vadd.f32 %v6633_v14, %v4750_v31  ;;  %v4752_v62 = vpop.f32.mrb[47].mxu0  ;;  %v9526_v57 = vpop.permute.xlu0 %5438  ;;  %v6489_v17 = vmul.f32 -1.442695, %v9353_v19 }
 0x2f6   : > { %v9528_v39 = vpop.permute.xlu1 %5443  ;;  %v6491_v62 = vmul.f32 -1.442695, %v9365_v27  ;;  %v4984_v27 = vld [vmem:[%s10199_s3 + $0xb8] sm:$0xff] }
 0x2f7   : > { %v7241_v8 = vpop.eup %7240  ;;  %7246 = vtanh.f32 %v9524_v29 }
 0x2f8   : > { %5201 = vrot.lane.b32.xlu1 %v7241_v8, %s7438_s28 }
 0x2f9   : > { %v7243_v21 = vpop.eup %7242  ;;  %v9534_v28 = vpop.permute.xlu0 %5448 }
 0x2fa   : > { %v4755_v54 = vpop.f32.mrb[48].mxu0  ;;  %5203 = vrot.lane.b32.xlu0 %v7243_v21, %s7438_s28  ;;  %v9541_v8 = vpop.permute.xlu1 %5453  ;;  %v6492_v21 = vmul.f32 -1.442695, %v9370_v35 }
 0x2fb   : > { %v9536_v31 = vadd.f32 %v6635_v32, %v4755_v54  ;;  %v4757_v20 = vpop.f32.mrb[49].mxu0 }
 0x2fc   : > { %v4758_v14 = vpop.f32.mrb[50].mxu0 }
 0x2fd   : > { %7248 = vtanh.f32 %v9536_v31  ;;  %v4759_v5 = vpop.f32.mrb[51].mxu0  ;;  %v9544_v19 = vpop.permute.xlu0 %5458 }
 0x2fe   : > { %7250 = vpow2.f32 %v6489_v17  ;;  %v9548_v32 = vpop.permute.xlu1 %5463  ;;  %v6493_v5 = vmul.f32 -1.442695, %v9380_v60 }
 0x2ff   : > { %v7245_v49 = vpop.eup %7244  ;;  %7252 = vpow2.f32 %v6490_v58 }
 0x300   : > { %5205 = vrot.lane.b32.xlu1 %v7245_v49, %s7438_s28  ;;  %7254 = vpow2.f32 %v6491_v62 }
 0x301   : > { %v7247_v3 = vpop.eup %7246  ;;  %v9554_v17 = vpop.permute.xlu0 %5468  ;;  %7256 = vpow2.f32 %v6492_v21  ;;  %v6495_v21 = vmul.f32 -1.442695, %v9398_v63  ;;  %v6497_v63 = vmul.f32 -1.442695, %v9414_v13 }
 0x302   : > { %5207 = vrot.lane.b32.xlu0 %v7247_v3, %s7438_s28  ;;  %10442 = vst [vmem:[#allocation5_spill] sm:$0xff] %v9554_v17  ;;  %v9560_v14 = vpop.permute.xlu1 %5473  ;;  %v6494_v3 = vmul.f32 -1.442695, %v9386_v4  ;;  %7258 = vpow2.f32 %v6493_v5 }
 0x303   : > { %10443 = vst [vmem:[#allocation26_spill] sm:$0xff] %v9560_v14 }
 0x305   : > { %v9563_v35 = vpop.permute.xlu0 %5478 }
 0x306   : > { %5508 = vperm.xlu0 %7017, %v4985_v40   ;;  %10444 = vst [vmem:[#allocation6_spill] sm:$0xff] %v9563_v35  ;;  %v9566_v40 = vpop.permute.xlu1 %5483 }
 0x307   : > { %v7249_v54 = vpop.eup %7248 }
 0x308   : > { %5209 = vrot.lane.b32.xlu1 %v7249_v54, %s7438_s28  ;;  %v7251_v20 = vpop.eup %7250 }
 0x309   : > { %v7253_v58 = vpop.eup %7252  ;;  %v4861_v49 = vadd.f32 1.0, %v7251_v20  ;;  %v9569_v14 = vpop.permute.xlu0 %5488  ;;  %v6496_v20 = vmul.f32 -1.442695, %v9402_v50 }
 0x30a   : > { %v4862_v62 = vadd.f32 1.0, %v7253_v58  ;;  %v7255_v54 = vpop.eup %7254  ;;  %10445 = vst [vmem:[#allocation7_spill] sm:$0xff] %v9569_v14 }
 0x30b   : > { %7260 = vrcp.f32 %v4861_v49  ;;  %v7257_v60 = vpop.eup %7256  ;;  %v4863_v17 = vadd.f32 1.0, %v7255_v54 }
 0x30c   : > { %5503 = vperm.xlu1 %7016, %v4984_v27   ;;  %7262 = vpow2.f32 %v6494_v3  ;;  %v9572_v27 = vpop.permute.xlu1 %5493  ;;  %v4864_v35 = vadd.f32 1.0, %v7257_v60  ;;  %v7259_v4 = vpop.eup %7258 }
 0x30d   : > { %7264 = vrcp.f32 %v4862_v62  ;;  %10446 = vst [vmem:[#allocation8_spill] sm:$0xff] %v9572_v27  ;;  %v9574_v5 = vpop.permute.xlu0 %5498  ;;  %v4865_v54 = vadd.f32 1.0, %v7259_v4  ;;  %v6499_v4 = vmul.f32 -1.442695, %v9432_v12 }
 0x30e   : > { %7266 = vpow2.f32 %v6495_v21  ;;  %10447 = vst [vmem:[#allocation9_spill] sm:$0xff] %v9574_v5 }
 0x30f   : > { %7268 = vrcp.f32 %v4863_v17  ;;  %v6498_v17 = vmul.f32 -1.442695, %v9420_v9 }
 0x310   : > { %7270 = vpow2.f32 %v6496_v20 }
 0x311   : > { %7272 = vrcp.f32 %v4864_v35 }
 0x312   : > { %7274 = vpow2.f32 %v6497_v63  ;;  %v6500_v63 = vmul.f32 -1.442695, %v9438_v10 }
 0x313   : > { %7276 = vrcp.f32 %v4865_v54 }
 0x314   : > { %7278 = vpow2.f32 %v6498_v17 }
 0x315   : > { %v9576_v58 = vpop.eup %7260 }
 0x316   : > { %v7263_v62 = vpop.eup %7262 }
 0x317   : > { %v9580_v50 = vpop.eup %7264  ;;  %v4866_v60 = vadd.f32 1.0, %v7263_v62 }
 0x318   : > { %v7267_v35 = vpop.eup %7266 }
 0x319   : > { %v9586_v13 = vpop.eup %7268  ;;  %7280 = vrcp.f32 %v4866_v60  ;;  %v4867_v5 = vadd.f32 1.0, %v7267_v35  ;;  %v6501_v60 = vmul.f32 -1.442695, %v9450_v11 }
 0x31a   : > { %v5162_v49 = vpop.permute.xlu1 %5161  ;;  %7282 = vpow2.f32 %v6499_v4 }
 0x31b   : > { %v5236_v3 = vmul.f32 %v9576_v58, %v5162_v49  ;;  %7284 = vrcp.f32 %v4867_v5  ;;  %v6502_v5 = vmul.f32 -1.442695, %v9454_v56 }
 0x31c   : > { %v5164_v27 = vpop.permute.xlu0 %5163  ;;  %7286 = vpow2.f32 %v6500_v63 }
 0x31d   : > { %5286 = vrot.lane.b32.xlu0 %v5236_v3, %s7438_s28  ;;  %v5237_v21 = vmul.f32 %v9580_v50, %v5164_v27  ;;  %v7271_v3 = vpop.eup %7270 }
 0x31e   : > { %v9590_v9 = vpop.eup %7272  ;;  %v4868_v54 = vadd.f32 1.0, %v7271_v3 }
 0x31f   : > { %5288 = vrot.lane.b32.xlu1 %v5237_v21, %s7438_s28  ;;  %v7275_v17 = vpop.eup %7274 }
 0x320   : > { %v9596_v12 = vpop.eup %7276  ;;  %7288 = vrcp.f32 %v4868_v54  ;;  %v6503_v54 = vmul.f32 -1.442695, %v9464_v59 }
 0x321   : > { %7290 = vpow2.f32 %v6501_v60  ;;  %v6504_v60 = vmul.f32 -1.442695, %v9468_v7 }
 0x322   : > { %v5166_v20 = vpop.permute.xlu1 %5165 }
 0x323   : > { %v5238_v49 = vmul.f32 %v9586_v13, %v5166_v20  ;;  %v7279_v20 = vpop.eup %7278 }
 0x324   : > { %v5168_v27 = vpop.permute.xlu0 %5167  ;;  %v9600_v10 = vpop.eup %7280  ;;  %v4870_v3 = vadd.f32 1.0, %v7279_v20 }
 0x325   : > { %5290 = vrot.lane.b32.xlu0 %v5238_v49, %s7438_s28  ;;  %v5239_v62 = vmul.f32 %v9590_v9, %v5168_v27  ;;  %v4869_v49 = vadd.f32 1.0, %v7275_v17  ;;  %v7283_v63 = vpop.eup %7282 }
 0x326   : > { %v9606_v11 = vpop.eup %7284 }
 0x327   : > { %5292 = vrot.lane.b32.xlu1 %v5239_v62, %s7438_s28  ;;  %7292 = vrcp.f32 %v4869_v49 }
 0x328   : > { %7294 = vpow2.f32 %v6502_v5 }
 0x329   : > { %7296 = vrcp.f32 %v4870_v3  ;;  %v6505_v3 = vmul.f32 -1.442695, %v9478_v41 }
 0x32a   : > { %v5170_v21 = vpop.permute.xlu1 %5169  ;;  %7298 = vpow2.f32 %v6503_v54  ;;  %v6506_v54 = vmul.f32 -1.442695, %v9482_v55 }
 0x32b   : > { %v5240_v35 = vmul.f32 %v9596_v12, %v5170_v21  ;;  %v7287_v21 = vpop.eup %7286 }
 0x32c   : > { %v5172_v27 = vpop.permute.xlu0 %5171  ;;  %v9610_v56 = vpop.eup %7288  ;;  %v4872_v49 = vadd.f32 1.0, %v7287_v21 }
 0x32d   : > { %5294 = vrot.lane.b32.xlu0 %v5240_v35, %s7438_s28  ;;  %v5241_v4 = vmul.f32 %v9600_v10, %v5172_v27  ;;  %v4871_v35 = vadd.f32 1.0, %v7283_v63  ;;  %v7291_v5 = vpop.eup %7290 }
 0x32f   : > { %5296 = vrot.lane.b32.xlu1 %v5241_v4, %s7438_s28  ;;  %7300 = vrcp.f32 %v4871_v35 }
 0x330   : > { %7302 = vpow2.f32 %v6504_v60 }
 0x331   : > { %v9616_v59 = vpop.eup %7292  ;;  %7304 = vrcp.f32 %v4872_v49  ;;  %v6507_v49 = vmul.f32 -1.442695, %v9492_v16 }
 0x332   : > { %v5174_v62 = vpop.permute.xlu1 %5173  ;;  %7306 = vpow2.f32 %v6505_v3  ;;  %v6508_v3 = vmul.f32 -1.442695, %v9496_v48 }
 0x333   : > { %v5242_v17 = vmul.f32 %v9606_v11, %v5174_v62  ;;  %v7295_v62 = vpop.eup %7294 }
 0x334   : > { %v5176_v27 = vpop.permute.xlu0 %5175  ;;  %v9620_v7 = vpop.eup %7296  ;;  %v4874_v35 = vadd.f32 1.0, %v7295_v62 }
 0x335   : > { %5298 = vrot.lane.b32.xlu0 %v5242_v17, %s7438_s28  ;;  %v5243_v20 = vmul.f32 %v9610_v56, %v5176_v27  ;;  %v4873_v17 = vadd.f32 1.0, %v7291_v5  ;;  %v7299_v60 = vpop.eup %7298 }
 0x337   : > { %5300 = vrot.lane.b32.xlu1 %v5243_v20, %s7438_s28  ;;  %7308 = vrcp.f32 %v4873_v17 }
 0x338   : > { %7310 = vpow2.f32 %v6506_v54 }
 0x339   : > { %v9626_v41 = vpop.eup %7300  ;;  %7312 = vrcp.f32 %v4874_v35  ;;  %v6509_v35 = vmul.f32 -1.442695, %v9506_v43 }
 0x33a   : > { %v5178_v4 = vpop.permute.xlu1 %5177  ;;  %7314 = vpow2.f32 %v6507_v49  ;;  %v6510_v49 = vmul.f32 -1.442695, %v9510_v25 }
 0x33b   : > { %v5244_v63 = vmul.f32 %v9616_v59, %v5178_v4  ;;  %v7303_v4 = vpop.eup %7302 }
 0x33c   : > { %v5180_v27 = vpop.permute.xlu0 %5179  ;;  %v9630_v55 = vpop.eup %7304  ;;  %v4876_v17 = vadd.f32 1.0, %v7303_v4 }
 0x33d   : > { %5302 = vrot.lane.b32.xlu0 %v5244_v63, %s7438_s28  ;;  %v5245_v21 = vmul.f32 %v9620_v7, %v5180_v27  ;;  %v4875_v63 = vadd.f32 1.0, %v7299_v60  ;;  %v7307_v54 = vpop.eup %7306 }
 0x33f   : > { %5304 = vrot.lane.b32.xlu1 %v5245_v21, %s7438_s28  ;;  %7316 = vrcp.f32 %v4875_v63 }
 0x340   : > { %7318 = vpow2.f32 %v6508_v3 }
 0x341   : > { %v9636_v16 = vpop.eup %7308  ;;  %7320 = vrcp.f32 %v4876_v17  ;;  %v6511_v17 = vmul.f32 -1.442695, %v9520_v36 }
 0x342   : > { %v5182_v20 = vpop.permute.xlu1 %5181  ;;  %7322 = vpow2.f32 %v6509_v35  ;;  %v6512_v35 = vmul.f32 -1.442695, %v9524_v29 }
 0x343   : > { %v5246_v5 = vmul.f32 %v9626_v41, %v5182_v20  ;;  %v7311_v20 = vpop.eup %7310 }
 0x344   : > { %v5184_v27 = vpop.permute.xlu0 %5183  ;;  %v9640_v48 = vpop.eup %7312  ;;  %v4878_v63 = vadd.f32 1.0, %v7311_v20 }
 0x345   : > { %5306 = vrot.lane.b32.xlu0 %v5246_v5, %s7438_s28  ;;  %v5247_v62 = vmul.f32 %v9630_v55, %v5184_v27  ;;  %v4877_v5 = vadd.f32 1.0, %v7307_v54  ;;  %v7315_v3 = vpop.eup %7314 }
 0x347   : > { %5308 = vrot.lane.b32.xlu1 %v5247_v62, %s7438_s28  ;;  %7324 = vrcp.f32 %v4877_v5 }
 0x348   : > { %7326 = vpow2.f32 %v6510_v49 }
 0x349   : > { %v9646_v43 = vpop.eup %7316  ;;  %7328 = vrcp.f32 %v4878_v63  ;;  %v6513_v63 = vmul.f32 -1.442695, %v9536_v31 }
 0x34a   : > { %v5186_v21 = vpop.permute.xlu1 %5185  ;;  %7330 = vpow2.f32 %v6511_v17 }
 0x34b   : > { %v5248_v60 = vmul.f32 %v9636_v16, %v5186_v21  ;;  %v7319_v21 = vpop.eup %7318 }
 0x34c   : > { %v5188_v27 = vpop.permute.xlu0 %5187  ;;  %v9650_v25 = vpop.eup %7320  ;;  %v4880_v5 = vadd.f32 1.0, %v7319_v21 }
 0x34d   : > { %5310 = vrot.lane.b32.xlu0 %v5248_v60, %s7438_s28  ;;  %v5249_v4 = vmul.f32 %v9640_v48, %v5188_v27  ;;  %v4879_v60 = vadd.f32 1.0, %v7315_v3  ;;  %v7323_v49 = vpop.eup %7322 }
 0x34f   : > { %5312 = vrot.lane.b32.xlu1 %v5249_v4, %s7438_s28  ;;  %7332 = vrcp.f32 %v4879_v60 }
 0x350   : > { %7334 = vpow2.f32 %v6512_v35 }
 0x351   : > { %v9656_v36 = vpop.eup %7324  ;;  %7336 = vrcp.f32 %v4880_v5 }
 0x352   : > { %v5190_v62 = vpop.permute.xlu1 %5189  ;;  %7338 = vpow2.f32 %v6513_v63 }
 0x353   : > { %v5250_v54 = vmul.f32 %v9646_v43, %v5190_v62  ;;  %v7327_v62 = vpop.eup %7326 }
 0x354   : > { %v5192_v27 = vpop.permute.xlu0 %5191  ;;  %v9660_v29 = vpop.eup %7328  ;;  %v4882_v21 = vadd.f32 1.0, %v7327_v62 }
 0x355   : > { %5314 = vrot.lane.b32.xlu0 %v5250_v54, %s7438_s28  ;;  %v5251_v20 = vmul.f32 %v9650_v25, %v5192_v27  ;;  %v4881_v54 = vadd.f32 1.0, %v7323_v49  ;;  %v7331_v60 = vpop.eup %7330 }
 0x356   : > { %v4883_v49 = vadd.f32 1.0, %v7331_v60 }
 0x357   : > { %5316 = vrot.lane.b32.xlu1 %v5251_v20, %s7438_s28  ;;  %7340 = vrcp.f32 %v4881_v54 }
 0x358   : > { %7342 = vrcp.f32 %v4882_v21 }
 0x359   : > { %v9665_v35 = vpop.eup %7332  ;;  %7344 = vrcp.f32 %v4883_v49 }
 0x35a   : > { %v5194_v4 = vpop.permute.xlu1 %5193  ;;  %v7335_v5 = vpop.eup %7334 }
 0x35b   : > { %v5252_v3 = vmul.f32 %v9656_v36, %v5194_v4  ;;  %v9668_v4 = vpop.eup %7336  ;;  %v4884_v63 = vadd.f32 1.0, %v7335_v5 }
 0x35c   : > { %v5196_v27 = vpop.permute.xlu0 %5195  ;;  %v7339_v62 = vpop.eup %7338 }
 0x35d   : > { %5318 = vrot.lane.b32.xlu0 %v5252_v3, %s7438_s28  ;;  %v5253_v17 = vmul.f32 %v9660_v29, %v5196_v27  ;;  %7346 = vrcp.f32 %v4884_v63  ;;  %v4885_v21 = vadd.f32 1.0, %v7339_v62 }
 0x35f   : > { %5320 = vrot.lane.b32.xlu1 %v5253_v17, %s7438_s28  ;;  %7348 = vrcp.f32 %v4885_v21 }
 0x361   : > { %v9673_v54 = vpop.eup %7340 }
 0x362   : > { %v5198_v31 = vpop.permute.xlu1 %5197  ;;  %v9676_v60 = vpop.eup %7342 }
 0x363   : > { %v5254_v20 = vmul.f32 %v9665_v35, %v5198_v31  ;;  %10448 = vst [vmem:[#allocation10_spill] sm:$0xff] %v9676_v60 }
 0x364   : > { %v5200_v14 = vpop.permute.xlu0 %5199 }
 0x365   : > { %5322 = vrot.lane.b32.xlu0 %v5254_v20, %s7438_s28  ;;  %v5255_v3 = vmul.f32 %v9668_v4, %v5200_v14  ;;  %v9681_v14 = vpop.eup %7344 }
 0x366   : > { %10449 = vst [vmem:[#allocation11_spill] sm:$0xff] %v9681_v14 }
 0x367   : > { %5324 = vrot.lane.b32.xlu1 %v5255_v3, %s7438_s28  ;;  %v9684_v3 = vpop.eup %7346 }
 0x368   : > { %10450 = vst [vmem:[#allocation12_spill] sm:$0xff] %v9684_v3 }
 0x36a   : > { %v5202_v27 = vpop.permute.xlu1 %5201 }
 0x36b   : > { %v5256_v17 = vmul.f32 %v9673_v54, %v5202_v27  ;;  %v9689_v27 = vpop.eup %7348 }
 0x36c   : > { %v5204_v31 = vpop.permute.xlu0 %5203 }
 0x36d   : > { %5326 = vrot.lane.b32.xlu0 %v5256_v17, %s7438_s28  ;;  %v5257_v20 = vmul.f32 %v9676_v60, %v5204_v31 }
 0x36f   : > { %5328 = vrot.lane.b32.xlu1 %v5257_v20, %s7438_s28  ;;  %v5111_v20 = vmul.f32 %v9576_v58, %v9324_v47 }
 0x372   : > { %v5206_v5 = vpop.permute.xlu1 %5205 }
 0x373   : > { %v5258_v49 = vmul.f32 %v9681_v14, %v5206_v5 }
 0x374   : > { %v5208_v63 = vpop.permute.xlu0 %5207 }
 0x375   : > { %5330 = vrot.lane.b32.xlu0 %v5258_v49, %s7438_s28  ;;  %v5259_v62 = vmul.f32 %v9684_v3, %v5208_v63  ;;  %v5112_v63 = vmul.f32 %v9580_v50, %v9332_v37  ;;  %v5114_v37 = vmul.f32 %v9590_v9, %v9322_v52  ;;  %v5116_v52 = vmul.f32 %v9600_v10, %v9330_v42 }
 0x377   : > { %5332 = vrot.lane.b32.xlu1 %v5259_v62, %s7438_s28 }
 0x37a   : > { %v5210_v17 = vpop.permute.xlu1 %5209 }
 0x37b   : > { %v5260_v21 = vmul.f32 %v9689_v27, %v5210_v17 }
 0x37d   : > { %5334 = vrot.lane.b32.xlu0 %v5260_v21, %s7438_s28  ;;  %v5113_v21 = vmul.f32 %v9586_v13, %v9316_v33  ;;  %v5115_v33 = vmul.f32 %v9596_v12, %v9340_v23 }
 0x385   : > { %v9693_v31 = vpop.permute.xlu0 %5508 }
 0x38b   : > { %v9697_v5 = vpop.permute.xlu1 %5503 }
 0x38f   : > { %v5287_v14 = vpop.permute.xlu0 %5286 }
 0x390   : > { %v5361_v49 = vadd.f32 %v5287_v14, %v5111_v20 }
 0x391   : > { %v5289_v3 = vpop.permute.xlu1 %5288 }
 0x392   : > { %v5511_v62 = vmul.f32 %v9442_v22, %v5361_v49  ;;  %v5362_v60 = vadd.f32 %v5289_v3, %v5112_v63 }
 0x394   : > { %5711 = vrot.lane.b32.xlu0 %v5511_v62, %s7439_s22  ;;  %v5512_v17 = vmul.f32 %v9475_v51, %v5362_v60 }
 0x396   : > { %7350 = vtanh.f32 %v5512_v17  ;;  %5713 = vrot.lane.b32.xlu1 %v5512_v17, %s7439_s22 }
 0x397   : > { %v5291_v47 = vpop.permute.xlu0 %5290  ;;  %7352 = vtanh.f32 %v5511_v62 }
 0x398   : > { %v5363_v14 = vadd.f32 %v5291_v47, %v5113_v21  ;;  %v5117_v21 = vmul.f32 %v9606_v11, %v9350_v53 }
 0x399   : > { %v5293_v3 = vpop.permute.xlu1 %5292 }
 0x39a   : > { %v5513_v22 = vmul.f32 %v9458_v0, %v5363_v14  ;;  %v5364_v20 = vadd.f32 %v5293_v3, %v5114_v37  ;;  %v5118_v14 = vmul.f32 %v9610_v56, %v9336_v26 }
 0x39c   : > { %5715 = vrot.lane.b32.xlu0 %v5513_v22, %s7439_s22  ;;  %v5514_v51 = vmul.f32 %v9472_v18, %v5364_v20  ;;  %v5119_v20 = vmul.f32 %v9616_v59, %v9360_v46 }
 0x39e   : > { %7354 = vtanh.f32 %v5514_v51  ;;  %5717 = vrot.lane.b32.xlu1 %v5514_v51, %s7439_s22 }
 0x39f   : > { %v5295_v60 = vpop.permute.xlu0 %5294  ;;  %7356 = vtanh.f32 %v5513_v22 }
 0x3a0   : > { %v5365_v49 = vadd.f32 %v5295_v60, %v5115_v33  ;;  %v7351_v63 = vpop.eup %7350  ;;  %v5120_v33 = vmul.f32 %v9620_v7, %v9347_v45 }
 0x3a1   : > { %v7353_v0 = vpop.eup %7352  ;;  %v5297_v17 = vpop.permute.xlu1 %5296  ;;  %5588 = vrot.lane.b32.xlu0 %v7351_v63, %s7438_s28 }
 0x3a2   : > { %v5515_v62 = vmul.f32 %v9489_v24, %v5365_v49  ;;  %v5366_v18 = vadd.f32 %v5297_v17, %v5116_v52  ;;  %5586 = vrot.lane.b32.xlu1 %v7353_v0, %s7438_s28  ;;  %v5121_v52 = vmul.f32 %v9626_v41, %v9372_v1 }
 0x3a4   : > { %v5516_v23 = vmul.f32 %v9486_v30, %v5366_v18 }
 0x3a5   : > { %5719 = vrot.lane.b32.xlu0 %v5515_v62, %s7439_s22 }
 0x3a6   : > { %7358 = vtanh.f32 %v5516_v23  ;;  %5721 = vrot.lane.b32.xlu1 %v5516_v23, %s7439_s22 }
 0x3a7   : > { %v5299_v42 = vpop.permute.xlu0 %5298  ;;  %7360 = vtanh.f32 %v5515_v62  ;;  %v5122_v62 = vmul.f32 %v9630_v55, %v9358_v34 }
 0x3a8   : > { %v5367_v47 = vadd.f32 %v5299_v42, %v5117_v21  ;;  %v7355_v24 = vpop.eup %7354  ;;  %v5123_v21 = vmul.f32 %v9636_v16, %v9383_v44 }
 0x3a9   : > { %v7357_v37 = vpop.eup %7356  ;;  %v5301_v3 = vpop.permute.xlu1 %5300  ;;  %5592 = vrot.lane.b32.xlu0 %v7355_v24, %s7438_s28 }
 0x3aa   : > { %v5517_v22 = vmul.f32 %v9503_v61, %v5367_v47  ;;  %v5368_v30 = vadd.f32 %v5301_v3, %v5118_v14  ;;  %5590 = vrot.lane.b32.xlu1 %v7357_v37, %s7438_s28  ;;  %v5124_v47 = vmul.f32 %v9640_v48, %v9367_v38 }
 0x3ac   : > { %v5518_v53 = vmul.f32 %v9500_v15, %v5368_v30 }
 0x3ad   : > { %5723 = vrot.lane.b32.xlu0 %v5517_v22, %s7439_s22 }
 0x3ae   : > { %7362 = vtanh.f32 %v5518_v53  ;;  %5725 = vrot.lane.b32.xlu1 %v5518_v53, %s7439_s22  ;;  %v10452_v53 = vld [vmem:[#allocation30_spill] sm:$0xff] }
 0x3af   : > { %v5303_v26 = vpop.permute.xlu0 %5302  ;;  %7364 = vtanh.f32 %v5517_v22  ;;  %v10451_v22 = vld [vmem:[#allocation32_spill] sm:$0xff] }
 0x3b0   : > { %v5369_v51 = vadd.f32 %v5303_v26, %v5119_v20  ;;  %v7359_v61 = vpop.eup %7358  ;;  %v5125_v3 = vmul.f32 %v9646_v43, %v10451_v22  ;;  %v5126_v20 = vmul.f32 %v9650_v25, %v10452_v53 }
 0x3b1   : > { %v7361_v60 = vpop.eup %7360  ;;  %v5305_v63 = vpop.permute.xlu1 %5304  ;;  %5596 = vrot.lane.b32.xlu0 %v7359_v61, %s7438_s28 }
 0x3b2   : > { %v5519_v49 = vmul.f32 %v9512_v6, %v5369_v51  ;;  %v5370_v15 = vadd.f32 %v5305_v63, %v5120_v33  ;;  %5594 = vrot.lane.b32.xlu1 %v7361_v60, %s7438_s28 }
 0x3b4   : > { %v5520_v46 = vmul.f32 %v9517_v2, %v5370_v15 }
 0x3b5   : > { %5727 = vrot.lane.b32.xlu0 %v5519_v49, %s7439_s22 }
 0x3b6   : > { %7366 = vtanh.f32 %v5520_v46  ;;  %5729 = vrot.lane.b32.xlu1 %v5520_v46, %s7439_s22 }
 0x3b7   : > { %v5307_v45 = vpop.permute.xlu0 %5306  ;;  %7368 = vtanh.f32 %v5519_v49  ;;  %v10453_v49 = vld [vmem:[#allocation36_spill] sm:$0xff] }
 0x3b8   : > { %v5371_v0 = vadd.f32 %v5307_v45, %v5121_v52  ;;  %v7363_v6 = vpop.eup %7362  ;;  %v5127_v63 = vmul.f32 %v9656_v36, %v10453_v49  ;;  %v10454_v52 = vld [vmem:[#allocation31_spill] sm:$0xff] }
 0x3b9   : > { %v7365_v17 = vpop.eup %7364  ;;  %v5309_v23 = vpop.permute.xlu1 %5308  ;;  %5600 = vrot.lane.b32.xlu0 %v7363_v6, %s7438_s28  ;;  %v5128_v45 = vmul.f32 %v9660_v29, %v10454_v52  ;;  %v10466_v52 = vld [vmem:[#allocation11_spill] sm:$0xff] }
 0x3ba   : > { %v5521_v18 = vmul.f32 %v9526_v57, %v5371_v0  ;;  %v5372_v2 = vadd.f32 %v5309_v23, %v5122_v62  ;;  %5598 = vrot.lane.b32.xlu1 %v7365_v17, %s7438_s28  ;;  %v10455_v0 = vld [vmem:[#allocation5_spill] sm:$0xff]  ;;  %v10456_v17 = vld [vmem:[#allocation26_spill] sm:$0xff] }
 0x3bc   : > { %v5522_v1 = vmul.f32 %v9528_v39, %v5372_v2  ;;  %v10457_v2 = vld [vmem:[#allocation18_spill] sm:$0xff] }
 0x3bd   : > { %5731 = vrot.lane.b32.xlu0 %v5521_v18, %s7439_s22 }
 0x3be   : > { %7370 = vtanh.f32 %v5522_v1  ;;  %5733 = vrot.lane.b32.xlu1 %v5522_v1, %s7439_s22  ;;  %v5129_v1 = vmul.f32 %v9665_v35, %v10457_v2 }
 0x3bf   : > { %v5311_v34 = vpop.permute.xlu0 %5310  ;;  %7372 = vtanh.f32 %v5521_v18 }
 0x3c0   : > { %v5373_v42 = vadd.f32 %v5311_v34, %v5123_v21  ;;  %v7367_v57 = vpop.eup %7366 }
 0x3c1   : > { %v7369_v24 = vpop.eup %7368  ;;  %v5313_v37 = vpop.permute.xlu1 %5312  ;;  %5604 = vrot.lane.b32.xlu0 %v7367_v57, %s7438_s28  ;;  %v10458_v57 = vld [vmem:[#allocation35_spill] sm:$0xff] }
 0x3c2   : > { %v5523_v14 = vmul.f32 %v9534_v28, %v5373_v42  ;;  %v5374_v39 = vadd.f32 %v5313_v37, %v5124_v47  ;;  %5602 = vrot.lane.b32.xlu1 %v7369_v24, %s7438_s28  ;;  %v5130_v47 = vmul.f32 %v9668_v4, %v10458_v57  ;;  %v10459_v24 = vld [vmem:[#allocation6_spill] sm:$0xff] }
 0x3c4   : > { %7374 = vtanh.f32 %v5523_v14  ;;  %v5524_v44 = vmul.f32 %v9541_v8, %v5374_v39 }
 0x3c5   : > { %5735 = vrot.lane.b32.xlu0 %v5523_v14, %s7439_s22 }
 0x3c6   : > { %7376 = vtanh.f32 %v5524_v44  ;;  %5737 = vrot.lane.b32.xlu1 %v5524_v44, %s7439_s22 }
 0x3c7   : > { %v5315_v38 = vpop.permute.xlu0 %5314 }
 0x3c8   : > { %v5375_v30 = vadd.f32 %v5315_v38, %v5125_v3  ;;  %v7371_v28 = vpop.eup %7370  ;;  %v10460_v3 = vld [vmem:[#allocation28_spill] sm:$0xff] }
 0x3c9   : > { %v7373_v26 = vpop.eup %7372  ;;  %v5317_v61 = vpop.permute.xlu1 %5316  ;;  %5608 = vrot.lane.b32.xlu0 %v7371_v28, %s7438_s28  ;;  %v5131_v38 = vmul.f32 %v9673_v54, %v10460_v3 }
 0x3ca   : > { %v9768_v51 = vmul.f32 %v9544_v19, %v5375_v30  ;;  %v5376_v8 = vadd.f32 %v5317_v61, %v5126_v20  ;;  %5606 = vrot.lane.b32.xlu1 %v7373_v26, %s7438_s28  ;;  %v10461_v20 = vld [vmem:[#allocation19_spill] sm:$0xff]  ;;  %v10462_v26 = vld [vmem:[#allocation10_spill] sm:$0xff] }
 0x3cb   : > { %v5132_v61 = vmul.f32 %v10462_v26, %v10461_v20 }
 0x3cc   : > { %7378 = vtanh.f32 %v9768_v51  ;;  %v9774_v33 = vmul.f32 %v9548_v32, %v5376_v8  ;;  %v10463_v8 = vld [vmem:[#allocation7_spill] sm:$0xff] }
 0x3ce   : > { %v7375_v60 = vpop.eup %7374  ;;  %7380 = vtanh.f32 %v9774_v33 }
 0x3cf   : > { %v5319_v15 = vpop.permute.xlu0 %5318  ;;  %5610 = vrot.lane.b32.xlu1 %v7375_v60, %s7438_s28 }
 0x3d0   : > { %v5377_v19 = vadd.f32 %v5319_v15, %v5127_v63  ;;  %v7377_v46 = vpop.eup %7376 }
 0x3d1   : > { %v5321_v62 = vpop.permute.xlu1 %5320  ;;  %5612 = vrot.lane.b32.xlu0 %v7377_v46, %s7438_s28  ;;  %v10465_v46 = vld [vmem:[#allocation27_spill] sm:$0xff] }
 0x3d2   : > { %v9783_v6 = vmul.f32 %v10455_v0, %v5377_v19  ;;  %v5378_v32 = vadd.f32 %v5321_v62, %v5128_v45  ;;  %v5133_v45 = vmul.f32 %v10466_v52, %v10465_v46 }
 0x3d4   : > { %7382 = vtanh.f32 %v9783_v6  ;;  %v5528_v18 = vmul.f32 %v10456_v17, %v5378_v32  ;;  %v10467_v17 = vld [vmem:[#allocation23_spill] sm:$0xff] }
 0x3d6   : > { %v7379_v23 = vpop.eup %7378  ;;  %7384 = vtanh.f32 %v5528_v18 }
 0x3d7   : > { %v5323_v21 = vpop.permute.xlu0 %5322  ;;  %5614 = vrot.lane.b32.xlu1 %v7379_v23, %s7438_s28  ;;  %v10468_v23 = vld [vmem:[#allocation12_spill] sm:$0xff] }
 0x3d8   : > { %v5379_v34 = vadd.f32 %v5323_v21, %v5129_v1  ;;  %v7381_v42 = vpop.eup %7380  ;;  %v5134_v2 = vmul.f32 %v10468_v23, %v10467_v17  ;;  %v10469_v1 = vld [vmem:[#allocation9_spill] sm:$0xff] }
 0x3d9   : > { %v5325_v37 = vpop.permute.xlu1 %5324  ;;  %5616 = vrot.lane.b32.xlu0 %v7381_v42, %s7438_s28 }
 0x3da   : > { %v5529_v14 = vmul.f32 %v10459_v24, %v5379_v34  ;;  %v5380_v39 = vadd.f32 %v5325_v37, %v5130_v47  ;;  %v10470_v24 = vld [vmem:[#allocation4_spill] sm:$0xff] }
 0x3db   : > { %v5135_v37 = vmul.f32 %v9689_v27, %v10470_v24 }
 0x3dc   : > { %7386 = vtanh.f32 %v5529_v14  ;;  %v5530_v44 = vmul.f32 %v9566_v40, %v5380_v39  ;;  %v10464_v40 = vld [vmem:[#allocation8_spill] sm:$0xff] }
 0x3de   : > { %v7383_v22 = vpop.eup %7382  ;;  %7388 = vtanh.f32 %v5530_v44 }
 0x3df   : > { %v5327_v30 = vpop.permute.xlu0 %5326  ;;  %5618 = vrot.lane.b32.xlu1 %v7383_v22, %s7438_s28 }
 0x3e0   : > { %v5381_v28 = vadd.f32 %v5327_v30, %v5131_v38  ;;  %v7385_v53 = vpop.eup %7384 }
 0x3e1   : > { %v5329_v49 = vpop.permute.xlu1 %5328  ;;  %5620 = vrot.lane.b32.xlu0 %v7385_v53, %s7438_s28 }
 0x3e2   : > { %v5531_v60 = vmul.f32 %v10463_v8, %v5381_v28  ;;  %v5382_v63 = vadd.f32 %v5329_v49, %v5132_v61 }
 0x3e4   : > { %7390 = vtanh.f32 %v5531_v60  ;;  %v9804_v15 = vmul.f32 %v10464_v40, %v5382_v63 }
 0x3e6   : > { %v7387_v19 = vpop.eup %7386  ;;  %7392 = vtanh.f32 %v9804_v15 }
 0x3e7   : > { %v5331_v0 = vpop.permute.xlu0 %5330  ;;  %5622 = vrot.lane.b32.xlu1 %v7387_v19, %s7438_s28 }
 0x3e8   : > { %v5383_v62 = vadd.f32 %v5331_v0, %v5133_v45  ;;  %v7389_v32 = vpop.eup %7388 }
 0x3e9   : > { %v5333_v34 = vpop.permute.xlu1 %5332  ;;  %5624 = vrot.lane.b32.xlu0 %v7389_v32, %s7438_s28 }
 0x3ea   : > { %v9813_v21 = vmul.f32 %v10469_v1, %v5383_v62  ;;  %v5384_v42 = vadd.f32 %v5333_v34, %v5134_v2 }
 0x3ec   : > { %7394 = vtanh.f32 %v9813_v21  ;;  %v9818_v57 = vmul.f32 %v9697_v5, %v5384_v42 }
 0x3ee   : > { %v7391_v47 = vpop.eup %7390  ;;  %7396 = vtanh.f32 %v9818_v57 }
 0x3ef   : > { %5626 = vrot.lane.b32.xlu1 %v7391_v47, %s7438_s28  ;;  %v5335_v39 = vpop.permute.xlu0 %5334 }
 0x3f0   : > { %v5385_v22 = vadd.f32 %v5335_v39, %v5135_v37  ;;  %v7393_v3 = vpop.eup %7392 }
 0x3f1   : > { %5628 = vrot.lane.b32.xlu0 %v7393_v3, %s7438_s28 }
 0x3f2   : > { %v9825_v38 = vmul.f32 %v9693_v31, %v5385_v22 }
 0x3f4   : > { %7398 = vtanh.f32 %v9825_v38 }
 0x3f6   : > { %v7395_v5 = vpop.eup %7394 }
 0x3f7   : > { %5630 = vrot.lane.b32.xlu1 %v7395_v5, %s7438_s28 }
 0x3f8   : > { %v7397_v30 = vpop.eup %7396 }
 0x3f9   : > { %5632 = vrot.lane.b32.xlu0 %v7397_v30, %s7438_s28 }
 0x3fd   : > { %5739 = vrot.lane.b32.xlu0 %v9768_v51, %s7439_s22 }
 0x3fe   : > { %v7399_v28 = vpop.eup %7398 }
 0x3ff   : > { %5634 = vrot.lane.b32.xlu1 %v7399_v28, %s7438_s28  ;;  %s7440_s28 = smov 64  }
 0x401   : > { %5743 = vrot.lane.b32.xlu0 %v9783_v6, %s7439_s22 }
 0x403   : > { %5741 = vrot.lane.b32.xlu1 %v9774_v33, %s7439_s22 }
 0x405   : > { %5745 = vrot.lane.b32.xlu0 %v5528_v18, %s7439_s22 }
 0x406   : > { %v9839_v31 = vpop.permute.xlu0 %5711 }
 0x407   : > { %5786 = vst.msk [vmem:[#allocation3] sm:$0xff] %vm808_vm5, %v9839_v31  ;;  %5747 = vrot.lane.b32.xlu1 %v5529_v14, %s7439_s22  ;;  %6049 = vst.msk [vmem:[%s10201_s5] sm:$0xff] (!%p6539_p5), %vm808_vm5, %v9839_v31 }
 0x408   : > { %v9844_v53 = vpop.permute.xlu1 %5713 }
 0x409   : > { %5787 = vst.msk [vmem:[#allocation3 + $0x8] sm:$0xff] %vm808_vm5, %v9844_v53  ;;  %5749 = vrot.lane.b32.xlu0 %v5530_v44, %s7439_s22  ;;  %6050 = vst.msk [vmem:[%s10201_s5 + $0x8] sm:$0xff] (!%p6539_p5), %vm808_vm5, %v9844_v53 }
 0x40b   : > { %5751 = vrot.lane.b32.xlu1 %v5531_v60, %s7439_s22 }
 0x40e   : > { %v9850_v51 = vpop.permute.xlu0 %5715 }
 0x40f   : > { %5788 = vst.msk [vmem:[#allocation3 + $0x10] sm:$0xff] %vm808_vm5, %v9850_v51  ;;  %6051 = vst.msk [vmem:[%s10201_s5 + $0x10] sm:$0xff] (!%p6539_p5), %vm808_vm5, %v9850_v51 }
 0x410   : > { %v9854_v33 = vpop.permute.xlu1 %5717 }
 0x411   : > { %5789 = vst.msk [vmem:[#allocation3 + $0x18] sm:$0xff] %vm808_vm5, %v9854_v33  ;;  %6052 = vst.msk [vmem:[%s10201_s5 + $0x18] sm:$0xff] (!%p6539_p5), %vm808_vm5, %v9854_v33 }
 0x413   : > { %v5589_v6 = vpop.permute.xlu0 %5588 }
 0x414   : > { %v5662_v18 = vmul.f32 %v9580_v50, %v5589_v6  ;;  %v5587_v14 = vpop.permute.xlu1 %5586 }
 0x415   : > { %v5661_v20 = vmul.f32 %v9576_v58, %v5587_v14 }
 0x416   : > { %v6543_v61 = vpack.c.bf16 %v5662_v18, %v5662_v18 }
 0x417   : > { %v6542_v44 = vpack.c.bf16 %v5661_v20, %v5661_v20  ;;  %v9860_v8 = vpop.permute.xlu0 %5719 }
 0x418   : > { %5790 = vst.msk [vmem:[#allocation3 + $0x20] sm:$0xff] %vm808_vm5, %v9860_v8  ;;  %v9864_v60 = vpop.permute.xlu1 %5721  ;;  %5889 = vrot.lane.b32.xlu0 %v6543_v61, %s7440_s28  ;;  %6053 = vst.msk [vmem:[%s10201_s5 + $0x20] sm:$0xff] (!%p6539_p5), %vm808_vm5, %v9860_v8 }
 0x419   : > { %5791 = vst.msk [vmem:[#allocation3 + $0x28] sm:$0xff] %vm808_vm5, %v9864_v60  ;;  %5887 = vrot.lane.b32.xlu1 %v6542_v44, %s7440_s28  ;;  %6054 = vst.msk [vmem:[%s10201_s5 + $0x28] sm:$0xff] (!%p6539_p5), %vm808_vm5, %v9864_v60 }
 0x41b   : > { %v5593_v50 = vpop.permute.xlu0 %5592 }
 0x41c   : > { %v5664_v58 = vmul.f32 %v9590_v9, %v5593_v50  ;;  %v5591_v49 = vpop.permute.xlu1 %5590 }
 0x41d   : > { %v5663_v63 = vmul.f32 %v9586_v13, %v5591_v49 }
 0x41e   : > { %v6545_v40 = vpack.c.bf16 %v5664_v58, %v5664_v58 }
 0x41f   : > { %v6544_v19 = vpack.c.bf16 %v5663_v63, %v5663_v63  ;;  %v9872_v46 = vpop.permute.xlu0 %5723 }
 0x420   : > { %5792 = vst.msk [vmem:[#allocation3 + $0x30] sm:$0xff] %vm808_vm5, %v9872_v46  ;;  %v9876_v45 = vpop.permute.xlu1 %5725  ;;  %5893 = vrot.lane.b32.xlu0 %v6545_v40, %s7440_s28  ;;  %6055 = vst.msk [vmem:[%s10201_s5 + $0x30] sm:$0xff] (!%p6539_p5), %vm808_vm5, %v9872_v46 }
 0x421   : > { %5793 = vst.msk [vmem:[#allocation3 + $0x38] sm:$0xff] %vm808_vm5, %v9876_v45  ;;  %5891 = vrot.lane.b32.xlu1 %v6544_v19, %s7440_s28  ;;  %6056 = vst.msk [vmem:[%s10201_s5 + $0x38] sm:$0xff] (!%p6539_p5), %vm808_vm5, %v9876_v45 }
 0x423   : > { %v5597_v9 = vpop.permute.xlu0 %5596 }
 0x424   : > { %v5666_v0 = vmul.f32 %v9600_v10, %v5597_v9  ;;  %v5595_v13 = vpop.permute.xlu1 %5594 }
 0x425   : > { %v5665_v62 = vmul.f32 %v9596_v12, %v5595_v13 }
 0x426   : > { %v6547_v32 = vpack.c.bf16 %v5666_v0, %v5666_v0 }
 0x427   : > { %v6546_v17 = vpack.c.bf16 %v5665_v62, %v5665_v62  ;;  %v9884_v2 = vpop.permute.xlu0 %5727 }
 0x428   : > { %5794 = vst.msk [vmem:[#allocation3 + $0x40] sm:$0xff] %vm808_vm5, %v9884_v2  ;;  %v9888_v1 = vpop.permute.xlu1 %5729  ;;  %5897 = vrot.lane.b32.xlu0 %v6547_v32, %s7440_s28  ;;  %6057 = vst.msk [vmem:[%s10201_s5 + $0x40] sm:$0xff] (!%p6539_p5), %vm808_vm5, %v9884_v2 }
 0x429   : > { %5795 = vst.msk [vmem:[#allocation3 + $0x48] sm:$0xff] %vm808_vm5, %v9888_v1  ;;  %5895 = vrot.lane.b32.xlu1 %v6546_v17, %s7440_s28  ;;  %6058 = vst.msk [vmem:[%s10201_s5 + $0x48] sm:$0xff] (!%p6539_p5), %vm808_vm5, %v9888_v1 }
 0x42b   : > { %v5601_v10 = vpop.permute.xlu0 %5600 }
 0x42c   : > { %v5668_v34 = vmul.f32 %v9610_v56, %v5601_v10  ;;  %v5599_v12 = vpop.permute.xlu1 %5598 }
 0x42d   : > { %v5667_v42 = vmul.f32 %v9606_v11, %v5599_v12 }
 0x42e   : > { %v6549_v47 = vpack.c.bf16 %v5668_v34, %v5668_v34 }
 0x42f   : > { %v6548_v24 = vpack.c.bf16 %v5667_v42, %v5667_v42  ;;  %v9896_v37 = vpop.permute.xlu0 %5731 }
 0x430   : > { %5796 = vst.msk [vmem:[#allocation3 + $0x50] sm:$0xff] %vm808_vm5, %v9896_v37  ;;  %v9900_v39 = vpop.permute.xlu1 %5733  ;;  %5901 = vrot.lane.b32.xlu0 %v6549_v47, %s7440_s28  ;;  %6059 = vst.msk [vmem:[%s10201_s5 + $0x50] sm:$0xff] (!%p6539_p5), %vm808_vm5, %v9896_v37 }
 0x431   : > { %5797 = vst.msk [vmem:[#allocation3 + $0x58] sm:$0xff] %vm808_vm5, %v9900_v39  ;;  %5899 = vrot.lane.b32.xlu1 %v6548_v24, %s7440_s28  ;;  %6060 = vst.msk [vmem:[%s10201_s5 + $0x58] sm:$0xff] (!%p6539_p5), %vm808_vm5, %v9900_v39 }
 0x433   : > { %v5605_v56 = vpop.permute.xlu0 %5604 }
 0x434   : > { %v5670_v22 = vmul.f32 %v9620_v7, %v5605_v56  ;;  %v5603_v11 = vpop.permute.xlu1 %5602 }
 0x435   : > { %v5669_v3 = vmul.f32 %v9616_v59, %v5603_v11 }
 0x436   : > { %v6551_v5 = vpack.c.bf16 %v5670_v22, %v5670_v22 }
 0x437   : > { %v6550_v30 = vpack.c.bf16 %v5669_v3, %v5669_v3  ;;  %v9908_v28 = vpop.permute.xlu0 %5735 }
 0x438   : > { %5798 = vst.msk [vmem:[#allocation3 + $0x60] sm:$0xff] %vm808_vm5, %v9908_v28  ;;  %v9912_v6 = vpop.permute.xlu1 %5737  ;;  %5905 = vrot.lane.b32.xlu0 %v6551_v5, %s7440_s28  ;;  %6061 = vst.msk [vmem:[%s10201_s5 + $0x60] sm:$0xff] (!%p6539_p5), %vm808_vm5, %v9908_v28 }
 0x439   : > { %5799 = vst.msk [vmem:[#allocation3 + $0x68] sm:$0xff] %vm808_vm5, %v9912_v6  ;;  %5903 = vrot.lane.b32.xlu1 %v6550_v30, %s7440_s28  ;;  %6062 = vst.msk [vmem:[%s10201_s5 + $0x68] sm:$0xff] (!%p6539_p5), %vm808_vm5, %v9912_v6 }
 0x43b   : > { %v5609_v7 = vpop.permute.xlu0 %5608 }
 0x43c   : > { %v5672_v18 = vmul.f32 %v9630_v55, %v5609_v7  ;;  %v5607_v59 = vpop.permute.xlu1 %5606 }
 0x43d   : > { %v5671_v14 = vmul.f32 %v9626_v41, %v5607_v59  ;;  %v6014_v59 = vld [vmem:[#allocation2 + $0xdc] sm:$0xf] }
 0x43e   : > { %v6553_v20 = vpack.c.bf16 %v5672_v18, %v5672_v18  ;;  %v5987_v18 = vld [vmem:[#allocation2 + $0x4] sm:$0xf]  ;;  %6043 = vst.msk [vmem:[%s7491_s27 + $0x6c] sm:$0xf] %vm315_vm4, %v6014_v59 }
 0x43f   : > { %v6552_v61 = vpack.c.bf16 %v5671_v14, %v5671_v14  ;;  %6016 = vst.msk [vmem:[%s7491_s27] sm:$0xf] %vm315_vm4, %v5987_v18 }
 0x440   : > { %5909 = vrot.lane.b32.xlu0 %v6553_v20, %s7440_s28  ;;  %v6015_v20 = vld [vmem:[#allocation2 + $0xe4] sm:$0xf] }
 0x441   : > { %v5611_v44 = vpop.permute.xlu1 %5610  ;;  %5907 = vrot.lane.b32.xlu1 %v6552_v61, %s7440_s28  ;;  %6044 = vst.msk [vmem:[%s7491_s27 + $0x70] sm:$0xf] %vm315_vm4, %v6015_v20 }
 0x442   : > { %v5673_v50 = vmul.f32 %v9636_v16, %v5611_v44 }
 0x443   : > { %v5613_v49 = vpop.permute.xlu0 %5612 }
 0x444   : > { %v6554_v58 = vpack.c.bf16 %v5673_v50, %v5673_v50  ;;  %v5674_v63 = vmul.f32 %v9640_v48, %v5613_v49 }
 0x446   : > { %5911 = vrot.lane.b32.xlu1 %v6554_v58, %s7440_s28  ;;  %v6555_v40 = vpack.c.bf16 %v5674_v63, %v5674_v63 }
 0x448   : > { %5913 = vrot.lane.b32.xlu0 %v6555_v40, %s7440_s28 }
 0x449   : > { %v5615_v55 = vpop.permute.xlu1 %5614 }
 0x44a   : > { %v5675_v41 = vmul.f32 %v9646_v43, %v5615_v55 }
 0x44b   : > { %v5617_v9 = vpop.permute.xlu0 %5616 }
 0x44c   : > { %v6556_v19 = vpack.c.bf16 %v5675_v41, %v5675_v41  ;;  %v5676_v0 = vmul.f32 %v9650_v25, %v5617_v9 }
 0x44e   : > { %5915 = vrot.lane.b32.xlu1 %v6556_v19, %s7440_s28  ;;  %v6557_v16 = vpack.c.bf16 %v5676_v0, %v5676_v0 }
 0x450   : > { %5917 = vrot.lane.b32.xlu0 %v6557_v16, %s7440_s28 }
 0x451   : > { %v5619_v13 = vpop.permute.xlu1 %5618 }
 0x452   : > { %v5677_v48 = vmul.f32 %v9656_v36, %v5619_v13 }
 0x453   : > { %v5621_v32 = vpop.permute.xlu0 %5620 }
 0x454   : > { %v6558_v62 = vpack.c.bf16 %v5677_v48, %v5677_v48  ;;  %v5678_v17 = vmul.f32 %v9660_v29, %v5621_v32 }
 0x456   : > { %5919 = vrot.lane.b32.xlu1 %v6558_v62, %s7440_s28  ;;  %v6559_v10 = vpack.c.bf16 %v5678_v17, %v5678_v17 }
 0x458   : > { %5921 = vrot.lane.b32.xlu0 %v6559_v10, %s7440_s28 }
 0x459   : > { %v5623_v43 = vpop.permute.xlu1 %5622 }
 0x45a   : > { %v5679_v25 = vmul.f32 %v9665_v35, %v5623_v43 }
 0x45b   : > { %v5625_v12 = vpop.permute.xlu0 %5624 }
 0x45c   : > { %v6560_v34 = vpack.c.bf16 %v5679_v25, %v5679_v25  ;;  %v5680_v42 = vmul.f32 %v9668_v4, %v5625_v12 }
 0x45e   : > { %5923 = vrot.lane.b32.xlu1 %v6560_v34, %s7440_s28  ;;  %v6561_v47 = vpack.c.bf16 %v5680_v42, %v5680_v42 }
 0x460   : > { %5925 = vrot.lane.b32.xlu0 %v6561_v47, %s7440_s28 }
 0x461   : > { %v5627_v36 = vpop.permute.xlu1 %5626 }
 0x462   : > { %v5681_v29 = vmul.f32 %v9673_v54, %v5627_v36 }
 0x463   : > { %v5629_v56 = vpop.permute.xlu0 %5628 }
 0x464   : > { %v6562_v24 = vpack.c.bf16 %v5681_v29, %v5681_v29  ;;  %v5682_v22 = vmul.f32 %v10462_v26, %v5629_v56 }
 0x466   : > { %5927 = vrot.lane.b32.xlu1 %v6562_v24, %s7440_s28  ;;  %v6563_v11 = vpack.c.bf16 %v5682_v22, %v5682_v22 }
 0x468   : > { %5929 = vrot.lane.b32.xlu0 %v6563_v11, %s7440_s28 }
 0x469   : > { %v5631_v35 = vpop.permute.xlu1 %5630 }
 0x46a   : > { %v5683_v4 = vmul.f32 %v10466_v52, %v5631_v35  ;;  %v5988_v52 = vld [vmem:[#allocation2 + $0xc] sm:$0xf] }
 0x46b   : > { %v5633_v5 = vpop.permute.xlu0 %5632  ;;  %6017 = vst.msk [vmem:[%s7491_s27 + $0x4] sm:$0xf] %vm315_vm4, %v5988_v52 }
 0x46c   : > { %v6564_v3 = vpack.c.bf16 %v5683_v4, %v5683_v4  ;;  %v5684_v54 = vmul.f32 %v10468_v23, %v5633_v5 }
 0x46e   : > { %5931 = vrot.lane.b32.xlu1 %v6564_v3, %s7440_s28  ;;  %v6565_v30 = vpack.c.bf16 %v5684_v54, %v5684_v54 }
 0x46f   : > { %v9945_v26 = vpop.permute.xlu0 %5739 }
 0x470   : > { %5800 = vst.msk [vmem:[#allocation3 + $0x70] sm:$0xff] %vm808_vm5, %v9945_v26  ;;  %5933 = vrot.lane.b32.xlu0 %v6565_v30, %s7440_s28  ;;  %6063 = vst.msk [vmem:[%s10201_s5 + $0x70] sm:$0xff] (!%p6539_p5), %vm808_vm5, %v9945_v26 }
 0x471   : > { %v5635_v7 = vpop.permute.xlu1 %5634 }
 0x472   : > { %v5685_v14 = vmul.f32 %v9689_v27, %v5635_v7 }
 0x473   : > { %v9959_v61 = vpop.permute.xlu0 %5743 }
 0x474   : > { %v6566_v23 = vpack.c.bf16 %v5685_v14, %v5685_v14  ;;  %5802 = vst.msk [vmem:[#allocation3 + $0x80] sm:$0xff] %vm808_vm5, %v9959_v61  ;;  %5753 = vrot.lane.b32.xlu0 %v9804_v15, %s7439_s22  ;;  %6065 = vst.msk [vmem:[%s10201_s5 + $0x80] sm:$0xff] (!%p6539_p5), %vm808_vm5, %v9959_v61 }
 0x475   : > { %v9965_v44 = vpop.permute.xlu1 %5741 }
 0x476   : > { %5801 = vst.msk [vmem:[#allocation3 + $0x78] sm:$0xff] %vm808_vm5, %v9965_v44  ;;  %5935 = vrot.lane.b32.xlu1 %v6566_v23, %s7440_s28  ;;  %6064 = vst.msk [vmem:[%s10201_s5 + $0x78] sm:$0xff] (!%p6539_p5), %vm808_vm5, %v9965_v44 }
 0x477   : > { %v9970_v27 = vpop.permute.xlu0 %5745 }
 0x478   : > { %5803 = vst.msk [vmem:[#allocation3 + $0x88] sm:$0xff] %vm808_vm5, %v9970_v27  ;;  %5757 = vrot.lane.b32.xlu0 %v9818_v57, %s7439_s22  ;;  %6066 = vst.msk [vmem:[%s10201_s5 + $0x88] sm:$0xff] (!%p6539_p5), %vm808_vm5, %v9970_v27 }
 0x479   : > { %v9976_v50 = vpop.permute.xlu1 %5747 }
 0x47a   : > { %5804 = vst.msk [vmem:[#allocation3 + $0x90] sm:$0xff] %vm808_vm5, %v9976_v50  ;;  %5755 = vrot.lane.b32.xlu1 %v9813_v21, %s7439_s22  ;;  %6067 = vst.msk [vmem:[%s10201_s5 + $0x90] sm:$0xff] (!%p6539_p5), %vm808_vm5, %v9976_v50 }
 0x47b   : > { %v9982_v15 = vpop.permute.xlu0 %5749 }
 0x47c   : > { %5805 = vst.msk [vmem:[#allocation3 + $0x98] sm:$0xff] %vm808_vm5, %v9982_v15  ;;  %6068 = vst.msk [vmem:[%s10201_s5 + $0x98] sm:$0xff] (!%p6539_p5), %vm808_vm5, %v9982_v15 }
 0x47d   : > { %v9986_v58 = vpop.permute.xlu1 %5751 }
 0x47e   : > { %5806 = vst.msk [vmem:[#allocation3 + $0xa0] sm:$0xff] %vm808_vm5, %v9986_v58  ;;  %5759 = vrot.lane.b32.xlu1 %v9825_v38, %s7439_s22  ;;  %6069 = vst.msk [vmem:[%s10201_s5 + $0xa0] sm:$0xff] (!%p6539_p5), %vm808_vm5, %v9986_v58 }
 0x48a   : > { %v5890_v57 = vpop.permute.xlu0 %5889 }
 0x48b   : > { %5963 = vst.msk [vmem:[#allocation2 + $0x1c] sm:$0xf] %vm315_vm4, %v5890_v57  ;;  %v5888_v49 = vpop.permute.xlu1 %5887 }
 0x48c   : > { %5962 = vst.msk [vmem:[#allocation2 + $0x14] sm:$0xf] %vm315_vm4, %v5888_v49 }
 0x492   : > { %v5990_v21 = vld [vmem:[#allocation2 + $0x1c] sm:$0xf]  ;;  %v5894_v63 = vpop.permute.xlu0 %5893 }
 0x493   : > { %6019 = vst.msk [vmem:[%s7491_s27 + $0xc] sm:$0xf] %vm315_vm4, %v5990_v21  ;;  %v5989_v40 = vld [vmem:[#allocation2 + $0x14] sm:$0xf]  ;;  %5965 = vst.msk [vmem:[#allocation2 + $0x2c] sm:$0xf] %vm315_vm4, %v5894_v63  ;;  %v5892_v55 = vpop.permute.xlu1 %5891 }
 0x494   : > { %6018 = vst.msk [vmem:[%s7491_s27 + $0x8] sm:$0xf] %vm315_vm4, %v5989_v40  ;;  %5964 = vst.msk [vmem:[#allocation2 + $0x24] sm:$0xf] %vm315_vm4, %v5892_v55 }
 0x49a   : > { %v5992_v38 = vld [vmem:[#allocation2 + $0x2c] sm:$0xf]  ;;  %v5898_v41 = vpop.permute.xlu0 %5897 }
 0x49b   : > { %6021 = vst.msk [vmem:[%s7491_s27 + $0x14] sm:$0xf] %vm315_vm4, %v5992_v38  ;;  %v5991_v19 = vld [vmem:[#allocation2 + $0x24] sm:$0xf]  ;;  %5967 = vst.msk [vmem:[#allocation2 + $0x3c] sm:$0xf] %vm315_vm4, %v5898_v41  ;;  %v5896_v9 = vpop.permute.xlu1 %5895 }
 0x49c   : > { %6020 = vst.msk [vmem:[%s7491_s27 + $0x10] sm:$0xf] %vm315_vm4, %v5991_v19  ;;  %5966 = vst.msk [vmem:[#allocation2 + $0x34] sm:$0xf] %vm315_vm4, %v5896_v9 }
 0x4a2   : > { %v5994_v0 = vld [vmem:[#allocation2 + $0x3c] sm:$0xf]  ;;  %v5902_v16 = vpop.permute.xlu0 %5901 }
 0x4a3   : > { %6023 = vst.msk [vmem:[%s7491_s27 + $0x1c] sm:$0xf] %vm315_vm4, %v5994_v0  ;;  %v5993_v13 = vld [vmem:[#allocation2 + $0x34] sm:$0xf]  ;;  %5969 = vst.msk [vmem:[#allocation2 + $0x4c] sm:$0xf] %vm315_vm4, %v5902_v16  ;;  %v5900_v48 = vpop.permute.xlu1 %5899 }
 0x4a4   : > { %6022 = vst.msk [vmem:[%s7491_s27 + $0x18] sm:$0xf] %vm315_vm4, %v5993_v13  ;;  %5968 = vst.msk [vmem:[#allocation2 + $0x44] sm:$0xf] %vm315_vm4, %v5900_v48 }
 0x4aa   : > { %v5996_v62 = vld [vmem:[#allocation2 + $0x4c] sm:$0xf]  ;;  %v5906_v32 = vpop.permute.xlu0 %5905 }
 0x4ab   : > { %6025 = vst.msk [vmem:[%s7491_s27 + $0x24] sm:$0xf] %vm315_vm4, %v5996_v62  ;;  %v5995_v17 = vld [vmem:[#allocation2 + $0x44] sm:$0xf]  ;;  %5971 = vst.msk [vmem:[#allocation2 + $0x5c] sm:$0xf] %vm315_vm4, %v5906_v32  ;;  %v5904_v10 = vpop.permute.xlu1 %5903 }
 0x4ac   : > { %6024 = vst.msk [vmem:[%s7491_s27 + $0x20] sm:$0xf] %vm315_vm4, %v5995_v17  ;;  %5970 = vst.msk [vmem:[#allocation2 + $0x54] sm:$0xf] %vm315_vm4, %v5904_v10 }
 0x4b2   : > { %v5998_v43 = vld [vmem:[#allocation2 + $0x5c] sm:$0xf]  ;;  %v5910_v25 = vpop.permute.xlu0 %5909 }
 0x4b3   : > { %6027 = vst.msk [vmem:[%s7491_s27 + $0x2c] sm:$0xf] %vm315_vm4, %v5998_v43  ;;  %v5997_v34 = vld [vmem:[#allocation2 + $0x54] sm:$0xf]  ;;  %5973 = vst.msk [vmem:[#allocation2 + $0x6c] sm:$0xf] %vm315_vm4, %v5910_v25  ;;  %v5908_v12 = vpop.permute.xlu1 %5907 }
 0x4b4   : > { %6026 = vst.msk [vmem:[%s7491_s27 + $0x28] sm:$0xf] %vm315_vm4, %v5997_v34  ;;  %5972 = vst.msk [vmem:[#allocation2 + $0x64] sm:$0xf] %vm315_vm4, %v5908_v12 }
 0x4b8   : > { %v5912_v42 = vpop.permute.xlu1 %5911 }
 0x4b9   : > { %5974 = vst.msk [vmem:[#allocation2 + $0x74] sm:$0xf] %vm315_vm4, %v5912_v42 }
 0x4ba   : > { %v6000_v47 = vld [vmem:[#allocation2 + $0x6c] sm:$0xf]  ;;  %v5914_v36 = vpop.permute.xlu0 %5913 }
 0x4bb   : > { %6029 = vst.msk [vmem:[%s7491_s27 + $0x34] sm:$0xf] %vm315_vm4, %v6000_v47  ;;  %v5999_v29 = vld [vmem:[#allocation2 + $0x64] sm:$0xf]  ;;  %5975 = vst.msk [vmem:[#allocation2 + $0x7c] sm:$0xf] %vm315_vm4, %v5914_v36 }
 0x4bc   : > { %6028 = vst.msk [vmem:[%s7491_s27 + $0x30] sm:$0xf] %vm315_vm4, %v5999_v29 }
 0x4c0   : > { %v6001_v24 = vld [vmem:[#allocation2 + $0x74] sm:$0xf]  ;;  %v5916_v56 = vpop.permute.xlu1 %5915 }
 0x4c1   : > { %6030 = vst.msk [vmem:[%s7491_s27 + $0x38] sm:$0xf] %vm315_vm4, %v6001_v24  ;;  %5976 = vst.msk [vmem:[#allocation2 + $0x84] sm:$0xf] %vm315_vm4, %v5916_v56 }
 0x4c2   : > { %v6002_v22 = vld [vmem:[#allocation2 + $0x7c] sm:$0xf]  ;;  %v5918_v11 = vpop.permute.xlu0 %5917 }
 0x4c3   : > { %6031 = vst.msk [vmem:[%s7491_s27 + $0x3c] sm:$0xf] %vm315_vm4, %v6002_v22  ;;  %5977 = vst.msk [vmem:[#allocation2 + $0x8c] sm:$0xf] %vm315_vm4, %v5918_v11 }
 0x4c8   : > { %v6003_v35 = vld [vmem:[#allocation2 + $0x84] sm:$0xf]  ;;  %v5920_v4 = vpop.permute.xlu1 %5919 }
 0x4c9   : > { %6032 = vst.msk [vmem:[%s7491_s27 + $0x40] sm:$0xf] %vm315_vm4, %v6003_v35  ;;  %5978 = vst.msk [vmem:[#allocation2 + $0x94] sm:$0xf] %vm315_vm4, %v5920_v4 }
 0x4ca   : > { %v6004_v3 = vld [vmem:[#allocation2 + $0x8c] sm:$0xf]  ;;  %v5922_v5 = vpop.permute.xlu0 %5921 }
 0x4cb   : > { %6033 = vst.msk [vmem:[%s7491_s27 + $0x44] sm:$0xf] %vm315_vm4, %v6004_v3  ;;  %5979 = vst.msk [vmem:[#allocation2 + $0x9c] sm:$0xf] %vm315_vm4, %v5922_v5 }
 0x4d0   : > { %v6005_v54 = vld [vmem:[#allocation2 + $0x94] sm:$0xf]  ;;  %v5924_v30 = vpop.permute.xlu1 %5923 }
 0x4d1   : > { %6034 = vst.msk [vmem:[%s7491_s27 + $0x48] sm:$0xf] %vm315_vm4, %v6005_v54  ;;  %5980 = vst.msk [vmem:[#allocation2 + $0xa4] sm:$0xf] %vm315_vm4, %v5924_v30 }
 0x4d2   : > { %v6006_v7 = vld [vmem:[#allocation2 + $0x9c] sm:$0xf]  ;;  %v5926_v18 = vpop.permute.xlu0 %5925 }
 0x4d3   : > { %6035 = vst.msk [vmem:[%s7491_s27 + $0x4c] sm:$0xf] %vm315_vm4, %v6006_v7  ;;  %5981 = vst.msk [vmem:[#allocation2 + $0xac] sm:$0xf] %vm315_vm4, %v5926_v18 }
 0x4d8   : > { %v6007_v52 = vld [vmem:[#allocation2 + $0xa4] sm:$0xf]  ;;  %v5928_v59 = vpop.permute.xlu1 %5927 }
 0x4d9   : > { %6036 = vst.msk [vmem:[%s7491_s27 + $0x50] sm:$0xf] %vm315_vm4, %v6007_v52  ;;  %5982 = vst.msk [vmem:[#allocation2 + $0xb4] sm:$0xf] %vm315_vm4, %v5928_v59 }
 0x4da   : > { %v6008_v14 = vld [vmem:[#allocation2 + $0xac] sm:$0xf]  ;;  %v5930_v20 = vpop.permute.xlu0 %5929 }
 0x4db   : > { %6037 = vst.msk [vmem:[%s7491_s27 + $0x54] sm:$0xf] %vm315_vm4, %v6008_v14  ;;  %5983 = vst.msk [vmem:[#allocation2 + $0xbc] sm:$0xf] %vm315_vm4, %v5930_v20 }
 0x4e0   : > { %v6009_v23 = vld [vmem:[#allocation2 + $0xb4] sm:$0xf]  ;;  %v5932_v57 = vpop.permute.xlu1 %5931 }
 0x4e1   : > { %6038 = vst.msk [vmem:[%s7491_s27 + $0x58] sm:$0xf] %vm315_vm4, %v6009_v23  ;;  %5984 = vst.msk [vmem:[#allocation2 + $0xc4] sm:$0xf] %vm315_vm4, %v5932_v57 }
 0x4e2   : > { %v6010_v49 = vld [vmem:[#allocation2 + $0xbc] sm:$0xf]  ;;  %v5934_v21 = vpop.permute.xlu0 %5933 }
 0x4e3   : > { %6039 = vst.msk [vmem:[%s7491_s27 + $0x5c] sm:$0xf] %vm315_vm4, %v6010_v49  ;;  %5985 = vst.msk [vmem:[#allocation2 + $0xcc] sm:$0xf] %vm315_vm4, %v5934_v21 }
 0x4e6   : > { %v5754_v63 = vpop.permute.xlu0 %5753 }
 0x4e7   : > { %5807 = vst.msk [vmem:[#allocation3 + $0xa8] sm:$0xff] %vm808_vm5, %v5754_v63  ;;  %6070 = vst.msk [vmem:[%s10201_s5 + $0xa8] sm:$0xff] (!%p6539_p5), %vm808_vm5, %v5754_v63 }
 0x4e8   : > { %v6011_v40 = vld [vmem:[#allocation2 + $0xc4] sm:$0xf]  ;;  %v5936_v55 = vpop.permute.xlu1 %5935 }
 0x4e9   : > { %6040 = vst.msk [vmem:[%s7491_s27 + $0x60] sm:$0xf] %vm315_vm4, %v6011_v40  ;;  %5986 = vst.msk [vmem:[#allocation2 + $0xd4] sm:$0xf] %vm315_vm4, %v5936_v55 }
 0x4ea   : > { %v6012_v38 = vld [vmem:[#allocation2 + $0xcc] sm:$0xf]  ;;  %v5758_v41 = vpop.permute.xlu0 %5757 }
 0x4eb   : > { %6041 = vst.msk [vmem:[%s7491_s27 + $0x64] sm:$0xf] %vm315_vm4, %v6012_v38 }
 0x4ec   : > { %5809 = vst.msk [vmem:[#allocation3 + $0xb8] sm:$0xff] %vm808_vm5, %v5758_v41  ;;  %v5756_v19 = vpop.permute.xlu1 %5755  ;;  %6048 = sbr.rel (%p6539_p5) target bundleno = 1267 (0x4f3), region = 44  ;;  %6072 = vst.msk [vmem:[%s10201_s5 + $0xb8] sm:$0xff] (!%p6539_p5), %vm808_vm5, %v5758_v41 }
 0x4ed   : > { %5808 = vst.msk [vmem:[#allocation3 + $0xb0] sm:$0xff] %vm808_vm5, %v5756_v19  ;;  %6071 = vst.msk [vmem:[%s10201_s5 + $0xb0] sm:$0xff] (!%p6539_p5), %vm808_vm5, %v5756_v19 }
 0x4f0   : > { %v6013_v9 = vld [vmem:[#allocation2 + $0xd4] sm:$0xf]  ;;  %v5760_v0 = vpop.permute.xlu1 %5759 }
 0x4f1   : > { %6042 = vst.msk [vmem:[%s7491_s27 + $0x68] sm:$0xf] %vm315_vm4, %v6013_v9 }
 0x4f2   : > { %5810 = vst.msk [vmem:[#allocation3 + $0xc0] sm:$0xff] %vm808_vm5, %v5760_v0  ;;  %6073 = vst.msk [vmem:[%s10201_s5 + $0xc0] sm:$0xff] (!%p6539_p5), %vm808_vm5, %v5760_v0 }
 0x4f3 PF: > { %s16_s18 = sadd.s32 1, %s7433_s18  }
 0x4f4   : > { %p13_p6 = scmp.ge.s32.totalorder %s16_s18, 6  }
 0x4f6   :  { %15 = sbr.rel (!%p13_p6) target bundleno = 1 (0x1), region = 82 }

// kernel: conv_lstm_forward.2
= control target key start
LH: loop header
LB: loop body
LE: loop exit
PB: predicated region body
PF: predicated region fallthrough
CT: control target
= control target key end

     0   :  { %11 = vsyncpa [#allocation5], 0  ;;  %s7537_s18 = smov 0   ;;  %s10210_s0 = inlined_call_operand.vmem [shape: bf16[4,232,4], index: 0, kind: input, shape index: {}]   ;;  %s10211_s1 = inlined_call_operand.vmem [shape: bf16[1440,128], index: 1, kind: input, shape index: {}]   ;;  %s10212_s2 = inlined_call_operand.vmem [shape: f32[1,128], index: 2, kind: input, shape index: {}]   ;;  %s10213_s3 = inlined_call_operand.vmem [shape: f32[200,1], index: 3, kind: input, shape index: {}]   ;;  %s10214_s4 = inlined_call_operand.vmem [shape: bf16[4,232,32], index: 4, kind: output, shape index: {0}]   ;;  %s10215_s5 = inlined_call_operand.hbm [shape: f32[200,32], index: 5, kind: output, shape index: {1}]  }
   0x1 LB: > { %s7543_s19 = sadd.s32 4294967295, %s7496_s18   ;;  %p6161_p0 = scmp.ge.s32.totalorder %s7496_s18, 1  ;;  %s7496_s18 = sphi %s7537_s18, %s17_s18  }
   0x2   : > { %p186_p1 = scmp.lt.s32.totalorder %s7496_s18, 5 }
   0x4   : > { %p187_p2 = pnand %p6161_p0, %p186_p1 }
   0x6   : > { %190 = sbr.rel (%p187_p2) target bundleno = 1293 (0x50d), region = 36 }
   0xd   : > { %p214_p3 = scmp.lt.s32.totalorder %s7543_s19, 3  ;;  %p6164_p4 = scmp.ne.s32.totalorder %s7543_s19, 0 }
   0xe   : > { %vm229_vm0 = vcmask (!%p6164_p4), 1043456   ;;  %vm230_vm1 = vcmask (!%p6164_p4), 261124   ;;  %vm261_vm2 = vcmask (!%p6164_p4), 261120   ;;  %v7498_v1 = vmov (!%p6164_p4), 0  }
   0xf   : > { %s215_s20 = scalar_select %p214_p3, %s7543_s19, 3 }
  0x10   : > { %228 = sbr.rel (%p6164_p4) target bundleno = 45 (0x2d), region = 40  ;;  %vm7560_vm3 = vmor (!%p6164_p4), %vm230_vm1, %vm229_vm0  ;;  %v7499_v2 = vmov (!%p6164_p4), 0.0  }
  0x11   : > { %s7025_s21 = smul.u32 116, %s215_s20  ;;  %232 = vst.msk [vmem:[#allocation2] sm:$0xff] (!%p6164_p4), %vm7560_vm3, %v7498_v1  ;;  %233 = vst.msk [vmem:[#allocation2 + $0x8] sm:$0xff] (!%p6164_p4), %vm7560_vm3, %v7498_v1 }
  0x12   : > { %234 = vst.msk [vmem:[#allocation2 + $0x10] sm:$0xff] (!%p6164_p4), %vm7560_vm3, %v7498_v1  ;;  %235 = vst.msk [vmem:[#allocation2 + $0x18] sm:$0xff] (!%p6164_p4), %vm7560_vm3, %v7498_v1 }
  0x13   : > { %s7552_s24 = scalar_lea.vmem %s10210_s0, %s7025_s21  ;;  %s7557_s27 = scalar_lea.vmem %s10214_s4, %s7025_s21  ;;  %236 = vst.msk [vmem:[#allocation2 + $0x20] sm:$0xff] (!%p6164_p4), %vm7560_vm3, %v7498_v1  ;;  %237 = vst.msk [vmem:[#allocation2 + $0x28] sm:$0xff] (!%p6164_p4), %vm7560_vm3, %v7498_v1 }
  0x14   : > { %238 = vst.msk [vmem:[#allocation2 + $0x30] sm:$0xff] (!%p6164_p4), %vm7560_vm3, %v7498_v1  ;;  %239 = vst.msk [vmem:[#allocation2 + $0x38] sm:$0xff] (!%p6164_p4), %vm7560_vm3, %v7498_v1 }
  0x15   : > { %240 = vst.msk [vmem:[#allocation2 + $0x40] sm:$0xff] (!%p6164_p4), %vm7560_vm3, %v7498_v1  ;;  %241 = vst.msk [vmem:[#allocation2 + $0x48] sm:$0xff] (!%p6164_p4), %vm7560_vm3, %v7498_v1 }
  0x16   : > { %242 = vst.msk [vmem:[#allocation2 + $0x50] sm:$0xff] (!%p6164_p4), %vm7560_vm3, %v7498_v1  ;;  %243 = vst.msk [vmem:[#allocation2 + $0x58] sm:$0xff] (!%p6164_p4), %vm7560_vm3, %v7498_v1 }
  0x17   : > { %244 = vst.msk [vmem:[#allocation2 + $0x60] sm:$0xff] %vm7560_vm3, %v7498_v1  ;;  %245 = vst.msk [vmem:[#allocation2 + $0x68] sm:$0xff] %vm7560_vm3, %v7498_v1 }
  0x18   : > { %246 = vst.msk [vmem:[#allocation2 + $0x70] sm:$0xff] %vm7560_vm3, %v7498_v1  ;;  %247 = vst.msk [vmem:[#allocation2 + $0x78] sm:$0xff] %vm7560_vm3, %v7498_v1 }
  0x19   : > { %248 = vst.msk [vmem:[#allocation2 + $0x80] sm:$0xff] %vm7560_vm3, %v7498_v1  ;;  %249 = vst.msk [vmem:[#allocation2 + $0x88] sm:$0xff] %vm7560_vm3, %v7498_v1 }
  0x1a   : > { %250 = vst.msk [vmem:[#allocation2 + $0x90] sm:$0xff] %vm7560_vm3, %v7498_v1  ;;  %251 = vst.msk [vmem:[#allocation2 + $0x98] sm:$0xff] %vm7560_vm3, %v7498_v1 }
  0x1b   : > { %252 = vst.msk [vmem:[#allocation2 + $0xa0] sm:$0xff] %vm7560_vm3, %v7498_v1  ;;  %253 = vst.msk [vmem:[#allocation2 + $0xa8] sm:$0xff] %vm7560_vm3, %v7498_v1 }
  0x1c   : > { %254 = vst.msk [vmem:[#allocation2 + $0xb0] sm:$0xff] %vm7560_vm3, %v7498_v1  ;;  %255 = vst.msk [vmem:[#allocation2 + $0xb8] sm:$0xff] %vm7560_vm3, %v7498_v1 }
  0x1d   : > { %256 = vst.msk [vmem:[#allocation2 + $0xc0] sm:$0xff] %vm7560_vm3, %v7498_v1  ;;  %257 = vst.msk [vmem:[#allocation2 + $0xc8] sm:$0xff] %vm7560_vm3, %v7498_v1 }
  0x1e   : > { %258 = vst.msk [vmem:[#allocation2 + $0xd0] sm:$0xff] %vm7560_vm3, %v7498_v1  ;;  %259 = vst.msk [vmem:[#allocation2 + $0xd8] sm:$0xff] %vm7560_vm3, %v7498_v1 }
  0x1f   : > { %260 = vst.msk [vmem:[#allocation2 + $0xe0] sm:$0xff] %vm7560_vm3, %v7498_v1 }
  0x20   : > { %262 = vst.msk [vmem:[#allocation3] sm:$0xff] %vm261_vm2, %v7499_v2  ;;  %263 = vst.msk [vmem:[#allocation3 + $0x8] sm:$0xff] %vm261_vm2, %v7499_v2 }
  0x21   : > { %264 = vst.msk [vmem:[#allocation3 + $0x10] sm:$0xff] %vm261_vm2, %v7499_v2  ;;  %265 = vst.msk [vmem:[#allocation3 + $0x18] sm:$0xff] %vm261_vm2, %v7499_v2 }
  0x22   : > { %266 = vst.msk [vmem:[#allocation3 + $0x20] sm:$0xff] %vm261_vm2, %v7499_v2  ;;  %267 = vst.msk [vmem:[#allocation3 + $0x28] sm:$0xff] %vm261_vm2, %v7499_v2 }
  0x23   : > { %268 = vst.msk [vmem:[#allocation3 + $0x30] sm:$0xff] %vm261_vm2, %v7499_v2  ;;  %269 = vst.msk [vmem:[#allocation3 + $0x38] sm:$0xff] %vm261_vm2, %v7499_v2 }
  0x24   : > { %270 = vst.msk [vmem:[#allocation3 + $0x40] sm:$0xff] %vm261_vm2, %v7499_v2  ;;  %271 = vst.msk [vmem:[#allocation3 + $0x48] sm:$0xff] %vm261_vm2, %v7499_v2 }
  0x25   : > { %272 = vst.msk [vmem:[#allocation3 + $0x50] sm:$0xff] %vm261_vm2, %v7499_v2  ;;  %273 = vst.msk [vmem:[#allocation3 + $0x58] sm:$0xff] %vm261_vm2, %v7499_v2 }
  0x26   : > { %274 = vst.msk [vmem:[#allocation3 + $0x60] sm:$0xff] %vm261_vm2, %v7499_v2  ;;  %275 = vst.msk [vmem:[#allocation3 + $0x68] sm:$0xff] %vm261_vm2, %v7499_v2 }
  0x27   : > { %276 = vst.msk [vmem:[#allocation3 + $0x70] sm:$0xff] %vm261_vm2, %v7499_v2  ;;  %277 = vst.msk [vmem:[#allocation3 + $0x78] sm:$0xff] %vm261_vm2, %v7499_v2 }
  0x28   : > { %278 = vst.msk [vmem:[#allocation3 + $0x80] sm:$0xff] %vm261_vm2, %v7499_v2  ;;  %279 = vst.msk [vmem:[#allocation3 + $0x88] sm:$0xff] %vm261_vm2, %v7499_v2 }
  0x29   : > { %280 = vst.msk [vmem:[#allocation3 + $0x90] sm:$0xff] %vm261_vm2, %v7499_v2  ;;  %281 = vst.msk [vmem:[#allocation3 + $0x98] sm:$0xff] %vm261_vm2, %v7499_v2 }
  0x2a   : > { %282 = vst.msk [vmem:[#allocation3 + $0xa0] sm:$0xff] %vm261_vm2, %v7499_v2  ;;  %283 = vst.msk [vmem:[#allocation3 + $0xa8] sm:$0xff] %vm261_vm2, %v7499_v2 }
  0x2b   : > { %284 = vst.msk [vmem:[#allocation3 + $0xb0] sm:$0xff] %vm261_vm2, %v7499_v2  ;;  %285 = vst.msk [vmem:[#allocation3 + $0xb8] sm:$0xff] %vm261_vm2, %v7499_v2 }
  0x2c   : > { %286 = vst.msk [vmem:[#allocation3 + $0xc0] sm:$0xff] %vm261_vm2, %v7499_v2 }
  0x2d PF: > { %v7051_v3 = vld [vmem:[%s10211_s1] sm:$0xff]   ;;  %v10220_v4 = vmov 0   ;;  %v7053_v6 = vld [vmem:[%s10211_s1 + $0x8] sm:$0xff]   ;;  %v7055_v8 = vld [vmem:[%s10211_s1 + $0x10] sm:$0xff]   ;;  %vm316_vm4 = vcmask 27648   ;;  %vm809_vm5 = vcmask 261120  }
  0x2e   : > { %849 = vmatprep.subr.bf16.mxu1 %v10220_v4  ;;  %2595 = vmatprep.subr.bf16.mxu0 %v10220_v4  ;;  %v7052_v5 = vld [vmem:[%s10211_s1 + $0x140] sm:$0xff]   ;;  %v7054_v7 = vld [vmem:[%s10211_s1 + $0x148] sm:$0xff]   ;;  %v7056_v9 = vld [vmem:[%s10211_s1 + $0x150] sm:$0xff]   ;;  %vm503_vm6 = vsmask.f32 5376  ;;  %vm1036_vm8 = vcmask 1044480  }
  0x2f   : > { %850 = vmatpush1.bf16.msra.mxu1 %v7051_v3  ;;  %7049 = vset.pattern.permute.xlu1 %v10220_v4  ;;  %v7057_v10 = vld [vmem:[%s10211_s1 + $0x18] sm:$0xff]   ;;  %v7059_v12 = vld [vmem:[%s10211_s1 + $0x20] sm:$0xff]   ;;  %v7061_v14 = vld [vmem:[%s10211_s1 + $0x28] sm:$0xff]   ;;  %vm2906_vm7 = vsmask.f32 7424  ;;  %vm4041_vm10 = vcmask 1046528  }
  0x30   : > { %2596 = vmatpush1.bf16.msra.mxu0 %v7052_v5  ;;  %851 = vmatprep.subr.bf16.mxu1 %v10220_v4  ;;  %v7058_v11 = vld [vmem:[%s10211_s1 + $0x158] sm:$0xff]   ;;  %v7060_v13 = vld [vmem:[%s10211_s1 + $0x160] sm:$0xff]   ;;  %v7062_v15 = vld [vmem:[%s10211_s1 + $0x168] sm:$0xff]   ;;  %vm1386_vm9 = vsmask.f32 4352  ;;  %s7501_s28 = smov 32  }
  0x31   : > { %2597 = vmatprep.subr.bf16.mxu0 %v10220_v4  ;;  %7050 = vset.pattern.permute.xlu0 %v10220_v4  ;;  %v287_v16 = vld [vmem:[%s7552_s24] sm:$0xf]  ;;  %v288_v17 = vld [vmem:[%s7552_s24 + $0x4] sm:$0xf]  ;;  %v289_v18 = vld [vmem:[%s7552_s24 + $0x8] sm:$0xf] }
  0x32   : > { %v7063_v19 = vld [vmem:[%s10211_s1 + $0x30] sm:$0xff]   ;;  %v290_v20 = vld [vmem:[%s7552_s24 + $0xc] sm:$0xf]  ;;  %317 = vst.msk [vmem:[#allocation2] sm:$0xf] %vm316_vm4, %v287_v16  ;;  %v7065_v24 = vld [vmem:[%s10211_s1 + $0x38] sm:$0xff]  }
  0x33   : > { %852 = vmatpush1.bf16.msra.mxu1 %v7053_v6  ;;  %318 = vst.msk [vmem:[#allocation2 + $0x8] sm:$0xf] %vm316_vm4, %v288_v17  ;;  %319 = vst.msk [vmem:[#allocation2 + $0x10] sm:$0xf] %vm316_vm4, %v289_v18  ;;  %v7064_v21 = vld [vmem:[%s10211_s1 + $0x170] sm:$0xff]   ;;  %v7066_v27 = vld [vmem:[%s10211_s1 + $0x178] sm:$0xff]  }
  0x34   : > { %2598 = vmatpush1.bf16.msra.mxu0 %v7054_v7  ;;  %853 = vmatprep.subr.bf16.mxu1 %v10220_v4  ;;  %320 = vst.msk [vmem:[#allocation2 + $0x18] sm:$0xf] %vm316_vm4, %v290_v20  ;;  %v291_v22 = vld [vmem:[%s7552_s24 + $0x10] sm:$0xf]  ;;  %v292_v23 = vld [vmem:[%s7552_s24 + $0x14] sm:$0xf] }
  0x35   : > { %2599 = vmatprep.subr.bf16.mxu0 %v10220_v4  ;;  %321 = vst.msk [vmem:[#allocation2 + $0x20] sm:$0xf] %vm316_vm4, %v291_v22  ;;  %322 = vst.msk [vmem:[#allocation2 + $0x28] sm:$0xf] %vm316_vm4, %v292_v23  ;;  %v293_v25 = vld [vmem:[%s7552_s24 + $0x18] sm:$0xf] }
  0x36   : > { %v294_v26 = vld [vmem:[%s7552_s24 + $0x1c] sm:$0xf]  ;;  %323 = vst.msk [vmem:[#allocation2 + $0x30] sm:$0xf] %vm316_vm4, %v293_v25  ;;  %v7067_v34 = vld [vmem:[%s10211_s1 + $0x40] sm:$0xff]   ;;  %v7069_v45 = vld [vmem:[%s10211_s1 + $0x48] sm:$0xff]  }
  0x37   : > { %854 = vmatpush1.bf16.msra.mxu1 %v7055_v8  ;;  %324 = vst.msk [vmem:[#allocation2 + $0x38] sm:$0xf] %vm316_vm4, %v294_v26  ;;  %v7068_v35 = vld [vmem:[%s10211_s1 + $0x180] sm:$0xff]   ;;  %v7070_v51 = vld [vmem:[%s10211_s1 + $0x188] sm:$0xff]   ;;  %v7075_v6 = vld [vmem:[%s10211_s1 + $0x190] sm:$0xff]   ;;  %s7502_s22 = smov 96  }
  0x38   : > { %2600 = vmatpush1.bf16.msra.mxu0 %v7056_v9  ;;  %855 = vmatprep.subr.bf16.mxu1 %v10220_v4  ;;  %v295_v38 = vld [vmem:[%s7552_s24 + $0x20] sm:$0xf]  ;;  %v296_v50 = vld [vmem:[%s7552_s24 + $0x24] sm:$0xf]  ;;  %v298_v17 = vld [vmem:[%s7552_s24 + $0x2c] sm:$0xf] }
  0x39   : > { %2601 = vmatprep.subr.bf16.mxu0 %v10220_v4  ;;  %v353_v28 = vld [vmem:[#allocation2] sm:$0xcc]  ;;  %325 = vst.msk [vmem:[#allocation2 + $0x40] sm:$0xf] %vm316_vm4, %v295_v38  ;;  %326 = vst.msk [vmem:[#allocation2 + $0x48] sm:$0xf] %vm316_vm4, %v296_v50 }
  0x3a   : > { %v7729_v29 = vld [vmem:[#allocation2 + $0x8] sm:$0xff]  ;;  %v355_v30 = vld [vmem:[#allocation2 + $0x10] sm:$0xff]  ;;  %328 = vst.msk [vmem:[#allocation2 + $0x58] sm:$0xf] %vm316_vm4, %v298_v17  ;;  %vm4391_vm11 = vsmask.f32 6400 }
  0x3b   : > { %856 = vmatpush1.bf16.msra.mxu1 %v7057_v10  ;;  %v356_v31 = vld [vmem:[#allocation2 + $0x18] sm:$0xff]  ;;  %v6167_v32 = vcombine.high %v353_v28, %v7729_v29  ;;  %v6166_v33 = vcombine.low %v353_v28, %v7729_v29  ;;  %v297_v10 = vld [vmem:[%s7552_s24 + $0x28] sm:$0xf]  ;;  %v300_v38 = vld [vmem:[%s7552_s24 + $0x34] sm:$0xf]  ;;  %vm5963_vm12 = vcmask 257024  }
  0x3c   : > { %2602 = vmatpush1.bf16.msra.mxu0 %v7058_v11  ;;  %857 = vmatprep.subr.bf16.mxu1 %v10220_v4  ;;  %v7739_v36 = vcombine.high %v355_v30, %v356_v31  ;;  %v7741_v37 = vcombine.low %v355_v30, %v356_v31  ;;  %v357_v43 = vld [vmem:[#allocation2 + $0x20] sm:$0xff]  ;;  %v358_v44 = vld [vmem:[#allocation2 + $0x28] sm:$0xff]  ;;  %327 = vst.msk [vmem:[#allocation2 + $0x50] sm:$0xf] %vm316_vm4, %v297_v10  ;;  %v7078_v28 = vld [vmem:[%s10211_s1 + $0x198] sm:$0xff]   ;;  %p6561_p5 = scmp.ne.s32.totalorder %s7543_s19, 3 }
  0x3d   : > { %2603 = vmatprep.subr.bf16.mxu0 %v10220_v4  ;;  %v522_v39 = vshrl.u32 %v6167_v32, 16  ;;  %v525_v40 = vshll.u32 %v6167_v32, 16  ;;  %v505_v41 = vshrl.u32 %v6166_v33, 16  ;;  %v508_v42 = vshll.u32 %v6166_v33, 16  ;;  %v359_v60 = vld [vmem:[#allocation2 + $0x30] sm:$0xff] }
  0x3e   : > { %v7751_v46 = vshrl.u32 %v7739_v36, 16  ;;  %v7754_v47 = vshll.u32 %v7739_v36, 16  ;;  %6350 = vmatprep.mubr.msk.bf16.mxu0 %vm809_vm5, %v7739_v36  ;;  %v7759_v48 = vshrl.u32 %v7741_v37, 16  ;;  %v7762_v49 = vshll.u32 %v7741_v37, 16  ;;  %v360_v61 = vld [vmem:[#allocation2 + $0x38] sm:$0xff] }
  0x3f   : > { %858 = vmatpush1.bf16.msra.mxu1 %v7059_v12  ;;  %v524_v52 = vrot.slane %v522_v39, 2  ;;  %v527_v53 = vrot.slane %v525_v40, 3  ;;  %v507_v54 = vrot.slane %v505_v41, 2  ;;  %v510_v55 = vrot.slane %v508_v42, 3  ;;  %v299_v33 = vld [vmem:[%s7552_s24 + $0x30] sm:$0xf] }
  0x40   : > { %2604 = vmatpush1.bf16.msra.mxu0 %v7060_v13  ;;  %859 = vmatprep.subr.bf16.mxu1 %v10220_v4  ;;  %10313 = vst [vmem:[#allocation7_spill] sm:$0xff] %v7751_v46  ;;  %10314 = vst [vmem:[#allocation8_spill] sm:$0xff] %v7754_v47  ;;  %v532_v56 = vrot.slane %v7751_v46, 2  ;;  %v535_v57 = vrot.slane %v7754_v47, 3  ;;  %v515_v58 = vrot.slane %v7759_v48, 2  ;;  %v518_v59 = vrot.slane %v7762_v49, 3 }
  0x41   : > { %2605 = vmatprep.subr.bf16.mxu0 %v10220_v4  ;;  %10315 = vst [vmem:[#allocation9_spill] sm:$0xff] %v7759_v48  ;;  %10316 = vst [vmem:[#allocation10_spill] sm:$0xff] %v7762_v49  ;;  %v528_v62 = vor.u32 %v527_v53, %v524_v52  ;;  %v511_v63 = vor.u32 %v510_v55, %v507_v54  ;;  %v7774_v0 = vcombine.high %v357_v43, %v358_v44  ;;  %v7077_v13 = vld [vmem:[%s10211_s1 + $0x50] sm:$0xff]   ;;  %v361_v16 = vld [vmem:[#allocation2 + $0x40] sm:$0xff] }
  0x42   : > { %v536_v1 = vor.u32 %v535_v57, %v532_v56  ;;  %v519_v2 = vor.u32 %v518_v59, %v515_v58  ;;  %v7777_v3 = vcombine.low %v357_v43, %v358_v44  ;;  %v7779_v5 = vcombine.high %v359_v60, %v360_v61  ;;  %v362_v26 = vld [vmem:[#allocation2 + $0x48] sm:$0xff]  ;;  %329 = vst.msk [vmem:[#allocation2 + $0x60] sm:$0xf] %vm316_vm4, %v299_v33  ;;  %v364_v55 = vld [vmem:[#allocation2 + $0x58] sm:$0xff] }
  0x43   : > { %860 = vmatpush1.bf16.msra.mxu1 %v7061_v14  ;;  %v7785_v7 = vshrl.u32 %v7774_v0, 16  ;;  %v7788_v8 = vshll.u32 %v7774_v0, 16  ;;  %v7790_v9 = vcombine.low %v359_v60, %v360_v61  ;;  %v7831_v32 = vcombine.high %v361_v16, %v362_v26  ;;  %330 = vst.msk [vmem:[#allocation2 + $0x68] sm:$0xf] %vm316_vm4, %v300_v38  ;;  %v301_v56 = vld [vmem:[%s7552_s24 + $0x38] sm:$0xf] }
  0x44   : > { %2606 = vmatpush1.bf16.msra.mxu0 %v7062_v15  ;;  %861 = vmatprep.subr.bf16.mxu1 %v10220_v4  ;;  %v537_v11 = vsel %vm503_vm6, %v528_v62, %v536_v1  ;;  %v520_v12 = vsel %vm503_vm6, %v511_v63, %v519_v2  ;;  %v7799_v14 = vshrl.u32 %v7777_v3, 16  ;;  %v7802_v15 = vshll.u32 %v7777_v3, 16  ;;  %v302_v59 = vld [vmem:[%s7552_s24 + $0x3c] sm:$0xf]  ;;  %331 = vst.msk [vmem:[#allocation2 + $0x70] sm:$0xf] %vm316_vm4, %v301_v56 }
  0x45   : > { %2607 = vmatprep.subr.bf16.mxu0 %v10220_v4  ;;  %10317 = vst [vmem:[#allocation11_spill] sm:$0xff] %v7785_v7  ;;  %10318 = vst [vmem:[#allocation12_spill] sm:$0xff] %v7788_v8  ;;  %6202 = vmatprep.mubr.msk.bf16.mxu1 %vm809_vm5, %v537_v11  ;;  %v550_v18 = vrot.slane %v7785_v7, 2  ;;  %v7810_v20 = vshrl.u32 %v7779_v5, 16  ;;  %v7824_v25 = vshll.u32 %v7790_v9, 16  ;;  %v7844_v41 = vshrl.u32 %v7831_v32, 16 }
  0x46   : > { %10319 = vst [vmem:[#allocation13_spill] sm:$0xff] %v7799_v14  ;;  %10320 = vst [vmem:[#allocation14_spill] sm:$0xff] %v7802_v15  ;;  %v541_v22 = vrot.slane %v7799_v14, 2  ;;  %v544_v23 = vrot.slane %v7802_v15, 3  ;;  %v7847_v42 = vshll.u32 %v7831_v32, 16  ;;  %v7861_v54 = vcombine.low %v361_v16, %v362_v26  ;;  %v7088_v60 = vld [vmem:[%s10211_s1 + $0x60] sm:$0xff]  }
  0x47   : > { %862 = vmatpush1.bf16.msra.mxu1 %v7063_v19  ;;  %v553_v19 = vrot.slane %v7788_v8, 3  ;;  %10321 = vst [vmem:[#allocation15_spill] sm:$0xff] %v7810_v20  ;;  %10323 = vst [vmem:[#allocation17_spill] sm:$0xff] %v7824_v25  ;;  %v568_v30 = vrot.slane %v7810_v20, 2  ;;  %v562_v44 = vrot.slane %v7824_v25, 3  ;;  %v586_v52 = vrot.slane %v7844_v41, 2 }
  0x48   : > { %2608 = vmatpush1.bf16.msra.mxu0 %v7064_v21  ;;  %863 = vmatprep.subr.bf16.mxu1 %v10220_v4  ;;  %v7813_v21 = vshll.u32 %v7779_v5, 16  ;;  %10324 = vst [vmem:[#allocation18_spill] sm:$0xff] %v7847_v42  ;;  %v589_v53 = vrot.slane %v7847_v42, 3  ;;  %332 = vst.msk [vmem:[#allocation2 + $0x78] sm:$0xf] %vm316_vm4, %v302_v59  ;;  %v7084_v63 = vld [vmem:[%s10211_s1 + $0x1a8] sm:$0xff]  }
  0x49   : > { %2609 = vmatprep.subr.bf16.mxu0 %v10220_v4  ;;  %v303_v61 = vld [vmem:[%s7552_s24 + $0x40] sm:$0xf]  ;;  %v7094_v16 = vld [vmem:[%s10211_s1 + $0x68] sm:$0xff]   ;;  %v308_v56 = vld [vmem:[%s7552_s24 + $0x54] sm:$0xf] }
  0x4a   : > { %10322 = vst [vmem:[#allocation16_spill] sm:$0xff] %v7813_v21  ;;  %v571_v31 = vrot.slane %v7813_v21, 3  ;;  %333 = vst.msk [vmem:[#allocation2 + $0x80] sm:$0xf] %vm316_vm4, %v303_v61  ;;  %v590_v10 = vor.u32 %v589_v53, %v586_v52  ;;  %v366_v17 = vld [vmem:[#allocation2 + $0x68] sm:$0xff] }
  0x4b   : > { %864 = vmatpush1.bf16.msra.mxu1 %v7065_v24  ;;  %v7821_v24 = vshrl.u32 %v7790_v9, 16  ;;  %v305_v26 = vld [vmem:[%s7552_s24 + $0x48] sm:$0xf]  ;;  %v307_v52 = vld [vmem:[%s7552_s24 + $0x50] sm:$0xf] }
  0x4c   : > { %2610 = vmatpush1.bf16.msra.mxu0 %v7066_v27  ;;  %865 = vmatprep.subr.bf16.mxu1 %v10220_v4  ;;  %v554_v27 = vor.u32 %v553_v19, %v550_v18  ;;  %v572_v40 = vor.u32 %v571_v31, %v568_v30  ;;  %335 = vst.msk [vmem:[#allocation2 + $0x90] sm:$0xf] %vm316_vm4, %v305_v26  ;;  %v367_v53 = vld [vmem:[#allocation2 + $0x70] sm:$0xff]  ;;  %337 = vst.msk [vmem:[#allocation2 + $0xa0] sm:$0xf] %vm316_vm4, %v307_v52 }
  0x4d   : > { %2611 = vmatprep.subr.bf16.mxu0 %v10220_v4  ;;  %v559_v43 = vrot.slane %v7821_v24, 2  ;;  %338 = vst.msk [vmem:[#allocation2 + $0xa8] sm:$0xf] %vm316_vm4, %v308_v56  ;;  %v7097_v56 = vld [vmem:[%s10211_s1 + $0x1d0] sm:$0xff]  }
  0x4e   : > { %v555_v39 = vsel %vm503_vm6, %v536_v1, %v554_v27  ;;  %v573_v57 = vsel %vm503_vm6, %v554_v27, %v572_v40  ;;  %v7882_v1 = vshrl.u32 %v7861_v54, 16  ;;  %v591_v27 = vsel %vm503_vm6, %v572_v40, %v590_v10 }
  0x4f   : > { %866 = vmatpush1.bf16.msra.mxu1 %v7067_v34  ;;  %v545_v34 = vor.u32 %v544_v23, %v541_v22  ;;  %v563_v62 = vor.u32 %v562_v44, %v559_v43  ;;  %v7089_v43 = vld [vmem:[%s10211_s1 + $0x1b8] sm:$0xff]  }
  0x50   : > { %2612 = vmatpush1.bf16.msra.mxu0 %v7068_v35  ;;  %867 = vmatprep.subr.bf16.mxu1 %v10220_v4  ;;  %v7083_v35 = vld [vmem:[%s10211_s1 + $0x58] sm:$0xff]   ;;  %v577_v19 = vrot.slane %v7882_v1, 2 }
  0x51   : > { %2613 = vmatprep.subr.bf16.mxu0 %v10220_v4  ;;  %v546_v50 = vsel %vm503_vm6, %v519_v2, %v545_v34  ;;  %v7885_v2 = vshll.u32 %v7861_v54, 16  ;;  %v564_v18 = vsel %vm503_vm6, %v545_v34, %v563_v62  ;;  %v306_v34 = vld [vmem:[%s7552_s24 + $0x4c] sm:$0xf] }
  0x52   : > { %336 = vst.msk [vmem:[#allocation2 + $0x98] sm:$0xf] %vm316_vm4, %v306_v34 }
  0x53   : > { %868 = vmatpush1.bf16.msra.mxu1 %v7069_v45  ;;  %v363_v45 = vld [vmem:[#allocation2 + $0x50] sm:$0xff]  ;;  %10325 = vst [vmem:[#allocation19_spill] sm:$0xff] %v7885_v2  ;;  %v580_v22 = vrot.slane %v7885_v2, 3 }
  0x54   : > { %2614 = vmatpush1.bf16.msra.mxu0 %v7070_v51  ;;  %1199 = vmatprep.subr.bf16.mxu1 %v10220_v4  ;;  %v7080_v51 = vld [vmem:[%s10211_s1 + $0x1a0] sm:$0xff]   ;;  %v7866_v58 = vcombine.high %v363_v45, %v364_v55  ;;  %v7906_v23 = vcombine.low %v363_v45, %v364_v55  ;;  %v368_v55 = vld [vmem:[#allocation2 + $0x78] sm:$0xff] }
  0x55   : > { %3225 = vmatprep.subr.bf16.mxu0 %v10220_v4  ;;  %v581_v38 = vor.u32 %v580_v22, %v577_v19  ;;  %v310_v22 = vld [vmem:[%s7552_s24 + $0x5c] sm:$0xf] }
  0x56   : > { %882 = vmatmul.mubr.bf16.vlgmr.msra.gmra.mrb[0].mxu1 %v520_v12  ;;  %v7892_v11 = vshrl.u32 %v7866_v58, 16  ;;  %v7895_v12 = vshll.u32 %v7866_v58, 16  ;;  %v7931_v40 = vshll.u32 %v7906_v23, 16  ;;  %340 = vst.msk [vmem:[#allocation2 + $0xb8] sm:$0xf] %vm316_vm4, %v310_v22 }
  0x57   : > { %2628 = vmatmul.mubr.bf16.vlgmr.msra.gmra.mrb[0].mxu0 %v7741_v37  ;;  %1200 = vmatpush1.bf16.msra.mxu1 %v7077_v13  ;;  %v365_v13 = vld [vmem:[#allocation2 + $0x60] sm:$0xff]  ;;  %v582_v59 = vsel %vm503_vm6, %v563_v62, %v581_v38 }
  0x58   : > { %3226 = vmatpush1.bf16.msra.mxu0 %v7075_v6  ;;  %6351 = vmatprep.mubr.msk.bf16.mxu0 %vm809_vm5, %v7774_v0  ;;  %v304_v6 = vld [vmem:[%s7552_s24 + $0x44] sm:$0xf]  ;;  %10326 = vst [vmem:[#allocation20_spill] sm:$0xff] %v7895_v12  ;;  %v604_v30 = vrot.slane %v7892_v11, 2  ;;  %v607_v31 = vrot.slane %v7895_v12, 3  ;;  %v7915_v33 = vcombine.high %v365_v13, %v366_v17  ;;  %v598_v61 = vrot.slane %v7931_v40, 3 }
  0x59   : > { %3227 = vmatprep.subr.bf16.mxu0 %v10220_v4  ;;  %6203 = vmatprep.mubr.msk.bf16.mxu1 %vm809_vm5, %v555_v39  ;;  %334 = vst.msk [vmem:[#allocation2 + $0x88] sm:$0xf] %vm316_vm4, %v304_v6  ;;  %v7928_v39 = vshrl.u32 %v7906_v23, 16  ;;  %v7092_v6 = vld [vmem:[%s10211_s1 + $0x1c0] sm:$0xff]  }
  0x5a   : > { %1201 = vmatprep.subr.bf16.mxu1 %v10220_v4  ;;  %v608_v44 = vor.u32 %v607_v31, %v604_v30  ;;  %v7939_v45 = vshrl.u32 %v7915_v33, 16  ;;  %v7111_v62 = vld [vmem:[%s10211_s1 + $0x80] sm:$0xff]   ;;  %v7096_v30 = vld [vmem:[%s10211_s1 + $0x1c8] sm:$0xff]  }
  0x5b   : > { %1202 = vmatpush1.bf16.msra.mxu1 %v7083_v35  ;;  %v7100_v35 = vld [vmem:[%s10211_s1 + $0x70] sm:$0xff]  }
  0x5c   : > { %3228 = vmatpush1.bf16.msra.mxu0 %v7078_v28  ;;  %1203 = vmatprep.subr.bf16.mxu1 %v10220_v4  ;;  %v7087_v28 = vld [vmem:[%s10211_s1 + $0x1b0] sm:$0xff]  }
  0x5d   : > { %3229 = vmatprep.subr.bf16.mxu0 %v10220_v4 }
  0x5e   : > { %890 = vmatmul.mubr.bf16.gmra.mrb[4].mxu1 %v546_v50  ;;  %v7942_v50 = vshll.u32 %v7915_v33, 16 }
  0x5f   : > { %2636 = vmatmul.mubr.bf16.gmra.mrb[4].mxu0 %v7777_v3  ;;  %6204 = vmatprep.mubr.msk.bf16.mxu1 %vm809_vm5, %v573_v57  ;;  %v7951_v57 = vcombine.low %v365_v13, %v366_v17  ;;  %v622_v13 = vrot.slane %v7939_v45, 2  ;;  %v7964_v17 = vcombine.high %v367_v53, %v368_v55 }
  0x60   : > { %3230 = vmatpush1.bf16.msra.mxu0 %v7080_v51  ;;  %6352 = vmatprep.mubr.msk.bf16.mxu0 %vm809_vm5, %v7779_v5  ;;  %v7106_v51 = vld [vmem:[%s10211_s1 + $0x78] sm:$0xff]  }
  0x61   : > { %3231 = vmatprep.subr.bf16.mxu0 %v10220_v4  ;;  %1204 = vmatpush1.bf16.msra.mxu1 %v7088_v60  ;;  %v595_v60 = vrot.slane %v7928_v39, 2  ;;  %10327 = vst [vmem:[#allocation21_spill] sm:$0xff] %v7964_v17  ;;  %v7975_v19 = vshll.u32 %v7951_v57, 16  ;;  %v7990_v31 = vshrl.u32 %v7964_v17, 16  ;;  %v7993_v34 = vshll.u32 %v7964_v17, 16 }
  0x62   : > { %1205 = vmatprep.subr.bf16.mxu1 %v10220_v4 }
  0x63   : > { %v599_v26 = vor.u32 %v598_v61, %v595_v60  ;;  %v616_v52 = vrot.slane %v7975_v19, 3  ;;  %v8011_v61 = vld [vmem:[#allocation2 + $0x84] ss:$8 sps:$4 sm:$0xff]  }
  0x64   : > { %3232 = vmatpush1.bf16.msra.mxu0 %v7084_v63  ;;  %v609_v63 = vsel %vm503_vm6, %v590_v10, %v608_v44  ;;  %v7972_v10 = vshrl.u32 %v7951_v57, 16  ;;  %10328 = vst [vmem:[#allocation22_spill] sm:$0xff] %v8011_v61  ;;  %v8037_v22 = vshrl.u32 %v8011_v61, 16 }
  0x65   : > { %3233 = vmatprep.subr.bf16.mxu0 %v10220_v4  ;;  %1206 = vmatpush1.bf16.msra.mxu1 %v7094_v16  ;;  %v625_v16 = vrot.slane %v7942_v50, 3  ;;  %v600_v60 = vsel %vm503_vm6, %v581_v38, %v599_v26 }
  0x66   : > { %898 = vmatmul.mubr.bf16.gmra.mrb[8].mxu1 %v564_v18  ;;  %1207 = vmatprep.subr.bf16.mxu1 %v10220_v4  ;;  %v309_v18 = vld [vmem:[%s7552_s24 + $0x58] sm:$0xf]  ;;  %10330 = vst [vmem:[#allocation24_spill] sm:$0xff] %v8037_v22 }
  0x67   : > { %2644 = vmatmul.mubr.bf16.gmra.mrb[8].mxu0 %v7790_v9  ;;  %6205 = vmatprep.mubr.msk.bf16.mxu1 %vm809_vm5, %v591_v27  ;;  %339 = vst.msk [vmem:[#allocation2 + $0xb0] sm:$0xf] %vm316_vm4, %v309_v18  ;;  %v311_v27 = vld [vmem:[%s7552_s24 + $0x60] sm:$0xf]  ;;  %v7101_v18 = vld [vmem:[%s10211_s1 + $0x1d8] sm:$0xff]  }
  0x68   : > { %6353 = vmatprep.mubr.msk.bf16.mxu0 %vm809_vm5, %v7831_v32  ;;  %3234 = vmatpush1.bf16.msra.mxu0 %v7087_v28  ;;  %v626_v28 = vor.u32 %v625_v16, %v622_v13  ;;  %341 = vst.msk [vmem:[#allocation2 + $0xc0] sm:$0xf] %vm316_vm4, %v311_v27  ;;  %v643_v13 = vrot.slane %v7993_v34, 3  ;;  %v8040_v27 = vshll.u32 %v8011_v61, 16  ;;  %v1010_v61 = vld [vmem:[#allocation2] sm:$0x88] }
  0x69   : > { %3235 = vmatprep.subr.bf16.mxu0 %v10220_v4  ;;  %1208 = vmatpush1.bf16.msra.mxu1 %v7100_v35  ;;  %v312_v35 = vld [vmem:[%s7552_s24 + $0x64] sm:$0xf] }
  0x6a   : > { %1209 = vmatprep.subr.bf16.mxu1 %v10220_v4  ;;  %342 = vst.msk [vmem:[#allocation2 + $0xc8] sm:$0xf] %vm316_vm4, %v312_v35 }
  0x6c   : > { %3236 = vmatpush1.bf16.msra.mxu0 %v7089_v43  ;;  %v7119_v43 = vld [vmem:[%s10211_s1 + $0x88] sm:$0xff]  }
  0x6d   : > { %3237 = vmatprep.subr.bf16.mxu0 %v10220_v4  ;;  %1210 = vmatpush1.bf16.msra.mxu1 %v7106_v51  ;;  %v613_v51 = vrot.slane %v7972_v10, 2 }
  0x6e   : > { %906 = vmatmul.mubr.bf16.gmra.mrb[12].mxu1 %v582_v59  ;;  %1211 = vmatprep.subr.bf16.mxu1 %v10220_v4  ;;  %v8007_v59 = vcombine.low %v367_v53, %v368_v55  ;;  %v7123_v53 = vld [vmem:[%s10211_s1 + $0x90] sm:$0xff]  }
  0x6f   : > { %2652 = vmatmul.mubr.bf16.gmra.mrb[12].mxu0 %v7861_v54  ;;  %6206 = vmatprep.mubr.msk.bf16.mxu1 %vm809_vm5, %v609_v63  ;;  %v627_v63 = vsel %vm503_vm6, %v608_v44, %v626_v28  ;;  %v8026_v44 = vld [vmem:[#allocation2 + $0x80] ss:$8 sps:$4 sm:$0xff]   ;;  %v617_v16 = vor.u32 %v616_v52, %v613_v51 }
  0x70   : > { %6354 = vmatprep.mubr.msk.bf16.mxu0 %vm809_vm5, %v7866_v58  ;;  %3238 = vmatpush1.bf16.msra.mxu0 %v7092_v6  ;;  %v640_v6 = vrot.slane %v7990_v31, 2  ;;  %v8021_v55 = vshrl.u32 %v8007_v59, 16  ;;  %v8024_v38 = vshll.u32 %v8007_v59, 16  ;;  %v8049_v51 = vshrl.u32 %v8026_v44, 16 }
  0x71   : > { %3239 = vmatprep.subr.bf16.mxu0 %v10220_v4  ;;  %1212 = vmatpush1.bf16.msra.mxu1 %v7111_v62  ;;  %v618_v52 = vsel %vm503_vm6, %v599_v26, %v617_v16 }
  0x72   : > { %1213 = vmatprep.subr.bf16.mxu1 %v10220_v4  ;;  %10329 = vst [vmem:[#allocation23_spill] sm:$0xff] %v8021_v55  ;;  %v644_v62 = vor.u32 %v643_v13, %v640_v6  ;;  %v631_v35 = vrot.slane %v8021_v55, 2  ;;  %10331 = vst [vmem:[#allocation25_spill] sm:$0xff] %v8049_v51  ;;  %v658_v6 = vrot.slane %v8037_v22, 2  ;;  %v661_v13 = vrot.slane %v8040_v27, 3 }
  0x73   : > { %v649_v55 = vrot.slane %v8049_v51, 2  ;;  %v8097_v22 = vld [vmem:[#allocation2 + $0xa4] ss:$8 sps:$4 sm:$0xff]  }
  0x74   : > { %3240 = vmatpush1.bf16.msra.mxu0 %v7096_v30  ;;  %v7125_v30 = vld [vmem:[%s10211_s1 + $0x98] sm:$0xff]   ;;  %10337 = vst [vmem:[#allocation31_spill] sm:$0xff] %v8097_v22 }
  0x75   : > { %3241 = vmatprep.subr.bf16.mxu0 %v10220_v4  ;;  %1214 = vmatpush1.bf16.msra.mxu1 %v7119_v43  ;;  %v634_v43 = vrot.slane %v8024_v38, 3 }
  0x76   : > { %914 = vmatmul.mubr.bf16.gmra.mrb[16].mxu1 %v600_v60  ;;  %1215 = vmatprep.subr.bf16.mxu1 %v10220_v4  ;;  %v8054_v60 = vld [vmem:[#allocation2 + $0x94] ss:$8 sps:$4 sm:$0xff]  }
  0x77   : > { %2660 = vmatmul.mubr.bf16.gmra.mrb[16].mxu0 %v7906_v23  ;;  %6207 = vmatprep.mubr.msk.bf16.mxu1 %vm809_vm5, %v627_v63  ;;  %10332 = vst [vmem:[#allocation26_spill] sm:$0xff] %v8054_v60  ;;  %v645_v63 = vsel %vm503_vm6, %v626_v28, %v644_v62  ;;  %v635_v26 = vor.u32 %v634_v43, %v631_v35  ;;  %v2912_v28 = vrot.slane %v7762_v49, 1 }
  0x78   : > { %6355 = vmatprep.mubr.msk.bf16.mxu0 %vm809_vm5, %v7915_v33  ;;  %3242 = vmatpush1.bf16.msra.mxu0 %v7097_v56  ;;  %v2924_v56 = vrot.slane %v7754_v47, 1  ;;  %v2929_v47 = vrot.slane %v7788_v8, 1  ;;  %v662_v35 = vor.u32 %v661_v13, %v658_v6  ;;  %v1041_v8 = vrot.slane %v7739_v36, 3 }
  0x79   : > { %3243 = vmatprep.subr.bf16.mxu0 %v10220_v4  ;;  %1216 = vmatpush1.bf16.msra.mxu1 %v7123_v53  ;;  %v8060_v53 = vshll.u32 %v8026_v44, 16  ;;  %v636_v49 = vsel %vm503_vm6, %v617_v16, %v635_v26 }
  0x7a   : > { %1217 = vmatprep.subr.bf16.mxu1 %v10220_v4  ;;  %v2925_v43 = vor.u32 %v2924_v56, %v7751_v46  ;;  %v663_v51 = vsel %vm503_vm6, %v644_v62, %v662_v35 }
  0x7b   : > { %10333 = vst [vmem:[#allocation27_spill] sm:$0xff] %v8060_v53 }
  0x7c   : > { %3244 = vmatpush1.bf16.msra.mxu0 %v7101_v18  ;;  %v8070_v18 = vshrl.u32 %v8054_v60, 16  ;;  %v2930_v36 = vsel %vm2906_vm7, %v2925_v43, %v2929_v47  ;;  %v2913_v43 = vor.u32 %v2912_v28, %v7759_v48  ;;  %v2945_v28 = vrot.slane %v7813_v21, 1 }
  0x7d   : > { %3854 = vmatprep.subr.bf16.mxu0 %v10220_v4  ;;  %1218 = vmatpush1.bf16.msra.mxu1 %v7125_v30  ;;  %v8073_v30 = vshll.u32 %v8054_v60, 16  ;;  %v8087_v60 = vld [vmem:[#allocation2 + $0x90] ss:$8 sps:$4 sm:$0xff]  }
  0x7e   : > { %922 = vmatmul.mubr.bf16.gmra.mrb[20].mxu1 %v618_v52  ;;  %1621 = vmatprep.subr.bf16.mxu1 %v10220_v4  ;;  %10334 = vst [vmem:[#allocation28_spill] sm:$0xff] %v8070_v18  ;;  %v8079_v52 = vcombine.low %v1010_v61, %v7729_v29  ;;  %v8082_v4 = vcombine.high %v1010_v61, %v7729_v29  ;;  %v676_v13 = vrot.slane %v8070_v18, 2  ;;  %v1038_v29 = vrot.slane %v7741_v37, 3 }
  0x7f   : > { %2668 = vmatmul.mubr.bf16.gmra.mrb[20].mxu0 %v7951_v57  ;;  %6208 = vmatprep.mubr.msk.bf16.mxu1 %vm809_vm5, %v645_v63  ;;  %v652_v63 = vrot.slane %v8060_v53, 3  ;;  %v679_v46 = vrot.slane %v8073_v30, 3  ;;  %v1045_v61 = vrot.slane %v7774_v0, 3  ;;  %v314_v53 = vld [vmem:[%s7552_s24 + $0x6c] sm:$0xf]  ;;  %v1043_v0 = vrot.slane %v7777_v3, 3 }
  0x80   : > { %6356 = vmatprep.mubr.msk.bf16.mxu0 %vm809_vm5, %v7964_v17  ;;  %10335 = vst [vmem:[#allocation29_spill] sm:$0xff] %v8079_v52  ;;  %10336 = vst [vmem:[#allocation30_spill] sm:$0xff] %v8082_v4  ;;  %v1040_v6 = vrot.slane %v8082_v4, 3  ;;  %v1037_v56 = vrot.slane %v8079_v52, 3  ;;  %v313_v4 = vld [vmem:[%s7552_s24 + $0x68] sm:$0xf] }
  0x81   : > { %v2917_v52 = vrot.slane %v7802_v15, 1  ;;  %v8109_v37 = vsel %vm1036_vm8, %v1041_v8, %v1045_v61  ;;  %343 = vst.msk [vmem:[#allocation2 + $0xd0] sm:$0xf] %vm316_vm4, %v313_v4  ;;  %344 = vst.msk [vmem:[#allocation2 + $0xd8] sm:$0xf] %vm316_vm4, %v314_v53  ;;  %v8114_v62 = vor.u32 %v652_v63, %v649_v55  ;;  %v8126_v4 = vshll.u32 %v8087_v60, 16 }
  0x82   : > { %v8100_v16 = vsel %vm1036_vm8, %v1040_v6, %v1041_v8  ;;  %v8106_v18 = vsel %vm1036_vm8, %v1037_v56, %v1038_v29  ;;  %v8118_v6 = vshrl.u32 %v8087_v60, 16  ;;  %v1049_v56 = vrot.slane %v7779_v5, 3  ;;  %v8139_v53 = vld [vmem:[#allocation2 + $0xa0] ss:$8 sps:$4 sm:$0xff]  }
  0x83   : > { %v8123_v8 = vor.u32 %v679_v46, %v676_v13  ;;  %v1047_v3 = vrot.slane %v7790_v9, 3  ;;  %v8134_v55 = vshrl.u32 %v8097_v22, 16  ;;  %v8137_v5 = vshll.u32 %v8097_v22, 16 }
  0x84   : > { %v8142_v46 = vsel %vm1036_vm8, %v1045_v61, %v1049_v56  ;;  %v1053_v9 = vrot.slane %v7831_v32, 3  ;;  %v654_v13 = vsel %vm503_vm6, %v635_v26, %v8114_v62  ;;  %v1051_v15 = vrot.slane %v7861_v54, 3  ;;  %v7105_v32 = vld [vmem:[%s10211_s1 + $0x1e0] sm:$0xff]  }
  0x85   : > { %v8147_v63 = vsel %vm1036_vm8, %v1043_v0, %v1047_v3  ;;  %v681_v61 = vsel %vm503_vm6, %v662_v35, %v8123_v8  ;;  %v694_v26 = vrot.slane %v8134_v55, 2  ;;  %v1055_v35 = vrot.slane %v7906_v23, 3 }
  0x86   : > { %930 = vmatmul.mubr.bf16.gmra.mrb[24].mxu1 %v636_v49  ;;  %v8129_v49 = vsel %vm1036_vm8, %v1038_v29, %v1043_v0  ;;  %v2918_v29 = vsel %vm2906_vm7, %v2913_v43, %v2917_v52  ;;  %v8159_v21 = vsel %vm1036_vm8, %v1049_v56, %v1053_v9  ;;  %v1057_v0 = vrot.slane %v7866_v58, 3 }
  0x87   : > { %2676 = vmatmul.mubr.bf16.gmra.mrb[24].mxu0 %v8007_v59  ;;  %6209 = vmatprep.mubr.msk.bf16.mxu1 %vm809_vm5, %v663_v51  ;;  %v2941_v51 = vor.u32 %v2929_v47, %v7785_v7  ;;  %v670_v47 = vrot.slane %v8126_v4, 3  ;;  %10338 = vst [vmem:[#allocation32_spill] sm:$0xff] %v8159_v21  ;;  %v697_v43 = vrot.slane %v8137_v5, 3  ;;  %v8167_v7 = vld [vmem:[#allocation2 + $0xb4] ss:$8 sps:$4 sm:$0xff]   ;;  %v8170_v54 = vsel %vm1036_vm8, %v1047_v3, %v1051_v15 }
  0x88   : > { %6399 = vmatprep.mubr.msk.bf16.mxu0 %vm809_vm5, %v2930_v36  ;;  %v667_v36 = vrot.slane %v8118_v6, 2  ;;  %10339 = vst [vmem:[#allocation33_spill] sm:$0xff] %v8170_v54  ;;  %v8175_v48 = vshrl.u32 %v8139_v53, 16  ;;  %v8178_v58 = vsel %vm1036_vm8, %v1053_v9, %v1057_v0  ;;  %v8181_v22 = vshll.u32 %v8139_v53, 16  ;;  %v7110_v9 = vld [vmem:[%s10211_s1 + $0x1e8] sm:$0xff]  }
  0x89   : > { %v2946_v56 = vsel %vm2906_vm7, %v2941_v51, %v2945_v28  ;;  %10340 = vst [vmem:[#allocation34_spill] sm:$0xff] %v8178_v58  ;;  %v8184_v21 = vsel %vm1036_vm8, %v1051_v15, %v1055_v35  ;;  %v1061_v3 = vrot.slane %v7915_v33, 3  ;;  %v2933_v51 = vor.u32 %v2917_v52, %v7799_v14  ;;  %v378_v52 = vld [vmem:[#allocation2 + $0xc8] sm:$0x77] }
  0x8a   : > { %10341 = vst [vmem:[#allocation35_spill] sm:$0xff] %v8184_v21  ;;  %v671_v23 = vor.u32 %v670_v47, %v667_v36  ;;  %v2937_v54 = vrot.slane %v7824_v25, 1  ;;  %v1059_v58 = vrot.slane %v7951_v57, 3  ;;  %v698_v15 = vor.u32 %v697_v43, %v694_v26 }
  0x8b   : > { %v8198_v33 = vshrl.u32 %v8167_v7, 16  ;;  %v8204_v36 = vsel %vm1036_vm8, %v1057_v0, %v1061_v3  ;;  %v2957_v47 = vor.u32 %v2945_v28, %v7810_v20  ;;  %v2961_v57 = vrot.slane %v7847_v42, 1  ;;  %v8221_v20 = vld [vmem:[#allocation2 + $0xb0] ss:$8 sps:$4 sm:$0xff]  }
  0x8c   : > { %10344 = vst [vmem:[#allocation38_spill] sm:$0xff] %v8204_v36  ;;  %v685_v26 = vrot.slane %v8175_v48, 2  ;;  %v688_v43 = vrot.slane %v8181_v22, 3  ;;  %v672_v25 = vsel %vm503_vm6, %v8114_v62, %v671_v23  ;;  %v2938_v28 = vsel %vm2906_vm7, %v2933_v51, %v2937_v54 }
  0x8d   : > { %10342 = vst [vmem:[#allocation36_spill] sm:$0xff] %v8198_v33  ;;  %v1063_v42 = vrot.slane %v8007_v59, 3  ;;  %v699_v14 = vsel %vm503_vm6, %v8123_v8, %v698_v15  ;;  %v10347_v36 = vrot.slane %v7964_v17, 3  ;;  %v2962_v51 = vsel %vm2906_vm7, %v2957_v47, %v2961_v57 }
  0x8e   : > { %938 = vmatmul.mubr.bf16.gmra.mrb[28].mxu1 %v654_v13  ;;  %v8193_v13 = vld [vmem:[#allocation2 + $0xc0] sm:$0xff]  ;;  %v689_v59 = vor.u32 %v688_v43, %v685_v26  ;;  %v1067_v8 = vrot.slane %v8026_v44, 3  ;;  %v8245_v17 = vshrl.u32 %v8221_v20, 16  ;;  %v2973_v47 = vor.u32 %v2961_v57, %v7844_v41 }
  0x8f   : > { %3258 = vmatmul.mubr.bf16.vlgmr.msra.gmra.mrb[0].mxu0 %v2918_v29  ;;  %6210 = vmatprep.mubr.msk.bf16.mxu1 %vm809_vm5, %v681_v61  ;;  %v8201_v29 = vshll.u32 %v8167_v7, 16  ;;  %v10345_v61 = vmov 0   ;;  %v8234_v62 = vsel %vm1036_vm8, %v1061_v3, %v10347_v36  ;;  %v8239_v21 = vsel %vm1036_vm8, %v1059_v58, %v1063_v42 }
  0x90   : > { %3855 = vmatpush1.bf16.msra.mxu0 %v7105_v32  ;;  %6400 = vmatprep.mubr.msk.bf16.mxu0 %vm809_vm5, %v2946_v56  ;;  %v8210_v32 = vsel %vm1036_vm8, %v1055_v35, %v1059_v58  ;;  %v7115_v56 = vld [vmem:[%s10211_s1 + $0x1f0] sm:$0xff]   ;;  %v8224_v35 = vcombine.high %v8193_v13, %v378_v52  ;;  %10348 = vst [vmem:[#allocation40_spill] sm:$0xff] %v8245_v17  ;;  %v8248_v3 = vshll.u32 %v8221_v20, 16  ;;  %v2977_v26 = vrot.slane %v7895_v12, 1 }
  0x91   : > { %10343 = vst [vmem:[#allocation37_spill] sm:$0xff] %v8201_v29  ;;  %3856 = vmatprep.subr.bf16.mxu0 %v10345_v61  ;;  %10346 = vst [vmem:[#allocation39_spill] sm:$0xff] %v8210_v32  ;;  %v712_v32 = vrot.slane %v8198_v33, 2  ;;  %v715_v0 = vrot.slane %v8201_v29, 3  ;;  %v690_v43 = vsel %vm503_vm6, %v671_v23, %v689_v59 }
  0x92   : > { %10349 = vst [vmem:[#allocation41_spill] sm:$0xff] %v8248_v3  ;;  %v728_v36 = vshrl.u32 %v8224_v35, 16  ;;  %v731_v44 = vshll.u32 %v8224_v35, 16  ;;  %v2978_v23 = vsel %vm2906_vm7, %v2973_v47, %v2977_v26  ;;  %v2989_v47 = vor.u32 %v2977_v26, %v7892_v11  ;;  %v7128_v26 = vld [vmem:[%s10211_s1 + $0x210] sm:$0xff]  }
  0x93   : > { %v716_v58 = vor.u32 %v715_v0, %v712_v32  ;;  %v703_v32 = vrot.slane %v8245_v17, 2  ;;  %v706_v0 = vrot.slane %v8248_v3, 3 }
  0x94   : > { %3857 = vmatpush1.bf16.msra.mxu0 %v7110_v9  ;;  %v2949_v9 = vor.u32 %v2937_v54, %v7821_v24  ;;  %v8258_v54 = vsel %vm1036_vm8, %v1063_v42, %v1067_v8  ;;  %v7124_v42 = vld [vmem:[%s10211_s1 + $0x200] sm:$0xff]  }
  0x95   : > { %3858 = vmatprep.subr.bf16.mxu0 %v10345_v61  ;;  %v717_v12 = vsel %vm503_vm6, %v698_v15, %v716_v58 }
  0x96   : > { %946 = vmatmul.mubr.bf16.gmra.mrb[32].mxu1 %v672_v25  ;;  %v2953_v25 = vrot.slane %v7885_v2, 1  ;;  %v733_v2 = vrot.slane %v731_v44, 3 }
  0x97   : > { %3266 = vmatmul.mubr.bf16.gmra.mrb[4].mxu0 %v2938_v28  ;;  %6211 = vmatprep.mubr.msk.bf16.mxu1 %vm809_vm5, %v699_v14  ;;  %v7122_v14 = vld [vmem:[%s10211_s1 + $0x1f8] sm:$0xff]   ;;  %v730_v28 = vrot.slane %v728_v36, 2  ;;  %v2969_v36 = vrot.slane %v7931_v40, 1 }
  0x98   : > { %6401 = vmatprep.mubr.msk.bf16.mxu0 %vm809_vm5, %v2962_v51  ;;  %3859 = vmatpush1.bf16.msra.mxu0 %v7115_v56  ;;  %v1071_v56 = vrot.slane %v8087_v60, 3  ;;  %v8268_v51 = vcombine.low %v8193_v13, %v378_v52  ;;  %v2954_v57 = vsel %vm2906_vm7, %v2949_v9, %v2953_v25  ;;  %v2965_v52 = vor.u32 %v2953_v25, %v7882_v1  ;;  %v7126_v25 = vld [vmem:[%s10211_s1 + $0x208] sm:$0xff]  }
  0x99   : > { %3860 = vmatprep.subr.bf16.mxu0 %v10345_v61  ;;  %v707_v9 = vor.u32 %v706_v0, %v703_v32  ;;  %v1079_v32 = vrot.slane %v8221_v20, 3  ;;  %v10251_v20 = vrot.slane %v8224_v35, 3 }
  0x9a   : > { %v8276_v60 = vsel %vm1036_vm8, %v1067_v8, %v1071_v56  ;;  %v719_v15 = vshrl.u32 %v8268_v51, 16  ;;  %v722_v44 = vshll.u32 %v8268_v51, 16  ;;  %v1075_v8 = vrot.slane %v8139_v53, 3 }
  0x9b   : > { %v708_v53 = vsel %vm503_vm6, %v689_v59, %v707_v9 }
  0x9c   : > { %3861 = vmatpush1.bf16.msra.mxu0 %v7122_v14  ;;  %v734_v14 = vor.u32 %v733_v2, %v730_v28  ;;  %v2970_v2 = vsel %vm2906_vm7, %v2965_v52, %v2969_v36  ;;  %v721_v0 = vrot.slane %v719_v15, 2  ;;  %v724_v28 = vrot.slane %v722_v44, 3 }
  0x9d   : > { %3862 = vmatprep.subr.bf16.mxu0 %v10345_v61  ;;  %v2981_v44 = vor.u32 %v2969_v36, %v7928_v39  ;;  %v7134_v36 = vld [vmem:[%s10211_s1 + $0x220] sm:$0xff]  }
  0x9e   : > { %954 = vmatmul.mubr.bf16.gmra.mrb[36].mxu1 %v690_v43  ;;  %v2993_v43 = vrot.slane %v7942_v50, 1  ;;  %v725_v52 = vor.u32 %v724_v28, %v721_v0  ;;  %v7138_v28 = vld [vmem:[%s10211_s1 + $0x228] sm:$0xff]  }
  0x9f   : > { %3274 = vmatmul.mubr.bf16.gmra.mrb[8].mxu0 %v2954_v57  ;;  %6212 = vmatprep.mubr.msk.bf16.mxu1 %vm809_vm5, %v717_v12  ;;  %v8294_v12 = vsel %vm1036_vm8, %v1071_v56, %v1075_v8  ;;  %v10252_v57 = vrot.slane %v8167_v7, 3  ;;  %v8305_v56 = vsel %vm1036_vm8, %v1075_v8, %v1079_v32  ;;  %v2985_v8 = vrot.slane %v7975_v19, 1 }
  0xa0   : > { %6402 = vmatprep.mubr.msk.bf16.mxu0 %vm809_vm5, %v2978_v23  ;;  %3863 = vmatpush1.bf16.msra.mxu0 %v7124_v42  ;;  %v735_v42 = vsel %vm503_vm6, %v716_v58, %v734_v14  ;;  %v2994_v59 = vsel %vm2906_vm7, %v2989_v47, %v2993_v43  ;;  %v10250_v23 = vrot.slane %v8268_v51, 3  ;;  %v3005_v47 = vor.u32 %v2993_v43, %v7939_v45 }
  0xa1   : > { %3864 = vmatprep.subr.bf16.mxu0 %v10345_v61  ;;  %v8316_v58 = vsel %vm1036_vm8, %v10252_v57, %v10251_v20  ;;  %v2997_v43 = vor.u32 %v2985_v8, %v7972_v10 }
  0xa2   : > { %v8322_v15 = vsel %vm1036_vm8, %v1079_v32, %v10250_v23  ;;  %v726_v32 = vsel %vm503_vm6, %v707_v9, %v725_v52  ;;  %v3001_v9 = vrot.slane %v8024_v38, 1 }
  0xa4   : > { %3865 = vmatpush1.bf16.msra.mxu0 %v7126_v25  ;;  %v7130_v25 = vld [vmem:[%s10211_s1 + $0x218] sm:$0xff]  }
  0xa5   : > { %3866 = vmatprep.subr.bf16.mxu0 %v10345_v61 }
  0xa6   : > { %962 = vmatmul.mubr.bf16.gmra.mrb[40].mxu1 %v708_v53  ;;  %v3009_v53 = vrot.slane %v7993_v34, 1 }
  0xa7   : > { %3282 = vmatmul.mubr.bf16.gmra.mrb[12].mxu0 %v2970_v2  ;;  %6213 = vmatprep.mubr.msk.bf16.mxu1 %vm809_vm5, %v735_v42  ;;  %v2986_v2 = vsel %vm2906_vm7, %v2981_v44, %v2985_v8  ;;  %v10350_v44 = vld [vmem:[#allocation23_spill] sm:$0xff] }
  0xa8   : > { %6403 = vmatprep.mubr.msk.bf16.mxu0 %vm809_vm5, %v2994_v59  ;;  %3867 = vmatpush1.bf16.msra.mxu0 %v7128_v26  ;;  %v3010_v0 = vsel %vm2906_vm7, %v3005_v47, %v3009_v53  ;;  %v3021_v42 = vor.u32 %v3009_v53, %v7990_v31  ;;  %v3025_v26 = vrot.slane %v8040_v27, 1  ;;  %v3002_v59 = vsel %vm2906_vm7, %v2997_v43, %v3001_v9  ;;  %v10352_v53 = vld [vmem:[#allocation24_spill] sm:$0xff]  ;;  %v10353_v43 = vld [vmem:[#allocation25_spill] sm:$0xff] }
  0xa9   : > { %3868 = vmatprep.subr.bf16.mxu0 %v10345_v61  ;;  %v3013_v8 = vor.u32 %v3001_v9, %v10350_v44 }
  0xac   : > { %3869 = vmatpush1.bf16.msra.mxu0 %v7130_v25  ;;  %v10351_v25 = vld [vmem:[#allocation27_spill] sm:$0xff] }
  0xad   : > { %3870 = vmatprep.subr.bf16.mxu0 %v10345_v61  ;;  %v3017_v47 = vrot.slane %v10351_v25, 1 }
  0xae   : > { %970 = vmatmul.mubr.bf16.gmra.mrb[44].mxu1 %v726_v32  ;;  %v3037_v32 = vor.u32 %v3025_v26, %v10352_v53 }
  0xaf   : > { %3290 = vmatmul.mubr.bf16.gmra.mrb[16].mxu0 %v2986_v2  ;;  %6214 = vmatprep.mubr.msk.bf16.mxu1 %vm809_vm5, %v734_v14  ;;  %v3026_v14 = vsel %vm2906_vm7, %v3021_v42, %v3025_v26  ;;  %v3041_v2 = vrot.slane %v8073_v30, 1  ;;  %v3029_v9 = vor.u32 %v3017_v47, %v10353_v43  ;;  %v7129_v42 = vld [vmem:[%s10211_s1 + $0xa8] sm:$0xff]   ;;  %v10354_v26 = vld [vmem:[#allocation28_spill] sm:$0xff] }
  0xb0   : > { %6404 = vmatprep.mubr.msk.bf16.mxu0 %vm809_vm5, %v3010_v0  ;;  %3871 = vmatpush1.bf16.msra.mxu0 %v7134_v36  ;;  %v3018_v36 = vsel %vm2906_vm7, %v3013_v8, %v3017_v47  ;;  %v8386_v47 = vld [vmem:[#allocation2 + $0xc8] sm:$0xff] }
  0xb1   : > { %3872 = vmatprep.subr.bf16.mxu0 %v10345_v61  ;;  %v3042_v0 = vsel %vm2906_vm7, %v3037_v32, %v3041_v2 }
  0xb4   : > { %3873 = vmatpush1.bf16.msra.mxu0 %v7138_v28  ;;  %v3033_v28 = vrot.slane %v8126_v4, 1 }
  0xb5   : > { %4204 = vmatprep.subr.bf16.mxu0 %v10345_v61 }
  0xb6   : > { %978 = vmatmul.mubr.bf16.gmra.mrb[48].mxu1 %v725_v52  ;;  %v7127_v52 = vld [vmem:[%s10211_s1 + $0xa0] sm:$0xff]   ;;  %v3045_v32 = vor.u32 %v3033_v28, %v8118_v6 }
  0xb7   : > { %3298 = vmatmul.mubr.bf16.gmra.mrb[20].mxu0 %v3002_v59  ;;  %6227 = vmatprep.mubr.msk.bf16.mxu1 %vm809_vm5, %v8100_v16  ;;  %v315_v16 = vld [vmem:[%s7552_s24 + $0x70] sm:$0xf]  ;;  %v3057_v59 = vrot.slane %v8137_v5, 1 }
  0xb8   : > { %6405 = vmatprep.mubr.msk.bf16.mxu0 %vm809_vm5, %v3026_v14  ;;  %345 = vst.msk [vmem:[#allocation2 + $0xe0] sm:$0xf] %vm316_vm4, %v315_v16  ;;  %v7131_v14 = vld [vmem:[%s10211_s1 + $0xb0] sm:$0xff]   ;;  %v7139_v16 = vld [vmem:[%s10211_s1 + $0xc0] sm:$0xff]  }
  0xbe   : > { %1232 = vmatmul.mubr.bf16.vlgmr.msra.gmra.mrb[0].mxu1 %v8106_v18  ;;  %v3053_v18 = vor.u32 %v3041_v2, %v10354_v26  ;;  %v3049_v2 = vrot.slane %v8181_v22, 1 }
  0xbf   : > { %3306 = vmatmul.mubr.bf16.gmra.mrb[24].mxu0 %v3018_v36  ;;  %6228 = vmatprep.mubr.msk.bf16.mxu1 %vm809_vm5, %v8109_v37  ;;  %v3034_v37 = vsel %vm2906_vm7, %v3029_v9, %v3033_v28  ;;  %v7135_v36 = vld [vmem:[%s10211_s1 + $0xb8] sm:$0xff]  }
  0xc0   : > { %1622 = vmatpush1.bf16.msra.mxu1 %v7127_v52  ;;  %6406 = vmatprep.mubr.msk.bf16.mxu0 %vm809_vm5, %v3042_v0  ;;  %v3058_v8 = vsel %vm2906_vm7, %v3053_v18, %v3057_v59  ;;  %v3069_v52 = vor.u32 %v3057_v59, %v8134_v55  ;;  %v6386_v0 = vcombine.high %v8193_v13, %v8386_v47  ;;  %v2781_v18 = vld [vmem:[#allocation2 + $0xd8] sm:$0x11]  ;;  %v10355_v59 = vld [vmem:[#allocation32_spill] sm:$0xff] }
  0xc1   : > { %1623 = vmatprep.subr.bf16.mxu1 %v10345_v61 }
  0xc2   : > { %v3087_v28 = vshll.u32 %v6386_v0, 16 }
  0xc4   : > { %1624 = vmatpush1.bf16.msra.mxu1 %v7129_v42  ;;  %v8408_v42 = vld [vmem:[#allocation2 + $0xd0] sm:$0xff] }
  0xc5   : > { %1625 = vmatprep.subr.bf16.mxu1 %v10345_v61  ;;  %v6387_v23 = vcombine.low %v8408_v42, %v2781_v18 }
  0xc6   : > { %1240 = vmatmul.mubr.bf16.gmra.mrb[4].mxu1 %v8129_v49  ;;  %v3073_v49 = vrot.slane %v8201_v29, 1 }
  0xc7   : > { %3314 = vmatmul.mubr.bf16.gmra.mrb[28].mxu0 %v3034_v37  ;;  %6229 = vmatprep.mubr.msk.bf16.mxu1 %vm809_vm5, %v8142_v46  ;;  %v3050_v46 = vsel %vm2906_vm7, %v3045_v32, %v3049_v2  ;;  %v3061_v37 = vor.u32 %v3049_v2, %v8175_v48  ;;  %v3095_v57 = vshll.u32 %v6387_v23, 16 }
  0xc8   : > { %6407 = vmatprep.mubr.msk.bf16.mxu0 %vm809_vm5, %v3058_v8  ;;  %1626 = vmatpush1.bf16.msra.mxu1 %v7131_v14  ;;  %v3074_v9 = vsel %vm2906_vm7, %v3069_v52, %v3073_v49  ;;  %v3065_v14 = vrot.slane %v8248_v3, 1  ;;  %v6385_v8 = vcombine.low %v8193_v13, %v8386_v47  ;;  %v3085_v32 = vor.u32 %v3073_v49, %v8198_v33  ;;  %v7151_v13 = vld [vmem:[%s10211_s1 + $0xd0] sm:$0xff]   ;;  %v10356_v49 = vld [vmem:[#allocation33_spill] sm:$0xff] }
  0xc9   : > { %1627 = vmatprep.subr.bf16.mxu1 %v10345_v61  ;;  %v6388_v52 = vcombine.high %v8408_v42, %v2781_v18  ;;  %v7164_v18 = vld [vmem:[%s10211_s1 + $0xe0] sm:$0xff]  }
  0xca   : > { %v3079_v2 = vshll.u32 %v6385_v8, 16 }
  0xcc   : > { %1628 = vmatpush1.bf16.msra.mxu1 %v7135_v36  ;;  %v3089_v36 = vrot.slane %v3087_v28, 1  ;;  %v10357_v28 = vld [vmem:[#allocation34_spill] sm:$0xff] }
  0xcd   : > { %1629 = vmatprep.subr.bf16.mxu1 %v10345_v61 }
  0xce   : > { %1248 = vmatmul.mubr.bf16.gmra.mrb[8].mxu1 %v8147_v63  ;;  %v7146_v63 = vld [vmem:[%s10211_s1 + $0xc8] sm:$0xff]  }
  0xcf   : > { %3322 = vmatmul.mubr.bf16.gmra.mrb[32].mxu0 %v3050_v46  ;;  %6230 = vmatprep.mubr.msk.bf16.mxu1 %vm809_vm5, %v10355_v59  ;;  %v3066_v46 = vsel %vm2906_vm7, %v3061_v37, %v3065_v14  ;;  %v3103_v59 = vshll.u32 %v6388_v52, 16  ;;  %v3077_v37 = vor.u32 %v3065_v14, %v8245_v17 }
  0xd0   : > { %6408 = vmatprep.mubr.msk.bf16.mxu0 %vm809_vm5, %v3074_v9  ;;  %1630 = vmatpush1.bf16.msra.mxu1 %v7139_v16  ;;  %v3090_v16 = vsel %vm2906_vm7, %v3085_v32, %v3089_v36  ;;  %v3099_v9 = vshrl.u32 %v6386_v0, 16  ;;  %v7158_v0 = vld [vmem:[%s10211_s1 + $0xd8] sm:$0xff]  }
  0xd1   : > { %1631 = vmatprep.subr.bf16.mxu1 %v10345_v61  ;;  %v3105_v20 = vrot.slane %v3103_v59, 1  ;;  %v3110_v59 = vshrl.u32 %v6388_v52, 16  ;;  %v10360_v52 = vld [vmem:[#allocation39_spill] sm:$0xff] }
  0xd2   : > { %v3101_v32 = vor.u32 %v3099_v9, %v3089_v36  ;;  %v10358_v36 = vld [vmem:[#allocation35_spill] sm:$0xff]  ;;  %v3097_v9 = vrot.slane %v3095_v57, 1 }
  0xd4   : > { %1632 = vmatpush1.bf16.msra.mxu1 %v7146_v63  ;;  %v3081_v63 = vrot.slane %v3079_v2, 1  ;;  %v3106_v14 = vsel %vm2906_vm7, %v3101_v32, %v3105_v20 }
  0xd5   : > { %1633 = vmatprep.subr.bf16.mxu1 %v10345_v61 }
  0xd6   : > { %1256 = vmatmul.mubr.bf16.gmra.mrb[12].mxu1 %v10356_v49  ;;  %v8439_v49 = vld [vmem:[#allocation2 + $0x20] sm:$0xff] }
  0xd7   : > { %3330 = vmatmul.mubr.bf16.gmra.mrb[36].mxu0 %v3066_v46  ;;  %6231 = vmatprep.mubr.msk.bf16.mxu1 %vm809_vm5, %v10357_v28  ;;  %v3386_v46 = vld [vmem:[#allocation2 + $0x18] sm:$0xff]  ;;  %v3082_v28 = vsel %vm2906_vm7, %v3077_v37, %v3081_v63  ;;  %v7169_v37 = vld [vmem:[%s10211_s1 + $0xe8] sm:$0xff]  }
  0xd8   : > { %6409 = vmatprep.mubr.msk.bf16.mxu0 %vm809_vm5, %v3090_v16  ;;  %1634 = vmatpush1.bf16.msra.mxu1 %v7151_v13  ;;  %v3091_v16 = vshrl.u32 %v6385_v8, 16  ;;  %v6413_v2 = vcombine.high %v3386_v46, %v8439_v49  ;;  %v10359_v13 = vld [vmem:[#allocation38_spill] sm:$0xff] }
  0xd9   : > { %1635 = vmatprep.subr.bf16.mxu1 %v10345_v61 }
  0xda   : > { %v3093_v8 = vor.u32 %v3091_v16, %v3081_v63  ;;  %v3551_v32 = vshll.u32 %v6413_v2, 16  ;;  %v3107_v16 = vshrl.u32 %v6387_v23, 16 }
  0xdc   : > { %1636 = vmatpush1.bf16.msra.mxu1 %v7158_v0  ;;  %v8455_v0 = vld [vmem:[#allocation2 + $0x2c] ss:$8 sps:$4 sm:$0xff]   ;;  %v3553_v63 = vrot.slane %v3551_v32, 1  ;;  %v3109_v32 = vor.u32 %v3107_v16, %v3097_v9 }
  0xdd   : > { %1637 = vmatprep.subr.bf16.mxu1 %v10345_v61  ;;  %v10257_v57 = vshll.u32 %v8455_v0, 16  ;;  %v10272_v17 = vshrl.u32 %v8455_v0, 16 }
  0xde   : > { %1264 = vmatmul.mubr.bf16.gmra.mrb[16].mxu1 %v10358_v36  ;;  %v3112_v36 = vor.u32 %v3110_v59, %v3105_v20 }
  0xdf   : > { %3338 = vmatmul.mubr.bf16.gmra.mrb[40].mxu0 %v3082_v28  ;;  %6232 = vmatprep.mubr.msk.bf16.mxu1 %vm809_vm5, %v10359_v13  ;;  %v3098_v28 = vsel %vm2906_vm7, %v3093_v8, %v3097_v9  ;;  %v6412_v13 = vcombine.low %v3386_v46, %v8439_v49  ;;  %v8467_v8 = vld [vmem:[#allocation2 + $0x28] ss:$8 sps:$4 sm:$0xff]   ;;  %v3558_v59 = vrot.slane %v10257_v57, 1 }
  0xe0   : > { %6410 = vmatprep.mubr.msk.bf16.mxu0 %vm809_vm5, %v3106_v14  ;;  %1638 = vmatpush1.bf16.msra.mxu1 %v7164_v18  ;;  %v3549_v14 = vshrl.u32 %v6413_v2, 16  ;;  %v10361_v18 = vld [vmem:[#allocation22_spill] sm:$0xff] }
  0xe1   : > { %1639 = vmatprep.subr.bf16.mxu1 %v10345_v61  ;;  %v1069_v20 = vrot.slane %v10361_v18, 3  ;;  %v3539_v46 = vshll.u32 %v6412_v13, 16  ;;  %v8515_v57 = vld [vmem:[#allocation2 + $0x48] ss:$8 sps:$4 sm:$0xff]  }
  0xe2   : > { %v3554_v2 = vor.u32 %v3553_v63, %v3549_v14  ;;  %v10364_v63 = vld [vmem:[#allocation26_spill] sm:$0xff]  ;;  %10366 = vst [vmem:[#allocation23_spill] sm:$0xff] %v8515_v57 }
  0xe3   : > { %v3541_v23 = vrot.slane %v3539_v46, 1  ;;  %v1073_v16 = vrot.slane %v10364_v63, 3  ;;  %v8486_v46 = vld [vmem:[#allocation2 + $0x38] ss:$8 sps:$4 sm:$0xff]  }
  0xe4   : > { %1640 = vmatpush1.bf16.msra.mxu1 %v7169_v37  ;;  %v8471_v37 = vld [vmem:[#allocation2 + $0x3c] ss:$8 sps:$4 sm:$0xff]   ;;  %v3559_v18 = vsel %vm2906_vm7, %v3554_v2, %v3558_v59  ;;  %v3570_v2 = vor.u32 %v10272_v17, %v3558_v59 }
  0xe5   : > { %2276 = vmatprep.subr.bf16.mxu1 %v10345_v61  ;;  %v10255_v14 = vshll.u32 %v8471_v37, 16  ;;  %v10260_v59 = vshrl.u32 %v8471_v37, 16 }
  0xe6   : > { %1272 = vmatmul.mubr.bf16.gmra.mrb[20].mxu1 %v10360_v52  ;;  %v10362_v52 = vld [vmem:[#allocation21_spill] sm:$0xff] }
  0xe7   : > { %3346 = vmatmul.mubr.bf16.gmra.mrb[44].mxu0 %v3098_v28  ;;  %6233 = vmatprep.mubr.msk.bf16.mxu1 %vm809_vm5, %v8234_v62  ;;  %v10363_v28 = vrot.slane %v10362_v52, 3  ;;  %v3537_v62 = vshrl.u32 %v6412_v13, 16  ;;  %v3574_v52 = vrot.slane %v10255_v14, 1  ;;  %v10365_v14 = vld [vmem:[#allocation31_spill] sm:$0xff] }
  0xe8   : > { %6411 = vmatprep.mubr.msk.bf16.mxu0 %vm809_vm5, %v3112_v36  ;;  %v10256_v36 = vshll.u32 %v8467_v8, 16 }
  0xe9   : > { %v1070_v3 = vsel %vm1036_vm8, %v10363_v28, %v1069_v20  ;;  %v3542_v9 = vor.u32 %v3541_v23, %v3537_v62  ;;  %v1074_v28 = vsel %vm1036_vm8, %v1069_v20, %v1073_v16  ;;  %v10265_v62 = vshrl.u32 %v8467_v8, 16 }
  0xea   : > { %v3546_v13 = vrot.slane %v10256_v36, 1  ;;  %v10258_v23 = vshll.u32 %v8486_v46, 16  ;;  %v1077_v36 = vrot.slane %v10365_v14, 3  ;;  %v10261_v14 = vshll.u32 %v8515_v57, 16 }
  0xec   : > { %v3562_v20 = vor.u32 %v10265_v62, %v3546_v13 }
  0xee   : > { %1280 = vmatmul.mubr.bf16.gmra.mrb[24].mxu1 %v8239_v21  ;;  %v8492_v21 = vld [vmem:[#allocation2 + $0x4c] ss:$8 sps:$4 sm:$0xff]  }
  0xef   : > { %3354 = vmatmul.mubr.bf16.gmra.mrb[48].mxu0 %v3109_v32  ;;  %6234 = vmatprep.mubr.msk.bf16.mxu1 %vm809_vm5, %v1070_v3  ;;  %v3547_v3 = vsel %vm2906_vm7, %v3542_v9, %v3546_v13  ;;  %v7145_v32 = vld [vmem:[%s10211_s1 + $0x230] sm:$0xff]   ;;  %v10259_v63 = vshll.u32 %v8492_v21, 16  ;;  %v3566_v9 = vrot.slane %v10258_v23, 1  ;;  %v8522_v13 = vld [vmem:[#allocation2 + $0x5c] ss:$8 sps:$4 sm:$0xff]  }
  0xf0   : > { %6448 = vmatprep.mubr.msk.bf16.mxu0 %vm809_vm5, %v3559_v18  ;;  %v3575_v18 = vsel %vm2906_vm7, %v3570_v2, %v3574_v52  ;;  %v7150_v2 = vld [vmem:[%s10211_s1 + $0x238] sm:$0xff]   ;;  %10367 = vst [vmem:[#allocation27_spill] sm:$0xff] %v8522_v13  ;;  %v7155_v23 = vld [vmem:[%s10211_s1 + $0x240] sm:$0xff]  }
  0xf6   : > { %1288 = vmatmul.mubr.bf16.gmra.mrb[28].mxu1 %v8258_v54  ;;  %v3586_v54 = vor.u32 %v10260_v59, %v3574_v52  ;;  %v10263_v59 = vshll.u32 %v8522_v13, 16 }
  0xf7   : > { %3887 = vmatmul.mubr.bf16.vlgmr.msra.gmra.mrb[0].mxu0 %v3547_v3  ;;  %6235 = vmatprep.mubr.msk.bf16.mxu1 %vm809_vm5, %v1074_v28  ;;  %v3590_v3 = vrot.slane %v10259_v63, 1  ;;  %v1078_v28 = vsel %vm1036_vm8, %v1073_v16, %v1077_v36  ;;  %v10264_v63 = vshrl.u32 %v8492_v21, 16 }
  0xf8   : > { %4205 = vmatpush1.bf16.msra.mxu0 %v7145_v32  ;;  %6449 = vmatprep.mubr.msk.bf16.mxu0 %vm809_vm5, %v3575_v18  ;;  %v3567_v32 = vsel %vm2906_vm7, %v3562_v20, %v3566_v9  ;;  %v10262_v18 = vshrl.u32 %v8486_v46, 16  ;;  %v3582_v20 = vrot.slane %v10261_v14, 1  ;;  %v10269_v14 = vshrl.u32 %v8515_v57, 16  ;;  %v10384_v57 = vld [vmem:[#allocation12_spill] sm:$0xff] }
  0xf9   : > { %4206 = vmatprep.subr.bf16.mxu0 %v10345_v61  ;;  %v3591_v52 = vsel %vm2906_vm7, %v3586_v54, %v3590_v3  ;;  %v7163_v54 = vld [vmem:[%s10211_s1 + $0x248] sm:$0xff]   ;;  %v1416_v29 = vrot.slane %v10384_v57, 4 }
  0xfa   : > { %v3578_v16 = vor.u32 %v10262_v18, %v3566_v9 }
  0xfc   : > { %4207 = vmatpush1.bf16.msra.mxu0 %v7150_v2  ;;  %v8542_v2 = vld [vmem:[#allocation2 + $0x58] ss:$8 sps:$4 sm:$0xff]   ;;  %v3583_v9 = vsel %vm2906_vm7, %v3578_v16, %v3582_v20  ;;  %v8574_v16 = vld [vmem:[#allocation2 + $0x68] ss:$8 sps:$4 sm:$0xff]  }
  0xfd   : > { %4208 = vmatprep.subr.bf16.mxu0 %v10345_v61  ;;  %10368 = vst [vmem:[#allocation24_spill] sm:$0xff] %v8542_v2  ;;  %v10267_v18 = vshll.u32 %v8542_v2, 16  ;;  %10371 = vst [vmem:[#allocation28_spill] sm:$0xff] %v8574_v16 }
  0xfe   : > { %1296 = vmatmul.mubr.bf16.gmra.mrb[32].mxu1 %v8276_v60  ;;  %v3602_v60 = vor.u32 %v10264_v63, %v3590_v3  ;;  %v7168_v3 = vld [vmem:[%s10211_s1 + $0x250] sm:$0xff]   ;;  %v10268_v63 = vshrl.u32 %v8522_v13, 16 }
  0xff   : > { %3895 = vmatmul.mubr.bf16.gmra.mrb[4].mxu0 %v3567_v32  ;;  %6236 = vmatprep.mubr.msk.bf16.mxu1 %vm809_vm5, %v1078_v28  ;;  %v3606_v32 = vrot.slane %v10263_v59, 1  ;;  %v8551_v28 = vld [vmem:[#allocation2 + $0x6c] ss:$8 sps:$4 sm:$0xff]  }
 0x100   : > { %6450 = vmatprep.mubr.msk.bf16.mxu0 %vm809_vm5, %v3591_v52  ;;  %4209 = vmatpush1.bf16.msra.mxu0 %v7155_v23  ;;  %10369 = vst [vmem:[#allocation25_spill] sm:$0xff] %v8551_v28  ;;  %v10370_v23 = vrot.slane %v8167_v7, 3  ;;  %v10266_v62 = vshll.u32 %v8551_v28, 16  ;;  %v3594_v7 = vor.u32 %v10269_v14, %v3582_v20 }
 0x101   : > { %4210 = vmatprep.subr.bf16.mxu0 %v10345_v61  ;;  %v3607_v59 = vsel %vm2906_vm7, %v3602_v60, %v3606_v32 }
 0x102   : > { %v1082_v52 = vsel %vm1036_vm8, %v1077_v36, %v10370_v23  ;;  %v3598_v36 = vrot.slane %v10267_v18, 1  ;;  %v3622_v60 = vrot.slane %v10266_v62, 1  ;;  %v10270_v23 = vshll.u32 %v8574_v16, 16 }
 0x104   : > { %4211 = vmatpush1.bf16.msra.mxu0 %v7163_v54  ;;  %v7173_v54 = vld [vmem:[%s10211_s1 + $0x258] sm:$0xff]   ;;  %v3599_v20 = vsel %vm2906_vm7, %v3594_v7, %v3598_v36  ;;  %v3614_v14 = vrot.slane %v10270_v23, 1 }
 0x105   : > { %4212 = vmatprep.subr.bf16.mxu0 %v10345_v61  ;;  %v8597_v7 = vld [vmem:[#allocation2 + $0x78] ss:$8 sps:$4 sm:$0xff]  }
 0x106   : > { %1304 = vmatmul.mubr.bf16.gmra.mrb[36].mxu1 %v8294_v12  ;;  %v3618_v12 = vor.u32 %v10268_v63, %v3606_v32 }
 0x107   : > { %3903 = vmatmul.mubr.bf16.gmra.mrb[8].mxu0 %v3583_v9  ;;  %6237 = vmatprep.mubr.msk.bf16.mxu1 %vm809_vm5, %v1082_v52  ;;  %v10271_v9 = vshrl.u32 %v8542_v2, 16  ;;  %v7181_v52 = vld [vmem:[%s10211_s1 + $0x260] sm:$0xff]  }
 0x108   : > { %6451 = vmatprep.mubr.msk.bf16.mxu0 %vm809_vm5, %v3607_v59  ;;  %4213 = vmatpush1.bf16.msra.mxu0 %v7168_v3  ;;  %v8583_v59 = vld [vmem:[#allocation2 + $0x7c] ss:$8 sps:$4 sm:$0xff]   ;;  %v3623_v32 = vsel %vm2906_vm7, %v3618_v12, %v3622_v60  ;;  %v10280_v3 = vshrl.u32 %v8551_v28, 16 }
 0x109   : > { %10372 = vst [vmem:[#allocation32_spill] sm:$0xff] %v8583_v59  ;;  %4214 = vmatprep.subr.bf16.mxu0 %v10345_v61  ;;  %v10279_v62 = vshll.u32 %v8583_v59, 16  ;;  %v3610_v12 = vor.u32 %v10271_v9, %v3598_v36  ;;  %v10374_v9 = vld [vmem:[#allocation7_spill] sm:$0xff]  ;;  %v10375_v2 = vld [vmem:[#allocation8_spill] sm:$0xff] }
 0x10a   : > { %v1407_v17 = vrot.slane %v10374_v9, 3  ;;  %v1408_v13 = vrot.slane %v10375_v2, 4  ;;  %v10377_v9 = vrot.slane %v8224_v35, 3  ;;  %v10379_v35 = vshrl.u32 %v8583_v59, 16 }
 0x10b   : > { %v3615_v28 = vsel %vm2906_vm7, %v3610_v12, %v3614_v14  ;;  %v10293_v59 = vshrl.u32 %v8597_v7, 16 }
 0x10c   : > { %4215 = vmatpush1.bf16.msra.mxu0 %v7173_v54  ;;  %v10373_v54 = vld [vmem:[#allocation30_spill] sm:$0xff] }
 0x10d   : > { %4216 = vmatprep.subr.bf16.mxu0 %v10345_v61  ;;  %v1400_v18 = vshrl.u32 %v10373_v54, 16  ;;  %v1403_v63 = vshll.u32 %v10373_v54, 16  ;;  %v8615_v54 = vld [vmem:[#allocation2 + $0x8c] ss:$8 sps:$4 sm:$0xff]  }
 0x10e   : > { %1312 = vmatmul.mubr.bf16.gmra.mrb[40].mxu1 %v8305_v56  ;;  %v7186_v56 = vld [vmem:[%s10211_s1 + $0x268] sm:$0xff]  }
 0x10f   : > { %3911 = vmatmul.mubr.bf16.gmra.mrb[12].mxu0 %v3599_v20  ;;  %6238 = vmatprep.mubr.msk.bf16.mxu1 %vm809_vm5, %v8316_v58  ;;  %v3634_v58 = vor.u32 %v10280_v3, %v3622_v60  ;;  %v3638_v20 = vrot.slane %v10279_v62, 1  ;;  %v1402_v23 = vrot.slane %v1400_v18, 3  ;;  %v7188_v60 = vld [vmem:[%s10211_s1 + $0x270] sm:$0xff]  }
 0x110   : > { %6452 = vmatprep.mubr.msk.bf16.mxu0 %vm809_vm5, %v3623_v32  ;;  %4217 = vmatpush1.bf16.msra.mxu0 %v7181_v52  ;;  %v10281_v32 = vshll.u32 %v8597_v7, 16  ;;  %v1405_v52 = vrot.slane %v1403_v63, 4  ;;  %v10376_v63 = vshrl.u32 %v8574_v16, 16 }
 0x111   : > { %4218 = vmatprep.subr.bf16.mxu0 %v10345_v61  ;;  %v3639_v62 = vsel %vm2906_vm7, %v3634_v58, %v3638_v20  ;;  %v10378_v58 = vld [vmem:[#allocation29_spill] sm:$0xff] }
 0x112   : > { %v3626_v18 = vor.u32 %v10376_v63, %v3614_v14  ;;  %v3630_v2 = vrot.slane %v10281_v32, 1  ;;  %v1406_v12 = vor.u32 %v1405_v52, %v1402_v23  ;;  %v1388_v3 = vshrl.u32 %v10378_v58, 16  ;;  %v7192_v14 = vld [vmem:[%s10211_s1 + $0x278] sm:$0xff]   ;;  %v10381_v52 = vld [vmem:[#allocation9_spill] sm:$0xff]  ;;  %v10382_v32 = vld [vmem:[#allocation10_spill] sm:$0xff] }
 0x113   : > { %v1391_v36 = vshll.u32 %v10378_v58, 16  ;;  %v10380_v23 = vshll.u32 %v8615_v54, 16  ;;  %v1395_v63 = vrot.slane %v10381_v52, 3  ;;  %v1396_v16 = vrot.slane %v10382_v32, 4 }
 0x114   : > { %4219 = vmatpush1.bf16.msra.mxu0 %v7186_v56  ;;  %v1409_v56 = vor.u32 %v1408_v13, %v1407_v17  ;;  %v8650_v13 = vld [vmem:[#allocation2 + $0x9c] ss:$8 sps:$4 sm:$0xff]   ;;  %v3642_v57 = vor.u32 %v10293_v59, %v3630_v2 }
 0x115   : > { %4220 = vmatprep.subr.bf16.mxu0 %v10345_v61  ;;  %v3654_v17 = vrot.slane %v10380_v23, 1  ;;  %v1393_v58 = vrot.slane %v1391_v36, 4  ;;  %v10290_v52 = vshll.u32 %v8650_v13, 16  ;;  %v1397_v32 = vor.u32 %v1396_v16, %v1395_v63  ;;  %v10386_v16 = vld [vmem:[#allocation13_spill] sm:$0xff] }
 0x116   : > { %1320 = vmatmul.mubr.bf16.gmra.mrb[44].mxu1 %v8322_v15  ;;  %v8641_v15 = vld [vmem:[#allocation2 + $0x88] ss:$8 sps:$4 sm:$0xff]   ;;  %v1411_v63 = vrot.slane %v10386_v16, 3 }
 0x117   : > { %3919 = vmatmul.mubr.bf16.gmra.mrb[16].mxu0 %v3615_v28  ;;  %6239 = vmatprep.mubr.msk.bf16.mxu1 %vm809_vm5, %v10377_v9  ;;  %v3650_v28 = vor.u32 %v10379_v35, %v3638_v20  ;;  %v1390_v9 = vrot.slane %v1388_v3, 3  ;;  %v10291_v20 = vshll.u32 %v8641_v15, 16  ;;  %v10383_v35 = vld [vmem:[#allocation11_spill] sm:$0xff]  ;;  %v10385_v3 = vrot.slane %v8268_v51, 3 }
 0x118   : > { %6453 = vmatprep.mubr.msk.bf16.mxu0 %vm809_vm5, %v3639_v62  ;;  %4221 = vmatpush1.bf16.msra.mxu0 %v7188_v60  ;;  %v3631_v62 = vsel %vm2906_vm7, %v3626_v18, %v3630_v2  ;;  %v1410_v60 = vsel %vm1386_vm9, %v1406_v12, %v1409_v56  ;;  %v1415_v23 = vrot.slane %v10383_v35, 3  ;;  %v10292_v18 = vshrl.u32 %v8615_v54, 16  ;;  %v8668_v12 = vld [vmem:[#allocation2 + $0x98] ss:$8 sps:$4 sm:$0xff]  }
 0x119   : > { %4222 = vmatprep.subr.bf16.mxu0 %v10345_v61  ;;  %v3655_v33 = vsel %vm2906_vm7, %v3650_v28, %v3654_v17  ;;  %v1394_v36 = vor.u32 %v1393_v58, %v1390_v9  ;;  %v10301_v2 = vshrl.u32 %v8641_v15, 16  ;;  %v10295_v35 = vshll.u32 %v8668_v12, 16 }
 0x11a   : > { %v1417_v28 = vor.u32 %v1416_v29, %v1415_v23  ;;  %v3666_v51 = vor.u32 %v10292_v18, %v3654_v17  ;;  %v7174_v17 = vld [vmem:[%s10211_s1 + $0xf0] sm:$0xff]  }
 0x11b   : > { %v1398_v9 = vsel %vm1386_vm9, %v1394_v36, %v1397_v32  ;;  %v3662_v59 = vrot.slane %v10295_v35, 1  ;;  %v10391_v35 = vld [vmem:[#allocation18_spill] sm:$0xff] }
 0x11c   : > { %4223 = vmatpush1.bf16.msra.mxu0 %v7192_v14  ;;  %v3646_v14 = vrot.slane %v10291_v20, 1  ;;  %v1418_v23 = vsel %vm1386_vm9, %v1409_v56, %v1417_v28  ;;  %v10389_v20 = vld [vmem:[#allocation16_spill] sm:$0xff] }
 0x11d   : > { %4626 = vmatprep.subr.bf16.mxu0 %v10345_v61  ;;  %v1424_v16 = vrot.slane %v10389_v20, 4 }
 0x11e   : > { %1328 = vmatmul.mubr.bf16.gmra.mrb[48].mxu1 %v10385_v3  ;;  %v3647_v29 = vsel %vm2906_vm7, %v3642_v57, %v3646_v14  ;;  %v10388_v3 = vld [vmem:[#allocation15_spill] sm:$0xff]  ;;  %v3658_v56 = vor.u32 %v10301_v2, %v3646_v14  ;;  %v8774_v2 = vcombine.low %v8386_v47, %v8408_v42 }
 0x11f   : > { %3927 = vmatmul.mubr.bf16.gmra.mrb[20].mxu0 %v3631_v62  ;;  %6252 = vmatprep.mubr.msk.bf16.mxu1 %vm809_vm5, %v1410_v60  ;;  %v3670_v62 = vrot.slane %v10290_v52, 1  ;;  %v8679_v60 = vld [vmem:[#allocation2 + $0xac] ss:$8 sps:$4 sm:$0xff]   ;;  %v1423_v52 = vrot.slane %v10388_v3, 3  ;;  %v8712_v14 = vld [vmem:[#allocation2 + $0xbc] ss:$8 sps:$4 sm:$0xff]  }
 0x120   : > { %6454 = vmatprep.mubr.msk.bf16.mxu0 %vm809_vm5, %v3655_v33  ;;  %v10387_v33 = vld [vmem:[#allocation14_spill] sm:$0xff]  ;;  %v10294_v18 = vshll.u32 %v8679_v60, 16  ;;  %v3663_v3 = vsel %vm2906_vm7, %v3658_v56, %v3662_v59  ;;  %v10298_v56 = vshll.u32 %v8712_v14, 16 }
 0x121   : > { %v1412_v58 = vrot.slane %v10387_v33, 4  ;;  %v3671_v36 = vsel %vm2906_vm7, %v3666_v51, %v3670_v62  ;;  %v10296_v33 = vshrl.u32 %v8650_v13, 16  ;;  %v1425_v20 = vor.u32 %v1424_v16, %v1423_v52  ;;  %v8702_v51 = vld [vmem:[#allocation2 + $0xa8] ss:$8 sps:$4 sm:$0xff]  }
 0x122   : > { %v10300_v16 = vshrl.u32 %v8668_v12, 16 }
 0x123   : > { %v1413_v57 = vor.u32 %v1412_v58, %v1411_v63  ;;  %v3686_v63 = vrot.slane %v10294_v18, 1  ;;  %v1419_v58 = vrot.slane %v7821_v24, 3  ;;  %v1431_v18 = vrot.slane %v7844_v41, 3  ;;  %v7187_v24 = vld [vmem:[%s10211_s1 + $0x100] sm:$0xff]  }
 0x124   : > { %v8731_v41 = vld [vmem:[#allocation2 + $0xb8] ss:$8 sps:$4 sm:$0xff]  }
 0x126   : > { %1654 = vmatmul.mubr.bf16.vlgmr.msra.gmra.mrb[0].mxu1 %v1398_v9  ;;  %v7182_v9 = vld [vmem:[%s10211_s1 + $0xf8] sm:$0xff]  }
 0x127   : > { %3935 = vmatmul.mubr.bf16.gmra.mrb[24].mxu0 %v3647_v29  ;;  %6253 = vmatprep.mubr.msk.bf16.mxu1 %vm809_vm5, %v1418_v23  ;;  %v3682_v29 = vor.u32 %v10296_v33, %v3670_v62  ;;  %v10390_v23 = vld [vmem:[#allocation17_spill] sm:$0xff]  ;;  %v10297_v62 = vshll.u32 %v8702_v51, 16  ;;  %v1432_v33 = vrot.slane %v10391_v35, 4  ;;  %v3674_v35 = vor.u32 %v10300_v16, %v3662_v59 }
 0x128   : > { %2277 = vmatpush1.bf16.msra.mxu1 %v7174_v17  ;;  %6455 = vmatprep.mubr.msk.bf16.mxu0 %vm809_vm5, %v3671_v36  ;;  %v1420_v52 = vrot.slane %v10390_v23, 4  ;;  %v1414_v17 = vsel %vm1386_vm9, %v1397_v32, %v1413_v57  ;;  %v1426_v36 = vsel %vm1386_vm9, %v1417_v28, %v1425_v20  ;;  %v10299_v32 = vshrl.u32 %v8679_v60, 16 }
 0x129   : > { %2278 = vmatprep.subr.bf16.mxu1 %v10345_v61  ;;  %v3687_v23 = vsel %vm2906_vm7, %v3682_v29, %v3686_v63  ;;  %v1433_v29 = vor.u32 %v1432_v33, %v1431_v18  ;;  %v1427_v18 = vrot.slane %v7882_v1, 3  ;;  %v10392_v33 = vld [vmem:[#allocation19_spill] sm:$0xff] }
 0x12a   : > { %v1421_v28 = vor.u32 %v1420_v52, %v1419_v58  ;;  %v3698_v58 = vor.u32 %v10299_v32, %v3686_v63  ;;  %v3702_v52 = vrot.slane %v10298_v56, 1  ;;  %v1439_v63 = vrot.slane %v7892_v11, 3  ;;  %v3410_v11 = vld [vmem:[#allocation2 + $0xd8] sm:$0xff] }
 0x12b   : > { %v1434_v16 = vsel %vm1386_vm9, %v1425_v20, %v1433_v29 }
 0x12c   : > { %2279 = vmatpush1.bf16.msra.mxu1 %v7182_v9  ;;  %v3678_v9 = vrot.slane %v10297_v62, 1  ;;  %v1422_v59 = vsel %vm1386_vm9, %v1413_v57, %v1421_v28  ;;  %v10393_v62 = vld [vmem:[#allocation20_spill] sm:$0xff]  ;;  %v7193_v57 = vld [vmem:[%s10211_s1 + $0x110] sm:$0xff]   ;;  %v3703_v1 = vsel %vm2906_vm7, %v3698_v58, %v3702_v52 }
 0x12d   : > { %2280 = vmatprep.subr.bf16.mxu1 %v10345_v61  ;;  %v1440_v56 = vrot.slane %v10393_v62, 4  ;;  %v3411_v62 = vld [vmem:[#allocation2 + $0xe0] sm:$0x11] }
 0x12e   : > { %1662 = vmatmul.mubr.bf16.gmra.mrb[4].mxu1 %v1414_v17  ;;  %v7189_v17 = vld [vmem:[%s10211_s1 + $0x108] sm:$0xff]   ;;  %v3679_v32 = vsel %vm2906_vm7, %v3674_v35, %v3678_v9 }
 0x12f   : > { %3943 = vmatmul.mubr.bf16.gmra.mrb[28].mxu0 %v3663_v3  ;;  %6254 = vmatprep.mubr.msk.bf16.mxu1 %vm809_vm5, %v1426_v36  ;;  %v8747_v3 = vcombine.high %v8386_v47, %v8408_v42  ;;  %v1428_v36 = vrot.slane %v10392_v33, 4  ;;  %v3712_v33 = vshrl.u32 %v8712_v14, 16  ;;  %v1441_v58 = vor.u32 %v1440_v56, %v1439_v63 }
 0x130   : > { %6456 = vmatprep.mubr.msk.bf16.mxu0 %vm809_vm5, %v3687_v23  ;;  %2281 = vmatpush1.bf16.msra.mxu1 %v7187_v24  ;;  %v3688_v24 = vshrl.u32 %v8702_v51, 16  ;;  %v3692_v23 = vshll.u32 %v8731_v41, 16  ;;  %v1435_v56 = vrot.slane %v7928_v39, 3  ;;  %v1436_v47 = vrot.slane %v7931_v40, 4  ;;  %v7197_v39 = vld [vmem:[%s10211_s1 + $0x120] sm:$0xff]  }
 0x131   : > { %2282 = vmatprep.subr.bf16.mxu1 %v10345_v61  ;;  %v1429_v20 = vor.u32 %v1428_v36, %v1427_v18  ;;  %v8783_v18 = vcombine.high %v3410_v11, %v3411_v62  ;;  %v1442_v63 = vsel %vm1386_vm9, %v1433_v29, %v1441_v58 }
 0x132   : > { %v3690_v35 = vor.u32 %v3688_v24, %v3678_v9  ;;  %v10394_v9 = vshll.u32 %v8747_v3, 16  ;;  %v1437_v29 = vor.u32 %v1436_v47, %v1435_v56 }
 0x133   : > { %v1430_v42 = vsel %vm1386_vm9, %v1421_v28, %v1429_v20  ;;  %v10304_v28 = vshrl.u32 %v8747_v3, 16 }
 0x134   : > { %2283 = vmatpush1.bf16.msra.mxu1 %v7189_v17  ;;  %v3694_v17 = vrot.slane %v3692_v23, 1 }
 0x135   : > { %2284 = vmatprep.subr.bf16.mxu1 %v10345_v61 }
 0x136   : > { %1670 = vmatmul.mubr.bf16.gmra.mrb[8].mxu1 %v1422_v59  ;;  %v3718_v59 = vrot.slane %v10394_v9, 1  ;;  %v3695_v36 = vsel %vm2906_vm7, %v3690_v35, %v3694_v17  ;;  %v1448_v9 = vrot.slane %v7942_v50, 4  ;;  %v3732_v35 = vshll.u32 %v8783_v18, 16 }
 0x137   : > { %3951 = vmatmul.mubr.bf16.gmra.mrb[32].mxu0 %v3679_v32  ;;  %6255 = vmatprep.mubr.msk.bf16.mxu1 %vm809_vm5, %v1434_v16  ;;  %v7195_v32 = vld [vmem:[%s10211_s1 + $0x118] sm:$0xff]   ;;  %v3714_v16 = vor.u32 %v3712_v33, %v3702_v52  ;;  %v10302_v52 = vshll.u32 %v8774_v2, 16 }
 0x138   : > { %6457 = vmatprep.mubr.msk.bf16.mxu0 %vm809_vm5, %v3703_v1  ;;  %2285 = vmatpush1.bf16.msra.mxu1 %v7193_v57  ;;  %v3704_v57 = vshrl.u32 %v8731_v41, 16  ;;  %v1447_v1 = vrot.slane %v7939_v45, 3  ;;  %v8803_v45 = vcombine.low %v3410_v11, %v3411_v62  ;;  %v3730_v56 = vor.u32 %v10304_v28, %v3718_v59 }
 0x139   : > { %2286 = vmatprep.subr.bf16.mxu1 %v10345_v61  ;;  %v3719_v40 = vsel %vm2906_vm7, %v3714_v16, %v3718_v59  ;;  %v3734_v47 = vrot.slane %v3732_v35, 1  ;;  %v1438_v11 = vsel %vm1386_vm9, %v1429_v20, %v1437_v29  ;;  %v1443_v62 = vrot.slane %v7972_v10, 3  ;;  %v7201_v20 = vld [vmem:[%s10211_s1 + $0x130] sm:$0xff]   ;;  %v7203_v35 = vld [vmem:[%s10211_s1 + $0x138] sm:$0xff]  }
 0x13a   : > { %v3706_v50 = vor.u32 %v3704_v57, %v3694_v17  ;;  %v1449_v16 = vor.u32 %v1448_v9, %v1447_v1  ;;  %v1444_v17 = vrot.slane %v7975_v19, 4  ;;  %v1456_v59 = vrot.slane %v7993_v34, 4 }
 0x13b   : > { %v3735_v10 = vsel %vm2906_vm7, %v3730_v56, %v3734_v47 }
 0x13c   : > { %2287 = vmatpush1.bf16.msra.mxu1 %v7195_v32  ;;  %v3710_v32 = vrot.slane %v10302_v52, 1  ;;  %v1450_v9 = vsel %vm1386_vm9, %v1441_v58, %v1449_v16  ;;  %v1445_v19 = vor.u32 %v1444_v17, %v1443_v62 }
 0x13d   : > { %2288 = vmatprep.subr.bf16.mxu1 %v10345_v61 }
 0x13e   : > { %1678 = vmatmul.mubr.bf16.gmra.mrb[12].mxu1 %v1430_v42  ;;  %v7199_v42 = vld [vmem:[%s10211_s1 + $0x128] sm:$0xff]   ;;  %v3711_v1 = vsel %vm2906_vm7, %v3706_v50, %v3710_v32  ;;  %v4015_v50 = vld [vmem:[#allocation2 + $0x18] sm:$0xee] }
 0x13f   : > { %3959 = vmatmul.mubr.bf16.gmra.mrb[36].mxu0 %v3695_v36  ;;  %6256 = vmatprep.mubr.msk.bf16.mxu1 %vm809_vm5, %v1442_v63  ;;  %v10303_v36 = vshrl.u32 %v8774_v2, 16  ;;  %v3724_v63 = vshll.u32 %v8803_v45, 16 }
 0x140   : > { %6458 = vmatprep.mubr.msk.bf16.mxu0 %vm809_vm5, %v3719_v40  ;;  %2289 = vmatpush1.bf16.msra.mxu1 %v7197_v39  ;;  %v1455_v39 = vrot.slane %v7990_v31, 3  ;;  %v3739_v40 = vshrl.u32 %v8783_v18, 16 }
 0x141   : > { %2290 = vmatprep.subr.bf16.mxu1 %v10345_v61  ;;  %v3722_v58 = vor.u32 %v10303_v36, %v3710_v32  ;;  %v3726_v31 = vrot.slane %v3724_v63, 1  ;;  %v1451_v32 = vrot.slane %v10350_v44, 3  ;;  %v1463_v63 = vrot.slane %v10352_v53, 3  ;;  %v4996_v36 = vld [vmem:[#allocation3 + $0x48] sm:$0xff] }
 0x142   : > { %v1457_v34 = vor.u32 %v1456_v59, %v1455_v39  ;;  %v3741_v17 = vor.u32 %v3739_v40, %v3734_v47  ;;  %v1459_v39 = vrot.slane %v10353_v43, 3  ;;  %v1460_v59 = vrot.slane %v10351_v25, 4 }
 0x143   : > { %v3727_v56 = vsel %vm2906_vm7, %v3722_v58, %v3726_v31  ;;  %v1471_v58 = vrot.slane %v10354_v26, 3  ;;  %v1472_v40 = vrot.slane %v8073_v30, 4  ;;  %v4043_v43 = vrot.slane %v8467_v8, 1 }
 0x144   : > { %2291 = vmatpush1.bf16.msra.mxu1 %v7199_v42  ;;  %v1446_v42 = vsel %vm1386_vm9, %v1437_v29, %v1445_v19  ;;  %v1458_v62 = vsel %vm1386_vm9, %v1449_v16, %v1457_v34  ;;  %v1467_v30 = vrot.slane %v8118_v6, 3 }
 0x145   : > { %2292 = vmatprep.subr.bf16.mxu1 %v10345_v61 }
 0x146   : > { %1686 = vmatmul.mubr.bf16.gmra.mrb[16].mxu1 %v1438_v11  ;;  %v1452_v11 = vrot.slane %v8024_v38, 4  ;;  %v3736_v38 = vshrl.u32 %v8803_v45, 16 }
 0x147   : > { %3967 = vmatmul.mubr.bf16.gmra.mrb[40].mxu0 %v3711_v1  ;;  %6257 = vmatprep.mubr.msk.bf16.mxu1 %vm809_vm5, %v1450_v9  ;;  %v1464_v1 = vrot.slane %v8040_v27, 4  ;;  %v8847_v9 = vcombine.high %v4015_v50, %v8439_v49  ;;  %v4046_v27 = vrot.slane %v8455_v0, 1 }
 0x148   : > { %6459 = vmatprep.mubr.msk.bf16.mxu0 %vm809_vm5, %v3735_v10  ;;  %2293 = vmatpush1.bf16.msra.mxu1 %v7201_v20  ;;  %v1453_v44 = vor.u32 %v1452_v11, %v1451_v32  ;;  %v3738_v47 = vor.u32 %v3736_v38, %v3726_v31  ;;  %v8860_v10 = vcombine.low %v4015_v50, %v8439_v49  ;;  %v4050_v49 = vrot.slane %v8471_v37, 1 }
 0x149   : > { %2294 = vmatprep.subr.bf16.mxu1 %v10345_v61  ;;  %v1465_v29 = vor.u32 %v1464_v1, %v1463_v63  ;;  %v4045_v53 = vrot.slane %v8847_v9, 1  ;;  %v1473_v31 = vor.u32 %v1472_v40, %v1471_v58  ;;  %v1479_v32 = vrot.slane %v8134_v55, 3 }
 0x14a   : > { %v1454_v16 = vsel %vm1386_vm9, %v1445_v19, %v1453_v44  ;;  %v1461_v19 = vor.u32 %v1460_v59, %v1459_v39  ;;  %v4042_v25 = vrot.slane %v8860_v10, 1  ;;  %v1480_v11 = vrot.slane %v8137_v5, 4  ;;  %v8889_v5 = vld [vmem:[#allocation2 + $0xc8] sm:$0xff] }
 0x14b   : > { %v1466_v20 = vsel %vm1386_vm9, %v1457_v34, %v1465_v29  ;;  %v1468_v34 = vrot.slane %v8126_v4, 4  ;;  %v4048_v4 = vrot.slane %v8486_v46, 1  ;;  %v4054_v55 = vrot.slane %v8492_v21, 1  ;;  %v10396_v39 = vld [vmem:[#allocation37_spill] sm:$0xff] }
 0x14c   : > { %2295 = vmatpush1.bf16.msra.mxu1 %v7203_v35  ;;  %v4047_v35 = vsel %vm4041_vm10, %v4045_v53, %v4046_v27  ;;  %v1462_v26 = vsel %vm1386_vm9, %v1453_v44, %v1461_v19  ;;  %v4044_v50 = vsel %vm4041_vm10, %v4042_v25, %v4043_v43  ;;  %v1481_v63 = vor.u32 %v1480_v11, %v1479_v32 }
 0x14d   : > { %6591 = vmatprep.subr.bf16.mxu1 %v10345_v61  ;;  %v1469_v6 = vor.u32 %v1468_v34, %v1467_v30  ;;  %v4049_v44 = vsel %vm4041_vm10, %v4043_v43, %v4048_v4  ;;  %v1475_v38 = vrot.slane %v8175_v48, 3  ;;  %v1488_v59 = vrot.slane %v10396_v39, 4  ;;  %v10399_v34 = vld [vmem:[#allocation40_spill] sm:$0xff] }
 0x14e   : > { %1694 = vmatmul.mubr.bf16.gmra.mrb[20].mxu1 %v1446_v42  ;;  %v7194_v42 = vld [vmem:[%s10211_s1 + $0x280] sm:$0xff]   ;;  %v1482_v53 = vsel %vm1386_vm9, %v1473_v31, %v1481_v63  ;;  %v4055_v40 = vsel %vm4041_vm10, %v4050_v49, %v4054_v55 }
 0x14f   : > { %3975 = vmatmul.mubr.bf16.gmra.mrb[44].mxu0 %v3727_v56  ;;  %6258 = vmatprep.mubr.msk.bf16.mxu1 %vm809_vm5, %v1458_v62  ;;  %v1474_v56 = vsel %vm1386_vm9, %v1465_v29, %v1473_v31  ;;  %v4051_v62 = vsel %vm4041_vm10, %v4046_v27, %v4050_v49  ;;  %v1470_v1 = vsel %vm1386_vm9, %v1461_v19, %v1469_v6  ;;  %v1476_v29 = vrot.slane %v8181_v22, 4  ;;  %v7198_v27 = vld [vmem:[%s10211_s1 + $0x290] sm:$0xff]   ;;  %v10397_v22 = vld [vmem:[#allocation23_spill] sm:$0xff] }
 0x150   : > { %6460 = vmatprep.mubr.msk.bf16.mxu0 %vm809_vm5, %v3741_v17  ;;  %v7196_v17 = vld [vmem:[%s10211_s1 + $0x288] sm:$0xff]   ;;  %v7200_v31 = vld [vmem:[%s10211_s1 + $0x298] sm:$0xff]  }
 0x151   : > { %v1477_v48 = vor.u32 %v1476_v29, %v1475_v38  ;;  %v10398_v49 = vld [vmem:[#allocation27_spill] sm:$0xff] }
 0x153   : > { %v1478_v30 = vsel %vm1386_vm9, %v1469_v6, %v1477_v48 }
 0x156   : > { %1702 = vmatmul.mubr.bf16.gmra.mrb[24].mxu1 %v1454_v16  ;;  %v10395_v16 = vld [vmem:[#allocation36_spill] sm:$0xff] }
 0x157   : > { %3983 = vmatmul.mubr.bf16.gmra.mrb[48].mxu0 %v3738_v47  ;;  %6259 = vmatprep.mubr.msk.bf16.mxu1 %vm809_vm5, %v1466_v20  ;;  %v1487_v47 = vrot.slane %v10395_v16, 3  ;;  %v7433_v20 = vld [vmem:[#allocation2 + $0xc0] sm:$0xff]  ;;  %v1782_v16 = vld [vmem:[#allocation2 + $0x8] sm:$0x88] }
 0x158   : > { %6473 = vmatprep.mubr.msk.bf16.mxu0 %vm809_vm5, %v4047_v35  ;;  %v6241_v58 = vcombine.high %v7433_v20, %v8889_v5  ;;  %v4052_v35 = vrot.slane %v10397_v22, 1  ;;  %v6240_v32 = vcombine.low %v7433_v20, %v8889_v5 }
 0x159   : > { %v1489_v19 = vor.u32 %v1488_v59, %v1487_v47  ;;  %v10402_v47 = vld [vmem:[#allocation25_spill] sm:$0xff] }
 0x15a   : > { %v1501_v25 = vshrl.u32 %v6241_v58, 16  ;;  %v1504_v43 = vshll.u32 %v6241_v58, 16  ;;  %v4053_v11 = vsel %vm4041_vm10, %v4048_v4, %v4052_v35  ;;  %v1492_v29 = vshrl.u32 %v6240_v32, 16 }
 0x15b   : > { %v1495_v4 = vshll.u32 %v6240_v32, 16  ;;  %v4062_v39 = vrot.slane %v10402_v47, 1 }
 0x15c   : > { %v1494_v20 = vrot.slane %v1492_v29, 3 }
 0x15d   : > { %v1497_v58 = vrot.slane %v1495_v4, 4 }
 0x15e   : > { %1710 = vmatmul.mubr.bf16.gmra.mrb[28].mxu1 %v1462_v26  ;;  %v4058_v26 = vrot.slane %v10398_v49, 1 }
 0x15f   : > { %4237 = vmatmul.mubr.bf16.vlgmr.msra.gmra.mrb[0].mxu0 %v4044_v50  ;;  %6260 = vmatprep.mubr.msk.bf16.mxu1 %vm809_vm5, %v1474_v56  ;;  %v1483_v50 = vrot.slane %v10399_v34, 3  ;;  %v7436_v34 = vld [vmem:[#allocation2 + $0x20] sm:$0xff] }
 0x160   : > { %4627 = vmatpush1.bf16.msra.mxu0 %v7194_v42  ;;  %6474 = vmatprep.mubr.msk.bf16.mxu0 %vm809_vm5, %v4051_v62  ;;  %v10400_v42 = vld [vmem:[#allocation41_spill] sm:$0xff]  ;;  %v1490_v62 = vsel %vm1386_vm9, %v1481_v63, %v1489_v19  ;;  %v4059_v38 = vsel %vm4041_vm10, %v4054_v55, %v4058_v26  ;;  %v10401_v63 = vld [vmem:[#allocation24_spill] sm:$0xff] }
 0x161   : > { %4628 = vmatprep.subr.bf16.mxu0 %v10345_v61  ;;  %v1484_v56 = vrot.slane %v10400_v42, 4  ;;  %v7204_v55 = vld [vmem:[%s10211_s1 + $0x2a8] sm:$0xff]   ;;  %v7205_v42 = vld [vmem:[%s10211_s1 + $0x2b0] sm:$0xff]  }
 0x163   : > { %v1485_v6 = vor.u32 %v1484_v56, %v1483_v50  ;;  %v4063_v56 = vsel %vm4041_vm10, %v4058_v26, %v4062_v39  ;;  %v7206_v26 = vld [vmem:[%s10211_s1 + $0x2b8] sm:$0xff]  }
 0x164   : > { %4629 = vmatpush1.bf16.msra.mxu0 %v7196_v17  ;;  %v1503_v17 = vrot.slane %v1501_v25, 3 }
 0x165   : > { %4630 = vmatprep.subr.bf16.mxu0 %v10345_v61  ;;  %v1486_v59 = vsel %vm1386_vm9, %v1477_v48, %v1485_v6  ;;  %v1498_v48 = vor.u32 %v1497_v58, %v1494_v20 }
 0x166   : > { %1718 = vmatmul.mubr.bf16.gmra.mrb[32].mxu1 %v1470_v1  ;;  %v1506_v1 = vrot.slane %v1504_v43, 4 }
 0x167   : > { %4245 = vmatmul.mubr.bf16.gmra.mrb[4].mxu0 %v4049_v44  ;;  %6261 = vmatprep.mubr.msk.bf16.mxu1 %vm809_vm5, %v1482_v53  ;;  %v7202_v44 = vld [vmem:[%s10211_s1 + $0x2a0] sm:$0xff]   ;;  %v4056_v53 = vrot.slane %v10401_v63, 1  ;;  %v1499_v29 = vsel %vm1386_vm9, %v1485_v6, %v1498_v48 }
 0x168   : > { %6475 = vmatprep.mubr.msk.bf16.mxu0 %vm809_vm5, %v4055_v40  ;;  %4631 = vmatpush1.bf16.msra.mxu0 %v7198_v27  ;;  %v1507_v27 = vor.u32 %v1506_v1, %v1503_v17  ;;  %v7434_v40 = vld [vmem:[#allocation2 + $0x10] sm:$0xff]  ;;  %v10404_v1 = vld [vmem:[#allocation32_spill] sm:$0xff] }
 0x169   : > { %4632 = vmatprep.subr.bf16.mxu0 %v10345_v61  ;;  %v6266_v25 = vcombine.high %v1782_v16, %v7434_v40  ;;  %v4057_v43 = vsel %vm4041_vm10, %v4052_v35, %v4056_v53  ;;  %v10403_v35 = vld [vmem:[#allocation28_spill] sm:$0xff] }
 0x16a   : > { %v4060_v32 = vrot.slane %v10403_v35, 1 }
 0x16c   : > { %4633 = vmatpush1.bf16.msra.mxu0 %v7200_v31  ;;  %v1508_v31 = vsel %vm1386_vm9, %v1489_v19, %v1507_v27  ;;  %v1950_v19 = vshrl.u32 %v6266_v25, 16  ;;  %v4061_v4 = vsel %vm4041_vm10, %v4056_v53, %v4060_v32 }
 0x16d   : > { %4634 = vmatprep.subr.bf16.mxu0 %v10345_v61 }
 0x16e   : > { %1726 = vmatmul.mubr.bf16.gmra.mrb[36].mxu1 %v1478_v30  ;;  %v7435_v30 = vld [vmem:[#allocation2 + $0x18] sm:$0xff] }
 0x16f   : > { %4253 = vmatmul.mubr.bf16.gmra.mrb[8].mxu0 %v4053_v11  ;;  %6262 = vmatprep.mubr.msk.bf16.mxu1 %vm809_vm5, %v1490_v62  ;;  %v6268_v50 = vcombine.high %v7435_v30, %v7436_v34  ;;  %v1953_v11 = vshll.u32 %v6266_v25, 16 }
 0x170   : > { %6476 = vmatprep.mubr.msk.bf16.mxu0 %vm809_vm5, %v4059_v38  ;;  %4635 = vmatpush1.bf16.msra.mxu0 %v7202_v44  ;;  %v4066_v44 = vrot.slane %v10404_v1, 1  ;;  %v6265_v38 = vcombine.low %v1782_v16, %v7434_v40  ;;  %v4064_v16 = vrot.slane %v8597_v7, 1 }
 0x171   : > { %4636 = vmatprep.subr.bf16.mxu0 %v10345_v61  ;;  %v1958_v62 = vshrl.u32 %v6268_v50, 16  ;;  %v1961_v17 = vshll.u32 %v6268_v50, 16  ;;  %v1955_v20 = vrot.slane %v1953_v11, 4 }
 0x172   : > { %v1933_v6 = vshrl.u32 %v6265_v38, 16  ;;  %v1936_v53 = vshll.u32 %v6265_v38, 16  ;;  %v4065_v38 = vsel %vm4041_vm10, %v4060_v32, %v4064_v16  ;;  %v4068_v32 = vrot.slane %v8641_v15, 1 }
 0x173   : > { %v1960_v58 = vrot.slane %v1958_v62, 3  ;;  %v1963_v25 = vrot.slane %v1961_v17, 4  ;;  %v4070_v17 = vrot.slane %v8615_v54, 1 }
 0x174   : > { %4637 = vmatpush1.bf16.msra.mxu0 %v7204_v55  ;;  %v1952_v55 = vrot.slane %v1950_v19, 3 }
 0x175   : > { %4638 = vmatprep.subr.bf16.mxu0 %v10345_v61  ;;  %v1964_v19 = vor.u32 %v1963_v25, %v1960_v58  ;;  %v7439_v25 = vld [vmem:[#allocation2 + $0x38] sm:$0xff] }
 0x176   : > { %1734 = vmatmul.mubr.bf16.gmra.mrb[40].mxu1 %v1486_v59  ;;  %v6267_v59 = vcombine.low %v7435_v30, %v7436_v34  ;;  %v1956_v34 = vor.u32 %v1955_v20, %v1952_v55 }
 0x177   : > { %4261 = vmatmul.mubr.bf16.gmra.mrb[12].mxu0 %v4057_v43  ;;  %6263 = vmatprep.mubr.msk.bf16.mxu1 %vm809_vm5, %v1508_v31  ;;  %v7437_v43 = vld [vmem:[#allocation2 + $0x28] sm:$0xff]  ;;  %v7438_v31 = vld [vmem:[#allocation2 + $0x30] sm:$0xff] }
 0x178   : > { %6477 = vmatprep.mubr.msk.bf16.mxu0 %vm809_vm5, %v4063_v56  ;;  %4639 = vmatpush1.bf16.msra.mxu0 %v7205_v42  ;;  %v6270_v50 = vcombine.high %v7437_v43, %v7438_v31  ;;  %v7207_v42 = vld [vmem:[%s10211_s1 + $0x2c0] sm:$0xff]   ;;  %v4067_v56 = vsel %vm4041_vm10, %v4062_v39, %v4066_v44  ;;  %v1941_v40 = vshrl.u32 %v6267_v59, 16  ;;  %v1944_v30 = vshll.u32 %v6267_v59, 16  ;;  %v7208_v39 = vld [vmem:[%s10211_s1 + $0x2c8] sm:$0xff]  }
 0x179   : > { %4640 = vmatprep.subr.bf16.mxu0 %v10345_v61  ;;  %v6269_v59 = vcombine.low %v7437_v43, %v7438_v31  ;;  %v1965_v55 = vsel %vm1386_vm9, %v1956_v34, %v1964_v19  ;;  %v4074_v34 = vrot.slane %v8650_v13, 1 }
 0x17a   : > { %v1976_v11 = vshrl.u32 %v6270_v50, 16  ;;  %v1979_v62 = vshll.u32 %v6270_v50, 16  ;;  %v7440_v50 = vld [vmem:[#allocation2 + $0x40] sm:$0xff] }
 0x17b   : > { %v1970_v43 = vshll.u32 %v6269_v59, 16 }
 0x17c   : > { %4641 = vmatpush1.bf16.msra.mxu0 %v7206_v26  ;;  %v1938_v26 = vrot.slane %v1936_v53, 4  ;;  %v1978_v20 = vrot.slane %v1976_v11, 3  ;;  %v1981_v58 = vrot.slane %v1979_v62, 4  ;;  %v1967_v53 = vshrl.u32 %v6269_v59, 16 }
 0x17d   : > { %4642 = vmatprep.subr.bf16.mxu0 %v10345_v61  ;;  %v6271_v11 = vcombine.low %v7439_v25, %v7440_v50 }
 0x17e   : > { %1742 = vmatmul.mubr.bf16.gmra.mrb[44].mxu1 %v1499_v29  ;;  %v1943_v29 = vrot.slane %v1941_v40, 3  ;;  %v1982_v31 = vor.u32 %v1981_v58, %v1978_v20  ;;  %v1969_v62 = vrot.slane %v1967_v53, 3 }
 0x17f   : > { %4269 = vmatmul.mubr.bf16.gmra.mrb[16].mxu0 %v4061_v4  ;;  %6264 = vmatprep.mubr.msk.bf16.mxu1 %vm809_vm5, %v1507_v27  ;;  %v1935_v27 = vrot.slane %v1933_v6, 3  ;;  %v1946_v4 = vrot.slane %v1944_v30, 4  ;;  %v1985_v20 = vshrl.u32 %v6271_v11, 16  ;;  %v1988_v58 = vshll.u32 %v6271_v11, 16 }
 0x180   : > { %6478 = vmatprep.mubr.msk.bf16.mxu0 %vm809_vm5, %v4067_v56  ;;  %4643 = vmatpush1.bf16.msra.mxu0 %v7207_v42  ;;  %v6272_v42 = vcombine.high %v7439_v25, %v7440_v50  ;;  %v4071_v56 = vsel %vm4041_vm10, %v4066_v44, %v4070_v17 }
 0x181   : > { %4644 = vmatprep.subr.bf16.mxu0 %v10345_v61  ;;  %v1939_v52 = vor.u32 %v1938_v26, %v1935_v27  ;;  %v1947_v6 = vor.u32 %v1946_v4, %v1943_v29  ;;  %v1983_v27 = vsel %vm1386_vm9, %v1964_v19, %v1982_v31  ;;  %v7441_v29 = vld [vmem:[#allocation2 + $0x48] sm:$0xff]  ;;  %v7442_v4 = vld [vmem:[#allocation2 + $0x50] sm:$0xff]  ;;  %v7443_v19 = vld [vmem:[%s10211_s1 + $0x140] sm:$0xff]   ;;  %v1990_v53 = vrot.slane %v1988_v58, 4 }
 0x182   : > { %v1994_v40 = vshrl.u32 %v6272_v42, 16  ;;  %v1997_v30 = vshll.u32 %v6272_v42, 16  ;;  %v6274_v59 = vcombine.high %v7441_v29, %v7442_v4 }
 0x183   : > { %v1948_v44 = vsel %vm1386_vm9, %v1939_v52, %v1947_v6 }
 0x184   : > { %4645 = vmatpush1.bf16.msra.mxu0 %v7208_v39  ;;  %v1972_v39 = vrot.slane %v1970_v43, 4  ;;  %v1996_v26 = vrot.slane %v1994_v40, 3  ;;  %v2012_v50 = vshrl.u32 %v6274_v59, 16  ;;  %v2015_v42 = vshll.u32 %v6274_v59, 16  ;;  %v7447_v59 = vld [vmem:[%s10211_s1 + $0x150] sm:$0xff]  }
 0x186   : > { %1750 = vmatmul.mubr.bf16.gmra.mrb[48].mxu1 %v1498_v48  ;;  %v4069_v48 = vsel %vm4041_vm10, %v4064_v16, %v4068_v32  ;;  %v1973_v52 = vor.u32 %v1972_v39, %v1969_v62  ;;  %v4072_v16 = vrot.slane %v8668_v12, 1  ;;  %v2017_v62 = vrot.slane %v2015_v42, 4  ;;  %v7445_v39 = vld [vmem:[#allocation2 + $0x58] sm:$0xff] }
 0x187   : > { %4277 = vmatmul.mubr.bf16.gmra.mrb[20].mxu0 %v4065_v38  ;;  %6301 = vmatprep.mubr.msk.bf16.mxu1 %vm809_vm5, %v1965_v55  ;;  %v1999_v38 = vrot.slane %v1997_v30, 4  ;;  %v4075_v55 = vsel %vm4041_vm10, %v4070_v17, %v4074_v34  ;;  %v4078_v17 = vrot.slane %v8679_v60, 1  ;;  %v6273_v30 = vcombine.low %v7441_v29, %v7442_v4 }
 0x188   : > { %6479 = vmatprep.mubr.msk.bf16.mxu0 %vm809_vm5, %v4071_v56  ;;  %v1987_v56 = vrot.slane %v1985_v20, 3  ;;  %v1974_v43 = vsel %vm1386_vm9, %v1947_v6, %v1973_v52  ;;  %v4073_v40 = vsel %vm4041_vm10, %v4068_v32, %v4072_v16  ;;  %v4076_v32 = vrot.slane %v8702_v51, 1 }
 0x189   : > { %v2000_v25 = vor.u32 %v1999_v38, %v1996_v26  ;;  %v4079_v38 = vsel %vm4041_vm10, %v4074_v34, %v4078_v17  ;;  %v2006_v29 = vshll.u32 %v6273_v30, 16  ;;  %v4082_v20 = vrot.slane %v8712_v14, 1 }
 0x18a   : > { %v1991_v6 = vor.u32 %v1990_v53, %v1987_v56 }
 0x18b   : > { %v2001_v11 = vsel %vm1386_vm9, %v1982_v31, %v2000_v25  ;;  %v2003_v31 = vshrl.u32 %v6273_v30, 16  ;;  %v2008_v42 = vrot.slane %v2006_v29, 4  ;;  %v7448_v30 = vld [vmem:[#allocation2 + $0x68] sm:$0xff]  ;;  %v4086_v29 = vrot.slane %v8747_v3, 1 }
 0x18c   : > { %v1992_v58 = vsel %vm1386_vm9, %v1973_v52, %v1991_v6 }
 0x18e   : > { %2309 = vmatmul.mubr.bf16.vlgmr.msra.gmra.mrb[0].mxu1 %v1948_v44  ;;  %v7444_v44 = vld [vmem:[%s10211_s1 + $0x148] sm:$0xff]  }
 0x18f   : > { %4285 = vmatmul.mubr.bf16.gmra.mrb[24].mxu0 %v4069_v48  ;;  %6302 = vmatprep.mubr.msk.bf16.mxu1 %vm809_vm5, %v1983_v27  ;;  %v2014_v48 = vrot.slane %v2012_v50, 3  ;;  %v7446_v27 = vld [vmem:[#allocation2 + $0x60] sm:$0xff]  ;;  %v2005_v50 = vrot.slane %v2003_v31, 3 }
 0x190   : > { %6601 = vmatpush1.bf16.msra.mxu1 %v7443_v19  ;;  %6480 = vmatprep.mubr.msk.bf16.mxu0 %vm809_vm5, %v4075_v55  ;;  %v6276_v26 = vcombine.high %v7445_v39, %v7446_v27  ;;  %v4077_v19 = vsel %vm4041_vm10, %v4072_v16, %v4076_v32  ;;  %v6275_v56 = vcombine.low %v7445_v39, %v7446_v27  ;;  %v4080_v39 = vrot.slane %v8731_v41, 1  ;;  %v9008_v31 = vld [vmem:[#allocation2 + $0x80] sm:$0xff]  ;;  %v4983_v41 = vld [vmem:[%s10213_s3 + $0xa8] sm:$0xff] }
 0x191   : > { %6592 = vmatprep.subr.bf16.mxu1 %v10345_v61  ;;  %v2018_v4 = vor.u32 %v2017_v62, %v2014_v48  ;;  %v7450_v48 = vld [vmem:[%s10211_s1 + $0x158] sm:$0xff]   ;;  %v4083_v62 = vsel %vm4041_vm10, %v4078_v17, %v4082_v20  ;;  %v2009_v52 = vor.u32 %v2008_v42, %v2005_v50  ;;  %v7451_v17 = vld [vmem:[%s10211_s1 + $0x160] sm:$0xff]  }
 0x192   : > { %v2030_v34 = vshrl.u32 %v6276_v26, 16  ;;  %v2033_v55 = vshll.u32 %v6276_v26, 16  ;;  %v2021_v16 = vshrl.u32 %v6275_v56, 16  ;;  %v4081_v42 = vsel %vm4041_vm10, %v4076_v32, %v4080_v39 }
 0x193   : > { %v2019_v53 = vsel %vm1386_vm9, %v2000_v25, %v2018_v4  ;;  %v2024_v25 = vshll.u32 %v6275_v56, 16 }
 0x194   : > { %6602 = vmatpush1.bf16.msra.mxu1 %v7444_v44 }
 0x195   : > { %6593 = vmatprep.subr.bf16.mxu1 %v10345_v61 }
 0x196   : > { %2317 = vmatmul.mubr.bf16.gmra.mrb[4].mxu1 %v1974_v43  ;;  %v2032_v43 = vrot.slane %v2030_v34, 3  ;;  %v2010_v34 = vsel %vm1386_vm9, %v1991_v6, %v2009_v52 }
 0x197   : > { %4293 = vmatmul.mubr.bf16.gmra.mrb[28].mxu0 %v4073_v40  ;;  %6303 = vmatprep.mubr.msk.bf16.mxu1 %vm809_vm5, %v2001_v11  ;;  %v2035_v40 = vrot.slane %v2033_v55, 4  ;;  %v7449_v11 = vld [vmem:[#allocation2 + $0x70] sm:$0xff]  ;;  %v2023_v55 = vrot.slane %v2021_v16, 3  ;;  %v4084_v16 = vrot.slane %v8774_v2, 1 }
 0x198   : > { %6481 = vmatprep.mubr.msk.bf16.mxu0 %vm809_vm5, %v4079_v38  ;;  %6603 = vmatpush1.bf16.msra.mxu1 %v7447_v59  ;;  %v6278_v44 = vcombine.high %v7448_v30, %v7449_v11  ;;  %v6277_v59 = vcombine.low %v7448_v30, %v7449_v11  ;;  %v4087_v30 = vsel %vm4041_vm10, %v4082_v20, %v4086_v29  ;;  %v7454_v20 = vld [vmem:[%s10211_s1 + $0x170] sm:$0xff]  }
 0x199   : > { %6594 = vmatprep.subr.bf16.mxu1 %v10345_v61  ;;  %v2036_v27 = vor.u32 %v2035_v40, %v2032_v43  ;;  %v7453_v40 = vld [vmem:[%s10211_s1 + $0x168] sm:$0xff]  }
 0x19a   : > { %v2048_v26 = vshrl.u32 %v6278_v44, 16  ;;  %v2051_v38 = vshll.u32 %v6278_v44, 16  ;;  %v2039_v6 = vshrl.u32 %v6277_v59, 16  ;;  %v2042_v11 = vshll.u32 %v6277_v59, 16 }
 0x19b   : > { %v2037_v56 = vsel %vm1386_vm9, %v2018_v4, %v2036_v27 }
 0x19c   : > { %6604 = vmatpush1.bf16.msra.mxu1 %v7450_v48  ;;  %v2053_v43 = vrot.slane %v2051_v38, 4  ;;  %v4989_v48 = vld [vmem:[#allocation3 + $0x10] sm:$0xff]  ;;  %v9031_v38 = vld [vmem:[#allocation2 + $0x88] sm:$0xff]  ;;  %v2041_v59 = vrot.slane %v2039_v6, 3 }
 0x19d   : > { %6595 = vmatprep.subr.bf16.mxu1 %v10345_v61  ;;  %5041 = vrot.lane.b32.xlu1 %v4989_v48, %s7501_s28  ;;  %v7455_v6 = vld [vmem:[%s10211_s1 + $0x178] sm:$0xff]  }
 0x19e   : > { %2325 = vmatmul.mubr.bf16.gmra.mrb[8].mxu1 %v1992_v58  ;;  %v2026_v58 = vrot.slane %v2024_v25, 4 }
 0x19f   : > { %4301 = vmatmul.mubr.bf16.gmra.mrb[32].mxu0 %v4077_v19  ;;  %6304 = vmatprep.mubr.msk.bf16.mxu1 %vm809_vm5, %v2019_v53  ;;  %v7452_v19 = vld [vmem:[#allocation2 + $0x78] sm:$0xff]  ;;  %v2050_v53 = vrot.slane %v2048_v26, 3  ;;  %v4090_v26 = vrot.slane %v8783_v18, 1  ;;  %v10408_v18 = vshll.u32 %v8467_v8, 16 }
 0x1a0   : > { %6482 = vmatprep.mubr.msk.bf16.mxu0 %vm809_vm5, %v4083_v62  ;;  %6605 = vmatpush1.bf16.msra.mxu1 %v7451_v17  ;;  %v6280_v50 = vcombine.high %v7452_v19, %v9008_v31  ;;  %v2027_v32 = vor.u32 %v2026_v58, %v2023_v55  ;;  %v4987_v62 = vld [vmem:[#allocation3] sm:$0xff]  ;;  %v9033_v17 = vld [vmem:[#allocation2 + $0x90] sm:$0xff]  ;;  %v4990_v55 = vld [vmem:[#allocation3 + $0x18] sm:$0xff] }
 0x1a1   : > { %6596 = vmatprep.subr.bf16.mxu1 %v10345_v61  ;;  %v2054_v25 = vor.u32 %v2053_v43, %v2050_v53  ;;  %5037 = vrot.lane.b32.xlu0 %v4987_v62, %s7501_s28  ;;  %v4988_v53 = vld [vmem:[#allocation3 + $0x8] sm:$0xff]  ;;  %v4085_v43 = vsel %vm4041_vm10, %v4080_v39, %v4084_v16 }
 0x1a2   : > { %v2066_v44 = vshrl.u32 %v6280_v50, 16  ;;  %v2069_v4 = vshll.u32 %v6280_v50, 16  ;;  %v2028_v58 = vsel %vm1386_vm9, %v2009_v52, %v2027_v32  ;;  %v4091_v52 = vsel %vm4041_vm10, %v4086_v29, %v4090_v26  ;;  %5043 = vrot.lane.b32.xlu1 %v4990_v55, %s7501_s28  ;;  %v4991_v29 = vld [vmem:[#allocation3 + $0x20] sm:$0xff] }
 0x1a3   : > { %v6281_v55 = vcombine.low %v9031_v38, %v9033_v17 }
 0x1a4   : > { %6606 = vmatpush1.bf16.msra.mxu1 %v7453_v40  ;;  %v2068_v50 = vrot.slane %v2066_v44, 3  ;;  %v2055_v40 = vsel %vm1386_vm9, %v2036_v27, %v2054_v25  ;;  %v4992_v27 = vld [vmem:[#allocation3 + $0x28] sm:$0xff] }
 0x1a5   : > { %6597 = vmatprep.subr.bf16.mxu1 %v10345_v61  ;;  %5039 = vrot.lane.b32.xlu0 %v4988_v53, %s7501_s28 }
 0x1a6   : > { %2333 = vmatmul.mubr.bf16.gmra.mrb[12].mxu1 %v2010_v34  ;;  %v2044_v34 = vrot.slane %v2042_v11, 4  ;;  %5047 = vrot.lane.b32.xlu1 %v4992_v27, %s7501_s28 }
 0x1a7   : > { %4309 = vmatmul.mubr.bf16.gmra.mrb[36].mxu0 %v4081_v42  ;;  %6305 = vmatprep.mubr.msk.bf16.mxu1 %vm809_vm5, %v2037_v56  ;;  %v2071_v42 = vrot.slane %v2069_v4, 4  ;;  %v6279_v56 = vcombine.low %v7452_v19, %v9008_v31  ;;  %v4088_v19 = vrot.slane %v8803_v45, 1 }
 0x1a8   : > { %6483 = vmatprep.mubr.msk.bf16.mxu0 %vm809_vm5, %v4087_v30  ;;  %6607 = vmatpush1.bf16.msra.mxu1 %v7454_v20  ;;  %v6282_v30 = vcombine.high %v9031_v38, %v9033_v17  ;;  %v9052_v39 = vor.u32 %v2044_v34, %v2041_v59  ;;  %v7456_v20 = vld [vmem:[%s10211_s1 + $0x180] sm:$0xff]   ;;  %v4405_v59 = vshrl.u32 %v8847_v9, 16  ;;  %v4408_v34 = vshll.u32 %v8847_v9, 16 }
 0x1a9   : > { %6598 = vmatprep.subr.bf16.mxu1 %v10345_v61  ;;  %v9057_v11 = vor.u32 %v2071_v42, %v2068_v50  ;;  %v2057_v44 = vshrl.u32 %v6279_v56, 16  ;;  %v2060_v4 = vshll.u32 %v6279_v56, 16  ;;  %v9069_v50 = vld [vmem:[#allocation2 + $0xa0] sm:$0xff]  ;;  %5045 = vrot.lane.b32.xlu0 %v4991_v29, %s7501_s28  ;;  %v4089_v9 = vsel %vm4041_vm10, %v4084_v16, %v4088_v19  ;;  %v7457_v29 = vld [vmem:[%s10211_s1 + $0x188] sm:$0xff]  }
 0x1aa   : > { %v2084_v48 = vshrl.u32 %v6282_v30, 16  ;;  %v2087_v62 = vshll.u32 %v6282_v30, 16  ;;  %v2046_v42 = vsel %vm1386_vm9, %v2027_v32, %v9052_v39  ;;  %v4994_v56 = vld [vmem:[#allocation3 + $0x38] sm:$0xff]  ;;  %v4993_v30 = vld [vmem:[#allocation3 + $0x30] sm:$0xff]  ;;  %v4407_v16 = vrot.slane %v4405_v59, 1 }
 0x1ab   : > { %v2073_v53 = vsel %vm1386_vm9, %v2054_v25, %v9057_v11  ;;  %v10406_v25 = vshll.u32 %v8455_v0, 16  ;;  %5051 = vrot.lane.b32.xlu1 %v4994_v56, %s7501_s28 }
 0x1ac   : > { %6608 = vmatpush1.bf16.msra.mxu1 %v7455_v6  ;;  %v2086_v6 = vrot.slane %v2084_v48, 3  ;;  %v2078_v48 = vshll.u32 %v6281_v55, 16 }
 0x1ad   : > { %6599 = vmatprep.subr.bf16.mxu1 %v10345_v61  ;;  %5049 = vrot.lane.b32.xlu0 %v4993_v30, %s7501_s28  ;;  %v9100_v30 = vld [vmem:[#allocation2 + $0xa8] sm:$0xff] }
 0x1ae   : > { %2341 = vmatmul.mubr.bf16.gmra.mrb[16].mxu1 %v2028_v58  ;;  %v9067_v58 = vld [vmem:[#allocation2 + $0x98] sm:$0xff] }
 0x1af   : > { %4317 = vmatmul.mubr.bf16.gmra.mrb[40].mxu0 %v4085_v43  ;;  %6306 = vmatprep.mubr.msk.bf16.mxu1 %vm809_vm5, %v2055_v40  ;;  %v2059_v43 = vrot.slane %v2057_v44, 3  ;;  %v2062_v40 = vrot.slane %v2060_v4, 4  ;;  %v6284_v32 = vcombine.high %v9067_v58, %v9069_v50  ;;  %v4413_v44 = vrot.slane %v10406_v25, 2 }
 0x1b0   : > { %6484 = vmatprep.mubr.msk.bf16.mxu0 %vm809_vm5, %v4091_v52  ;;  %6609 = vmatpush1.bf16.msra.mxu1 %v7456_v20  ;;  %v10405_v52 = vshrl.u32 %v8455_v0, 16  ;;  %v4410_v20 = vrot.slane %v4408_v34, 2  ;;  %v2075_v4 = vshrl.u32 %v6281_v55, 16  ;;  %v4995_v34 = vld [vmem:[#allocation3 + $0x40] sm:$0xff]  ;;  %v10407_v0 = vshrl.u32 %v8467_v8, 16 }
 0x1b1   : > { %6600 = vmatprep.subr.bf16.mxu1 %v10345_v61  ;;  %v2089_v61 = vrot.slane %v2087_v62, 4  ;;  %v4393_v62 = vshrl.u32 %v8860_v10, 16  ;;  %v2063_v59 = vor.u32 %v2062_v40, %v2059_v43  ;;  %v2105_v56 = vshll.u32 %v6284_v32, 16  ;;  %5055 = vrot.lane.b32.xlu1 %v4996_v36, %s7501_s28 }
 0x1b2   : > { %v4412_v27 = vrot.slane %v10405_v52, 1  ;;  %v4396_v52 = vshll.u32 %v8860_v10, 16  ;;  %v4411_v10 = vor.u32 %v4410_v20, %v4407_v16  ;;  %v2077_v28 = vrot.slane %v2075_v4, 3  ;;  %5053 = vrot.lane.b32.xlu0 %v4995_v34, %s7501_s28 }
 0x1b3   : > { %v2090_v55 = vor.u32 %v2089_v61, %v2086_v6  ;;  %v4395_v43 = vrot.slane %v4393_v62, 1  ;;  %v2064_v6 = vsel %vm1386_vm9, %v9052_v39, %v2063_v59  ;;  %v6283_v61 = vcombine.low %v9067_v58, %v9069_v50 }
 0x1b4   : > { %6610 = vmatpush1.bf16.msra.mxu1 %v7457_v29  ;;  %v4400_v29 = vrot.slane %v10407_v0, 1  ;;  %v4414_v25 = vor.u32 %v4413_v44, %v4412_v27  ;;  %v4398_v40 = vrot.slane %v4396_v52, 2  ;;  %v4401_v0 = vrot.slane %v10408_v18, 2  ;;  %v4997_v27 = vld [vmem:[#allocation3 + $0x50] sm:$0xff] }
 0x1b5   : > { %v2107_v16 = vrot.slane %v2105_v56, 4  ;;  %v10409_v44 = vshrl.u32 %v8471_v37, 16  ;;  %v2096_v56 = vshll.u32 %v6283_v61, 16 }
 0x1b6   : > { %2349 = vmatmul.mubr.bf16.gmra.mrb[20].mxu1 %v2046_v42  ;;  %v2102_v42 = vshrl.u32 %v6284_v32, 16  ;;  %v2091_v32 = vsel %vm1386_vm9, %v9057_v11, %v2090_v55  ;;  %v4415_v8 = vsel %vm4391_vm11, %v4411_v10, %v4414_v25  ;;  %v4399_v52 = vor.u32 %v4398_v40, %v4395_v43  ;;  %v5000_v11 = vld [vmem:[#allocation3 + $0x68] sm:$0xff]  ;;  %5057 = vrot.lane.b32.xlu0 %v4997_v27, %s7501_s28  ;;  %v4999_v10 = vld [vmem:[#allocation3 + $0x60] sm:$0xff]  ;;  %v5002_v43 = vld [vmem:[#allocation3 + $0x78] sm:$0xff] }
 0x1b7   : > { %4325 = vmatmul.mubr.bf16.gmra.mrb[44].mxu0 %v4089_v9  ;;  %6307 = vmatprep.mubr.msk.bf16.mxu1 %vm809_vm5, %v2073_v53  ;;  %v9102_v9 = vld [vmem:[#allocation2 + $0xb0] sm:$0xff]  ;;  %v2080_v53 = vrot.slane %v2078_v48, 4  ;;  %v4420_v4 = vrot.slane %v10409_v44, 1  ;;  %v10410_v48 = vshll.u32 %v8471_v37, 16  ;;  %v4402_v34 = vor.u32 %v4401_v0, %v4400_v29  ;;  %v9129_v29 = vld [vmem:[#allocation2 + $0xc0] sm:$0xff] }
 0x1b8   : > { %6485 = vmatprep.mubr.msk.bf16.mxu0 %vm809_vm5, %v4090_v26  ;;  %v4998_v26 = vld [vmem:[#allocation3 + $0x58] sm:$0xff]  ;;  %v2104_v36 = vrot.slane %v2102_v42, 3  ;;  %v6286_v20 = vcombine.high %v9100_v30, %v9102_v9  ;;  %v2093_v42 = vshrl.u32 %v6283_v61, 16  ;;  %v2098_v0 = vrot.slane %v2096_v56, 4  ;;  %v5004_v56 = vld [vmem:[#allocation3 + $0x88] sm:$0xff] }
 0x1b9   : > { %v4421_v39 = vrot.slane %v10410_v48, 2  ;;  %5059 = vrot.lane.b32.xlu1 %v4998_v26, %s7501_s28  ;;  %v2081_v62 = vor.u32 %v2080_v53, %v2077_v28  ;;  %v9127_v28 = vld [vmem:[#allocation2 + $0xb8] sm:$0xff]  ;;  %v6285_v53 = vcombine.low %v9100_v30, %v9102_v9  ;;  %v10411_v61 = vshrl.u32 %v8486_v46, 16 }
 0x1ba   : > { %v2108_v37 = vor.u32 %v2107_v16, %v2104_v36  ;;  %v2120_v18 = vshrl.u32 %v6286_v20, 16  ;;  %v2123_v26 = vshll.u32 %v6286_v20, 16  ;;  %5061 = vrot.lane.b32.xlu0 %v4999_v10, %s7501_s28  ;;  %v2095_v40 = vrot.slane %v2093_v42, 3  ;;  %v5001_v16 = vld [vmem:[#allocation3 + $0x70] sm:$0xff] }
 0x1bb   : > { %v2082_v45 = vsel %vm1386_vm9, %v2063_v59, %v2081_v62  ;;  %v4416_v27 = vrot.slane %v10411_v61, 1  ;;  %v6288_v44 = vcombine.high %v9127_v28, %v9129_v29  ;;  %v10413_v48 = vshrl.u32 %v8492_v21, 16 }
 0x1bc   : > { %v2109_v20 = vsel %vm1386_vm9, %v2090_v55, %v2108_v37  ;;  %v2122_v59 = vrot.slane %v2120_v18, 3  ;;  %v2114_v42 = vshll.u32 %v6285_v53, 16  ;;  %v2099_v55 = vor.u32 %v2098_v0, %v2095_v40  ;;  %v5006_v0 = vld [vmem:[#allocation3 + $0x98] sm:$0xff] }
 0x1bd   : > { %5063 = vrot.lane.b32.xlu1 %v5000_v11, %s7501_s28 }
 0x1be   : > { %2357 = vmatmul.mubr.bf16.gmra.mrb[24].mxu1 %v2064_v6  ;;  %v4422_v6 = vor.u32 %v4421_v39, %v4420_v4  ;;  %v4428_v39 = vrot.slane %v10413_v48, 1  ;;  %5065 = vrot.lane.b32.xlu0 %v5001_v16, %s7501_s28  ;;  %v10416_v16 = vshll.u32 %v10397_v22, 16 }
 0x1bf   : > { %4333 = vmatmul.mubr.bf16.gmra.mrb[48].mxu0 %v4088_v19  ;;  %6308 = vmatprep.mubr.msk.bf16.mxu1 %vm809_vm5, %v2091_v32  ;;  %v4403_v19 = vsel %vm4391_vm11, %v4399_v52, %v4402_v34  ;;  %v10412_v32 = vshll.u32 %v8486_v46, 16  ;;  %v10414_v52 = vshll.u32 %v8492_v21, 16  ;;  %v2111_v46 = vshrl.u32 %v6285_v53, 16 }
 0x1c0   : > { %6498 = vmatprep.mubr.msk.bf16.mxu0 %vm809_vm5, %v4415_v8  ;;  %v2125_v8 = vrot.slane %v2123_v26, 4  ;;  %v4423_v4 = vsel %vm4391_vm11, %v4414_v25, %v4422_v6  ;;  %v5003_v25 = vld [vmem:[#allocation3 + $0x80] sm:$0xff]  ;;  %v2138_v26 = vshrl.u32 %v6288_v44, 16  ;;  %v2141_v21 = vshll.u32 %v6288_v44, 16 }
 0x1c1   : > { %v4417_v36 = vrot.slane %v10412_v32, 2  ;;  %v4429_v11 = vrot.slane %v10414_v52, 2  ;;  %5067 = vrot.lane.b32.xlu1 %v5002_v43, %s7501_s28  ;;  %v9153_v32 = vld [vmem:[#allocation2 + $0xd0] sm:$0xff]  ;;  %v2116_v53 = vrot.slane %v2114_v42, 4  ;;  %v10415_v43 = vshrl.u32 %v10397_v22, 16 }
 0x1c2   : > { %v2126_v18 = vor.u32 %v2125_v8, %v2122_v59  ;;  %v4425_v40 = vrot.slane %v10416_v16, 2  ;;  %5069 = vrot.lane.b32.xlu0 %v5003_v25, %s7501_s28  ;;  %v5005_v59 = vld [vmem:[#allocation3 + $0x90] sm:$0xff]  ;;  %v2140_v44 = vrot.slane %v2138_v26, 3  ;;  %v6290_v48 = vcombine.high %v8889_v5, %v9153_v32  ;;  %v5008_v42 = vld [vmem:[#allocation3 + $0xa8] sm:$0xff] }
 0x1c3   : > { %v4418_v10 = vor.u32 %v4417_v36, %v4416_v27  ;;  %v4430_v61 = vor.u32 %v4429_v11, %v4428_v39  ;;  %v2100_v27 = vsel %vm1386_vm9, %v2081_v62, %v2099_v55  ;;  %v10417_v39 = vshrl.u32 %v10398_v49, 16 }
 0x1c4   : > { %v2127_v8 = vsel %vm1386_vm9, %v2108_v37, %v2126_v18  ;;  %v10418_v62 = vshll.u32 %v10398_v49, 16  ;;  %v2156_v26 = vshrl.u32 %v6290_v48, 16  ;;  %v2159_v49 = vshll.u32 %v6290_v48, 16 }
 0x1c5   : > { %5071 = vrot.lane.b32.xlu1 %v5004_v56, %s7501_s28  ;;  %v4419_v36 = vsel %vm4391_vm11, %v4402_v34, %v4418_v10  ;;  %v4431_v22 = vsel %vm4391_vm11, %v4422_v6, %v4430_v61  ;;  %v4436_v52 = vrot.slane %v10417_v39, 1  ;;  %v5007_v6 = vld [vmem:[#allocation3 + $0xa0] sm:$0xff] }
 0x1c6   : > { %2365 = vmatmul.mubr.bf16.gmra.mrb[28].mxu1 %v2082_v45  ;;  %v2113_v45 = vrot.slane %v2111_v46, 3  ;;  %v4437_v11 = vrot.slane %v10418_v62, 2  ;;  %5073 = vrot.lane.b32.xlu0 %v5005_v59, %s7501_s28  ;;  %v10420_v59 = vshll.u32 %v10401_v63, 16 }
 0x1c7   : > { %4659 = vmatmul.mubr.bf16.vlgmr.msra.gmra.mrb[0].mxu0 %v4403_v19  ;;  %6309 = vmatprep.mubr.msk.bf16.mxu1 %vm809_vm5, %v2109_v20  ;;  %v4424_v19 = vrot.slane %v10415_v43, 1  ;;  %v6287_v20 = vcombine.low %v9127_v28, %v9129_v29  ;;  %v5010_v43 = vld [vmem:[#allocation3 + $0xb8] sm:$0xff] }
 0x1c8   : > { %6499 = vmatprep.mubr.msk.bf16.mxu0 %vm809_vm5, %v4423_v4  ;;  %v2143_v4 = vrot.slane %v2141_v21, 4  ;;  %v2117_v34 = vor.u32 %v2116_v53, %v2113_v45  ;;  %v4438_v21 = vor.u32 %v4437_v11, %v4436_v52  ;;  %v4964_v11 = vld [vmem:[%s10213_s3 + $0x10] sm:$0xff] }
 0x1c9   : > { %5075 = vrot.lane.b32.xlu1 %v5006_v0, %s7501_s28  ;;  %v4426_v46 = vor.u32 %v4425_v40, %v4424_v19  ;;  %v2129_v37 = vshrl.u32 %v6287_v20, 16  ;;  %v2132_v56 = vshll.u32 %v6287_v20, 16  ;;  %v10419_v40 = vshrl.u32 %v10401_v63, 16 }
 0x1ca   : > { %v2144_v25 = vor.u32 %v2143_v4, %v2140_v44  ;;  %v2118_v45 = vsel %vm1386_vm9, %v2099_v55, %v2117_v34  ;;  %5077 = vrot.lane.b32.xlu0 %v5007_v6, %s7501_s28  ;;  %v2158_v55 = vrot.slane %v2156_v26, 3  ;;  %v2161_v44 = vrot.slane %v2159_v49, 4 }
 0x1cb   : > { %v4427_v53 = vsel %vm4391_vm11, %v4418_v10, %v4426_v46  ;;  %v2131_v19 = vrot.slane %v2129_v37, 3  ;;  %v2134_v16 = vrot.slane %v2132_v56, 4  ;;  %v4432_v0 = vrot.slane %v10419_v40, 1 }
 0x1cc   : > { %v2145_v20 = vsel %vm1386_vm9, %v2126_v18, %v2144_v25  ;;  %v4439_v10 = vsel %vm4391_vm11, %v4430_v61, %v4438_v21  ;;  %v10421_v4 = vshrl.u32 %v10402_v47, 16  ;;  %v10423_v49 = vshrl.u32 %v10403_v35, 16 }
 0x1cd   : > { %5079 = vrot.lane.b32.xlu1 %v5008_v42, %s7501_s28  ;;  %v2135_v63 = vor.u32 %v2134_v16, %v2131_v19  ;;  %v10425_v16 = vshrl.u32 %v10404_v1, 16 }
 0x1ce   : > { %2373 = vmatmul.mubr.bf16.gmra.mrb[32].mxu1 %v2100_v27  ;;  %v6289_v27 = vcombine.low %v8889_v5, %v9153_v32  ;;  %v4444_v48 = vrot.slane %v10421_v4, 1  ;;  %v4962_v5 = vld [vmem:[%s10213_s3] sm:$0xff]  ;;  %v10429_v4 = vshrl.u32 %v8615_v54, 16 }
 0x1cf   : > { %4667 = vmatmul.mubr.bf16.gmra.mrb[4].mxu0 %v4419_v36  ;;  %6310 = vmatprep.mubr.msk.bf16.mxu1 %vm809_vm5, %v2127_v8  ;;  %v5009_v36 = vld [vmem:[#allocation3 + $0xb0] sm:$0xff]  ;;  %v4433_v8 = vrot.slane %v10420_v59, 2  ;;  %v2136_v42 = vsel %vm1386_vm9, %v2117_v34, %v2135_v63  ;;  %v4452_v40 = vrot.slane %v10425_v16, 1 }
 0x1d0   : > { %6500 = vmatprep.mubr.msk.bf16.mxu0 %vm809_vm5, %v4431_v22  ;;  %v10422_v22 = vshll.u32 %v10402_v47, 16  ;;  %5081 = vrot.lane.b32.xlu0 %v5009_v36, %s7501_s28  ;;  %v2147_v18 = vshrl.u32 %v6289_v27, 16  ;;  %v2150_v61 = vshll.u32 %v6289_v27, 16  ;;  %v2162_v47 = vor.u32 %v2161_v44, %v2158_v55  ;;  %v4963_v44 = vld [vmem:[%s10213_s3 + $0x8] sm:$0xff]  ;;  %v4973_v16 = vld [vmem:[%s10213_s3 + $0x58] sm:$0xff] }
 0x1d1   : > { %5083 = vrot.lane.b32.xlu1 %v5010_v43, %s7501_s28  ;;  %v4434_v52 = vor.u32 %v4433_v8, %v4432_v0  ;;  %v10426_v0 = vshll.u32 %v10404_v1, 16  ;;  %v10428_v8 = vshll.u32 %v8597_v7, 16 }
 0x1d2   : > { %v4445_v39 = vrot.slane %v10422_v22, 2  ;;  %v2149_v37 = vrot.slane %v2147_v18, 3  ;;  %v2152_v56 = vrot.slane %v2150_v61, 4  ;;  %v2163_v26 = vsel %vm1386_vm9, %v2144_v25, %v2162_v47  ;;  %v4966_v18 = vld [vmem:[%s10213_s3 + $0x20] sm:$0xff] }
 0x1d3   : > { %v4435_v6 = vsel %vm4391_vm11, %v4426_v46, %v4434_v52  ;;  %v4453_v34 = vrot.slane %v10426_v0, 2  ;;  %v4449_v55 = vrot.slane %v10428_v8, 2  ;;  %v10430_v22 = vshll.u32 %v8615_v54, 16  ;;  %v4969_v54 = vld [vmem:[%s10213_s3 + $0x38] sm:$0xff]  ;;  %v4974_v8 = vld [vmem:[%s10213_s3 + $0x60] sm:$0xff] }
 0x1d4   : > { %v4446_v62 = vor.u32 %v4445_v39, %v4444_v48  ;;  %v2153_v46 = vor.u32 %v2152_v56, %v2149_v37  ;;  %v4460_v48 = vrot.slane %v10429_v4, 1  ;;  %v6329_v61 = vcombine.high %v9008_v31, %v9031_v38  ;;  %v4968_v37 = vld [vmem:[%s10213_s3 + $0x30] sm:$0xff] }
 0x1d5   : > { %5389 = vperm.xlu1 %7049, %v4962_v5   ;;  %v4454_v27 = vor.u32 %v4453_v34, %v4452_v40  ;;  %v4461_v39 = vrot.slane %v10430_v22, 2  ;;  %v4967_v5 = vld [vmem:[%s10213_s3 + $0x28] sm:$0xff]  ;;  %v6331_v40 = vcombine.high %v9033_v17, %v9067_v58  ;;  %v10435_v34 = vshrl.u32 %v8668_v12, 16 }
 0x1d6   : > { %2381 = vmatmul.mubr.bf16.gmra.mrb[36].mxu1 %v2118_v45  ;;  %v4440_v45 = vrot.slane %v10423_v49, 1  ;;  %v4447_v19 = vsel %vm4391_vm11, %v4438_v21, %v4446_v62  ;;  %v4965_v21 = vld [vmem:[%s10213_s3 + $0x18] sm:$0xff]  ;;  %v2154_v1 = vsel %vm1386_vm9, %v2135_v63, %v2153_v46  ;;  %v10434_v49 = vshll.u32 %v8650_v13, 16 }
 0x1d7   : > { %4675 = vmatmul.mubr.bf16.gmra.mrb[8].mxu0 %v4427_v53  ;;  %6311 = vmatprep.mubr.msk.bf16.mxu1 %vm809_vm5, %v2145_v20  ;;  %v10424_v53 = vshll.u32 %v10403_v35, 16  ;;  %v5011_v35 = vld [vmem:[#allocation3 + $0xc0] sm:$0xff]  ;;  %v10427_v20 = vshrl.u32 %v8597_v7, 16  ;;  %v4462_v63 = vor.u32 %v4461_v39, %v4460_v48  ;;  %v4472_v4 = vrot.slane %v3688_v24, 1 }
 0x1d8   : > { %6501 = vmatprep.mubr.msk.bf16.mxu0 %vm809_vm5, %v4439_v10  ;;  %5085 = vrot.lane.b32.xlu0 %v5011_v35, %s7501_s28  ;;  %v4455_v10 = vsel %vm4391_vm11, %v4446_v62, %v4454_v27  ;;  %v10437_v35 = vshrl.u32 %v8679_v60, 16  ;;  %v10439_v48 = vshll.u32 %v8702_v51, 16  ;;  %v4484_v39 = vrot.slane %v3712_v33, 1  ;;  %v4979_v24 = vld [vmem:[%s10213_s3 + $0x88] sm:$0xff]  ;;  %v4978_v33 = vld [vmem:[%s10213_s3 + $0x80] sm:$0xff] }
 0x1d9   : > { %v4441_v43 = vrot.slane %v10424_v53, 2  ;;  %5399 = vperm.xlu1 %7049, %v4964_v11   ;;  %v4448_v59 = vrot.slane %v10427_v20, 1  ;;  %v10432_v11 = vshll.u32 %v8641_v15, 16  ;;  %v4463_v56 = vsel %vm4391_vm11, %v4454_v27, %v4462_v63  ;;  %v4971_v53 = vld [vmem:[%s10213_s3 + $0x48] sm:$0xff] }
 0x1da   : > { %v4975_v20 = vld [vmem:[%s10213_s3 + $0x68] sm:$0xff]  ;;  %v4473_v22 = vrot.slane %v10439_v48, 2 }
 0x1db   : > { %v4442_v25 = vor.u32 %v4441_v43, %v4440_v45  ;;  %v4450_v7 = vor.u32 %v4449_v55, %v4448_v59  ;;  %v4469_v45 = vrot.slane %v10434_v49, 2  ;;  %v4977_v55 = vld [vmem:[%s10213_s3 + $0x78] sm:$0xff] }
 0x1dc   : > { %5394 = vperm.xlu0 %7050, %v4963_v44   ;;  %v6333_v44 = vcombine.high %v9069_v50, %v9100_v30  ;;  %v4474_v51 = vor.u32 %v4473_v22, %v4472_v4 }
 0x1dd   : > { %5404 = vperm.xlu1 %7049, %v4965_v21   ;;  %v4443_v36 = vsel %vm4391_vm11, %v4434_v52, %v4442_v25  ;;  %v4451_v52 = vsel %vm4391_vm11, %v4442_v25, %v4450_v7  ;;  %v10436_v25 = vshll.u32 %v8668_v12, 16  ;;  %v4476_v21 = vrot.slane %v10437_v35, 1 }
 0x1de   : > { %2389 = vmatmul.mubr.bf16.gmra.mrb[40].mxu1 %v2136_v42  ;;  %v4457_v42 = vrot.slane %v10432_v11, 2  ;;  %v10441_v11 = vshrl.u32 %v8747_v3, 16 }
 0x1df   : > { %4683 = vmatmul.mubr.bf16.gmra.mrb[12].mxu0 %v4435_v6  ;;  %6312 = vmatprep.mubr.msk.bf16.mxu1 %vm809_vm5, %v2163_v26  ;;  %v10433_v6 = vshrl.u32 %v8650_v13, 16  ;;  %v6328_v13 = vcombine.low %v9008_v31, %v9031_v38  ;;  %v4465_v27 = vrot.slane %v10436_v25, 2  ;;  %v4972_v31 = vld [vmem:[%s10213_s3 + $0x50] sm:$0xff] }
 0x1e0   : > { %6502 = vmatprep.mubr.msk.bf16.mxu0 %vm809_vm5, %v4447_v19  ;;  %5409 = vperm.xlu0 %7050, %v4966_v18   ;;  %v4970_v19 = vld [vmem:[%s10213_s3 + $0x40] sm:$0xff] }
 0x1e1   : > { %5414 = vperm.xlu1 %7049, %v4967_v5   ;;  %v4468_v26 = vrot.slane %v10433_v6, 1  ;;  %v10440_v5 = vshll.u32 %v8712_v14, 16  ;;  %v6332_v14 = vcombine.low %v9069_v50, %v9100_v30  ;;  %v4365_v18 = vld [vmem:[#allocation2 + $0xe0] sm:$0x33]  ;;  %v4980_v50 = vld [vmem:[%s10213_s3 + $0x90] sm:$0xff]  ;;  %v7458_v6 = vld [vmem:[#allocation2 + $0xd8] sm:$0xff] }
 0x1e3   : > { %v4470_v43 = vor.u32 %v4469_v45, %v4468_v26  ;;  %v6487_v26 = vcombine.high %v7458_v6, %v4365_v18 }
 0x1e4   : > { %5419 = vperm.xlu0 %7050, %v4968_v37   ;;  %v10442_v37 = vshll.u32 %v8747_v3, 16  ;;  %v4982_v3 = vld [vmem:[%s10213_s3 + $0xa0] sm:$0xff] }
 0x1e5   : > { %5424 = vperm.xlu1 %7049, %v4969_v54   ;;  %v4471_v38 = vsel %vm4391_vm11, %v4462_v63, %v4470_v43  ;;  %v4981_v54 = vld [vmem:[%s10213_s3 + $0x98] sm:$0xff]  ;;  %v4506_v49 = vshrl.u32 %v6487_v26, 16  ;;  %v4509_v45 = vshll.u32 %v6487_v26, 16 }
 0x1e6   : > { %2397 = vmatmul.mubr.bf16.gmra.mrb[44].mxu1 %v2154_v1  ;;  %v10438_v1 = vshll.u32 %v8679_v60, 16  ;;  %v6330_v60 = vcombine.low %v9033_v17, %v9067_v58  ;;  %v4976_v17 = vld [vmem:[%s10213_s3 + $0x70] sm:$0xff] }
 0x1e7   : > { %4691 = vmatmul.mubr.bf16.gmra.mrb[16].mxu0 %v4443_v36  ;;  %6313 = vmatprep.mubr.msk.bf16.mxu1 %vm809_vm5, %v2162_v47  ;;  %v10431_v47 = vshrl.u32 %v8641_v15, 16 }
 0x1e8   : > { %6503 = vmatprep.mubr.msk.bf16.mxu0 %vm809_vm5, %v4455_v10  ;;  %5429 = vperm.xlu0 %7050, %v4970_v19   ;;  %v4477_v36 = vrot.slane %v10438_v1, 2 }
 0x1e9   : > { %v4456_v62 = vrot.slane %v10431_v47, 1  ;;  %5434 = vperm.xlu1 %7049, %v4971_v53   ;;  %v4480_v47 = vrot.slane %v3704_v57, 1  ;;  %v6334_v53 = vcombine.low %v9102_v9, %v9127_v28 }
 0x1ea   : > { %v4478_v59 = vor.u32 %v4477_v36, %v4476_v21  ;;  %v6339_v21 = vcombine.high %v9153_v32, %v9153_v32 }
 0x1eb   : > { %v4458_v15 = vor.u32 %v4457_v42, %v4456_v62  ;;  %v4481_v62 = vrot.slane %v3692_v23, 2  ;;  %v4492_v42 = vrot.slane %v10441_v11, 1 }
 0x1ec   : > { %5439 = vperm.xlu0 %7050, %v4972_v31   ;;  %v4479_v58 = vsel %vm4391_vm11, %v4470_v43, %v4478_v59 }
 0x1ed   : > { %v4459_v0 = vsel %vm4391_vm11, %v4450_v7, %v4458_v15  ;;  %5444 = vperm.xlu1 %7049, %v4973_v16   ;;  %v4485_v7 = vrot.slane %v10440_v5, 2  ;;  %v4482_v23 = vor.u32 %v4481_v62, %v4480_v47 }
 0x1ee   : > { %2405 = vmatmul.mubr.bf16.gmra.mrb[48].mxu1 %v2153_v46  ;;  %v4464_v46 = vrot.slane %v10435_v34, 1  ;;  %v6486_v34 = vcombine.low %v7458_v6, %v4365_v18 }
 0x1ef   : > { %4699 = vmatmul.mubr.bf16.gmra.mrb[20].mxu0 %v4451_v52  ;;  %6357 = vmatprep.mubr.msk.bf16.mxu1 %vm809_vm5, %v6329_v61  ;;  %v4486_v63 = vor.u32 %v4485_v7, %v4484_v39  ;;  %v6335_v61 = vcombine.high %v9102_v9, %v9127_v28  ;;  %v4483_v19 = vsel %vm4391_vm11, %v4474_v51, %v4482_v23  ;;  %v4508_v9 = vrot.slane %v4506_v49, 1  ;;  %v9411_v49 = vld [vmem:[%s10212_s2] ss:$0 sm:$0xff] }
 0x1f0   : > { %6504 = vmatprep.mubr.msk.bf16.mxu0 %vm809_vm5, %v4463_v56  ;;  %v4466_v12 = vor.u32 %v4465_v27, %v4464_v46  ;;  %5449 = vperm.xlu0 %7050, %v4974_v8   ;;  %v4493_v56 = vrot.slane %v10442_v37, 2  ;;  %v4984_v46 = vld [vmem:[%s10213_s3 + $0xb0] sm:$0xff]  ;;  %v4511_v28 = vrot.slane %v4509_v45, 2  ;;  %v4497_v31 = vshrl.u32 %v6486_v34, 16 }
 0x1f1   : > { %5454 = vperm.xlu1 %7049, %v4975_v20   ;;  %v4487_v30 = vsel %vm4391_vm11, %v4478_v59, %v4486_v63  ;;  %v6338_v8 = vcombine.low %v9153_v32, %v9153_v32 }
 0x1f2   : > { %v4467_v10 = vsel %vm4391_vm11, %v4458_v15, %v4466_v12  ;;  %v4475_v52 = vsel %vm4391_vm11, %v4466_v12, %v4474_v51  ;;  %v4494_v57 = vor.u32 %v4493_v56, %v4492_v42  ;;  %v7459_v15 = vld [vmem:[#allocation2 + $0xc8] sm:$0xff]  ;;  %v4499_v36 = vrot.slane %v4497_v31, 1 }
 0x1f3   : > { %v6337_v43 = vcombine.high %v9129_v29, %v7459_v15  ;;  %v6336_v35 = vcombine.low %v9129_v29, %v7459_v15 }
 0x1f4   : > { %5459 = vperm.xlu0 %7050, %v4976_v17   ;;  %v4495_v25 = vsel %vm4391_vm11, %v4486_v63, %v4494_v57 }
 0x1f5   : > { %5464 = vperm.xlu1 %7049, %v4977_v55  }
 0x1f6   : > { %2684 = vmatmul.mubr.bf16.vlgmr.msra.gmra.mrb[28].mxu1 %v6328_v13  ;;  %v10443_v13 = vshrl.u32 %v8774_v2, 16 }
 0x1f7   : > { %4707 = vmatmul.mubr.bf16.gmra.mrb[24].mxu0 %v4459_v0  ;;  %6358 = vmatprep.mubr.msk.bf16.mxu1 %vm809_vm5, %v6331_v40  ;;  %v10444_v40 = vshll.u32 %v8774_v2, 16  ;;  %v4500_v2 = vshll.u32 %v6486_v34, 16 }
 0x1f8   : > { %6505 = vmatprep.mubr.msk.bf16.mxu0 %vm809_vm5, %v4471_v38  ;;  %5469 = vperm.xlu0 %7050, %v4978_v33   ;;  %v4488_v16 = vrot.slane %v10443_v13, 1  ;;  %v4512_v38 = vor.u32 %v4511_v28, %v4508_v9 }
 0x1f9   : > { %5474 = vperm.xlu1 %7049, %v4979_v24   ;;  %v4489_v0 = vrot.slane %v10444_v40, 2  ;;  %v4502_v20 = vrot.slane %v4500_v2, 2 }
 0x1fa   : > { %v4513_v12 = vsel %vm4391_vm11, %v4494_v57, %v4512_v38 }
 0x1fb   : > { %v4490_v27 = vor.u32 %v4489_v0, %v4488_v16  ;;  %v4503_v59 = vor.u32 %v4502_v20, %v4499_v36 }
 0x1fc   : > { %5479 = vperm.xlu0 %7050, %v4980_v50  }
 0x1fd   : > { %5484 = vperm.xlu1 %7049, %v4981_v54   ;;  %v4491_v1 = vsel %vm4391_vm11, %v4482_v23, %v4490_v27  ;;  %v4504_v29 = vsel %vm4391_vm11, %v4490_v27, %v4503_v59 }
 0x1fe   : > { %2692 = vmatmul.mubr.bf16.gmra.mrb[32].mxu1 %v6330_v60 }
 0x1ff   : > { %4715 = vmatmul.mubr.bf16.gmra.mrb[28].mxu0 %v4467_v10  ;;  %6359 = vmatprep.mubr.msk.bf16.mxu1 %vm809_vm5, %v6333_v44 }
 0x200   : > { %6506 = vmatprep.mubr.msk.bf16.mxu0 %vm809_vm5, %v4479_v58  ;;  %5489 = vperm.xlu0 %7050, %v4982_v3  }
 0x201   : > { %5494 = vperm.xlu1 %7049, %v4983_v41  }
 0x204   : > { %5499 = vperm.xlu0 %7050, %v4984_v46  }
 0x206   : > { %2700 = vmatmul.mubr.bf16.gmra.mrb[36].mxu1 %v6332_v14 }
 0x207   : > { %4723 = vmatmul.mubr.bf16.gmra.mrb[32].mxu0 %v4475_v52  ;;  %6360 = vmatprep.mubr.msk.bf16.mxu1 %vm809_vm5, %v6335_v61 }
 0x208   : > { %6507 = vmatprep.mubr.msk.bf16.mxu0 %vm809_vm5, %v4487_v30 }
 0x20e   : > { %2708 = vmatmul.mubr.bf16.gmra.mrb[40].mxu1 %v6334_v53 }
 0x20f   : > { %4731 = vmatmul.mubr.bf16.gmra.mrb[36].mxu0 %v4483_v19  ;;  %6361 = vmatprep.mubr.msk.bf16.mxu1 %vm809_vm5, %v6337_v43  ;;  %v9382_v33 = vpop.permute.xlu1 %5041 }
 0x210   : > { %6508 = vmatprep.mubr.msk.bf16.mxu0 %vm809_vm5, %v4495_v25 }
 0x213   : > { %v9390_v47 = vpop.permute.xlu0 %5037 }
 0x214   : > { %v9388_v52 = vpop.permute.xlu1 %5043 }
 0x216   : > { %2716 = vmatmul.mubr.bf16.gmra.mrb[44].mxu1 %v6336_v35 }
 0x217   : > { %4739 = vmatmul.mubr.bf16.gmra.mrb[40].mxu0 %v4491_v1  ;;  %6362 = vmatprep.mubr.msk.bf16.mxu1 %vm809_vm5, %v6339_v21  ;;  %v9398_v37 = vpop.permute.xlu0 %5039 }
 0x218   : > { %6509 = vmatprep.mubr.msk.bf16.mxu0 %vm809_vm5, %v4513_v12  ;;  %v9396_v42 = vpop.permute.xlu1 %5047 }
 0x21b   : > { %v9406_v23 = vpop.permute.xlu0 %5045 }
 0x21d   : > { %v9402_v26 = vpop.permute.xlu1 %5051 }
 0x21e   : > { %2724 = vmatmul.mubr.bf16.gmra.mrb[48].mxu1 %v6338_v8 }
 0x21f   : > { %4747 = vmatmul.mubr.bf16.gmra.mrb[44].mxu0 %v4504_v29  ;;  %v9416_v53 = vpop.permute.xlu0 %5049 }
 0x220   : > { %6510 = vmatprep.mubr.msk.bf16.mxu0 %vm809_vm5, %v4512_v38 }
 0x223   : > { %v9413_v45 = vpop.permute.xlu1 %5055 }
 0x224   : > { %v9426_v46 = vpop.permute.xlu0 %5053 }
 0x227   : > { %4755 = vmatmul.mubr.bf16.gmra.mrb[48].mxu0 %v4503_v59 }
 0x228   : > { %v9438_v1 = vpop.permute.xlu0 %5057 }
 0x22b   : > { %v9424_v34 = vpop.permute.xlu1 %5059 }
 0x22f   : > { %v9433_v38 = vpop.permute.xlu1 %5063 }
 0x233   : > { %v9443_v8 = vpop.permute.xlu1 %5067 }
 0x234   : > { %10445 = vst [vmem:[#allocation33_spill] sm:$0xff] %v9443_v8 }
 0x261   : > { %v2310_v60 = vpop.f32.mrb[0].mxu1 }
 0x262   : > { %v2312_v55 = vpop.f32.mrb[1].mxu1  ;;  %v6611_v3 = vadd.f32 %v9411_v49, %v2310_v60 }
 0x263   : > { %v2313_v44 = vpop.f32.mrb[2].mxu1 }
 0x264   : > { %v2315_v10 = vpop.f32.mrb[3].mxu1  ;;  %v6613_v43 = vadd.f32 %v9411_v49, %v2313_v44  ;;  %v9449_v44 = vpop.permute.xlu0 %5061 }
 0x269   : > { %v2318_v4 = vpop.f32.mrb[4].mxu1 }
 0x26a   : > { %v2320_v48 = vpop.f32.mrb[5].mxu1  ;;  %v6615_v25 = vadd.f32 %v9411_v49, %v2318_v4 }
 0x26b   : > { %v2321_v22 = vpop.f32.mrb[6].mxu1 }
 0x26c   : > { %v2323_v17 = vpop.f32.mrb[7].mxu1  ;;  %v6617_v28 = vadd.f32 %v9411_v49, %v2321_v22 }
 0x26d   : > { %v9456_v17 = vpop.permute.xlu1 %5071 }
 0x26e   : > { %10446 = vst [vmem:[#allocation34_spill] sm:$0xff] %v9456_v17 }
 0x271   : > { %v2326_v58 = vpop.f32.mrb[8].mxu1 }
 0x272   : > { %v2328_v39 = vpop.f32.mrb[9].mxu1  ;;  %v6619_v20 = vadd.f32 %v9411_v49, %v2326_v58 }
 0x273   : > { %v2329_v5 = vpop.f32.mrb[10].mxu1  ;;  %v9460_v39 = vpop.permute.xlu0 %5065 }
 0x274   : > { %v2331_v7 = vpop.f32.mrb[11].mxu1  ;;  %v6621_v29 = vadd.f32 %v9411_v49, %v2329_v5  ;;  %10447 = vst [vmem:[#allocation35_spill] sm:$0xff] %v9460_v39 }
 0x279   : > { %v9378_v32 = vpop.f32.mrb[12].mxu1 }
 0x27a   : > { %v2336_v24 = vpop.f32.mrb[13].mxu1  ;;  %v6623_v58 = vadd.f32 %v9411_v49, %v9378_v32 }
 0x27b   : > { %v9380_v51 = vpop.f32.mrb[14].mxu1 }
 0x27c   : > { %v2339_v63 = vpop.f32.mrb[15].mxu1  ;;  %v6625_v24 = vadd.f32 %v9411_v49, %v9380_v51 }
 0x281   : > { %v9384_v14 = vpop.f32.mrb[16].mxu1 }
 0x282   : > { %v2344_v18 = vpop.f32.mrb[17].mxu1  ;;  %v6627_v51 = vadd.f32 %v9411_v49, %v9384_v14 }
 0x283   : > { %v9386_v54 = vpop.f32.mrb[18].mxu1 }
 0x284   : > { %v2347_v61 = vpop.f32.mrb[19].mxu1 }
 0x289   : > { %v9392_v62 = vpop.f32.mrb[20].mxu1 }
 0x28a   : > { %v2352_v50 = vpop.f32.mrb[21].mxu1 }
 0x28b   : > { %v9394_v30 = vpop.f32.mrb[22].mxu1 }
 0x28c   : > { %v2355_v11 = vpop.f32.mrb[23].mxu1 }
 0x291   : > { %v9400_v56 = vpop.f32.mrb[24].mxu1 }
 0x292   : > { %v2360_v6 = vpop.f32.mrb[25].mxu1 }
 0x293   : > { %v9404_v41 = vpop.f32.mrb[26].mxu1  ;;  %v9470_v6 = vpop.permute.xlu1 %5075 }
 0x294   : > { %v2363_v57 = vpop.f32.mrb[27].mxu1  ;;  %10448 = vst [vmem:[#allocation38_spill] sm:$0xff] %v9470_v6 }
 0x295   : > { %v9472_v57 = vpop.permute.xlu0 %5069 }
 0x296   : > { %10449 = vst [vmem:[#allocation39_spill] sm:$0xff] %v9472_v57 }
 0x29a   : > { %v4660_v15 = vpop.f32.mrb[0].mxu0 }
 0x29b   : > { %v9419_v19 = vadd.f32 %v6611_v3, %v4660_v15  ;;  %v4662_v13 = vpop.f32.mrb[1].mxu0 }
 0x29c   : > { %v4663_v16 = vpop.f32.mrb[2].mxu0 }
 0x29d   : > { %7233 = vtanh.f32 %v9419_v19  ;;  %v9422_v40 = vadd.f32 %v6613_v43, %v4663_v16  ;;  %v4665_v0 = vpop.f32.mrb[3].mxu0  ;;  %v6629_v43 = vadd.f32 %v9411_v49, %v9386_v54  ;;  %v6631_v54 = vadd.f32 %v9411_v49, %v9392_v62 }
 0x29f   : > { %7235 = vtanh.f32 %v9422_v40 }
 0x2a2   : > { %v4668_v9 = vpop.f32.mrb[4].mxu0 }
 0x2a3   : > { %v9431_v27 = vadd.f32 %v6615_v25, %v4668_v9  ;;  %v4670_v31 = vpop.f32.mrb[5].mxu0  ;;  %v9483_v25 = vpop.permute.xlu1 %5079 }
 0x2a4   : > { %v4671_v2 = vpop.f32.mrb[6].mxu0  ;;  %10450 = vst [vmem:[#allocation22_spill] sm:$0xff] %v9483_v25  ;;  %v9488_v31 = vpop.permute.xlu0 %5073 }
 0x2a5   : > { %7237 = vtanh.f32 %v9431_v27  ;;  %v9436_v35 = vadd.f32 %v6617_v28, %v4671_v2  ;;  %v4673_v21 = vpop.f32.mrb[7].mxu0  ;;  %10451 = vst [vmem:[#allocation21_spill] sm:$0xff] %v9488_v31 }
 0x2a7   : > { %v7234_v36 = vpop.eup %7233  ;;  %7239 = vtanh.f32 %v9436_v35 }
 0x2a8   : > { %5162 = vrot.lane.b32.xlu1 %v7234_v36, %s7501_s28  ;;  %v9494_v36 = vpop.permute.xlu1 %5083 }
 0x2a9   : > { %v7236_v12 = vpop.eup %7235  ;;  %10452 = vst [vmem:[#allocation26_spill] sm:$0xff] %v9494_v36 }
 0x2aa   : > { %v4676_v59 = vpop.f32.mrb[8].mxu0  ;;  %5164 = vrot.lane.b32.xlu0 %v7236_v12, %s7501_s28 }
 0x2ab   : > { %v9446_v60 = vadd.f32 %v6619_v20, %v4676_v59  ;;  %v4678_v55 = vpop.f32.mrb[9].mxu0  ;;  %v6633_v20 = vadd.f32 %v9411_v49, %v9394_v30  ;;  %v6635_v30 = vadd.f32 %v9411_v49, %v9400_v56 }
 0x2ac   : > { %v4679_v10 = vpop.f32.mrb[10].mxu0 }
 0x2ad   : > { %7241 = vtanh.f32 %v9446_v60  ;;  %v9452_v4 = vadd.f32 %v6621_v29, %v4679_v10  ;;  %v4681_v48 = vpop.f32.mrb[11].mxu0  ;;  %v9501_v29 = vpop.permute.xlu0 %5077 }
 0x2ae   : > { %10453 = vst [vmem:[#allocation31_spill] sm:$0xff] %v9501_v29 }
 0x2af   : > { %v7238_v22 = vpop.eup %7237  ;;  %7243 = vtanh.f32 %v9452_v4 }
 0x2b0   : > { %5166 = vrot.lane.b32.xlu1 %v7238_v22, %s7501_s28  ;;  %v9508_v22 = vpop.permute.xlu1 %5389 }
 0x2b1   : > { %v7240_v5 = vpop.eup %7239 }
 0x2b2   : > { %v4684_v7 = vpop.f32.mrb[12].mxu0  ;;  %5168 = vrot.lane.b32.xlu0 %v7240_v5, %s7501_s28  ;;  %v9512_v5 = vpop.permute.xlu0 %5081 }
 0x2b3   : > { %v9464_v63 = vadd.f32 %v6623_v58, %v4684_v7  ;;  %v4686_v18 = vpop.f32.mrb[13].mxu0  ;;  %10454 = vst [vmem:[#allocation30_spill] sm:$0xff] %v9512_v5 }
 0x2b4   : > { %v4687_v61 = vpop.f32.mrb[14].mxu0 }
 0x2b5   : > { %7245 = vtanh.f32 %v9464_v63  ;;  %v9468_v50 = vadd.f32 %v6625_v24, %v4687_v61  ;;  %v4689_v11 = vpop.f32.mrb[15].mxu0  ;;  %v6637_v61 = vadd.f32 %v9411_v49, %v9404_v41 }
 0x2b7   : > { %v7242_v32 = vpop.eup %7241  ;;  %7247 = vtanh.f32 %v9468_v50 }
 0x2b8   : > { %5170 = vrot.lane.b32.xlu1 %v7242_v32, %s7501_s28 }
 0x2b9   : > { %v7244_v3 = vpop.eup %7243 }
 0x2ba   : > { %v4692_v15 = vpop.f32.mrb[16].mxu0  ;;  %5172 = vrot.lane.b32.xlu0 %v7244_v3, %s7501_s28 }
 0x2bb   : > { %v9480_v13 = vadd.f32 %v6627_v51, %v4692_v15  ;;  %v4694_v16 = vpop.f32.mrb[17].mxu0 }
 0x2bc   : > { %v4695_v0 = vpop.f32.mrb[18].mxu0 }
 0x2bd   : > { %7249 = vtanh.f32 %v9480_v13  ;;  %v9486_v9 = vadd.f32 %v6629_v43, %v4695_v0  ;;  %v4697_v28 = vpop.f32.mrb[19].mxu0  ;;  %v9524_v0 = vpop.permute.xlu1 %5399 }
 0x2bf   : > { %v7246_v14 = vpop.eup %7245  ;;  %7251 = vtanh.f32 %v9486_v9 }
 0x2c0   : > { %5174 = vrot.lane.b32.xlu1 %v7246_v14, %s7501_s28  ;;  %v9527_v14 = vpop.permute.xlu0 %5085 }
 0x2c1   : > { %v7248_v2 = vpop.eup %7247  ;;  %10455 = vst [vmem:[#allocation7_spill] sm:$0xff] %v9527_v14 }
 0x2c2   : > { %v4700_v21 = vpop.f32.mrb[20].mxu0  ;;  %5176 = vrot.lane.b32.xlu0 %v7248_v2, %s7501_s28 }
 0x2c3   : > { %v9498_v12 = vadd.f32 %v6631_v54, %v4700_v21  ;;  %v4702_v59 = vpop.f32.mrb[21].mxu0 }
 0x2c4   : > { %v4703_v55 = vpop.f32.mrb[22].mxu0 }
 0x2c5   : > { %7253 = vtanh.f32 %v9498_v12  ;;  %v9504_v10 = vadd.f32 %v6633_v20, %v4703_v55  ;;  %v4705_v62 = vpop.f32.mrb[23].mxu0 }
 0x2c7   : > { %v7250_v48 = vpop.eup %7249  ;;  %7255 = vtanh.f32 %v9504_v10 }
 0x2c8   : > { %5178 = vrot.lane.b32.xlu1 %v7250_v48, %s7501_s28 }
 0x2c9   : > { %v2685_v58 = vpop.f32.mrb[28].mxu1  ;;  %v7252_v7 = vpop.eup %7251 }
 0x2ca   : > { %v4708_v24 = vpop.f32.mrb[24].mxu0  ;;  %v2687_v18 = vpop.f32.mrb[29].mxu1  ;;  %5180 = vrot.lane.b32.xlu0 %v7252_v7, %s7501_s28  ;;  %v6639_v41 = vadd.f32 %v9411_v49, %v2685_v58 }
 0x2cb   : > { %v9516_v11 = vadd.f32 %v6635_v30, %v4708_v24  ;;  %v4710_v32 = vpop.f32.mrb[25].mxu0  ;;  %v2688_v51 = vpop.f32.mrb[30].mxu1 }
 0x2cc   : > { %v4711_v3 = vpop.f32.mrb[26].mxu0  ;;  %v2690_v15 = vpop.f32.mrb[31].mxu1  ;;  %v6641_v20 = vadd.f32 %v9411_v49, %v2688_v51 }
 0x2cd   : > { %7257 = vtanh.f32 %v9516_v11  ;;  %v9520_v56 = vadd.f32 %v6637_v61, %v4711_v3  ;;  %v4713_v43 = vpop.f32.mrb[27].mxu0  ;;  %v9538_v18 = vpop.permute.xlu1 %5404 }
 0x2ce   : > { %v9541_v51 = vpop.permute.xlu0 %5394 }
 0x2cf   : > { %v7254_v16 = vpop.eup %7253  ;;  %7259 = vtanh.f32 %v9520_v56 }
 0x2d0   : > { %5182 = vrot.lane.b32.xlu1 %v7254_v16, %s7501_s28 }
 0x2d1   : > { %v2693_v28 = vpop.f32.mrb[32].mxu1  ;;  %v7256_v54 = vpop.eup %7255 }
 0x2d2   : > { %v4716_v2 = vpop.f32.mrb[28].mxu0  ;;  %v2695_v21 = vpop.f32.mrb[33].mxu1  ;;  %5184 = vrot.lane.b32.xlu0 %v7256_v54, %s7501_s28  ;;  %v6643_v61 = vadd.f32 %v9411_v49, %v2693_v28 }
 0x2d3   : > { %v9530_v59 = vadd.f32 %v6639_v41, %v4716_v2  ;;  %v4718_v55 = vpop.f32.mrb[29].mxu0  ;;  %v2696_v62 = vpop.f32.mrb[34].mxu1 }
 0x2d4   : > { %v4719_v48 = vpop.f32.mrb[30].mxu0  ;;  %v2698_v30 = vpop.f32.mrb[35].mxu1  ;;  %v6645_v16 = vadd.f32 %v9411_v49, %v2696_v62 }
 0x2d5   : > { %7261 = vtanh.f32 %v9530_v59  ;;  %v9534_v7 = vadd.f32 %v6641_v20, %v4719_v48  ;;  %v4721_v58 = vpop.f32.mrb[31].mxu0  ;;  %v9552_v30 = vpop.permute.xlu1 %5414 }
 0x2d7   : > { %v7258_v24 = vpop.eup %7257  ;;  %7263 = vtanh.f32 %v9534_v7 }
 0x2d8   : > { %5186 = vrot.lane.b32.xlu1 %v7258_v24, %s7501_s28  ;;  %v9555_v24 = vpop.permute.xlu0 %5409 }
 0x2d9   : > { %v2701_v32 = vpop.f32.mrb[36].mxu1  ;;  %v7260_v3 = vpop.eup %7259 }
 0x2da   : > { %v4724_v15 = vpop.f32.mrb[32].mxu0  ;;  %v2703_v43 = vpop.f32.mrb[37].mxu1  ;;  %5188 = vrot.lane.b32.xlu0 %v7260_v3, %s7501_s28  ;;  %v6647_v62 = vadd.f32 %v9411_v49, %v2701_v32 }
 0x2db   : > { %v9544_v41 = vadd.f32 %v6643_v61, %v4724_v15  ;;  %v4726_v54 = vpop.f32.mrb[33].mxu0  ;;  %v2704_v2 = vpop.f32.mrb[38].mxu1 }
 0x2dc   : > { %v4727_v21 = vpop.f32.mrb[34].mxu0  ;;  %v2706_v20 = vpop.f32.mrb[39].mxu1  ;;  %v6649_v43 = vadd.f32 %v9411_v49, %v2704_v2 }
 0x2dd   : > { %7265 = vtanh.f32 %v9544_v41  ;;  %v9548_v55 = vadd.f32 %v6645_v16, %v4727_v21  ;;  %v4729_v28 = vpop.f32.mrb[35].mxu0 }
 0x2df   : > { %v7262_v48 = vpop.eup %7261  ;;  %7267 = vtanh.f32 %v9548_v55 }
 0x2e0   : > { %5190 = vrot.lane.b32.xlu1 %v7262_v48, %s7501_s28 }
 0x2e1   : > { %v2709_v58 = vpop.f32.mrb[40].mxu1  ;;  %v7264_v61 = vpop.eup %7263 }
 0x2e2   : > { %v4732_v3 = vpop.f32.mrb[36].mxu0  ;;  %v2711_v15 = vpop.f32.mrb[41].mxu1  ;;  %5192 = vrot.lane.b32.xlu0 %v7264_v61, %s7501_s28  ;;  %v6651_v2 = vadd.f32 %v9411_v49, %v2709_v58 }
 0x2e3   : > { %v9558_v16 = vadd.f32 %v6647_v62, %v4732_v3  ;;  %v4734_v54 = vpop.f32.mrb[37].mxu0  ;;  %v2712_v21 = vpop.f32.mrb[42].mxu1 }
 0x2e4   : > { %v4735_v20 = vpop.f32.mrb[38].mxu0  ;;  %v2714_v28 = vpop.f32.mrb[43].mxu1  ;;  %v6653_v36 = vadd.f32 %v9411_v49, %v2712_v21 }
 0x2e5   : > { %7269 = vtanh.f32 %v9558_v16  ;;  %v9562_v48 = vadd.f32 %v6649_v43, %v4735_v20  ;;  %v4737_v32 = vpop.f32.mrb[39].mxu0  ;;  %v9566_v15 = vpop.permute.xlu1 %5424 }
 0x2e6   : > { %v9569_v61 = vpop.permute.xlu0 %5419 }
 0x2e7   : > { %v7266_v14 = vpop.eup %7265  ;;  %7271 = vtanh.f32 %v9562_v48 }
 0x2e8   : > { %5194 = vrot.lane.b32.xlu1 %v7266_v14, %s7501_s28 }
 0x2e9   : > { %v2717_v62 = vpop.f32.mrb[44].mxu1  ;;  %v7268_v3 = vpop.eup %7267 }
 0x2ea   : > { %v4740_v54 = vpop.f32.mrb[40].mxu0  ;;  %v2719_v28 = vpop.f32.mrb[45].mxu1  ;;  %5196 = vrot.lane.b32.xlu0 %v7268_v3, %s7501_s28  ;;  %v6655_v21 = vadd.f32 %v9411_v49, %v2717_v62 }
 0x2eb   : > { %v9572_v43 = vadd.f32 %v6651_v2, %v4740_v54  ;;  %v4742_v20 = vpop.f32.mrb[41].mxu0  ;;  %v2720_v32 = vpop.f32.mrb[46].mxu1 }
 0x2ec   : > { %v4743_v5 = vpop.f32.mrb[42].mxu0  ;;  %v2722_v14 = vpop.f32.mrb[47].mxu1 }
 0x2ed   : > { %7273 = vtanh.f32 %v9572_v43  ;;  %v9576_v25 = vadd.f32 %v6653_v36, %v4743_v5  ;;  %v4745_v58 = vpop.f32.mrb[43].mxu0  ;;  %v9578_v6 = vpop.permute.xlu0 %5429  ;;  %v6657_v14 = vadd.f32 %v9411_v49, %v2720_v32 }
 0x2ee   : > { %v9583_v2 = vpop.permute.xlu1 %5434 }
 0x2ef   : > { %v7270_v29 = vpop.eup %7269  ;;  %7275 = vtanh.f32 %v9576_v25 }
 0x2f0   : > { %5198 = vrot.lane.b32.xlu1 %v7270_v29, %s7501_s28 }
 0x2f1   : > { %v2725_v3 = vpop.f32.mrb[48].mxu1  ;;  %v7272_v54 = vpop.eup %7271 }
 0x2f2   : > { %v4748_v28 = vpop.f32.mrb[44].mxu0  ;;  %v2727_v20 = vpop.f32.mrb[49].mxu1  ;;  %5200 = vrot.lane.b32.xlu0 %v7272_v54, %s7501_s28  ;;  %v6659_v32 = vadd.f32 %v9411_v49, %v2725_v3 }
 0x2f3   : > { %v9586_v36 = vadd.f32 %v6655_v21, %v4748_v28  ;;  %v4750_v5 = vpop.f32.mrb[45].mxu0  ;;  %v2728_v58 = vpop.f32.mrb[50].mxu1 }
 0x2f4   : > { %v4751_v31 = vpop.f32.mrb[46].mxu0  ;;  %v2729_v17 = vpop.f32.mrb[51].mxu1  ;;  %v6512_v58 = vmul.f32 -1.442695, %v9422_v40  ;;  %v4986_v40 = vld [vmem:[%s10213_s3 + $0xc0] sm:$0xff] }
 0x2f5   : > { %7277 = vtanh.f32 %v9586_v36  ;;  %v9590_v29 = vadd.f32 %v6657_v14, %v4751_v31  ;;  %v4753_v62 = vpop.f32.mrb[47].mxu0  ;;  %v9592_v57 = vpop.permute.xlu0 %5439  ;;  %v6511_v17 = vmul.f32 -1.442695, %v9419_v19 }
 0x2f6   : > { %v9594_v39 = vpop.permute.xlu1 %5444  ;;  %v6513_v62 = vmul.f32 -1.442695, %v9431_v27  ;;  %v4985_v27 = vld [vmem:[%s10213_s3 + $0xb8] sm:$0xff] }
 0x2f7   : > { %v7274_v8 = vpop.eup %7273  ;;  %7279 = vtanh.f32 %v9590_v29 }
 0x2f8   : > { %5202 = vrot.lane.b32.xlu1 %v7274_v8, %s7501_s28 }
 0x2f9   : > { %v7276_v21 = vpop.eup %7275  ;;  %v9600_v28 = vpop.permute.xlu0 %5449 }
 0x2fa   : > { %v4756_v54 = vpop.f32.mrb[48].mxu0  ;;  %5204 = vrot.lane.b32.xlu0 %v7276_v21, %s7501_s28  ;;  %v9607_v8 = vpop.permute.xlu1 %5454  ;;  %v6514_v21 = vmul.f32 -1.442695, %v9436_v35 }
 0x2fb   : > { %v9602_v31 = vadd.f32 %v6659_v32, %v4756_v54  ;;  %v4758_v20 = vpop.f32.mrb[49].mxu0 }
 0x2fc   : > { %v4759_v14 = vpop.f32.mrb[50].mxu0 }
 0x2fd   : > { %7281 = vtanh.f32 %v9602_v31  ;;  %v4760_v5 = vpop.f32.mrb[51].mxu0  ;;  %v9610_v19 = vpop.permute.xlu0 %5459 }
 0x2fe   : > { %7283 = vpow2.f32 %v6511_v17  ;;  %v9614_v32 = vpop.permute.xlu1 %5464  ;;  %v6515_v5 = vmul.f32 -1.442695, %v9446_v60 }
 0x2ff   : > { %v7278_v49 = vpop.eup %7277  ;;  %7285 = vpow2.f32 %v6512_v58 }
 0x300   : > { %5206 = vrot.lane.b32.xlu1 %v7278_v49, %s7501_s28  ;;  %7287 = vpow2.f32 %v6513_v62 }
 0x301   : > { %v7280_v3 = vpop.eup %7279  ;;  %v9620_v17 = vpop.permute.xlu0 %5469  ;;  %7289 = vpow2.f32 %v6514_v21  ;;  %v6517_v21 = vmul.f32 -1.442695, %v9464_v63  ;;  %v6519_v63 = vmul.f32 -1.442695, %v9480_v13 }
 0x302   : > { %5208 = vrot.lane.b32.xlu0 %v7280_v3, %s7501_s28  ;;  %10456 = vst [vmem:[#allocation8_spill] sm:$0xff] %v9620_v17  ;;  %v9626_v14 = vpop.permute.xlu1 %5474  ;;  %v6516_v3 = vmul.f32 -1.442695, %v9452_v4  ;;  %7291 = vpow2.f32 %v6515_v5 }
 0x303   : > { %10457 = vst [vmem:[#allocation29_spill] sm:$0xff] %v9626_v14 }
 0x305   : > { %v9629_v35 = vpop.permute.xlu0 %5479 }
 0x306   : > { %5509 = vperm.xlu0 %7050, %v4986_v40   ;;  %10458 = vst [vmem:[#allocation9_spill] sm:$0xff] %v9629_v35  ;;  %v9632_v40 = vpop.permute.xlu1 %5484 }
 0x307   : > { %v7282_v54 = vpop.eup %7281 }
 0x308   : > { %5210 = vrot.lane.b32.xlu1 %v7282_v54, %s7501_s28  ;;  %v7284_v20 = vpop.eup %7283 }
 0x309   : > { %v7286_v58 = vpop.eup %7285  ;;  %v4862_v49 = vadd.f32 1.0, %v7284_v20  ;;  %v9635_v14 = vpop.permute.xlu0 %5489  ;;  %v6518_v20 = vmul.f32 -1.442695, %v9468_v50 }
 0x30a   : > { %v4863_v62 = vadd.f32 1.0, %v7286_v58  ;;  %v7288_v54 = vpop.eup %7287  ;;  %10459 = vst [vmem:[#allocation10_spill] sm:$0xff] %v9635_v14 }
 0x30b   : > { %7293 = vrcp.f32 %v4862_v49  ;;  %v7290_v60 = vpop.eup %7289  ;;  %v4864_v17 = vadd.f32 1.0, %v7288_v54 }
 0x30c   : > { %5504 = vperm.xlu1 %7049, %v4985_v27   ;;  %7295 = vpow2.f32 %v6516_v3  ;;  %v9638_v27 = vpop.permute.xlu1 %5494  ;;  %v4865_v35 = vadd.f32 1.0, %v7290_v60  ;;  %v7292_v4 = vpop.eup %7291 }
 0x30d   : > { %7297 = vrcp.f32 %v4863_v62  ;;  %10460 = vst [vmem:[#allocation11_spill] sm:$0xff] %v9638_v27  ;;  %v9640_v5 = vpop.permute.xlu0 %5499  ;;  %v4866_v54 = vadd.f32 1.0, %v7292_v4  ;;  %v6521_v4 = vmul.f32 -1.442695, %v9498_v12 }
 0x30e   : > { %7299 = vpow2.f32 %v6517_v21  ;;  %10461 = vst [vmem:[#allocation12_spill] sm:$0xff] %v9640_v5 }
 0x30f   : > { %7301 = vrcp.f32 %v4864_v17  ;;  %v6520_v17 = vmul.f32 -1.442695, %v9486_v9 }
 0x310   : > { %7303 = vpow2.f32 %v6518_v20 }
 0x311   : > { %7305 = vrcp.f32 %v4865_v35 }
 0x312   : > { %7307 = vpow2.f32 %v6519_v63  ;;  %v6522_v63 = vmul.f32 -1.442695, %v9504_v10 }
 0x313   : > { %7309 = vrcp.f32 %v4866_v54 }
 0x314   : > { %7311 = vpow2.f32 %v6520_v17 }
 0x315   : > { %v9642_v58 = vpop.eup %7293 }
 0x316   : > { %v7296_v62 = vpop.eup %7295 }
 0x317   : > { %v9646_v50 = vpop.eup %7297  ;;  %v4867_v60 = vadd.f32 1.0, %v7296_v62 }
 0x318   : > { %v7300_v35 = vpop.eup %7299 }
 0x319   : > { %v9652_v13 = vpop.eup %7301  ;;  %7313 = vrcp.f32 %v4867_v60  ;;  %v4868_v5 = vadd.f32 1.0, %v7300_v35  ;;  %v6523_v60 = vmul.f32 -1.442695, %v9516_v11 }
 0x31a   : > { %v5163_v49 = vpop.permute.xlu1 %5162  ;;  %7315 = vpow2.f32 %v6521_v4 }
 0x31b   : > { %v5237_v3 = vmul.f32 %v9642_v58, %v5163_v49  ;;  %7317 = vrcp.f32 %v4868_v5  ;;  %v6524_v5 = vmul.f32 -1.442695, %v9520_v56 }
 0x31c   : > { %v5165_v27 = vpop.permute.xlu0 %5164  ;;  %7319 = vpow2.f32 %v6522_v63 }
 0x31d   : > { %5287 = vrot.lane.b32.xlu0 %v5237_v3, %s7501_s28  ;;  %v5238_v21 = vmul.f32 %v9646_v50, %v5165_v27  ;;  %v7304_v3 = vpop.eup %7303 }
 0x31e   : > { %v9656_v9 = vpop.eup %7305  ;;  %v4869_v54 = vadd.f32 1.0, %v7304_v3 }
 0x31f   : > { %5289 = vrot.lane.b32.xlu1 %v5238_v21, %s7501_s28  ;;  %v7308_v17 = vpop.eup %7307 }
 0x320   : > { %v9662_v12 = vpop.eup %7309  ;;  %7321 = vrcp.f32 %v4869_v54  ;;  %v6525_v54 = vmul.f32 -1.442695, %v9530_v59 }
 0x321   : > { %7323 = vpow2.f32 %v6523_v60  ;;  %v6526_v60 = vmul.f32 -1.442695, %v9534_v7 }
 0x322   : > { %v5167_v20 = vpop.permute.xlu1 %5166 }
 0x323   : > { %v5239_v49 = vmul.f32 %v9652_v13, %v5167_v20  ;;  %v7312_v20 = vpop.eup %7311 }
 0x324   : > { %v5169_v27 = vpop.permute.xlu0 %5168  ;;  %v9666_v10 = vpop.eup %7313  ;;  %v4871_v3 = vadd.f32 1.0, %v7312_v20 }
 0x325   : > { %5291 = vrot.lane.b32.xlu0 %v5239_v49, %s7501_s28  ;;  %v5240_v62 = vmul.f32 %v9656_v9, %v5169_v27  ;;  %v4870_v49 = vadd.f32 1.0, %v7308_v17  ;;  %v7316_v63 = vpop.eup %7315 }
 0x326   : > { %v9672_v11 = vpop.eup %7317 }
 0x327   : > { %5293 = vrot.lane.b32.xlu1 %v5240_v62, %s7501_s28  ;;  %7325 = vrcp.f32 %v4870_v49 }
 0x328   : > { %7327 = vpow2.f32 %v6524_v5 }
 0x329   : > { %7329 = vrcp.f32 %v4871_v3  ;;  %v6527_v3 = vmul.f32 -1.442695, %v9544_v41 }
 0x32a   : > { %v5171_v21 = vpop.permute.xlu1 %5170  ;;  %7331 = vpow2.f32 %v6525_v54  ;;  %v6528_v54 = vmul.f32 -1.442695, %v9548_v55 }
 0x32b   : > { %v5241_v35 = vmul.f32 %v9662_v12, %v5171_v21  ;;  %v7320_v21 = vpop.eup %7319 }
 0x32c   : > { %v5173_v27 = vpop.permute.xlu0 %5172  ;;  %v9676_v56 = vpop.eup %7321  ;;  %v4873_v49 = vadd.f32 1.0, %v7320_v21 }
 0x32d   : > { %5295 = vrot.lane.b32.xlu0 %v5241_v35, %s7501_s28  ;;  %v5242_v4 = vmul.f32 %v9666_v10, %v5173_v27  ;;  %v4872_v35 = vadd.f32 1.0, %v7316_v63  ;;  %v7324_v5 = vpop.eup %7323 }
 0x32f   : > { %5297 = vrot.lane.b32.xlu1 %v5242_v4, %s7501_s28  ;;  %7333 = vrcp.f32 %v4872_v35 }
 0x330   : > { %7335 = vpow2.f32 %v6526_v60 }
 0x331   : > { %v9682_v59 = vpop.eup %7325  ;;  %7337 = vrcp.f32 %v4873_v49  ;;  %v6529_v49 = vmul.f32 -1.442695, %v9558_v16 }
 0x332   : > { %v5175_v62 = vpop.permute.xlu1 %5174  ;;  %7339 = vpow2.f32 %v6527_v3  ;;  %v6530_v3 = vmul.f32 -1.442695, %v9562_v48 }
 0x333   : > { %v5243_v17 = vmul.f32 %v9672_v11, %v5175_v62  ;;  %v7328_v62 = vpop.eup %7327 }
 0x334   : > { %v5177_v27 = vpop.permute.xlu0 %5176  ;;  %v9686_v7 = vpop.eup %7329  ;;  %v4875_v35 = vadd.f32 1.0, %v7328_v62 }
 0x335   : > { %5299 = vrot.lane.b32.xlu0 %v5243_v17, %s7501_s28  ;;  %v5244_v20 = vmul.f32 %v9676_v56, %v5177_v27  ;;  %v4874_v17 = vadd.f32 1.0, %v7324_v5  ;;  %v7332_v60 = vpop.eup %7331 }
 0x337   : > { %5301 = vrot.lane.b32.xlu1 %v5244_v20, %s7501_s28  ;;  %7341 = vrcp.f32 %v4874_v17 }
 0x338   : > { %7343 = vpow2.f32 %v6528_v54 }
 0x339   : > { %v9692_v41 = vpop.eup %7333  ;;  %7345 = vrcp.f32 %v4875_v35  ;;  %v6531_v35 = vmul.f32 -1.442695, %v9572_v43 }
 0x33a   : > { %v5179_v4 = vpop.permute.xlu1 %5178  ;;  %7347 = vpow2.f32 %v6529_v49  ;;  %v6532_v49 = vmul.f32 -1.442695, %v9576_v25 }
 0x33b   : > { %v5245_v63 = vmul.f32 %v9682_v59, %v5179_v4  ;;  %v7336_v4 = vpop.eup %7335 }
 0x33c   : > { %v5181_v27 = vpop.permute.xlu0 %5180  ;;  %v9696_v55 = vpop.eup %7337  ;;  %v4877_v17 = vadd.f32 1.0, %v7336_v4 }
 0x33d   : > { %5303 = vrot.lane.b32.xlu0 %v5245_v63, %s7501_s28  ;;  %v5246_v21 = vmul.f32 %v9686_v7, %v5181_v27  ;;  %v4876_v63 = vadd.f32 1.0, %v7332_v60  ;;  %v7340_v54 = vpop.eup %7339 }
 0x33f   : > { %5305 = vrot.lane.b32.xlu1 %v5246_v21, %s7501_s28  ;;  %7349 = vrcp.f32 %v4876_v63 }
 0x340   : > { %7351 = vpow2.f32 %v6530_v3 }
 0x341   : > { %v9702_v16 = vpop.eup %7341  ;;  %7353 = vrcp.f32 %v4877_v17  ;;  %v6533_v17 = vmul.f32 -1.442695, %v9586_v36 }
 0x342   : > { %v5183_v20 = vpop.permute.xlu1 %5182  ;;  %7355 = vpow2.f32 %v6531_v35  ;;  %v6534_v35 = vmul.f32 -1.442695, %v9590_v29 }
 0x343   : > { %v5247_v5 = vmul.f32 %v9692_v41, %v5183_v20  ;;  %v7344_v20 = vpop.eup %7343 }
 0x344   : > { %v5185_v27 = vpop.permute.xlu0 %5184  ;;  %v9706_v48 = vpop.eup %7345  ;;  %v4879_v63 = vadd.f32 1.0, %v7344_v20 }
 0x345   : > { %5307 = vrot.lane.b32.xlu0 %v5247_v5, %s7501_s28  ;;  %v5248_v62 = vmul.f32 %v9696_v55, %v5185_v27  ;;  %v4878_v5 = vadd.f32 1.0, %v7340_v54  ;;  %v7348_v3 = vpop.eup %7347 }
 0x347   : > { %5309 = vrot.lane.b32.xlu1 %v5248_v62, %s7501_s28  ;;  %7357 = vrcp.f32 %v4878_v5 }
 0x348   : > { %7359 = vpow2.f32 %v6532_v49 }
 0x349   : > { %v9712_v43 = vpop.eup %7349  ;;  %7361 = vrcp.f32 %v4879_v63  ;;  %v6535_v63 = vmul.f32 -1.442695, %v9602_v31 }
 0x34a   : > { %v5187_v21 = vpop.permute.xlu1 %5186  ;;  %7363 = vpow2.f32 %v6533_v17 }
 0x34b   : > { %v5249_v60 = vmul.f32 %v9702_v16, %v5187_v21  ;;  %v7352_v21 = vpop.eup %7351 }
 0x34c   : > { %v5189_v27 = vpop.permute.xlu0 %5188  ;;  %v9716_v25 = vpop.eup %7353  ;;  %v4881_v5 = vadd.f32 1.0, %v7352_v21 }
 0x34d   : > { %5311 = vrot.lane.b32.xlu0 %v5249_v60, %s7501_s28  ;;  %v5250_v4 = vmul.f32 %v9706_v48, %v5189_v27  ;;  %v4880_v60 = vadd.f32 1.0, %v7348_v3  ;;  %v7356_v49 = vpop.eup %7355 }
 0x34f   : > { %5313 = vrot.lane.b32.xlu1 %v5250_v4, %s7501_s28  ;;  %7365 = vrcp.f32 %v4880_v60 }
 0x350   : > { %7367 = vpow2.f32 %v6534_v35 }
 0x351   : > { %v9722_v36 = vpop.eup %7357  ;;  %7369 = vrcp.f32 %v4881_v5 }
 0x352   : > { %v5191_v62 = vpop.permute.xlu1 %5190  ;;  %7371 = vpow2.f32 %v6535_v63 }
 0x353   : > { %v5251_v54 = vmul.f32 %v9712_v43, %v5191_v62  ;;  %v7360_v62 = vpop.eup %7359 }
 0x354   : > { %v5193_v27 = vpop.permute.xlu0 %5192  ;;  %v9726_v29 = vpop.eup %7361  ;;  %v4883_v21 = vadd.f32 1.0, %v7360_v62 }
 0x355   : > { %5315 = vrot.lane.b32.xlu0 %v5251_v54, %s7501_s28  ;;  %v5252_v20 = vmul.f32 %v9716_v25, %v5193_v27  ;;  %v4882_v54 = vadd.f32 1.0, %v7356_v49  ;;  %v7364_v60 = vpop.eup %7363 }
 0x356   : > { %v4884_v49 = vadd.f32 1.0, %v7364_v60 }
 0x357   : > { %5317 = vrot.lane.b32.xlu1 %v5252_v20, %s7501_s28  ;;  %7373 = vrcp.f32 %v4882_v54 }
 0x358   : > { %7375 = vrcp.f32 %v4883_v21 }
 0x359   : > { %v9731_v35 = vpop.eup %7365  ;;  %7377 = vrcp.f32 %v4884_v49 }
 0x35a   : > { %v5195_v4 = vpop.permute.xlu1 %5194  ;;  %v7368_v5 = vpop.eup %7367 }
 0x35b   : > { %v5253_v3 = vmul.f32 %v9722_v36, %v5195_v4  ;;  %v9734_v4 = vpop.eup %7369  ;;  %v4885_v63 = vadd.f32 1.0, %v7368_v5 }
 0x35c   : > { %v5197_v27 = vpop.permute.xlu0 %5196  ;;  %v7372_v62 = vpop.eup %7371 }
 0x35d   : > { %5319 = vrot.lane.b32.xlu0 %v5253_v3, %s7501_s28  ;;  %v5254_v17 = vmul.f32 %v9726_v29, %v5197_v27  ;;  %7379 = vrcp.f32 %v4885_v63  ;;  %v4886_v21 = vadd.f32 1.0, %v7372_v62 }
 0x35f   : > { %5321 = vrot.lane.b32.xlu1 %v5254_v17, %s7501_s28  ;;  %7381 = vrcp.f32 %v4886_v21 }
 0x361   : > { %v9739_v54 = vpop.eup %7373 }
 0x362   : > { %v5199_v31 = vpop.permute.xlu1 %5198  ;;  %v9742_v60 = vpop.eup %7375 }
 0x363   : > { %v5255_v20 = vmul.f32 %v9731_v35, %v5199_v31  ;;  %10462 = vst [vmem:[#allocation13_spill] sm:$0xff] %v9742_v60 }
 0x364   : > { %v5201_v14 = vpop.permute.xlu0 %5200 }
 0x365   : > { %5323 = vrot.lane.b32.xlu0 %v5255_v20, %s7501_s28  ;;  %v5256_v3 = vmul.f32 %v9734_v4, %v5201_v14  ;;  %v9747_v14 = vpop.eup %7377 }
 0x366   : > { %10463 = vst [vmem:[#allocation14_spill] sm:$0xff] %v9747_v14 }
 0x367   : > { %5325 = vrot.lane.b32.xlu1 %v5256_v3, %s7501_s28  ;;  %v9750_v3 = vpop.eup %7379 }
 0x368   : > { %10464 = vst [vmem:[#allocation15_spill] sm:$0xff] %v9750_v3 }
 0x36a   : > { %v5203_v27 = vpop.permute.xlu1 %5202 }
 0x36b   : > { %v5257_v17 = vmul.f32 %v9739_v54, %v5203_v27  ;;  %v9755_v27 = vpop.eup %7381 }
 0x36c   : > { %v5205_v31 = vpop.permute.xlu0 %5204 }
 0x36d   : > { %5327 = vrot.lane.b32.xlu0 %v5257_v17, %s7501_s28  ;;  %v5258_v20 = vmul.f32 %v9742_v60, %v5205_v31 }
 0x36f   : > { %5329 = vrot.lane.b32.xlu1 %v5258_v20, %s7501_s28  ;;  %v5112_v20 = vmul.f32 %v9642_v58, %v9390_v47 }
 0x372   : > { %v5207_v5 = vpop.permute.xlu1 %5206 }
 0x373   : > { %v5259_v49 = vmul.f32 %v9747_v14, %v5207_v5 }
 0x374   : > { %v5209_v63 = vpop.permute.xlu0 %5208 }
 0x375   : > { %5331 = vrot.lane.b32.xlu0 %v5259_v49, %s7501_s28  ;;  %v5260_v62 = vmul.f32 %v9750_v3, %v5209_v63  ;;  %v5113_v63 = vmul.f32 %v9646_v50, %v9398_v37  ;;  %v5115_v37 = vmul.f32 %v9656_v9, %v9388_v52  ;;  %v5117_v52 = vmul.f32 %v9666_v10, %v9396_v42 }
 0x377   : > { %5333 = vrot.lane.b32.xlu1 %v5260_v62, %s7501_s28 }
 0x37a   : > { %v5211_v17 = vpop.permute.xlu1 %5210 }
 0x37b   : > { %v5261_v21 = vmul.f32 %v9755_v27, %v5211_v17 }
 0x37d   : > { %5335 = vrot.lane.b32.xlu0 %v5261_v21, %s7501_s28  ;;  %v5114_v21 = vmul.f32 %v9652_v13, %v9382_v33  ;;  %v5116_v33 = vmul.f32 %v9662_v12, %v9406_v23 }
 0x385   : > { %v9759_v31 = vpop.permute.xlu0 %5509 }
 0x38b   : > { %v9763_v5 = vpop.permute.xlu1 %5504 }
 0x38f   : > { %v5288_v14 = vpop.permute.xlu0 %5287 }
 0x390   : > { %v5362_v49 = vadd.f32 %v5288_v14, %v5112_v20 }
 0x391   : > { %v5290_v3 = vpop.permute.xlu1 %5289 }
 0x392   : > { %v5512_v62 = vmul.f32 %v9508_v22, %v5362_v49  ;;  %v5363_v60 = vadd.f32 %v5290_v3, %v5113_v63 }
 0x394   : > { %5712 = vrot.lane.b32.xlu0 %v5512_v62, %s7502_s22  ;;  %v5513_v17 = vmul.f32 %v9541_v51, %v5363_v60 }
 0x396   : > { %7383 = vtanh.f32 %v5513_v17  ;;  %5714 = vrot.lane.b32.xlu1 %v5513_v17, %s7502_s22 }
 0x397   : > { %v5292_v47 = vpop.permute.xlu0 %5291  ;;  %7385 = vtanh.f32 %v5512_v62 }
 0x398   : > { %v5364_v14 = vadd.f32 %v5292_v47, %v5114_v21  ;;  %v5118_v21 = vmul.f32 %v9672_v11, %v9416_v53 }
 0x399   : > { %v5294_v3 = vpop.permute.xlu1 %5293 }
 0x39a   : > { %v5514_v22 = vmul.f32 %v9524_v0, %v5364_v14  ;;  %v5365_v20 = vadd.f32 %v5294_v3, %v5115_v37  ;;  %v5119_v14 = vmul.f32 %v9676_v56, %v9402_v26 }
 0x39c   : > { %5716 = vrot.lane.b32.xlu0 %v5514_v22, %s7502_s22  ;;  %v5515_v51 = vmul.f32 %v9538_v18, %v5365_v20  ;;  %v5120_v20 = vmul.f32 %v9682_v59, %v9426_v46 }
 0x39e   : > { %7387 = vtanh.f32 %v5515_v51  ;;  %5718 = vrot.lane.b32.xlu1 %v5515_v51, %s7502_s22 }
 0x39f   : > { %v5296_v60 = vpop.permute.xlu0 %5295  ;;  %7389 = vtanh.f32 %v5514_v22 }
 0x3a0   : > { %v5366_v49 = vadd.f32 %v5296_v60, %v5116_v33  ;;  %v7384_v63 = vpop.eup %7383  ;;  %v5121_v33 = vmul.f32 %v9686_v7, %v9413_v45 }
 0x3a1   : > { %v7386_v0 = vpop.eup %7385  ;;  %v5298_v17 = vpop.permute.xlu1 %5297  ;;  %5589 = vrot.lane.b32.xlu0 %v7384_v63, %s7501_s28 }
 0x3a2   : > { %v5516_v62 = vmul.f32 %v9555_v24, %v5366_v49  ;;  %v5367_v18 = vadd.f32 %v5298_v17, %v5117_v52  ;;  %5587 = vrot.lane.b32.xlu1 %v7386_v0, %s7501_s28  ;;  %v5122_v52 = vmul.f32 %v9692_v41, %v9438_v1 }
 0x3a4   : > { %v5517_v23 = vmul.f32 %v9552_v30, %v5367_v18 }
 0x3a5   : > { %5720 = vrot.lane.b32.xlu0 %v5516_v62, %s7502_s22 }
 0x3a6   : > { %7391 = vtanh.f32 %v5517_v23  ;;  %5722 = vrot.lane.b32.xlu1 %v5517_v23, %s7502_s22 }
 0x3a7   : > { %v5300_v42 = vpop.permute.xlu0 %5299  ;;  %7393 = vtanh.f32 %v5516_v62  ;;  %v5123_v62 = vmul.f32 %v9696_v55, %v9424_v34 }
 0x3a8   : > { %v5368_v47 = vadd.f32 %v5300_v42, %v5118_v21  ;;  %v7388_v24 = vpop.eup %7387  ;;  %v5124_v21 = vmul.f32 %v9702_v16, %v9449_v44 }
 0x3a9   : > { %v7390_v37 = vpop.eup %7389  ;;  %v5302_v3 = vpop.permute.xlu1 %5301  ;;  %5593 = vrot.lane.b32.xlu0 %v7388_v24, %s7501_s28 }
 0x3aa   : > { %v5518_v22 = vmul.f32 %v9569_v61, %v5368_v47  ;;  %v5369_v30 = vadd.f32 %v5302_v3, %v5119_v14  ;;  %5591 = vrot.lane.b32.xlu1 %v7390_v37, %s7501_s28  ;;  %v5125_v47 = vmul.f32 %v9706_v48, %v9433_v38 }
 0x3ac   : > { %v5519_v53 = vmul.f32 %v9566_v15, %v5369_v30 }
 0x3ad   : > { %5724 = vrot.lane.b32.xlu0 %v5518_v22, %s7502_s22 }
 0x3ae   : > { %7395 = vtanh.f32 %v5519_v53  ;;  %5726 = vrot.lane.b32.xlu1 %v5519_v53, %s7502_s22  ;;  %v10466_v53 = vld [vmem:[#allocation33_spill] sm:$0xff] }
 0x3af   : > { %v5304_v26 = vpop.permute.xlu0 %5303  ;;  %7397 = vtanh.f32 %v5518_v22  ;;  %v10465_v22 = vld [vmem:[#allocation35_spill] sm:$0xff] }
 0x3b0   : > { %v5370_v51 = vadd.f32 %v5304_v26, %v5120_v20  ;;  %v7392_v61 = vpop.eup %7391  ;;  %v5126_v3 = vmul.f32 %v9712_v43, %v10465_v22  ;;  %v5127_v20 = vmul.f32 %v9716_v25, %v10466_v53 }
 0x3b1   : > { %v7394_v60 = vpop.eup %7393  ;;  %v5306_v63 = vpop.permute.xlu1 %5305  ;;  %5597 = vrot.lane.b32.xlu0 %v7392_v61, %s7501_s28 }
 0x3b2   : > { %v5520_v49 = vmul.f32 %v9578_v6, %v5370_v51  ;;  %v5371_v15 = vadd.f32 %v5306_v63, %v5121_v33  ;;  %5595 = vrot.lane.b32.xlu1 %v7394_v60, %s7501_s28 }
 0x3b4   : > { %v5521_v46 = vmul.f32 %v9583_v2, %v5371_v15 }
 0x3b5   : > { %5728 = vrot.lane.b32.xlu0 %v5520_v49, %s7502_s22 }
 0x3b6   : > { %7399 = vtanh.f32 %v5521_v46  ;;  %5730 = vrot.lane.b32.xlu1 %v5521_v46, %s7502_s22 }
 0x3b7   : > { %v5308_v45 = vpop.permute.xlu0 %5307  ;;  %7401 = vtanh.f32 %v5520_v49  ;;  %v10467_v49 = vld [vmem:[#allocation39_spill] sm:$0xff] }
 0x3b8   : > { %v5372_v0 = vadd.f32 %v5308_v45, %v5122_v52  ;;  %v7396_v6 = vpop.eup %7395  ;;  %v5128_v63 = vmul.f32 %v9722_v36, %v10467_v49  ;;  %v10468_v52 = vld [vmem:[#allocation34_spill] sm:$0xff] }
 0x3b9   : > { %v7398_v17 = vpop.eup %7397  ;;  %v5310_v23 = vpop.permute.xlu1 %5309  ;;  %5601 = vrot.lane.b32.xlu0 %v7396_v6, %s7501_s28  ;;  %v5129_v45 = vmul.f32 %v9726_v29, %v10468_v52  ;;  %v10480_v52 = vld [vmem:[#allocation14_spill] sm:$0xff] }
 0x3ba   : > { %v5522_v18 = vmul.f32 %v9592_v57, %v5372_v0  ;;  %v5373_v2 = vadd.f32 %v5310_v23, %v5123_v62  ;;  %5599 = vrot.lane.b32.xlu1 %v7398_v17, %s7501_s28  ;;  %v10469_v0 = vld [vmem:[#allocation8_spill] sm:$0xff]  ;;  %v10470_v17 = vld [vmem:[#allocation29_spill] sm:$0xff] }
 0x3bc   : > { %v5523_v1 = vmul.f32 %v9594_v39, %v5373_v2  ;;  %v10471_v2 = vld [vmem:[#allocation21_spill] sm:$0xff] }
 0x3bd   : > { %5732 = vrot.lane.b32.xlu0 %v5522_v18, %s7502_s22 }
 0x3be   : > { %7403 = vtanh.f32 %v5523_v1  ;;  %5734 = vrot.lane.b32.xlu1 %v5523_v1, %s7502_s22  ;;  %v5130_v1 = vmul.f32 %v9731_v35, %v10471_v2 }
 0x3bf   : > { %v5312_v34 = vpop.permute.xlu0 %5311  ;;  %7405 = vtanh.f32 %v5522_v18 }
 0x3c0   : > { %v5374_v42 = vadd.f32 %v5312_v34, %v5124_v21  ;;  %v7400_v57 = vpop.eup %7399 }
 0x3c1   : > { %v7402_v24 = vpop.eup %7401  ;;  %v5314_v37 = vpop.permute.xlu1 %5313  ;;  %5605 = vrot.lane.b32.xlu0 %v7400_v57, %s7501_s28  ;;  %v10472_v57 = vld [vmem:[#allocation38_spill] sm:$0xff] }
 0x3c2   : > { %v5524_v14 = vmul.f32 %v9600_v28, %v5374_v42  ;;  %v5375_v39 = vadd.f32 %v5314_v37, %v5125_v47  ;;  %5603 = vrot.lane.b32.xlu1 %v7402_v24, %s7501_s28  ;;  %v5131_v47 = vmul.f32 %v9734_v4, %v10472_v57  ;;  %v10473_v24 = vld [vmem:[#allocation9_spill] sm:$0xff] }
 0x3c4   : > { %7407 = vtanh.f32 %v5524_v14  ;;  %v5525_v44 = vmul.f32 %v9607_v8, %v5375_v39 }
 0x3c5   : > { %5736 = vrot.lane.b32.xlu0 %v5524_v14, %s7502_s22 }
 0x3c6   : > { %7409 = vtanh.f32 %v5525_v44  ;;  %5738 = vrot.lane.b32.xlu1 %v5525_v44, %s7502_s22 }
 0x3c7   : > { %v5316_v38 = vpop.permute.xlu0 %5315 }
 0x3c8   : > { %v5376_v30 = vadd.f32 %v5316_v38, %v5126_v3  ;;  %v7404_v28 = vpop.eup %7403  ;;  %v10474_v3 = vld [vmem:[#allocation31_spill] sm:$0xff] }
 0x3c9   : > { %v7406_v26 = vpop.eup %7405  ;;  %v5318_v61 = vpop.permute.xlu1 %5317  ;;  %5609 = vrot.lane.b32.xlu0 %v7404_v28, %s7501_s28  ;;  %v5132_v38 = vmul.f32 %v9739_v54, %v10474_v3 }
 0x3ca   : > { %v9834_v51 = vmul.f32 %v9610_v19, %v5376_v30  ;;  %v5377_v8 = vadd.f32 %v5318_v61, %v5127_v20  ;;  %5607 = vrot.lane.b32.xlu1 %v7406_v26, %s7501_s28  ;;  %v10475_v20 = vld [vmem:[#allocation22_spill] sm:$0xff]  ;;  %v10476_v26 = vld [vmem:[#allocation13_spill] sm:$0xff] }
 0x3cb   : > { %v5133_v61 = vmul.f32 %v10476_v26, %v10475_v20 }
 0x3cc   : > { %7411 = vtanh.f32 %v9834_v51  ;;  %v9840_v33 = vmul.f32 %v9614_v32, %v5377_v8  ;;  %v10477_v8 = vld [vmem:[#allocation10_spill] sm:$0xff] }
 0x3ce   : > { %v7408_v60 = vpop.eup %7407  ;;  %7413 = vtanh.f32 %v9840_v33 }
 0x3cf   : > { %v5320_v15 = vpop.permute.xlu0 %5319  ;;  %5611 = vrot.lane.b32.xlu1 %v7408_v60, %s7501_s28 }
 0x3d0   : > { %v5378_v19 = vadd.f32 %v5320_v15, %v5128_v63  ;;  %v7410_v46 = vpop.eup %7409 }
 0x3d1   : > { %v5322_v62 = vpop.permute.xlu1 %5321  ;;  %5613 = vrot.lane.b32.xlu0 %v7410_v46, %s7501_s28  ;;  %v10479_v46 = vld [vmem:[#allocation30_spill] sm:$0xff] }
 0x3d2   : > { %v9849_v6 = vmul.f32 %v10469_v0, %v5378_v19  ;;  %v5379_v32 = vadd.f32 %v5322_v62, %v5129_v45  ;;  %v5134_v45 = vmul.f32 %v10480_v52, %v10479_v46 }
 0x3d4   : > { %7415 = vtanh.f32 %v9849_v6  ;;  %v5529_v18 = vmul.f32 %v10470_v17, %v5379_v32  ;;  %v10481_v17 = vld [vmem:[#allocation26_spill] sm:$0xff] }
 0x3d6   : > { %v7412_v23 = vpop.eup %7411  ;;  %7417 = vtanh.f32 %v5529_v18 }
 0x3d7   : > { %v5324_v21 = vpop.permute.xlu0 %5323  ;;  %5615 = vrot.lane.b32.xlu1 %v7412_v23, %s7501_s28  ;;  %v10482_v23 = vld [vmem:[#allocation15_spill] sm:$0xff] }
 0x3d8   : > { %v5380_v34 = vadd.f32 %v5324_v21, %v5130_v1  ;;  %v7414_v42 = vpop.eup %7413  ;;  %v5135_v2 = vmul.f32 %v10482_v23, %v10481_v17  ;;  %v10483_v1 = vld [vmem:[#allocation12_spill] sm:$0xff] }
 0x3d9   : > { %v5326_v37 = vpop.permute.xlu1 %5325  ;;  %5617 = vrot.lane.b32.xlu0 %v7414_v42, %s7501_s28 }
 0x3da   : > { %v5530_v14 = vmul.f32 %v10473_v24, %v5380_v34  ;;  %v5381_v39 = vadd.f32 %v5326_v37, %v5131_v47  ;;  %v10484_v24 = vld [vmem:[#allocation7_spill] sm:$0xff] }
 0x3db   : > { %v5136_v37 = vmul.f32 %v9755_v27, %v10484_v24 }
 0x3dc   : > { %7419 = vtanh.f32 %v5530_v14  ;;  %v5531_v44 = vmul.f32 %v9632_v40, %v5381_v39  ;;  %v10478_v40 = vld [vmem:[#allocation11_spill] sm:$0xff] }
 0x3de   : > { %v7416_v22 = vpop.eup %7415  ;;  %7421 = vtanh.f32 %v5531_v44 }
 0x3df   : > { %v5328_v30 = vpop.permute.xlu0 %5327  ;;  %5619 = vrot.lane.b32.xlu1 %v7416_v22, %s7501_s28 }
 0x3e0   : > { %v5382_v28 = vadd.f32 %v5328_v30, %v5132_v38  ;;  %v7418_v53 = vpop.eup %7417 }
 0x3e1   : > { %v5330_v49 = vpop.permute.xlu1 %5329  ;;  %5621 = vrot.lane.b32.xlu0 %v7418_v53, %s7501_s28 }
 0x3e2   : > { %v5532_v60 = vmul.f32 %v10477_v8, %v5382_v28  ;;  %v5383_v63 = vadd.f32 %v5330_v49, %v5133_v61 }
 0x3e4   : > { %7423 = vtanh.f32 %v5532_v60  ;;  %v9870_v15 = vmul.f32 %v10478_v40, %v5383_v63 }
 0x3e6   : > { %v7420_v19 = vpop.eup %7419  ;;  %7425 = vtanh.f32 %v9870_v15 }
 0x3e7   : > { %v5332_v0 = vpop.permute.xlu0 %5331  ;;  %5623 = vrot.lane.b32.xlu1 %v7420_v19, %s7501_s28 }
 0x3e8   : > { %v5384_v62 = vadd.f32 %v5332_v0, %v5134_v45  ;;  %v7422_v32 = vpop.eup %7421 }
 0x3e9   : > { %v5334_v34 = vpop.permute.xlu1 %5333  ;;  %5625 = vrot.lane.b32.xlu0 %v7422_v32, %s7501_s28 }
 0x3ea   : > { %v9879_v21 = vmul.f32 %v10483_v1, %v5384_v62  ;;  %v5385_v42 = vadd.f32 %v5334_v34, %v5135_v2 }
 0x3ec   : > { %7427 = vtanh.f32 %v9879_v21  ;;  %v9884_v57 = vmul.f32 %v9763_v5, %v5385_v42 }
 0x3ee   : > { %v7424_v47 = vpop.eup %7423  ;;  %7429 = vtanh.f32 %v9884_v57 }
 0x3ef   : > { %5627 = vrot.lane.b32.xlu1 %v7424_v47, %s7501_s28  ;;  %v5336_v39 = vpop.permute.xlu0 %5335 }
 0x3f0   : > { %v5386_v22 = vadd.f32 %v5336_v39, %v5136_v37  ;;  %v7426_v3 = vpop.eup %7425 }
 0x3f1   : > { %5629 = vrot.lane.b32.xlu0 %v7426_v3, %s7501_s28 }
 0x3f2   : > { %v9891_v38 = vmul.f32 %v9759_v31, %v5386_v22 }
 0x3f4   : > { %7431 = vtanh.f32 %v9891_v38 }
 0x3f6   : > { %v7428_v5 = vpop.eup %7427 }
 0x3f7   : > { %5631 = vrot.lane.b32.xlu1 %v7428_v5, %s7501_s28 }
 0x3f8   : > { %v7430_v30 = vpop.eup %7429 }
 0x3f9   : > { %5633 = vrot.lane.b32.xlu0 %v7430_v30, %s7501_s28 }
 0x3fd   : > { %5740 = vrot.lane.b32.xlu0 %v9834_v51, %s7502_s22 }
 0x3fe   : > { %v7432_v28 = vpop.eup %7431 }
 0x3ff   : > { %5635 = vrot.lane.b32.xlu1 %v7432_v28, %s7501_s28  ;;  %s7503_s28 = smov 64  }
 0x401   : > { %5744 = vrot.lane.b32.xlu0 %v9849_v6, %s7502_s22 }
 0x403   : > { %5742 = vrot.lane.b32.xlu1 %v9840_v33, %s7502_s22 }
 0x405   : > { %5746 = vrot.lane.b32.xlu0 %v5529_v18, %s7502_s22 }
 0x406   : > { %v9905_v31 = vpop.permute.xlu0 %5712 }
 0x407   : > { %5787 = vst.msk [vmem:[#allocation3] sm:$0xff] %vm809_vm5, %v9905_v31  ;;  %5748 = vrot.lane.b32.xlu1 %v5530_v14, %s7502_s22  ;;  %6051 = vst.msk [vmem:[#allocation4] sm:$0xff] (!%p6561_p5), %vm809_vm5, %v9905_v31 }
 0x408   : > { %v9910_v53 = vpop.permute.xlu1 %5714 }
 0x409   : > { %5788 = vst.msk [vmem:[#allocation3 + $0x8] sm:$0xff] %vm809_vm5, %v9910_v53  ;;  %5750 = vrot.lane.b32.xlu0 %v5531_v44, %s7502_s22  ;;  %6052 = vst.msk [vmem:[#allocation4 + $0x8] sm:$0xff] (!%p6561_p5), %vm809_vm5, %v9910_v53 }
 0x40b   : > { %5752 = vrot.lane.b32.xlu1 %v5532_v60, %s7502_s22 }
 0x40e   : > { %v9916_v51 = vpop.permute.xlu0 %5716 }
 0x40f   : > { %5789 = vst.msk [vmem:[#allocation3 + $0x10] sm:$0xff] %vm809_vm5, %v9916_v51  ;;  %6053 = vst.msk [vmem:[#allocation4 + $0x10] sm:$0xff] (!%p6561_p5), %vm809_vm5, %v9916_v51 }
 0x410   : > { %v9920_v33 = vpop.permute.xlu1 %5718 }
 0x411   : > { %5790 = vst.msk [vmem:[#allocation3 + $0x18] sm:$0xff] %vm809_vm5, %v9920_v33  ;;  %6054 = vst.msk [vmem:[#allocation4 + $0x18] sm:$0xff] (!%p6561_p5), %vm809_vm5, %v9920_v33 }
 0x413   : > { %v5590_v6 = vpop.permute.xlu0 %5589 }
 0x414   : > { %v5663_v18 = vmul.f32 %v9646_v50, %v5590_v6  ;;  %v5588_v14 = vpop.permute.xlu1 %5587 }
 0x415   : > { %v5662_v20 = vmul.f32 %v9642_v58, %v5588_v14 }
 0x416   : > { %v6567_v61 = vpack.c.bf16 %v5663_v18, %v5663_v18 }
 0x417   : > { %v6566_v44 = vpack.c.bf16 %v5662_v20, %v5662_v20  ;;  %v9926_v8 = vpop.permute.xlu0 %5720 }
 0x418   : > { %5791 = vst.msk [vmem:[#allocation3 + $0x20] sm:$0xff] %vm809_vm5, %v9926_v8  ;;  %v9930_v60 = vpop.permute.xlu1 %5722  ;;  %5890 = vrot.lane.b32.xlu0 %v6567_v61, %s7503_s28  ;;  %6055 = vst.msk [vmem:[#allocation4 + $0x20] sm:$0xff] (!%p6561_p5), %vm809_vm5, %v9926_v8 }
 0x419   : > { %5792 = vst.msk [vmem:[#allocation3 + $0x28] sm:$0xff] %vm809_vm5, %v9930_v60  ;;  %5888 = vrot.lane.b32.xlu1 %v6566_v44, %s7503_s28  ;;  %6056 = vst.msk [vmem:[#allocation4 + $0x28] sm:$0xff] (!%p6561_p5), %vm809_vm5, %v9930_v60 }
 0x41b   : > { %v5594_v50 = vpop.permute.xlu0 %5593 }
 0x41c   : > { %v5665_v58 = vmul.f32 %v9656_v9, %v5594_v50  ;;  %v5592_v49 = vpop.permute.xlu1 %5591 }
 0x41d   : > { %v5664_v63 = vmul.f32 %v9652_v13, %v5592_v49 }
 0x41e   : > { %v6569_v40 = vpack.c.bf16 %v5665_v58, %v5665_v58 }
 0x41f   : > { %v6568_v19 = vpack.c.bf16 %v5664_v63, %v5664_v63  ;;  %v9938_v46 = vpop.permute.xlu0 %5724 }
 0x420   : > { %5793 = vst.msk [vmem:[#allocation3 + $0x30] sm:$0xff] %vm809_vm5, %v9938_v46  ;;  %v9942_v45 = vpop.permute.xlu1 %5726  ;;  %5894 = vrot.lane.b32.xlu0 %v6569_v40, %s7503_s28  ;;  %6057 = vst.msk [vmem:[#allocation4 + $0x30] sm:$0xff] (!%p6561_p5), %vm809_vm5, %v9938_v46 }
 0x421   : > { %5794 = vst.msk [vmem:[#allocation3 + $0x38] sm:$0xff] %vm809_vm5, %v9942_v45  ;;  %5892 = vrot.lane.b32.xlu1 %v6568_v19, %s7503_s28  ;;  %6058 = vst.msk [vmem:[#allocation4 + $0x38] sm:$0xff] (!%p6561_p5), %vm809_vm5, %v9942_v45 }
 0x423   : > { %v5598_v9 = vpop.permute.xlu0 %5597 }
 0x424   : > { %v5667_v0 = vmul.f32 %v9666_v10, %v5598_v9  ;;  %v5596_v13 = vpop.permute.xlu1 %5595 }
 0x425   : > { %v5666_v62 = vmul.f32 %v9662_v12, %v5596_v13 }
 0x426   : > { %v6571_v32 = vpack.c.bf16 %v5667_v0, %v5667_v0 }
 0x427   : > { %v6570_v17 = vpack.c.bf16 %v5666_v62, %v5666_v62  ;;  %v9950_v2 = vpop.permute.xlu0 %5728 }
 0x428   : > { %5795 = vst.msk [vmem:[#allocation3 + $0x40] sm:$0xff] %vm809_vm5, %v9950_v2  ;;  %v9954_v1 = vpop.permute.xlu1 %5730  ;;  %5898 = vrot.lane.b32.xlu0 %v6571_v32, %s7503_s28  ;;  %6059 = vst.msk [vmem:[#allocation4 + $0x40] sm:$0xff] (!%p6561_p5), %vm809_vm5, %v9950_v2 }
 0x429   : > { %5796 = vst.msk [vmem:[#allocation3 + $0x48] sm:$0xff] %vm809_vm5, %v9954_v1  ;;  %5896 = vrot.lane.b32.xlu1 %v6570_v17, %s7503_s28  ;;  %6060 = vst.msk [vmem:[#allocation4 + $0x48] sm:$0xff] (!%p6561_p5), %vm809_vm5, %v9954_v1 }
 0x42b   : > { %v5602_v10 = vpop.permute.xlu0 %5601 }
 0x42c   : > { %v5669_v34 = vmul.f32 %v9676_v56, %v5602_v10  ;;  %v5600_v12 = vpop.permute.xlu1 %5599 }
 0x42d   : > { %v5668_v42 = vmul.f32 %v9672_v11, %v5600_v12 }
 0x42e   : > { %v6573_v47 = vpack.c.bf16 %v5669_v34, %v5669_v34 }
 0x42f   : > { %v6572_v24 = vpack.c.bf16 %v5668_v42, %v5668_v42  ;;  %v9962_v37 = vpop.permute.xlu0 %5732 }
 0x430   : > { %5797 = vst.msk [vmem:[#allocation3 + $0x50] sm:$0xff] %vm809_vm5, %v9962_v37  ;;  %v9966_v39 = vpop.permute.xlu1 %5734  ;;  %5902 = vrot.lane.b32.xlu0 %v6573_v47, %s7503_s28  ;;  %6061 = vst.msk [vmem:[#allocation4 + $0x50] sm:$0xff] (!%p6561_p5), %vm809_vm5, %v9962_v37 }
 0x431   : > { %5798 = vst.msk [vmem:[#allocation3 + $0x58] sm:$0xff] %vm809_vm5, %v9966_v39  ;;  %5900 = vrot.lane.b32.xlu1 %v6572_v24, %s7503_s28  ;;  %6062 = vst.msk [vmem:[#allocation4 + $0x58] sm:$0xff] (!%p6561_p5), %vm809_vm5, %v9966_v39 }
 0x433   : > { %v5606_v56 = vpop.permute.xlu0 %5605 }
 0x434   : > { %v5671_v22 = vmul.f32 %v9686_v7, %v5606_v56  ;;  %v5604_v11 = vpop.permute.xlu1 %5603 }
 0x435   : > { %v5670_v3 = vmul.f32 %v9682_v59, %v5604_v11 }
 0x436   : > { %v6575_v5 = vpack.c.bf16 %v5671_v22, %v5671_v22 }
 0x437   : > { %v6574_v30 = vpack.c.bf16 %v5670_v3, %v5670_v3  ;;  %v9974_v28 = vpop.permute.xlu0 %5736 }
 0x438   : > { %5799 = vst.msk [vmem:[#allocation3 + $0x60] sm:$0xff] %vm809_vm5, %v9974_v28  ;;  %v9978_v6 = vpop.permute.xlu1 %5738  ;;  %5906 = vrot.lane.b32.xlu0 %v6575_v5, %s7503_s28  ;;  %6063 = vst.msk [vmem:[#allocation4 + $0x60] sm:$0xff] (!%p6561_p5), %vm809_vm5, %v9974_v28 }
 0x439   : > { %5800 = vst.msk [vmem:[#allocation3 + $0x68] sm:$0xff] %vm809_vm5, %v9978_v6  ;;  %5904 = vrot.lane.b32.xlu1 %v6574_v30, %s7503_s28  ;;  %6064 = vst.msk [vmem:[#allocation4 + $0x68] sm:$0xff] (!%p6561_p5), %vm809_vm5, %v9978_v6 }
 0x43b   : > { %v5610_v7 = vpop.permute.xlu0 %5609 }
 0x43c   : > { %v5673_v18 = vmul.f32 %v9696_v55, %v5610_v7  ;;  %v5608_v59 = vpop.permute.xlu1 %5607  ;;  %v5989_v7 = vld [vmem:[#allocation2 + $0x4] sm:$0xf] }
 0x43d   : > { %v5672_v14 = vmul.f32 %v9692_v41, %v5608_v59  ;;  %v6016_v59 = vld [vmem:[#allocation2 + $0xdc] sm:$0xf]  ;;  %6018 = vst.msk [vmem:[%s7557_s27] sm:$0xf] %vm5963_vm12, %v5989_v7 }
 0x43e   : > { %v6577_v20 = vpack.c.bf16 %v5673_v18, %v5673_v18  ;;  %v5990_v18 = vld [vmem:[#allocation2 + $0xc] sm:$0xf]  ;;  %6045 = vst.msk [vmem:[%s7557_s27 + $0x6c] sm:$0xf] %vm5963_vm12, %v6016_v59 }
 0x43f   : > { %v6576_v61 = vpack.c.bf16 %v5672_v14, %v5672_v14  ;;  %6019 = vst.msk [vmem:[%s7557_s27 + $0x4] sm:$0xf] %vm5963_vm12, %v5990_v18 }
 0x440   : > { %5910 = vrot.lane.b32.xlu0 %v6577_v20, %s7503_s28  ;;  %v6017_v20 = vld [vmem:[#allocation2 + $0xe4] sm:$0xf] }
 0x441   : > { %v5612_v44 = vpop.permute.xlu1 %5611  ;;  %5908 = vrot.lane.b32.xlu1 %v6576_v61, %s7503_s28  ;;  %6046 = vst.msk [vmem:[%s7557_s27 + $0x70] sm:$0xf] %vm5963_vm12, %v6017_v20 }
 0x442   : > { %v5674_v50 = vmul.f32 %v9702_v16, %v5612_v44 }
 0x443   : > { %v5614_v49 = vpop.permute.xlu0 %5613 }
 0x444   : > { %v6578_v58 = vpack.c.bf16 %v5674_v50, %v5674_v50  ;;  %v5675_v63 = vmul.f32 %v9706_v48, %v5614_v49 }
 0x446   : > { %5912 = vrot.lane.b32.xlu1 %v6578_v58, %s7503_s28  ;;  %v6579_v40 = vpack.c.bf16 %v5675_v63, %v5675_v63 }
 0x448   : > { %5914 = vrot.lane.b32.xlu0 %v6579_v40, %s7503_s28 }
 0x449   : > { %v5616_v55 = vpop.permute.xlu1 %5615 }
 0x44a   : > { %v5676_v41 = vmul.f32 %v9712_v43, %v5616_v55 }
 0x44b   : > { %v5618_v9 = vpop.permute.xlu0 %5617 }
 0x44c   : > { %v6580_v19 = vpack.c.bf16 %v5676_v41, %v5676_v41  ;;  %v5677_v0 = vmul.f32 %v9716_v25, %v5618_v9 }
 0x44e   : > { %5916 = vrot.lane.b32.xlu1 %v6580_v19, %s7503_s28  ;;  %v6581_v16 = vpack.c.bf16 %v5677_v0, %v5677_v0 }
 0x450   : > { %5918 = vrot.lane.b32.xlu0 %v6581_v16, %s7503_s28 }
 0x451   : > { %v5620_v13 = vpop.permute.xlu1 %5619 }
 0x452   : > { %v5678_v48 = vmul.f32 %v9722_v36, %v5620_v13 }
 0x453   : > { %v5622_v32 = vpop.permute.xlu0 %5621 }
 0x454   : > { %v6582_v62 = vpack.c.bf16 %v5678_v48, %v5678_v48  ;;  %v5679_v17 = vmul.f32 %v9726_v29, %v5622_v32 }
 0x456   : > { %5920 = vrot.lane.b32.xlu1 %v6582_v62, %s7503_s28  ;;  %v6583_v10 = vpack.c.bf16 %v5679_v17, %v5679_v17 }
 0x458   : > { %5922 = vrot.lane.b32.xlu0 %v6583_v10, %s7503_s28 }
 0x459   : > { %v5624_v43 = vpop.permute.xlu1 %5623 }
 0x45a   : > { %v5680_v25 = vmul.f32 %v9731_v35, %v5624_v43 }
 0x45b   : > { %v5626_v12 = vpop.permute.xlu0 %5625 }
 0x45c   : > { %v6584_v34 = vpack.c.bf16 %v5680_v25, %v5680_v25  ;;  %v5681_v42 = vmul.f32 %v9734_v4, %v5626_v12 }
 0x45e   : > { %5924 = vrot.lane.b32.xlu1 %v6584_v34, %s7503_s28  ;;  %v6585_v47 = vpack.c.bf16 %v5681_v42, %v5681_v42 }
 0x460   : > { %5926 = vrot.lane.b32.xlu0 %v6585_v47, %s7503_s28 }
 0x461   : > { %v5628_v36 = vpop.permute.xlu1 %5627 }
 0x462   : > { %v5682_v29 = vmul.f32 %v9739_v54, %v5628_v36 }
 0x463   : > { %v5630_v56 = vpop.permute.xlu0 %5629 }
 0x464   : > { %v6586_v24 = vpack.c.bf16 %v5682_v29, %v5682_v29  ;;  %v5683_v22 = vmul.f32 %v10476_v26, %v5630_v56 }
 0x466   : > { %5928 = vrot.lane.b32.xlu1 %v6586_v24, %s7503_s28  ;;  %v6587_v11 = vpack.c.bf16 %v5683_v22, %v5683_v22 }
 0x468   : > { %5930 = vrot.lane.b32.xlu0 %v6587_v11, %s7503_s28 }
 0x469   : > { %v5632_v35 = vpop.permute.xlu1 %5631 }
 0x46a   : > { %v5684_v4 = vmul.f32 %v10480_v52, %v5632_v35 }
 0x46b   : > { %v5634_v5 = vpop.permute.xlu0 %5633 }
 0x46c   : > { %v6588_v3 = vpack.c.bf16 %v5684_v4, %v5684_v4  ;;  %v5685_v30 = vmul.f32 %v10482_v23, %v5634_v5 }
 0x46e   : > { %5932 = vrot.lane.b32.xlu1 %v6588_v3, %s7503_s28  ;;  %v6589_v54 = vpack.c.bf16 %v5685_v30, %v5685_v30 }
 0x46f   : > { %v10011_v26 = vpop.permute.xlu0 %5740 }
 0x470   : > { %5801 = vst.msk [vmem:[#allocation3 + $0x70] sm:$0xff] %vm809_vm5, %v10011_v26  ;;  %5934 = vrot.lane.b32.xlu0 %v6589_v54, %s7503_s28  ;;  %6065 = vst.msk [vmem:[#allocation4 + $0x70] sm:$0xff] (!%p6561_p5), %vm809_vm5, %v10011_v26 }
 0x471   : > { %v5636_v52 = vpop.permute.xlu1 %5635 }
 0x472   : > { %v5686_v14 = vmul.f32 %v9755_v27, %v5636_v52 }
 0x473   : > { %v10025_v61 = vpop.permute.xlu0 %5744 }
 0x474   : > { %v6590_v23 = vpack.c.bf16 %v5686_v14, %v5686_v14  ;;  %5803 = vst.msk [vmem:[#allocation3 + $0x80] sm:$0xff] %vm809_vm5, %v10025_v61  ;;  %5754 = vrot.lane.b32.xlu0 %v9870_v15, %s7502_s22  ;;  %6067 = vst.msk [vmem:[#allocation4 + $0x80] sm:$0xff] (!%p6561_p5), %vm809_vm5, %v10025_v61 }
 0x475   : > { %v10031_v44 = vpop.permute.xlu1 %5742 }
 0x476   : > { %5802 = vst.msk [vmem:[#allocation3 + $0x78] sm:$0xff] %vm809_vm5, %v10031_v44  ;;  %5936 = vrot.lane.b32.xlu1 %v6590_v23, %s7503_s28  ;;  %6066 = vst.msk [vmem:[#allocation4 + $0x78] sm:$0xff] (!%p6561_p5), %vm809_vm5, %v10031_v44 }
 0x477   : > { %v10036_v27 = vpop.permute.xlu0 %5746 }
 0x478   : > { %5804 = vst.msk [vmem:[#allocation3 + $0x88] sm:$0xff] %vm809_vm5, %v10036_v27  ;;  %5758 = vrot.lane.b32.xlu0 %v9884_v57, %s7502_s22  ;;  %6068 = vst.msk [vmem:[#allocation4 + $0x88] sm:$0xff] (!%p6561_p5), %vm809_vm5, %v10036_v27 }
 0x479   : > { %v10042_v50 = vpop.permute.xlu1 %5748 }
 0x47a   : > { %5805 = vst.msk [vmem:[#allocation3 + $0x90] sm:$0xff] %vm809_vm5, %v10042_v50  ;;  %5756 = vrot.lane.b32.xlu1 %v9879_v21, %s7502_s22  ;;  %6069 = vst.msk [vmem:[#allocation4 + $0x90] sm:$0xff] (!%p6561_p5), %vm809_vm5, %v10042_v50 }
 0x47b   : > { %v10048_v15 = vpop.permute.xlu0 %5750 }
 0x47c   : > { %5806 = vst.msk [vmem:[#allocation3 + $0x98] sm:$0xff] %vm809_vm5, %v10048_v15  ;;  %6070 = vst.msk [vmem:[#allocation4 + $0x98] sm:$0xff] (!%p6561_p5), %vm809_vm5, %v10048_v15 }
 0x47d   : > { %v10052_v58 = vpop.permute.xlu1 %5752 }
 0x47e   : > { %5807 = vst.msk [vmem:[#allocation3 + $0xa0] sm:$0xff] %vm809_vm5, %v10052_v58  ;;  %5760 = vrot.lane.b32.xlu1 %v9891_v38, %s7502_s22  ;;  %6071 = vst.msk [vmem:[#allocation4 + $0xa0] sm:$0xff] (!%p6561_p5), %vm809_vm5, %v10052_v58 }
 0x48a   : > { %v5891_v57 = vpop.permute.xlu0 %5890 }
 0x48b   : > { %5965 = vst.msk [vmem:[#allocation2 + $0x1c] sm:$0xf] %vm5963_vm12, %v5891_v57  ;;  %v5889_v49 = vpop.permute.xlu1 %5888 }
 0x48c   : > { %5964 = vst.msk [vmem:[#allocation2 + $0x14] sm:$0xf] %vm5963_vm12, %v5889_v49 }
 0x492   : > { %v5992_v21 = vld [vmem:[#allocation2 + $0x1c] sm:$0xf]  ;;  %v5895_v63 = vpop.permute.xlu0 %5894 }
 0x493   : > { %6021 = vst.msk [vmem:[%s7557_s27 + $0xc] sm:$0xf] %vm5963_vm12, %v5992_v21  ;;  %v5991_v40 = vld [vmem:[#allocation2 + $0x14] sm:$0xf]  ;;  %5967 = vst.msk [vmem:[#allocation2 + $0x2c] sm:$0xf] %vm5963_vm12, %v5895_v63  ;;  %v5893_v55 = vpop.permute.xlu1 %5892 }
 0x494   : > { %6020 = vst.msk [vmem:[%s7557_s27 + $0x8] sm:$0xf] %vm5963_vm12, %v5991_v40  ;;  %5966 = vst.msk [vmem:[#allocation2 + $0x24] sm:$0xf] %vm5963_vm12, %v5893_v55 }
 0x49a   : > { %v5994_v38 = vld [vmem:[#allocation2 + $0x2c] sm:$0xf]  ;;  %v5899_v41 = vpop.permute.xlu0 %5898 }
 0x49b   : > { %6023 = vst.msk [vmem:[%s7557_s27 + $0x14] sm:$0xf] %vm5963_vm12, %v5994_v38  ;;  %v5993_v19 = vld [vmem:[#allocation2 + $0x24] sm:$0xf]  ;;  %5969 = vst.msk [vmem:[#allocation2 + $0x3c] sm:$0xf] %vm5963_vm12, %v5899_v41  ;;  %v5897_v9 = vpop.permute.xlu1 %5896 }
 0x49c   : > { %6022 = vst.msk [vmem:[%s7557_s27 + $0x10] sm:$0xf] %vm5963_vm12, %v5993_v19  ;;  %5968 = vst.msk [vmem:[#allocation2 + $0x34] sm:$0xf] %vm5963_vm12, %v5897_v9 }
 0x4a2   : > { %v5996_v0 = vld [vmem:[#allocation2 + $0x3c] sm:$0xf]  ;;  %v5903_v16 = vpop.permute.xlu0 %5902 }
 0x4a3   : > { %6025 = vst.msk [vmem:[%s7557_s27 + $0x1c] sm:$0xf] %vm5963_vm12, %v5996_v0  ;;  %v5995_v13 = vld [vmem:[#allocation2 + $0x34] sm:$0xf]  ;;  %5971 = vst.msk [vmem:[#allocation2 + $0x4c] sm:$0xf] %vm5963_vm12, %v5903_v16  ;;  %v5901_v48 = vpop.permute.xlu1 %5900 }
 0x4a4   : > { %6024 = vst.msk [vmem:[%s7557_s27 + $0x18] sm:$0xf] %vm5963_vm12, %v5995_v13  ;;  %5970 = vst.msk [vmem:[#allocation2 + $0x44] sm:$0xf] %vm5963_vm12, %v5901_v48 }
 0x4aa   : > { %v5998_v62 = vld [vmem:[#allocation2 + $0x4c] sm:$0xf]  ;;  %v5907_v32 = vpop.permute.xlu0 %5906 }
 0x4ab   : > { %6027 = vst.msk [vmem:[%s7557_s27 + $0x24] sm:$0xf] %vm5963_vm12, %v5998_v62  ;;  %v5997_v17 = vld [vmem:[#allocation2 + $0x44] sm:$0xf]  ;;  %5973 = vst.msk [vmem:[#allocation2 + $0x5c] sm:$0xf] %vm5963_vm12, %v5907_v32  ;;  %v5905_v10 = vpop.permute.xlu1 %5904 }
 0x4ac   : > { %6026 = vst.msk [vmem:[%s7557_s27 + $0x20] sm:$0xf] %vm5963_vm12, %v5997_v17  ;;  %5972 = vst.msk [vmem:[#allocation2 + $0x54] sm:$0xf] %vm5963_vm12, %v5905_v10 }
 0x4b2   : > { %v6000_v43 = vld [vmem:[#allocation2 + $0x5c] sm:$0xf]  ;;  %v5911_v25 = vpop.permute.xlu0 %5910 }
 0x4b3   : > { %6029 = vst.msk [vmem:[%s7557_s27 + $0x2c] sm:$0xf] %vm5963_vm12, %v6000_v43  ;;  %v5999_v34 = vld [vmem:[#allocation2 + $0x54] sm:$0xf]  ;;  %5975 = vst.msk [vmem:[#allocation2 + $0x6c] sm:$0xf] %vm5963_vm12, %v5911_v25  ;;  %v5909_v12 = vpop.permute.xlu1 %5908 }
 0x4b4   : > { %6028 = vst.msk [vmem:[%s7557_s27 + $0x28] sm:$0xf] %vm5963_vm12, %v5999_v34  ;;  %5974 = vst.msk [vmem:[#allocation2 + $0x64] sm:$0xf] %vm5963_vm12, %v5909_v12 }
 0x4b8   : > { %v5913_v42 = vpop.permute.xlu1 %5912 }
 0x4b9   : > { %5976 = vst.msk [vmem:[#allocation2 + $0x74] sm:$0xf] %vm5963_vm12, %v5913_v42 }
 0x4ba   : > { %v6002_v47 = vld [vmem:[#allocation2 + $0x6c] sm:$0xf]  ;;  %v5915_v36 = vpop.permute.xlu0 %5914 }
 0x4bb   : > { %6031 = vst.msk [vmem:[%s7557_s27 + $0x34] sm:$0xf] %vm5963_vm12, %v6002_v47  ;;  %v6001_v29 = vld [vmem:[#allocation2 + $0x64] sm:$0xf]  ;;  %5977 = vst.msk [vmem:[#allocation2 + $0x7c] sm:$0xf] %vm5963_vm12, %v5915_v36 }
 0x4bc   : > { %6030 = vst.msk [vmem:[%s7557_s27 + $0x30] sm:$0xf] %vm5963_vm12, %v6001_v29 }
 0x4c0   : > { %v6003_v24 = vld [vmem:[#allocation2 + $0x74] sm:$0xf]  ;;  %v5917_v56 = vpop.permute.xlu1 %5916 }
 0x4c1   : > { %6032 = vst.msk [vmem:[%s7557_s27 + $0x38] sm:$0xf] %vm5963_vm12, %v6003_v24  ;;  %5978 = vst.msk [vmem:[#allocation2 + $0x84] sm:$0xf] %vm5963_vm12, %v5917_v56 }
 0x4c2   : > { %v6004_v22 = vld [vmem:[#allocation2 + $0x7c] sm:$0xf]  ;;  %v5919_v11 = vpop.permute.xlu0 %5918 }
 0x4c3   : > { %6033 = vst.msk [vmem:[%s7557_s27 + $0x3c] sm:$0xf] %vm5963_vm12, %v6004_v22  ;;  %5979 = vst.msk [vmem:[#allocation2 + $0x8c] sm:$0xf] %vm5963_vm12, %v5919_v11 }
 0x4c8   : > { %v6005_v35 = vld [vmem:[#allocation2 + $0x84] sm:$0xf]  ;;  %v5921_v4 = vpop.permute.xlu1 %5920 }
 0x4c9   : > { %6034 = vst.msk [vmem:[%s7557_s27 + $0x40] sm:$0xf] %vm5963_vm12, %v6005_v35  ;;  %5980 = vst.msk [vmem:[#allocation2 + $0x94] sm:$0xf] %vm5963_vm12, %v5921_v4 }
 0x4ca   : > { %v6006_v3 = vld [vmem:[#allocation2 + $0x8c] sm:$0xf]  ;;  %v5923_v5 = vpop.permute.xlu0 %5922 }
 0x4cb   : > { %6035 = vst.msk [vmem:[%s7557_s27 + $0x44] sm:$0xf] %vm5963_vm12, %v6006_v3  ;;  %5981 = vst.msk [vmem:[#allocation2 + $0x9c] sm:$0xf] %vm5963_vm12, %v5923_v5 }
 0x4d0   : > { %v6007_v30 = vld [vmem:[#allocation2 + $0x94] sm:$0xf]  ;;  %v5925_v54 = vpop.permute.xlu1 %5924 }
 0x4d1   : > { %6036 = vst.msk [vmem:[%s7557_s27 + $0x48] sm:$0xf] %vm5963_vm12, %v6007_v30  ;;  %5982 = vst.msk [vmem:[#allocation2 + $0xa4] sm:$0xf] %vm5963_vm12, %v5925_v54 }
 0x4d2   : > { %v6008_v52 = vld [vmem:[#allocation2 + $0x9c] sm:$0xf]  ;;  %v5927_v7 = vpop.permute.xlu0 %5926 }
 0x4d3   : > { %6037 = vst.msk [vmem:[%s7557_s27 + $0x4c] sm:$0xf] %vm5963_vm12, %v6008_v52  ;;  %5983 = vst.msk [vmem:[#allocation2 + $0xac] sm:$0xf] %vm5963_vm12, %v5927_v7 }
 0x4d8   : > { %v6009_v18 = vld [vmem:[#allocation2 + $0xa4] sm:$0xf]  ;;  %v5929_v59 = vpop.permute.xlu1 %5928 }
 0x4d9   : > { %6038 = vst.msk [vmem:[%s7557_s27 + $0x50] sm:$0xf] %vm5963_vm12, %v6009_v18  ;;  %5984 = vst.msk [vmem:[#allocation2 + $0xb4] sm:$0xf] %vm5963_vm12, %v5929_v59 }
 0x4da   : > { %v6010_v14 = vld [vmem:[#allocation2 + $0xac] sm:$0xf]  ;;  %v5931_v20 = vpop.permute.xlu0 %5930 }
 0x4db   : > { %6039 = vst.msk [vmem:[%s7557_s27 + $0x54] sm:$0xf] %vm5963_vm12, %v6010_v14  ;;  %5985 = vst.msk [vmem:[#allocation2 + $0xbc] sm:$0xf] %vm5963_vm12, %v5931_v20 }
 0x4e0   : > { %v6011_v23 = vld [vmem:[#allocation2 + $0xb4] sm:$0xf]  ;;  %v5933_v57 = vpop.permute.xlu1 %5932 }
 0x4e1   : > { %6040 = vst.msk [vmem:[%s7557_s27 + $0x58] sm:$0xf] %vm5963_vm12, %v6011_v23  ;;  %5986 = vst.msk [vmem:[#allocation2 + $0xc4] sm:$0xf] %vm5963_vm12, %v5933_v57 }
 0x4e2   : > { %v6012_v49 = vld [vmem:[#allocation2 + $0xbc] sm:$0xf]  ;;  %v5935_v21 = vpop.permute.xlu0 %5934 }
 0x4e3   : > { %6041 = vst.msk [vmem:[%s7557_s27 + $0x5c] sm:$0xf] %vm5963_vm12, %v6012_v49  ;;  %5987 = vst.msk [vmem:[#allocation2 + $0xcc] sm:$0xf] %vm5963_vm12, %v5935_v21 }
 0x4e6   : > { %v5755_v63 = vpop.permute.xlu0 %5754 }
 0x4e7   : > { %5808 = vst.msk [vmem:[#allocation3 + $0xa8] sm:$0xff] %vm809_vm5, %v5755_v63  ;;  %6072 = vst.msk [vmem:[#allocation4 + $0xa8] sm:$0xff] (!%p6561_p5), %vm809_vm5, %v5755_v63 }
 0x4e8   : > { %v6013_v40 = vld [vmem:[#allocation2 + $0xc4] sm:$0xf]  ;;  %v5937_v55 = vpop.permute.xlu1 %5936 }
 0x4e9   : > { %6042 = vst.msk [vmem:[%s7557_s27 + $0x60] sm:$0xf] %vm5963_vm12, %v6013_v40  ;;  %5988 = vst.msk [vmem:[#allocation2 + $0xd4] sm:$0xf] %vm5963_vm12, %v5937_v55 }
 0x4ea   : > { %v6014_v38 = vld [vmem:[#allocation2 + $0xcc] sm:$0xf]  ;;  %v5759_v41 = vpop.permute.xlu0 %5758 }
 0x4eb   : > { %6043 = vst.msk [vmem:[%s7557_s27 + $0x64] sm:$0xf] %vm5963_vm12, %v6014_v38 }
 0x4ec   : > { %5810 = vst.msk [vmem:[#allocation3 + $0xb8] sm:$0xff] %vm809_vm5, %v5759_v41  ;;  %v5757_v19 = vpop.permute.xlu1 %5756  ;;  %6050 = sbr.rel (%p6561_p5) target bundleno = 1267 (0x4f3), region = 44  ;;  %6074 = vst.msk [vmem:[#allocation4 + $0xb8] sm:$0xff] (!%p6561_p5), %vm809_vm5, %v5759_v41 }
 0x4ed   : > { %5809 = vst.msk [vmem:[#allocation3 + $0xb0] sm:$0xff] %vm809_vm5, %v5757_v19  ;;  %6073 = vst.msk [vmem:[#allocation4 + $0xb0] sm:$0xff] (!%p6561_p5), %vm809_vm5, %v5757_v19 }
 0x4f0   : > { %v6015_v9 = vld [vmem:[#allocation2 + $0xd4] sm:$0xf]  ;;  %v5761_v0 = vpop.permute.xlu1 %5760 }
 0x4f1   : > { %6044 = vst.msk [vmem:[%s7557_s27 + $0x68] sm:$0xf] %vm5963_vm12, %v6015_v9 }
 0x4f2   : > { %5811 = vst.msk [vmem:[#allocation3 + $0xc0] sm:$0xff] %vm809_vm5, %v5761_v0  ;;  %6075 = vst.msk [vmem:[#allocation4 + $0xc0] sm:$0xff] (!%p6561_p5), %vm809_vm5, %v5761_v0 }
 0x4f3 PF: > { %p7030_p6 = scmp.eq.s32.totalorder %s7543_s19, 3  ;;  %s7504_s27 = smov [#allocation4]  }
 0x4f4   : > { %s6090_s23 = sshll.u32 %s7504_s27, 4  ;;  %s6091_s23 = int_to_ptr.vmem [resolvable:$true] %s6090_s23 }
 0x4f5   : > { %s7460_s25 = scalar_lea.vmem %s6091_s23, 3200  ;;  %p7467_p10 = scmp.lt.s32.totalorder %s6091_s23, %s6091_s23 }
 0x4f6   : > { %p7461_p7 = scmp.ne.s32.totalorder %s6091_s23, %s7460_s25  ;;  %p7468_p11 = scmp.lt.s32.totalorder %s7460_s25, %s7460_s25 }
 0x4f8   : > { %p7462_p8 = pnand %p7461_p7, %p7030_p6  ;;  %p7469_p12 = por %p7468_p11, %p7467_p10 }
 0x4fa   : > { %p7463_p9 = pneg %p7462_p8 }
 0x4fc   : > { %p7470_p13 = pnand %p7469_p12, %p7463_p9 }
 0x4fe   : > { %7473 = shalt.err (!%p7470_p13)
}
 0x4ff   : > { %s7474_s29 = scalar_lea.hbm %s10215_s5, 3200 }
 0x500   : > { %p7475_p0 = scmp.ne.s32.totalorder %s10215_s5, %s7474_s29  ;;  %p7480_p3 = scmp.lt.u32.totalorder %s7474_s29, %s10215_s5 }
 0x502   : > { %p7476_p1 = pnand %p7475_p0, %p7030_p6 }
 0x504   : > { %p7477_p2 = pneg %p7476_p1 }
 0x506   : > { %p7482_p4 = pnand %p7480_p3, %p7477_p2 }
 0x508   : > { %7485 = shalt.err (!%p7482_p4)
}
 0x509   : > { %s7505_s9 = smov 128   ;;  %s7506_s10 = smov 8  }
 0x50a   : > { %7027 = dma.vmem_to_hbm [thread:$0]  (%p7030_p6), %s6091_s23, 3200, %s10215_s5, [#allocation5], %s7505_s9, %s7505_s9, %s7506_s10  }
 0x50b   : > { %7491 = dma.done.wait (%p7030_p6), [#allocation5], 3200  }
 0x50c   : > { %7493 = vsyncadd (%p7030_p6), [#allocation5], 4294964096 }
 0x50d PF: > { %s17_s18 = sadd.s32 1, %s7496_s18  }
 0x50e   : > { %p14_p5 = scmp.ge.s32.totalorder %s17_s18, 6  }
 0x510   :  { %16 = sbr.rel (!%p14_p5) target bundleno = 1 (0x1), region = 83 }
 0x517   :  { %6114 = vsyncpa [#allocation5], 1 }
 0x518   :  { %6116 = vsyncpa [#allocation5 + $0x1], 1 }

</bundles_post_ra>
